<compile_context>
chip_gen: v7x
topology: tpu7x:2x2x1
jax: 0.10.0
libtpu: 0.0.40
codegen_flags: <defaults>
</compile_context>

<pallas_src>
import functools
import math

import jax
import jax.numpy as jnp
from jax import lax
from jax.experimental import pallas as pl
from jax.experimental.pallas import tpu as pltpu


def _qkv_proj_kernel(x_ref, w_ref, b_ref, q_ref, kv_ref):
    # x_ref: (1, bm, C) bf16; w_ref: (C, 3C) bf16; b_ref: (1, 3C) f32
    x = x_ref[0]                                                    # (bm, C)
    y = jnp.dot(x, w_ref[...], preferred_element_type=jnp.float32)  # (bm, 3C) f32
    y = y + b_ref[...]                                              # bias (scale pre-folded)
    C = q_ref.shape[-1]
    q_ref[0] = y[:, :C].astype(q_ref.dtype)                         # (bm, C)
    kv_ref[0] = y[:, C:].astype(kv_ref.dtype)                       # (bm, 2C)


def _flash_attn_proj_kernel(qi_tbl, ki_tbl, q_ref, kv_ref, wp_ref, bp_ref,
                            o_ref, acc_ref, m_ref, l_ref, *, n_head: int):
    # qi_tbl / ki_tbl : SMEM int32 tables (scalar prefetch), length n_tri.
    # q_ref : (1, bq, C)  bf16 (already scaled by 1/sqrt(hd) via folded weights)
    # kv_ref: (1, bk, 2C) bf16   (K columns [0,C), V columns [C,2C))
    # wp_ref: (C, C) bf16, bp_ref: (1, C) f32
    # o_ref : (1, bq, C)  output dtype
    # scratch: acc (bq, C) f32 lane-dense, m (H, bq, 1) f32, l (H, bq, 1) f32
    t = pl.program_id(1)
    qi = qi_tbl[t]
    ki = ki_tbl[t]
    _, blk_q, C = q_ref.shape
    blk_k = kv_ref.shape[1]
    hd = C // n_head

    @pl.when(ki == 0)
    def _init():
        m_ref[...] = jnp.full_like(m_ref, -1e30)
        l_ref[...] = jnp.zeros_like(l_ref)
        acc_ref[...] = jnp.zeros_like(acc_ref)

    def _attend(masked):
        # Additive causal bias is only needed on diagonal blocks.
        if masked:
            q_ids = qi * blk_q + lax.broadcasted_iota(jnp.int32, (blk_q, blk_k), 0)
            k_ids = ki * blk_k + lax.broadcasted_iota(jnp.int32, (blk_q, blk_k), 1)
            bias = jnp.where(k_ids <= q_ids, 0.0, -1e30).astype(jnp.float32)

        pvs, alphas = [], []
        for h in range(n_head):                                      # unrolled (H=6)
            qh = q_ref[0, :, h * hd:(h + 1) * hd]                    # (bq, hd) bf16
            kh = kv_ref[0, :, h * hd:(h + 1) * hd]                   # (bk, hd) bf16
            vh = kv_ref[0, :, C + h * hd:C + (h + 1) * hd]           # (bk, hd) bf16

            # scores = q @ k^T (contraction over hd), f32 accumulation on MXU
            s = lax.dot_general(qh, kh, (((1,), (1,)), ((), ())),
                                preferred_element_type=jnp.float32)  # (bq, bk)
            if masked:
                s = s + bias

            # online softmax (all f32)
            m_prev = m_ref[h]                                        # (bq, 1)
            m_new = jnp.maximum(m_prev, jnp.max(s, axis=-1, keepdims=True))
            alpha = jnp.exp(m_prev - m_new)
            p = jnp.exp(s - m_new)                                   # (bq, bk) f32
            l_ref[h] = alpha * l_ref[h] + jnp.sum(p, axis=-1, keepdims=True)
            m_ref[h] = m_new

            pv = jnp.dot(p.astype(vh.dtype), vh,
                         preferred_element_type=jnp.float32)         # (bq, hd)
            pvs.append(pv)
            alphas.append(jnp.broadcast_to(alpha, (blk_q, hd)))

        # Single lane-dense (bq, C) update of the f32 accumulator.
        acc_ref[...] = (jnp.concatenate(alphas, axis=-1) * acc_ref[...]
                        + jnp.concatenate(pvs, axis=-1))

    @pl.when(ki < qi)
    def _off_diagonal():
        _attend(masked=False)

    # The diagonal block is the last block visited for this Q tile (the
    # triangular table orders ki = 0..qi); process it with the causal mask,
    # then normalize per head and apply the fused output projection as a
    # single deep (bq,C)@(C,C) MXU pass.
    @pl.when(ki == qi)
    def _diagonal_and_finalize():
        _attend(masked=True)
        invs = [jnp.broadcast_to(1.0 / l_ref[h], (blk_q, hd))        # exact divide
                for h in range(n_head)]
        attn = (acc_ref[...] * jnp.concatenate(invs, axis=-1)).astype(wp_ref.dtype)
        y = jnp.dot(attn, wp_ref[...], preferred_element_type=jnp.float32)
        o_ref[0] = (y + bp_ref[...]).astype(o_ref.dtype)


def causal_self_attention(x, w_qkv, b_qkv, w_proj, b_proj, *, n_head,
                          block_m=512, block_q=256, block_kv=256):
    """x: (B,T,C); w_qkv: (C,3C); b_qkv: (3C,); w_proj: (C,C); b_proj: (C,)."""
    B, T, C = x.shape
    assert C % n_head == 0
    hd = C // n_head

    bm = min(block_m, T)
    bq = min(block_q, T)
    bk = min(block_kv, T)
    assert T % bm == 0 and T % bq == 0 and T % bk == 0
    # Required: guarantees every row of the diagonal block has >=1 unmasked key
    # (no fully-masked softmax row) and makes the triangular table valid.
    assert bq == bk, "causal block-skip logic assumes square Q/K tiles"

    # Fold the 1/sqrt(hd) attention scale into the Q columns of the projection
    # (one-time O(C^2) host-side cost instead of an O(H*T^2) in-kernel pass).
    scale = 1.0 / math.sqrt(hd)
    w_qkv = w_qkv.at[:, :C].multiply(scale)
    b_qkv = b_qkv.at[:C].multiply(scale)

    # bf16 MXU operands; accumulation / softmax stay f32 inside the kernels.
    x_bf = x.astype(jnp.bfloat16)
    w_qkv_bf = w_qkv.astype(jnp.bfloat16)
    w_proj_bf = w_proj.astype(jnp.bfloat16)
    b_qkv2 = b_qkv.reshape(1, 3 * C).astype(jnp.float32)   # lane-dense biases
    b_proj2 = b_proj.reshape(1, C).astype(jnp.float32)

    # ---- kernel 1: QKV projection -------------------------------------------
    q, kv = pl.pallas_call(
        _qkv_proj_kernel,
        out_shape=(jax.ShapeDtypeStruct((B, T, C), jnp.bfloat16),
                   jax.ShapeDtypeStruct((B, T, 2 * C), jnp.bfloat16)),
        grid_spec=pltpu.PrefetchScalarGridSpec(
            num_scalar_prefetch=0,
            grid=(B, T // bm),
            in_specs=[
                pl.BlockSpec((1, bm, C), lambda b, i: (b, i, 0)),
                # constant index_map -> weight/bias DMA'd once, stays resident
                pl.BlockSpec((C, 3 * C), lambda b, i: (0, 0)),
                pl.BlockSpec((1, 3 * C), lambda b, i: (0, 0)),
            ],
            out_specs=[
                pl.BlockSpec((1, bm, C), lambda b, i: (b, i, 0)),
                pl.BlockSpec((1, bm, 2 * C), lambda b, i: (b, i, 0)),
            ],
        ),
        compiler_params=pltpu.CompilerParams(
            dimension_semantics=("parallel", "parallel"),
            vmem_limit_bytes=32 * 1024 * 1024),
    )(x_bf, w_qkv_bf, b_qkv2)

    # ---- kernel 2: flash attention + fused output projection ----------------
    # Flatten the lower-triangular (qi, ki<=qi) pairs into one grid axis so no
    # dead upper-triangle steps are executed; ki is innermost (reduction order
    # 0..qi per Q tile, diagonal last).
    nq = T // bq
    qi_list, ki_list = [], []
    for qi in range(nq):
        for ki in range(qi + 1):
            qi_list.append(qi)
            ki_list.append(ki)
    qi_tbl = jnp.asarray(qi_list, dtype=jnp.int32)
    ki_tbl = jnp.asarray(ki_list, dtype=jnp.int32)
    n_tri = len(qi_list)

    kernel = functools.partial(_flash_attn_proj_kernel, n_head=n_head)
    out = pl.pallas_call(
        kernel,
        out_shape=jax.ShapeDtypeStruct((B, T, C), x.dtype),
        grid_spec=pltpu.PrefetchScalarGridSpec(
            num_scalar_prefetch=2,          # qi_tbl, ki_tbl -> SMEM
            grid=(B, n_tri),
            in_specs=[
                pl.BlockSpec((1, bq, C),
                             lambda b, t, qi_t, ki_t: (b, qi_t[t], 0)),
                pl.BlockSpec((1, bk, 2 * C),
                             lambda b, t, qi_t, ki_t: (b, ki_t[t], 0)),
                # constant index_maps -> projection weights stay VMEM resident
                pl.BlockSpec((C, C), lambda b, t, qi_t, ki_t: (0, 0)),
                pl.BlockSpec((1, C), lambda b, t, qi_t, ki_t: (0, 0)),
            ],
            out_specs=pl.BlockSpec((1, bq, C),
                                   lambda b, t, qi_t, ki_t: (b, qi_t[t], 0)),
            scratch_shapes=[
                pltpu.VMEM((bq, C), jnp.float32),            # lane-dense accumulator
                pltpu.VMEM((n_head, bq, 1), jnp.float32),    # running max
                pltpu.VMEM((n_head, bq, 1), jnp.float32),    # running denominator
            ],
        ),
        compiler_params=pltpu.CompilerParams(
            # batch axis is parallel (megacore); flattened triangular axis is a
            # reduction (output block resident across the ki steps of each qi).
            dimension_semantics=("parallel", "arbitrary"),
            vmem_limit_bytes=32 * 1024 * 1024),
    )(qi_tbl, ki_tbl, q, kv, w_proj_bf, b_proj2)
    return out


def reference(x, w_qkv, b_qkv, w_proj, b_proj, n_head):
    B, T, C = x.shape
    hd = C // n_head
    qkv = x @ w_qkv + b_qkv
    q, k, v = jnp.split(qkv, 3, axis=-1)

    def heads(t):  # (B, T, C) -> (B, H, T, hd)
        return t.reshape(B, T, n_head, hd).transpose(0, 2, 1, 3)

    q, k, v = heads(q), heads(k), heads(v)
    s = jnp.einsum('bhqd,bhkd->bhqk', q, k) / math.sqrt(hd)
    mask = jnp.tril(jnp.ones((T, T), dtype=bool))
    s = jnp.where(mask[None, None], s, -jnp.inf)
    p = jax.nn.softmax(s, axis=-1)
    attn = jnp.einsum('bhqk,bhkd->bhqd', p, v)
    attn = attn.transpose(0, 2, 1, 3).reshape(B, T, C)
    return attn @ w_proj + b_proj


if __name__ == "__main__":
    # Module-consistent dims: block_size=512, n_embed=384, n_head=6 (head_dim=64).
    # T=512 with 256-wide tiles exercises the triangular grid (3 steps/batch).
    B, T = 2, 512
    n_head = 6
    n_embed = 384

    key = jax.random.PRNGKey(0)
    kx, kw1, kb1, kw2, kb2 = jax.random.split(key, 5)

    x = jax.random.normal(kx, (B, T, n_embed), dtype=jnp.float32)
    # nn.Linear(n_embed, 3*n_embed): stored pre-transposed as (in, out).
    w_qkv = jax.random.normal(kw1, (n_embed, 3 * n_embed), dtype=jnp.float32) * 0.02
    b_qkv = jax.random.normal(kb1, (3 * n_embed,), dtype=jnp.float32) * 0.02
    # nn.Linear(n_embed, n_embed)
    w_proj = jax.random.normal(kw2, (n_embed, n_embed), dtype=jnp.float32) * 0.02
    b_proj = jax.random.normal(kb2, (n_embed,), dtype=jnp.float32) * 0.02

    out = causal_self_attention(x, w_qkv, b_qkv, w_proj, b_proj, n_head=n_head)
    out = jax.block_until_ready(out)

    ref = reference(x, w_qkv, b_qkv, w_proj, b_proj, n_head)
    assert out.shape == (B, T, n_embed)
    rel_err = float(jnp.linalg.norm(out - ref) / jnp.linalg.norm(ref))
    assert rel_err < 2e-2, f"mismatch vs reference: rel_err={rel_err}"

    print("KERNEL_OK")
</pallas_src>

<mosaic_0001>
module attributes {stable_mosaic.version = 11 : i64} {
  func.func @_qkv_proj_kernel(%arg0: i32, %arg1: i32, %arg2: memref<1x512x384xbf16, #tpu.memory_space<vmem>>, %arg3: memref<384x1152xbf16, #tpu.memory_space<vmem>>, %arg4: memref<1x1152xf32, #tpu.memory_space<vmem>>, %arg5: memref<1x512x384xbf16, #tpu.memory_space<vmem>>, %arg6: memref<1x512x768xbf16, #tpu.memory_space<vmem>>) attributes {dimension_semantics = [#tpu.dimension_semantics<parallel>, #tpu.dimension_semantics<parallel>], iteration_bounds = array<i64: 2, 1>, scalar_prefetch = 0 : i64, scratch_operands = 0 : i64, tpu.core_type = #tpu.core_type<tc>, window_params = [{transform_indices = @transform_0, window_bounds = array<i64: 1, 512, 384>}, {pipeline_mode = #tpu.pipeline_mode<synchronous>, transform_indices = @transform_1, window_bounds = array<i64: 384, 1152>}, {pipeline_mode = #tpu.pipeline_mode<synchronous>, transform_indices = @transform_2, window_bounds = array<i64: 1, 1152>}, {transform_indices = @transform_3, window_bounds = array<i64: 1, 512, 384>}, {transform_indices = @transform_4, window_bounds = array<i64: 1, 512, 768>}]} {
    %c0 = arith.constant 0 : index
    %c0_0 = arith.constant 0 : index
    %c0_1 = arith.constant 0 : index
    %0 = vector.load %arg2[%c0, %c0_0, %c0_1] : memref<1x512x384xbf16, #tpu.memory_space<vmem>>, vector<1x512x384xbf16>
    %1 = vector.shape_cast %0 : vector<1x512x384xbf16> to vector<512x384xbf16>
    %c0_2 = arith.constant 0 : index
    %c0_3 = arith.constant 0 : index
    %2 = vector.load %arg3[%c0_2, %c0_3] : memref<384x1152xbf16, #tpu.memory_space<vmem>>, vector<384x1152xbf16>
    %cst = arith.constant dense<0.000000e+00> : vector<512x1152xf32>
    %3 = tpu.matmul %1, %2, %cst {dimension_numbers = #tpu.dot_dimension_numbers<[1], [0], [0], [1], [0, 0, 1, 1], [], []>} : vector<512x384xbf16>, vector<384x1152xbf16>, vector<512x1152xf32> -> vector<512x1152xf32>
    %c0_4 = arith.constant 0 : index
    %c0_5 = arith.constant 0 : index
    %4 = vector.load %arg4[%c0_4, %c0_5] : memref<1x1152xf32, #tpu.memory_space<vmem>>, vector<1x1152xf32>
    %5 = vector.broadcast %4 : vector<1x1152xf32> to vector<512x1152xf32>
    %6 = arith.addf %3, %5 : vector<512x1152xf32>
    %7 = vector.extract_strided_slice %6 {offsets = [0, 0], sizes = [512, 384], strides = [1, 1]} : vector<512x1152xf32> to vector<512x384xf32>
    %8 = arith.truncf %7 : vector<512x384xf32> to vector<512x384xbf16>
    %c0_6 = arith.constant 0 : index
    %c0_7 = arith.constant 0 : index
    %c0_8 = arith.constant 0 : index
    %9 = vector.load %arg5[%c0_6, %c0_7, %c0_8] : memref<1x512x384xbf16, #tpu.memory_space<vmem>>, vector<1x512x384xbf16>
    %10 = vector.shape_cast %9 : vector<1x512x384xbf16> to vector<512x384xbf16>
    %11 = vector.shape_cast %8 : vector<512x384xbf16> to vector<1x512x384xbf16>
    tpu.vector_store %arg5[%c0_6, %c0_7, %c0_8], %11 {strides = array<i32>} : memref<1x512x384xbf16, #tpu.memory_space<vmem>>, vector<1x512x384xbf16>,
    %12 = vector.extract_strided_slice %6 {offsets = [0, 384], sizes = [512, 768], strides = [1, 1]} : vector<512x1152xf32> to vector<512x768xf32>
    %13 = arith.truncf %12 : vector<512x768xf32> to vector<512x768xbf16>
    %c0_9 = arith.constant 0 : index
    %c0_10 = arith.constant 0 : index
    %c0_11 = arith.constant 0 : index
    %14 = vector.load %arg6[%c0_9, %c0_10, %c0_11] : memref<1x512x768xbf16, #tpu.memory_space<vmem>>, vector<1x512x768xbf16>
    %15 = vector.shape_cast %14 : vector<1x512x768xbf16> to vector<512x768xbf16>
    %16 = vector.shape_cast %13 : vector<512x768xbf16> to vector<1x512x768xbf16>
    tpu.vector_store %arg6[%c0_9, %c0_10, %c0_11], %16 {strides = array<i32>} : memref<1x512x768xbf16, #tpu.memory_space<vmem>>, vector<1x512x768xbf16>,
    return
  }
  func.func @transform_0(%arg0: i32, %arg1: i32) -> (i32, i32, i32) {
    %c0_i32 = arith.constant 0 : i32
    %c0_i32_0 = arith.constant 0 : i32
    return %arg0, %arg1, %c0_i32 : i32, i32, i32
  }
  func.func @transform_1(%arg0: i32, %arg1: i32) -> (i32, i32) {
    %c0_i32 = arith.constant 0 : i32
    %c0_i32_0 = arith.constant 0 : i32
    %c0_i32_1 = arith.constant 0 : i32
    return %c0_i32, %c0_i32_0 : i32, i32
  }
  func.func @transform_2(%arg0: i32, %arg1: i32) -> (i32, i32) {
    %c0_i32 = arith.constant 0 : i32
    %c0_i32_0 = arith.constant 0 : i32
    %c0_i32_1 = arith.constant 0 : i32
    return %c0_i32, %c0_i32_0 : i32, i32
  }
  func.func @transform_3(%arg0: i32, %arg1: i32) -> (i32, i32, i32) {
    %c0_i32 = arith.constant 0 : i32
    %c0_i32_0 = arith.constant 0 : i32
    return %arg0, %arg1, %c0_i32 : i32, i32, i32
  }
  func.func @transform_4(%arg0: i32, %arg1: i32) -> (i32, i32, i32) {
    %c0_i32 = arith.constant 0 : i32
    %c0_i32_0 = arith.constant 0 : i32
    return %arg0, %arg1, %c0_i32 : i32, i32, i32
  }
}

</mosaic_0001>

<bundles_post_ra>
// kernel: tpu_custom_call.1
= control target key start
LH: loop header
LB: loop body
LE: loop exit
PB: predicated region body
PF: predicated region fallthrough
CT: control target
= control target key end

     0   :  { %10 = vsyncpa [#allocation3], 0  ;;  %s14313_s0 = inlined_call_operand.hbm [shape: bf16[2,512,384], index: 0, kind: input, shape index: {}]   ;;  %s14314_s1 = inlined_call_operand.hbm [shape: bf16[384,1152], index: 1, kind: input, shape index: {}]   ;;  %s14315_s2 = inlined_call_operand.hbm [shape: f32[1,1152], index: 2, kind: input, shape index: {}]   ;;  %s14316_s3 = inlined_call_operand.hbm [shape: bf16[2,512,384], index: 3, kind: output, shape index: {0}]   ;;  %s14317_s4 = inlined_call_operand.hbm [shape: bf16[2,512,768], index: 4, kind: output, shape index: {1}]  }
   0x1   :  { %12 = vsyncpa [#allocation3 + $0x1], 0 }
   0x2   :  { %13 = vsyncpa [#allocation6], 0 }
   0x3   :  { %14 = vsyncpa [#allocation4], 0 }
   0x4   :  { %16 = vsyncpa [#allocation4 + $0x1], 0 }
   0x5   :  { %17 = vsyncpa [#allocation10], 0 }
   0x6   :  { %19 = vsyncpa [#allocation10 + $0x1], 0  ;;  %s11127_s15 = smov 0   ;;  %s11129_s16 = smov 0  }
   0x7   :  { %s11131_s17 = smov 0   ;;  %s11133_s18 = smov 0  }
   0x8   :  { %s11135_s19 = smov 0   ;;  %s11137_s20 = smov 0  }
   0x9 LB: > { %s8008_s21 = sadd.s32 4294967295, %s11086_s20   ;;  %s8009_s22 = sadd.s32 4294967294, %s11086_s20   ;;  %s11086_s20 = sphi %s11137_s20, %s25_s20   ;;  %s11082_s19 = sphi %s11135_s19, %s14525_s19   ;;  %s11078_s18 = sphi %s11133_s18, %s14524_s18   ;;  %s11074_s17 = sphi %s11131_s17, %s14523_s17   ;;  %s11070_s16 = sphi %s11129_s16, %s14522_s16   ;;  %s11066_s15 = sphi %s11127_s15, %s14521_s15  }
   0xa   : > { %p59_p0 = scmp.ne.s32.totalorder %s11070_s16, %s11066_s15  ;;  %p11161_p1 = scmp.eq.s32.totalorder %s8008_s21, 0 }
   0xb   : > { %p11165_p2 = scmp.eq.s32.totalorder %s8008_s21, 1  ;;  %p133_p3 = scmp.eq.s32.totalorder %s8009_s22, 1 }
   0xc   : > { %s14325_s23 = scalar_select %p11161_p1, 1, 0 }
   0xd   : > { %p11171_p4 = por %p11161_p1, %p59_p0  ;;  %p8010_p5 = scmp.ge.s32.totalorder %s11086_s20, 1 }
   0xe   : > { %p11176_p6 = por %p133_p3, %p59_p0  ;;  %p168_p7 = scmp.lt.s32.totalorder %s11086_s20, 3 }
   0xf   : > { %s14327_s25 = scalar_select %p11171_p4, 1, 0 }
  0x10   : > { %s14328_s26 = scalar_select %p11176_p6, 1, 0 }
  0x11   : > { %p11181_p8 = pnand %p8010_p5, %p168_p7  ;;  %s11088_s28 = smov [#allocation5]  }
  0x12   : > { %s180_s29 = sshll.u32 %s11088_s28, 4  ;;  %s11089_s5 = smov [#allocation7]   ;;  %s11185_s29 = int_to_ptr.vmem [resolvable:$true] %s180_s29 }
  0x13   : > { %p10155_p9 = pneg %p11181_p8  ;;  %s194_s6 = sshll.u32 %s11089_s5, 4  ;;  %s11196_s6 = int_to_ptr.vmem [resolvable:$true] %s194_s6 }
  0x14   : > { %s10882_s9 = scalar_lea.hbm %s14314_s1, 27648 }
  0x15   : > { %p11192_p11 = pnand %p10155_p9, %p11161_p1  ;;  %p10883_p12 = scmp.ne.s32.totalorder %s14314_s1, %s10882_s9 }
  0x16   : > { %p10889_p5 = scmp.lt.u32.totalorder %s10882_s9, %s14314_s1 }
  0x17   : > { %p10884_p13 = pneg %p11192_p11 }
  0x19   : > { %p10885_p0 = pnand %p10884_p13, %p10883_p12 }
  0x1b   : > { %p10886_p3 = pneg %p10885_p0 }
  0x1d   : > { %p10891_p7 = pnand %p10889_p5, %p10886_p3 }
  0x1f   : > { %10894 = shalt.err (!%p10891_p7)
}
  0x20   : > { %s10895_s14 = scalar_lea.vmem %s11185_s29, 27648  ;;  %p10903_p1 = scmp.lt.s32.totalorder %s11185_s29, %s11185_s29 }
  0x21   : > { %p10896_p9 = scmp.ne.s32.totalorder %s11185_s29, %s10895_s14  ;;  %p10904_p12 = scmp.lt.s32.totalorder %s10895_s14, %s10895_s14 }
  0x23   : > { %p10898_p10 = pnand %p10896_p9, %p10884_p13  ;;  %p10905_p0 = por %p10904_p12, %p10903_p1 }
  0x25   : > { %p10899_p6 = pneg %p10898_p10 }
  0x27   : > { %p10906_p4 = pnand %p10905_p0, %p10899_p6 }
  0x29   : > { %10909 = shalt.err (!%p10906_p4)
}
  0x2a   : > { %s11090_s21 = smov 576   ;;  %s11091_s22 = smov 36  }
  0x2b   : > { %10158 = dma.hbm_to_vmem [thread:$0]  (!%p11192_p11), %s14314_s1, 27648, %s11185_s29, [#allocation6], %s11090_s21, %s11090_s21, %s11091_s22  }
  0x2c   : > { %s10910_s9 = scalar_lea.hbm %s14315_s2, 144 }
  0x2d   : > { %p10911_p1 = scmp.ne.s32.totalorder %s14315_s2, %s10910_s9  ;;  %p10917_p10 = scmp.lt.u32.totalorder %s10910_s9, %s14315_s2 }
  0x2f   : > { %p10913_p4 = pnand %p10911_p1, %p10884_p13 }
  0x31   : > { %p10914_p6 = pneg %p10913_p4 }
  0x33   : > { %p10919_p3 = pnand %p10917_p10, %p10914_p6 }
  0x35   : > { %10922 = shalt.err (!%p10919_p3)
}
  0x36   : > { %s10923_s29 = scalar_lea.vmem %s11196_s6, 144  ;;  %s10930_s14 = scalar_lea.vmem %s11196_s6, 160 }
  0x37   : > { %p10924_p5 = scmp.ne.s32.totalorder %s11196_s6, %s10923_s29  ;;  %p10931_p12 = scmp.lt.s32.totalorder %s11196_s6, %s11196_s6 }
  0x38   : > { %p10932_p0 = scmp.lt.s32.totalorder %s10930_s14, %s10923_s29 }
  0x39   : > { %p10926_p7 = pnand %p10924_p5, %p10884_p13 }
  0x3a   : > { %p10933_p1 = por %p10932_p0, %p10931_p12 }
  0x3b   : > { %p10927_p9 = pneg %p10926_p7 }
  0x3d   : > { %p10934_p4 = pnand %p10933_p1, %p10927_p9 }
  0x3f   : > { %10937 = shalt.err (!%p10934_p4)
}
  0x40   : > { %10161 = dma.hbm_to_vmem [thread:$0]  (!%p11192_p11), %s14315_s2, 144, %s11196_s6, [#allocation6]  }
  0x41   : > { %s37_s28 = sadd.s32 1, %s11082_s19  ;;  %s46_s5 = sadd.s32 1, %s11074_s17 }
  0x42   : > { %p39_p13 = scmp.ge.s32.totalorder %s37_s28, 2  ;;  %p53_p6 = scmp.ne.s32.totalorder %s11074_s17, %s11070_s16 }
  0x43   : > { %p54_p10 = scmp.eq.s32.totalorder %s11086_s20, 0  ;;  %p10175_p3 = scmp.lt.s32.totalorder %s11086_s20, 2 }
  0x44   : > { %s14527_s28 = smov (%p39_p13, %s37_s28), 0  ;;  %p11261_p7 = por %p11165_p2, %p53_p6 }
  0x45   : > { %p55_p5 = por %p54_p10, %p53_p6  ;;  %s41_s7 = ssub.s32 %s11082_s19, %s14527_s28 }
  0x46   : > { %s14331_s30 = scalar_select %p11261_p7, 1, 0 }
  0x47   : > { %s205_s8 = sand.u32 1, %s11074_s17   ;;  %p44_p9 = scmp.eq.s32.totalorder %s41_s7, 0 }
  0x48   : > { %s10135_s6 = smul.u32 768, %s205_s8  ;;  %p11268_p11 = pnand %p10175_p3, %p55_p5 }
  0x49   : > { %s11273_s10 = scalar_select %p44_p9, %s11074_s17, %s46_s5  }
  0x4a   : > { %s10136_s11 = smul.u32 12288, %s11082_s19  ;;  %s209_s12 = scalar_lea.vmem [#allocation2], %s10135_s6 }
  0x4b   : > { %s219_s13 = sshll.u32 %s209_s12, 4  ;;  %s11283_s21 = scalar_lea.sflag [#allocation3], %s205_s8  ;;  %s11281_s13 = int_to_ptr.vmem [resolvable:$true] %s219_s13 }
  0x4c   : > { %s11279_s14 = scalar_lea.hbm %s14313_s0, %s10136_s11  ;;  %p10940_p12 = pneg %p11268_p11 }
  0x4d   : > { %s10938_s22 = scalar_lea.hbm %s11279_s14, 12288  ;;  %s10943_s6 = scalar_lea.hbm %s14313_s0, 24576 }
  0x4e   : > { %p10939_p2 = scmp.ne.s32.totalorder %s11279_s14, %s10938_s22  ;;  %p10944_p4 = scmp.lt.u32.totalorder %s11279_s14, %s14313_s0 }
  0x4f   : > { %p10945_p13 = scmp.lt.u32.totalorder %s10943_s6, %s10938_s22  ;;  %p10947_p10 = scmp.lt.u32.totalorder %s10938_s22, %s11279_s14 }
  0x50   : > { %p10941_p0 = pnand %p10940_p12, %p10939_p2 }
  0x51   : > { %p10946_p6 = por %p10945_p13, %p10944_p4 }
  0x52   : > { %p10942_p1 = pneg %p10941_p0 }
  0x53   : > { %p10948_p3 = por %p10947_p10, %p10946_p6 }
  0x55   : > { %p10949_p5 = pnand %p10948_p3, %p10942_p1 }
  0x57   : > { %10952 = shalt.err (!%p10949_p5)
}
  0x58   : > { %s10953_s8 = scalar_lea.vmem %s11281_s13, 12288  ;;  %s11092_s24 = smov [#allocation2]  }
  0x59   : > { %p10954_p9 = scmp.ne.s32.totalorder %s11281_s13, %s10953_s8  ;;  %s10958_s29 = sshll.u32 %s11092_s24, 4  ;;  %s10959_s29 = int_to_ptr.vmem [resolvable:$false] %s10958_s29 }
  0x5a   : > { %s10960_s5 = scalar_lea.vmem %s10959_s29, 24576  ;;  %p10961_p7 = scmp.lt.s32.totalorder %s11281_s13, %s10959_s29 }
  0x5b   : > { %p10956_p2 = pnand %p10954_p9, %p10940_p12  ;;  %p10962_p4 = scmp.lt.s32.totalorder %s10960_s5, %s10953_s8 }
  0x5d   : > { %p10957_p0 = pneg %p10956_p2  ;;  %p10963_p13 = por %p10962_p4, %p10961_p7 }
  0x5f   : > { %p10964_p6 = pnand %p10963_p13, %p10957_p0 }
  0x61   : > { %10967 = shalt.err (!%p10964_p6)
}
  0x62   : > { %s11093_s22 = smov 192   ;;  %s11094_s7 = smov 12  }
  0x63   : > { %10165 = dma.hbm_to_vmem [thread:$0]  (!%p11268_p11), %s11279_s14, 12288, %s11281_s13, %s11283_s21, %s11093_s22, %s11093_s22, %s11094_s7  }
  0x64   : > { %231 = sbr.rel (%p11181_p8) target bundleno = 1608 (0x648), region = 32 }
  0x6b   : > { %s11314_s6 = sand.u32 1, %s11070_s16   ;;  %p14333_p7 = scmp.ne.s32.totalorder %s14327_s25, 0 }
  0x6c   : > { %s10137_s11 = smul.u32 768, %s11314_s6  ;;  %s234_s12 = scalar_lea.sflag [#allocation3], %s11314_s6 }
  0x6e   : > { %s11320_s8 = scalar_lea.vmem [#allocation2], %s10137_s11 }
  0x6f   : > { %11049 = dma.done.wait (%p14333_p7), %s234_s12, 12288  }
  0x70   : > { %11051 = vsyncadd (%p14333_p7), %s234_s12, 4294955008  ;;  %p14334_p11 = scmp.ne.s32.totalorder %s14325_s23, 0 }
  0x72   : > { %11053 = dma.done.wait (%p14334_p11), [#allocation6], 27792  }
  0x73   : > { %11055 = vsyncadd (%p14334_p11), [#allocation6], 4294939504  ;;  %v14322_v0 = vmov 0   ;;  %v10238_v1 = vld [vmem:[#allocation5 + $0x4] ss:$36 sps:$4 sm:$0xff]   ;;  %s11808_s23 = scalar_lea.vmem [#allocation8], %s10137_s11 }
  0x74   : > { %2917 = vmatprep.mubr.bf16.mxu1 %v14322_v0  ;;  %v11331_v2 = vld [vmem:[#allocation5 + $0x484] ss:$36 sps:$4 sm:$0xff]   ;;  %2312 = vmatprep.subr.bf16.mxu0 %v10238_v1  ;;  %v10244_v5 = vld [vmem:[#allocation5 + $0x4c] ss:$36 sps:$4 sm:$0xff]   ;;  %v10250_v9 = vld [vmem:[#allocation5 + $0x94] ss:$36 sps:$4 sm:$0xff]  }
  0x75   : > { %v10242_v3 = vld [vmem:[#allocation5] ss:$36 sps:$4 sm:$0xff]   ;;  %9095 = vmatprep.subr.bf16.mxu1 %v11331_v2  ;;  %v11337_v6 = vld [vmem:[#allocation5 + $0x4cc] ss:$36 sps:$4 sm:$0xff]   ;;  %v11342_v10 = vld [vmem:[#allocation5 + $0x514] ss:$36 sps:$4 sm:$0xff]  }
  0x76   : > { %v11333_v4 = vld [vmem:[#allocation5 + $0x480] ss:$36 sps:$4 sm:$0xff]   ;;  %2313 = vmatpush1.bf16.msra.mxu0 %v10242_v3  ;;  %v10248_v7 = vld [vmem:[#allocation5 + $0x48] ss:$36 sps:$4 sm:$0xff]   ;;  %v10254_v11 = vld [vmem:[#allocation5 + $0x90] ss:$36 sps:$4 sm:$0xff]  }
  0x77   : > { %9103 = vmatpush1.bf16.msra.mxu1 %v11333_v4  ;;  %2314 = vmatprep.subr.bf16.mxu0 %v10244_v5  ;;  %v11339_v8 = vld [vmem:[#allocation5 + $0x4c8] ss:$36 sps:$4 sm:$0xff]   ;;  %v11344_v12 = vld [vmem:[#allocation5 + $0x510] ss:$36 sps:$4 sm:$0xff]   ;;  %v10256_v13 = vld [vmem:[#allocation5 + $0xdc] ss:$36 sps:$4 sm:$0xff]  }
  0x78   : > { %9096 = vmatprep.subr.bf16.mxu1 %v11337_v6  ;;  %v11348_v14 = vld [vmem:[#allocation5 + $0x55c] ss:$36 sps:$4 sm:$0xff]   ;;  %v10262_v17 = vld [vmem:[#allocation5 + $0x124] ss:$36 sps:$4 sm:$0xff]   ;;  %v10268_v21 = vld [vmem:[#allocation5 + $0x16c] ss:$36 sps:$4 sm:$0xff]  }
  0x79   : > { %v10260_v15 = vld [vmem:[#allocation5 + $0xd8] ss:$36 sps:$4 sm:$0xff]   ;;  %v11354_v18 = vld [vmem:[#allocation5 + $0x5a4] ss:$36 sps:$4 sm:$0xff]   ;;  %v11360_v22 = vld [vmem:[#allocation5 + $0x5ec] ss:$36 sps:$4 sm:$0xff]  }
  0x7a   : > { %2315 = vmatpush1.bf16.msra.mxu0 %v10248_v7  ;;  %v11351_v16 = vld [vmem:[#allocation5 + $0x558] ss:$36 sps:$4 sm:$0xff]   ;;  %v10266_v19 = vld [vmem:[#allocation5 + $0x120] ss:$36 sps:$4 sm:$0xff]   ;;  %v10272_v23 = vld [vmem:[#allocation5 + $0x168] ss:$36 sps:$4 sm:$0xff]  }
  0x7b   : > { %9104 = vmatpush1.bf16.msra.mxu1 %v11339_v8  ;;  %2316 = vmatprep.subr.bf16.mxu0 %v10250_v9  ;;  %v11356_v20 = vld [vmem:[#allocation5 + $0x5a0] ss:$36 sps:$4 sm:$0xff]   ;;  %v11363_v24 = vld [vmem:[#allocation5 + $0x5e8] ss:$36 sps:$4 sm:$0xff]   ;;  %v10274_v25 = vld [vmem:[#allocation5 + $0x1b4] ss:$36 sps:$4 sm:$0xff]  }
  0x7c   : > { %9097 = vmatprep.subr.bf16.mxu1 %v11342_v10  ;;  %v11366_v26 = vld [vmem:[#allocation5 + $0x634] ss:$36 sps:$4 sm:$0xff]   ;;  %v10280_v29 = vld [vmem:[#allocation5 + $0x1fc] ss:$36 sps:$4 sm:$0xff]   ;;  %v10286_v33 = vld [vmem:[#allocation5 + $0x244] ss:$36 sps:$4 sm:$0xff]  }
  0x7d   : > { %v10278_v27 = vld [vmem:[#allocation5 + $0x1b0] ss:$36 sps:$4 sm:$0xff]   ;;  %v11372_v30 = vld [vmem:[#allocation5 + $0x67c] ss:$36 sps:$4 sm:$0xff]   ;;  %v10288_v35 = vld [vmem:[%s11320_s8 + $0x218] ss:$12 sps:$4 sm:$0xff]  }
  0x7e   : > { %2317 = vmatpush1.bf16.msra.mxu0 %v10254_v11  ;;  %v11369_v28 = vld [vmem:[#allocation5 + $0x630] ss:$36 sps:$4 sm:$0xff]   ;;  %v10284_v31 = vld [vmem:[#allocation5 + $0x1f8] ss:$36 sps:$4 sm:$0xff]   ;;  %v10289_v36 = vld [vmem:[#allocation5 + $0x240] ss:$36 sps:$4 sm:$0xff]  }
  0x7f   : > { %9105 = vmatpush1.bf16.msra.mxu1 %v11344_v12  ;;  %2318 = vmatprep.subr.bf16.mxu0 %v10256_v13  ;;  %v11375_v32 = vld [vmem:[#allocation5 + $0x678] ss:$36 sps:$4 sm:$0xff]   ;;  %v10292_v34 = vld [vmem:[#allocation5 + $0xc] ss:$36 sps:$4 sm:$0xff]   ;;  %v10314_v49 = vld [vmem:[#allocation5 + $0xe4] ss:$36 sps:$4 sm:$0xff]  }
  0x80   : > { %9098 = vmatprep.subr.bf16.mxu1 %v11348_v14  ;;  %v10290_v37 = vld [vmem:[#allocation5 + $0x8] ss:$36 sps:$4 sm:$0xff]   ;;  %v10298_v39 = vld [vmem:[#allocation5 + $0x54] ss:$36 sps:$4 sm:$0xff]   ;;  %v10305_v43 = vld [vmem:[#allocation5 + $0x9c] ss:$36 sps:$4 sm:$0xff]  }
  0x81   : > { %v10293_v38 = vld [vmem:[#allocation5 + $0x28c] ss:$36 sps:$4 sm:$0xff]   ;;  %v10299_v42 = vld [vmem:[#allocation5 + $0x2d4] ss:$36 sps:$4 sm:$0xff]   ;;  %v10306_v47 = vld [vmem:[#allocation5 + $0x31c] ss:$36 sps:$4 sm:$0xff]  }
  0x82   : > { %2319 = vmatpush1.bf16.msra.mxu0 %v10260_v15  ;;  %v10295_v40 = vld [vmem:[#allocation5 + $0x288] ss:$36 sps:$4 sm:$0xff]   ;;  %v10296_v41 = vld [vmem:[#allocation5 + $0x50] ss:$36 sps:$4 sm:$0xff]   ;;  %v10303_v46 = vld [vmem:[#allocation5 + $0x98] ss:$36 sps:$4 sm:$0xff]  }
  0x83   : > { %9106 = vmatpush1.bf16.msra.mxu1 %v11351_v16  ;;  %2320 = vmatprep.subr.bf16.mxu0 %v10262_v17  ;;  %v10301_v44 = vld [vmem:[%s11320_s8 + $0x230] ss:$12 sps:$4 sm:$0xff]   ;;  %v10309_v50 = vld [vmem:[#allocation5 + $0x364] ss:$36 sps:$4 sm:$0xff]   ;;  %v10328_v58 = vld [vmem:[#allocation5 + $0x174] ss:$36 sps:$4 sm:$0xff]  }
  0x84   : > { %9099 = vmatprep.subr.bf16.mxu1 %v11354_v18  ;;  %v10302_v45 = vld [vmem:[#allocation5 + $0x2d0] ss:$36 sps:$4 sm:$0xff]   ;;  %v10308_v48 = vld [vmem:[#allocation5 + $0x318] ss:$36 sps:$4 sm:$0xff]   ;;  %v10312_v51 = vld [vmem:[#allocation5 + $0xe0] ss:$36 sps:$4 sm:$0xff]  }
  0x85   : > { %v11383_v52 = vld [vmem:[%s11320_s8 + $0x4] ss:$12 sps:$4 sm:$0xff]   ;;  %v10311_v54 = vld [vmem:[%s11320_s8 + $0x248] ss:$12 sps:$4 sm:$0xff]   ;;  %v10336_v62 = vld [vmem:[#allocation5 + $0x1bc] ss:$36 sps:$4 sm:$0xff]  }
  0x86   : > { %2321 = vmatpush1.bf16.msra.mxu0 %v10266_v19  ;;  %v10321_v53 = vld [vmem:[#allocation5 + $0x12c] ss:$36 sps:$4 sm:$0xff]   ;;  %2344 = vmatprep.mubr.bf16.mxu0 %v11383_v52  ;;  %v10315_v55 = vld [vmem:[#allocation5 + $0x360] ss:$36 sps:$4 sm:$0xff]   ;;  %v10322_v61 = vld [vmem:[#allocation5 + $0x3f4] ss:$36 sps:$4 sm:$0xff]  }
  0x87   : > { %9107 = vmatpush1.bf16.msra.mxu1 %v11356_v20  ;;  %2322 = vmatprep.subr.bf16.mxu0 %v10268_v21  ;;  %v10319_v56 = vld [vmem:[#allocation5 + $0x128] ss:$36 sps:$4 sm:$0xff]   ;;  %v10326_v60 = vld [vmem:[#allocation5 + $0x170] ss:$36 sps:$4 sm:$0xff]   ;;  %v10329_v3 = vld [vmem:[#allocation5 + $0x43c] ss:$36 sps:$4 sm:$0xff]  }
  0x88   : > { %9100 = vmatprep.subr.bf16.mxu1 %v11360_v22  ;;  %v10316_v57 = vld [vmem:[#allocation5 + $0x3ac] ss:$36 sps:$4 sm:$0xff]   ;;  %v10334_v5 = vld [vmem:[#allocation5 + $0x1b8] ss:$36 sps:$4 sm:$0xff]   ;;  %v10341_v7 = vld [vmem:[#allocation5 + $0x204] ss:$36 sps:$4 sm:$0xff]  }
  0x89   : > { %v10318_v59 = vld [vmem:[#allocation5 + $0x3a8] ss:$36 sps:$4 sm:$0xff]   ;;  %v10325_v1 = vld [vmem:[#allocation5 + $0x3f0] ss:$36 sps:$4 sm:$0xff]   ;;  %v10331_v9 = vld [vmem:[#allocation5 + $0x438] ss:$36 sps:$4 sm:$0xff]  }
  0x8a   : > { %2323 = vmatpush1.bf16.msra.mxu0 %v10272_v23  ;;  %v10324_v63 = vld [vmem:[%s11320_s8 + $0x260] ss:$12 sps:$4 sm:$0xff]   ;;  %v10338_v17 = vld [vmem:[%s11320_s8 + $0x278] ss:$12 sps:$4 sm:$0xff]   ;;  %v11396_v19 = vld [vmem:[%s11320_s8 + $0x1c] ss:$12 sps:$4 sm:$0xff]  }
  0x8b   : > { %9108 = vmatpush1.bf16.msra.mxu1 %v11363_v24  ;;  %2324 = vmatprep.subr.bf16.mxu0 %v10274_v25  ;;  %v10339_v11 = vld [vmem:[#allocation5 + $0x200] ss:$36 sps:$4 sm:$0xff]   ;;  %v10348_v13 = vld [vmem:[#allocation5 + $0x24c] ss:$36 sps:$4 sm:$0xff]   ;;  %v10351_v23 = vld [vmem:[#allocation5 + $0x294] ss:$36 sps:$4 sm:$0xff]  }
  0x8c   : > { %9101 = vmatprep.subr.bf16.mxu1 %v11366_v26  ;;  %v11392_v15 = vld [vmem:[%s11320_s8] ss:$12 sps:$4 sm:$0xff]   ;;  %v11404_v25 = vld [vmem:[%s11320_s8 + $0x18] ss:$12 sps:$4 sm:$0xff]   ;;  %s10138_s25 = smul.u32 1536, %s11314_s6  ;;  %s7848_s13 = sshll.u32 %s11808_s23, 4  ;;  %s13893_s13 = int_to_ptr.vmem [resolvable:$true] %s7848_s13 }
  0x8d   : > { %v10346_v21 = vld [vmem:[#allocation5 + $0x248] ss:$36 sps:$4 sm:$0xff]   ;;  %s10139_s9 = smul.u32 12288, %s11078_s18  ;;  %s7827_s29 = scalar_lea.sflag [#allocation4], %s11314_s6 }
  0x8e   : > { %2325 = vmatpush1.bf16.msra.mxu0 %v10278_v27  ;;  %v10349_v27 = vld [vmem:[#allocation5 + $0x290] ss:$36 sps:$4 sm:$0xff]   ;;  %s12872_s27 = scalar_lea.vmem [#allocation9], %s10138_s25  ;;  %s10968_s5 = scalar_lea.vmem %s13893_s13, 12288 }
  0x8f   : > { %9109 = vmatpush1.bf16.msra.mxu1 %v11369_v28  ;;  %2326 = vmatprep.subr.bf16.mxu0 %v10280_v29  ;;  %v10345_v29 = vld [vmem:[%s11320_s8 + $0x290] ss:$12 sps:$4 sm:$0xff]   ;;  %s13885_s24 = scalar_lea.hbm %s14316_s3, %s10139_s9  ;;  %p10969_p8 = scmp.ne.s32.totalorder %s13893_s13, %s10968_s5 }
  0x90   : > { %9102 = vmatprep.subr.bf16.mxu1 %v11372_v30  ;;  %p14471_p12 = scmp.ne.s32.totalorder %s14331_s30, 0  ;;  %s11096_s22 = smov [#allocation8]  }
  0x91   : > { %s10972_s7 = sshll.u32 %s11096_s22, 4  ;;  %s10973_s7 = int_to_ptr.vmem [resolvable:$false] %s10972_s7 }
  0x92   : > { %2327 = vmatpush1.bf16.msra.mxu0 %v10284_v31  ;;  %v11409_v31 = vld [vmem:[%s11320_s8 + $0x34] ss:$12 sps:$4 sm:$0xff]   ;;  %p10970_p1 = pnand %p10969_p8, %p14471_p12  ;;  %s10974_s11 = scalar_lea.vmem %s10973_s7, 24576 }
  0x93   : > { %9110 = vmatpush1.bf16.msra.mxu1 %v11375_v32  ;;  %2328 = vmatprep.subr.bf16.mxu0 %v10286_v33  ;;  %v10365_v33 = vld [vmem:[#allocation5 + $0x324] ss:$36 sps:$4 sm:$0xff]   ;;  %p10975_p3 = scmp.lt.s32.totalorder %s13893_s13, %s10973_s7  ;;  %p10976_p5 = scmp.lt.s32.totalorder %s10974_s11, %s10968_s5 }
  0x94   : > { %3018 = vmatprep.subr.bf16.mxu1 %v10292_v34  ;;  %v10363_v34 = vld [vmem:[#allocation5 + $0x320] ss:$36 sps:$4 sm:$0xff]   ;;  %p10971_p10 = pneg %p10970_p1 }
  0x95   : > { %p10977_p9 = por %p10976_p5, %p10975_p3 }
  0x96   : > { %2918 = vmatmul.mubr.bf16.vlgmr.msra.gmra.mrb[0].mxu1 %v10288_v35  ;;  %2329 = vmatpush1.bf16.msra.mxu0 %v10289_v36  ;;  %v11423_v35 = vld [vmem:[%s11320_s8 + $0x4c] ss:$12 sps:$4 sm:$0xff]  }
  0x97   : > { %3019 = vmatpush1.bf16.msra.mxu1 %v10290_v37  ;;  %2330 = vmatprep.subr.bf16.mxu0 %v10293_v38  ;;  %v10366_v36 = vld [vmem:[#allocation5 + $0x368] ss:$36 sps:$4 sm:$0xff]   ;;  %v10375_v37 = vld [vmem:[#allocation5 + $0x3b4] ss:$36 sps:$4 sm:$0xff]   ;;  %p10978_p2 = pnand %p10977_p9, %p10971_p10 }
  0x98   : > { %3020 = vmatprep.subr.bf16.mxu1 %v10298_v39  ;;  %2927 = vmatprep.mubr.bf16.mxu1 %v14322_v0  ;;  %v10362_v38 = vld [vmem:[%s11320_s8 + $0x2c0] ss:$12 sps:$4 sm:$0xff]   ;;  %v10378_v39 = vld [vmem:[#allocation5 + $0x3f8] ss:$36 sps:$4 sm:$0xff]  }
  0x9a   : > { %2331 = vmatpush1.bf16.msra.mxu0 %v10295_v40  ;;  %v10385_v40 = vld [vmem:[#allocation5 + $0x444] ss:$36 sps:$4 sm:$0xff]  }
  0x9b   : > { %3021 = vmatpush1.bf16.msra.mxu1 %v10296_v41  ;;  %2332 = vmatprep.subr.bf16.mxu0 %v10299_v42  ;;  %v11451_v41 = vld [vmem:[%s11320_s8 + $0x7c] ss:$12 sps:$4 sm:$0xff]  }
  0x9c   : > { %3022 = vmatprep.subr.bf16.mxu1 %v10305_v43  ;;  %v10382_v42 = vld [vmem:[%s11320_s8 + $0x2f0] ss:$12 sps:$4 sm:$0xff]   ;;  %v10386_v43 = vld [vmem:[%s11320_s8 + $0x94] ss:$12 sps:$4 sm:$0xff]  }
  0x9e   : > { %2928 = vmatmul.mubr.bf16.gmra.mrb[4].mxu1 %v10301_v44  ;;  %2333 = vmatpush1.bf16.msra.mxu0 %v10302_v45  ;;  %v10392_v44 = vld [vmem:[%s11320_s8 + $0xac] ss:$12 sps:$4 sm:$0xff]  }
  0x9f   : > { %3023 = vmatpush1.bf16.msra.mxu1 %v10303_v46  ;;  %2334 = vmatprep.subr.bf16.mxu0 %v10306_v47  ;;  %v10406_v45 = vld [vmem:[#allocation5 + $0x4d4] ss:$36 sps:$4 sm:$0xff]   ;;  %v10421_v47 = vld [vmem:[#allocation5 + $0x51c] ss:$36 sps:$4 sm:$0xff]  }
  0xa0   : > { %2937 = vmatprep.mubr.bf16.mxu1 %v14322_v0  ;;  %3024 = vmatprep.subr.bf16.mxu1 %v10314_v49  ;;  %v10404_v46 = vld [vmem:[#allocation5 + $0x4d0] ss:$36 sps:$4 sm:$0xff]  }
  0xa1   : > { %v10395_v49 = vld [vmem:[%s11320_s8 + $0xc4] ss:$12 sps:$4 sm:$0xff]  }
  0xa2   : > { %2335 = vmatpush1.bf16.msra.mxu0 %v10308_v48  ;;  %v10394_v48 = vld [vmem:[%s11320_s8 + $0xa8] ss:$12 sps:$4 sm:$0xff]  }
  0xa3   : > { %3025 = vmatpush1.bf16.msra.mxu1 %v10312_v51  ;;  %2336 = vmatprep.subr.bf16.mxu0 %v10309_v50  ;;  %v10419_v50 = vld [vmem:[#allocation5 + $0x518] ss:$36 sps:$4 sm:$0xff]   ;;  %v10436_v51 = vld [vmem:[#allocation5 + $0x564] ss:$36 sps:$4 sm:$0xff]  }
  0xa4   : > { %3026 = vmatprep.subr.bf16.mxu1 %v10321_v53  ;;  %v10451_v53 = vld [vmem:[#allocation5 + $0x5ac] ss:$36 sps:$4 sm:$0xff]  }
  0xa6   : > { %2938 = vmatmul.mubr.bf16.gmra.mrb[8].mxu1 %v10311_v54  ;;  %2337 = vmatpush1.bf16.msra.mxu0 %v10315_v55  ;;  %v10397_v54 = vld [vmem:[%s11320_s8 + $0xc0] ss:$12 sps:$4 sm:$0xff]   ;;  %v10398_v55 = vld [vmem:[%s11320_s8 + $0xdc] ss:$12 sps:$4 sm:$0xff]  }
  0xa7   : > { %3027 = vmatpush1.bf16.msra.mxu1 %v10319_v56  ;;  %2338 = vmatprep.subr.bf16.mxu0 %v10316_v57  ;;  %v10449_v56 = vld [vmem:[#allocation5 + $0x5a8] ss:$36 sps:$4 sm:$0xff]   ;;  %v10400_v57 = vld [vmem:[%s11320_s8 + $0xd8] ss:$12 sps:$4 sm:$0xff]  }
  0xa8   : > { %2947 = vmatprep.mubr.bf16.mxu1 %v14322_v0  ;;  %3028 = vmatprep.subr.bf16.mxu1 %v10328_v58  ;;  %v10401_v58 = vld [vmem:[%s11320_s8 + $0xf4] ss:$12 sps:$4 sm:$0xff]  }
  0xaa   : > { %2339 = vmatpush1.bf16.msra.mxu0 %v10318_v59  ;;  %v10403_v59 = vld [vmem:[%s11320_s8 + $0xf0] ss:$12 sps:$4 sm:$0xff]  }
  0xab   : > { %3029 = vmatpush1.bf16.msra.mxu1 %v10326_v60  ;;  %2340 = vmatprep.subr.bf16.mxu0 %v10322_v61  ;;  %v10407_v60 = vld [vmem:[%s11320_s8 + $0x10c] ss:$12 sps:$4 sm:$0xff]   ;;  %v10464_v61 = vld [vmem:[#allocation5 + $0x5f0] ss:$36 sps:$4 sm:$0xff]  }
  0xac   : > { %3030 = vmatprep.subr.bf16.mxu1 %v10336_v62  ;;  %v10466_v62 = vld [vmem:[#allocation5 + $0x5f4] ss:$36 sps:$4 sm:$0xff]  }
  0xae   : > { %2948 = vmatmul.mubr.bf16.gmra.mrb[12].mxu1 %v10324_v63  ;;  %2341 = vmatpush1.bf16.msra.mxu0 %v10325_v1  ;;  %v10409_v63 = vld [vmem:[%s11320_s8 + $0x108] ss:$12 sps:$4 sm:$0xff]   ;;  %v10410_v1 = vld [vmem:[%s11320_s8 + $0x124] ss:$12 sps:$4 sm:$0xff]  }
  0xaf   : > { %2957 = vmatprep.mubr.bf16.mxu1 %v14322_v0  ;;  %2342 = vmatprep.subr.bf16.mxu0 %v10329_v3  ;;  %v10412_v3 = vld [vmem:[%s11320_s8 + $0x120] ss:$12 sps:$4 sm:$0xff]  }
  0xb0   : > { %3031 = vmatpush1.bf16.msra.mxu1 %v10334_v5  ;;  %v10413_v5 = vld [vmem:[%s11320_s8 + $0x13c] ss:$12 sps:$4 sm:$0xff]  }
  0xb1   : > { %3032 = vmatprep.subr.bf16.mxu1 %v10341_v7  ;;  %v10415_v7 = vld [vmem:[%s11320_s8 + $0x138] ss:$12 sps:$4 sm:$0xff]  }
  0xb2   : > { %2343 = vmatpush1.bf16.msra.mxu0 %v10331_v9  ;;  %v10416_v9 = vld [vmem:[%s11320_s8 + $0x154] ss:$12 sps:$4 sm:$0xff]  }
  0xb3   : > { %2665 = vmatprep.subr.bf16.mxu0 %v11331_v2  ;;  %v10358_v2 = vld [vmem:[#allocation5 + $0x2dc] ss:$36 sps:$4 sm:$0xff]  }
  0xb4   : > { %3033 = vmatpush1.bf16.msra.mxu1 %v10339_v11  ;;  %v10418_v11 = vld [vmem:[%s11320_s8 + $0x150] ss:$12 sps:$4 sm:$0xff]  }
  0xb5   : > { %3034 = vmatprep.subr.bf16.mxu1 %v10348_v13  ;;  %2345 = vmatmul.mubr.bf16.vlgmr.msra.gmra.mrb[0].mxu0 %v11392_v15  ;;  %v10422_v13 = vld [vmem:[%s11320_s8 + $0x16c] ss:$12 sps:$4 sm:$0xff]  }
  0xb6   : > { %2958 = vmatmul.mubr.bf16.gmra.mrb[16].mxu1 %v10338_v17  ;;  %2666 = vmatpush1.bf16.msra.mxu0 %v11333_v4  ;;  %v10356_v4 = vld [vmem:[#allocation5 + $0x2d8] ss:$36 sps:$4 sm:$0xff]  }
  0xb7   : > { %2354 = vmatprep.mubr.bf16.mxu0 %v11396_v19  ;;  %2967 = vmatprep.mubr.bf16.mxu1 %v14322_v0  ;;  %v10481_v17 = vld [vmem:[#allocation5 + $0x63c] ss:$36 sps:$4 sm:$0xff]  }
  0xb8   : > { %3035 = vmatpush1.bf16.msra.mxu1 %v10346_v21  ;;  %2667 = vmatprep.subr.bf16.mxu0 %v11337_v6  ;;  %v11417_v6 = vld [vmem:[%s11320_s8 + $0x30] ss:$12 sps:$4 sm:$0xff]  }
  0xb9   : > { %3036 = vmatprep.subr.bf16.mxu1 %v10351_v23  ;;  %v10425_v21 = vld [vmem:[%s11320_s8 + $0x184] ss:$12 sps:$4 sm:$0xff]   ;;  %v10427_v23 = vld [vmem:[%s11320_s8 + $0x180] ss:$12 sps:$4 sm:$0xff]  }
  0xba   : > { %2668 = vmatpush1.bf16.msra.mxu0 %v11339_v8  ;;  %v10368_v8 = vld [vmem:[#allocation5 + $0x36c] ss:$36 sps:$4 sm:$0xff]  }
  0xbb   : > { %2669 = vmatprep.subr.bf16.mxu0 %v11342_v10  ;;  %v10355_v10 = vld [vmem:[%s11320_s8 + $0x2a8] ss:$12 sps:$4 sm:$0xff]  }
  0xbc   : > { %3037 = vmatpush1.bf16.msra.mxu1 %v10349_v27  ;;  %v10488_v27 = vld [vmem:[#allocation5 + $0x14] ss:$36 sps:$4 sm:$0xff]  }
  0xbd   : > { %3038 = vmatprep.subr.bf16.mxu1 %v10358_v2  ;;  %2355 = vmatmul.mubr.bf16.gmra.mrb[4].mxu0 %v11404_v25  ;;  %v10430_v2 = vld [vmem:[%s11320_s8 + $0x198] ss:$12 sps:$4 sm:$0xff]  }
  0xbe   : > { %2968 = vmatmul.mubr.bf16.gmra.mrb[20].mxu1 %v10345_v29  ;;  %2364 = vmatprep.mubr.bf16.mxu0 %v11409_v31  ;;  %v10431_v29 = vld [vmem:[%s11320_s8 + $0x1b4] ss:$12 sps:$4 sm:$0xff]  }
  0xbf   : > { %2977 = vmatprep.mubr.bf16.mxu1 %v14322_v0  ;;  %2670 = vmatpush1.bf16.msra.mxu0 %v11344_v12  ;;  %v11431_v12 = vld [vmem:[%s11320_s8 + $0x48] ss:$12 sps:$4 sm:$0xff]  }
  0xc0   : > { %3039 = vmatpush1.bf16.msra.mxu1 %v10356_v4  ;;  %2671 = vmatprep.subr.bf16.mxu0 %v11348_v14  ;;  %v10373_v14 = vld [vmem:[#allocation5 + $0x3b0] ss:$36 sps:$4 sm:$0xff]   ;;  %v10437_v4 = vld [vmem:[%s11320_s8 + $0x1cc] ss:$12 sps:$4 sm:$0xff]  }
  0xc1   : > { %3040 = vmatprep.subr.bf16.mxu1 %v10365_v33  ;;  %v10494_v33 = vld [vmem:[#allocation5 + $0x680] ss:$36 sps:$4 sm:$0xff]  }
  0xc3   : > { %2672 = vmatpush1.bf16.msra.mxu0 %v11351_v16  ;;  %v10380_v16 = vld [vmem:[#allocation5 + $0x3fc] ss:$36 sps:$4 sm:$0xff]  }
  0xc4   : > { %3041 = vmatpush1.bf16.msra.mxu1 %v10363_v34  ;;  %2673 = vmatprep.subr.bf16.mxu0 %v11354_v18  ;;  %v11437_v18 = vld [vmem:[%s11320_s8 + $0x64] ss:$12 sps:$4 sm:$0xff]   ;;  %v10439_v34 = vld [vmem:[%s11320_s8 + $0x1c8] ss:$12 sps:$4 sm:$0xff]  }
  0xc5   : > { %3042 = vmatprep.subr.bf16.mxu1 %v10368_v8  ;;  %2365 = vmatmul.mubr.bf16.gmra.mrb[8].mxu0 %v11417_v6  ;;  %v10440_v8 = vld [vmem:[%s11320_s8 + $0x1e4] ss:$12 sps:$4 sm:$0xff]  }
  0xc6   : > { %2978 = vmatmul.mubr.bf16.gmra.mrb[24].mxu1 %v10355_v10  ;;  %2374 = vmatprep.mubr.bf16.mxu0 %v11423_v35  ;;  %v10442_v10 = vld [vmem:[%s11320_s8 + $0x1e0] ss:$12 sps:$4 sm:$0xff]  }
  0xc7   : > { %2987 = vmatprep.mubr.bf16.mxu1 %v14322_v0  ;;  %2674 = vmatpush1.bf16.msra.mxu0 %v11356_v20  ;;  %v11445_v20 = vld [vmem:[%s11320_s8 + $0x60] ss:$12 sps:$4 sm:$0xff]  }
  0xc8   : > { %3043 = vmatpush1.bf16.msra.mxu1 %v10366_v36  ;;  %2675 = vmatprep.subr.bf16.mxu0 %v11360_v22  ;;  %v10383_v22 = vld [vmem:[#allocation5 + $0x440] ss:$36 sps:$4 sm:$0xff]  }
  0xc9   : > { %3044 = vmatprep.subr.bf16.mxu1 %v10375_v37  ;;  %v10445_v36 = vld [vmem:[%s11320_s8 + $0x1f8] ss:$12 sps:$4 sm:$0xff]   ;;  %v10446_v37 = vld [vmem:[%s11320_s8 + $0x214] ss:$12 sps:$4 sm:$0xff]  }
  0xcb   : > { %2676 = vmatpush1.bf16.msra.mxu0 %v11363_v24  ;;  %v10391_v24 = vld [vmem:[#allocation5 + $0x48c] ss:$36 sps:$4 sm:$0xff]  }
  0xcc   : > { %3045 = vmatpush1.bf16.msra.mxu1 %v10373_v14  ;;  %2677 = vmatprep.subr.bf16.mxu0 %v11366_v26  ;;  %v10372_v26 = vld [vmem:[%s11320_s8 + $0x2d8] ss:$12 sps:$4 sm:$0xff]  }
  0xcd   : > { %3046 = vmatprep.subr.bf16.mxu1 %v10380_v16  ;;  %2375 = vmatmul.mubr.bf16.gmra.mrb[12].mxu0 %v11431_v12  ;;  %v11507_v14 = vld [vmem:[%s11320_s8 + $0x22c] ss:$12 sps:$4 sm:$0xff]   ;;  %v10512_v16 = vld [vmem:[#allocation5 + $0x1c] ss:$36 sps:$4 sm:$0xff]  }
  0xce   : > { %2988 = vmatmul.mubr.bf16.gmra.mrb[28].mxu1 %v10362_v38  ;;  %2384 = vmatprep.mubr.bf16.mxu0 %v11437_v18 }
  0xcf   : > { %2997 = vmatprep.mubr.bf16.mxu1 %v14322_v0  ;;  %2678 = vmatpush1.bf16.msra.mxu0 %v11369_v28  ;;  %v10381_v28 = vld [vmem:[%s11320_s8 + $0x78] ss:$12 sps:$4 sm:$0xff]  }
  0xd0   : > { %3047 = vmatpush1.bf16.msra.mxu1 %v10378_v39  ;;  %2679 = vmatprep.subr.bf16.mxu0 %v11372_v30  ;;  %v10388_v30 = vld [vmem:[%s11320_s8 + $0x90] ss:$12 sps:$4 sm:$0xff]   ;;  %v11516_v39 = vld [vmem:[%s11320_s8 + $0x228] ss:$12 sps:$4 sm:$0xff]  }
  0xd1   : > { %3048 = vmatprep.subr.bf16.mxu1 %v10385_v40 }
  0xd3   : > { %2680 = vmatpush1.bf16.msra.mxu0 %v11375_v32  ;;  %v10389_v32 = vld [vmem:[#allocation5 + $0x488] ss:$36 sps:$4 sm:$0xff]  }
  0xd4   : > { %3049 = vmatpush1.bf16.msra.mxu1 %v10383_v22  ;;  %3724 = vmatprep.subr.bf16.mxu0 %v10488_v27 }
  0xd5   : > { %3371 = vmatprep.subr.bf16.mxu1 %v10391_v24  ;;  %2385 = vmatmul.mubr.bf16.gmra.mrb[16].mxu0 %v11445_v20 }
  0xd6   : > { %2998 = vmatmul.mubr.bf16.gmra.mrb[32].mxu1 %v10372_v26  ;;  %2394 = vmatprep.mubr.bf16.mxu0 %v11451_v41 }
  0xd7   : > { %3007 = vmatprep.mubr.bf16.mxu1 %v14322_v0 }
  0xdd   : > { %2395 = vmatmul.mubr.bf16.gmra.mrb[20].mxu0 %v10381_v28 }
  0xde   : > { %3008 = vmatmul.mubr.bf16.gmra.mrb[36].mxu1 %v10382_v42  ;;  %2404 = vmatprep.mubr.bf16.mxu0 %v10386_v43  ;;  %v11537_v42 = vld [vmem:[%s11320_s8 + $0x25c] ss:$12 sps:$4 sm:$0xff]  }
  0xdf   : > { %3050 = vmatprep.mubr.bf16.mxu1 %v11383_v52  ;;  %v10434_v52 = vld [vmem:[#allocation5 + $0x560] ss:$36 sps:$4 sm:$0xff]  }
  0xe5   : > { %2405 = vmatmul.mubr.bf16.gmra.mrb[24].mxu0 %v10388_v30 }
  0xe6   : > { %3051 = vmatmul.mubr.bf16.vlgmr.msra.gmra.mrb[40].mxu1 %v11392_v15  ;;  %2414 = vmatprep.mubr.bf16.mxu0 %v10392_v44  ;;  %v10479_v15 = vld [vmem:[#allocation5 + $0x638] ss:$36 sps:$4 sm:$0xff]  }
  0xe7   : > { %3372 = vmatpush1.bf16.msra.mxu1 %v10389_v32  ;;  %3060 = vmatprep.mubr.bf16.mxu1 %v11396_v19  ;;  %v10424_v19 = vld [vmem:[%s11320_s8 + $0x168] ss:$12 sps:$4 sm:$0xff]  }
  0xe8   : > { %3373 = vmatprep.subr.bf16.mxu1 %v10406_v45 }
  0xeb   : > { %3374 = vmatpush1.bf16.msra.mxu1 %v10404_v46  ;;  %v11553_v46 = vld [vmem:[%s11320_s8 + $0x274] ss:$12 sps:$4 sm:$0xff]  }
  0xec   : > { %3375 = vmatprep.subr.bf16.mxu1 %v10421_v47 }
  0xed   : > { %2415 = vmatmul.mubr.bf16.gmra.mrb[28].mxu0 %v10394_v48 }
  0xee   : > { %3061 = vmatmul.mubr.bf16.gmra.mrb[44].mxu1 %v11404_v25  ;;  %2424 = vmatprep.mubr.bf16.mxu0 %v10395_v49  ;;  %v10428_v25 = vld [vmem:[%s11320_s8 + $0x19c] ss:$12 sps:$4 sm:$0xff]  }
  0xef   : > { %3070 = vmatprep.mubr.bf16.mxu1 %v11409_v31  ;;  %3376 = vmatpush1.bf16.msra.mxu1 %v10419_v50  ;;  %v10433_v31 = vld [vmem:[%s11320_s8 + $0x1b0] ss:$12 sps:$4 sm:$0xff]  }
  0xf0   : > { %3377 = vmatprep.subr.bf16.mxu1 %v10436_v51  ;;  %v11564_v50 = vld [vmem:[%s11320_s8 + $0x270] ss:$12 sps:$4 sm:$0xff]  }
  0xf3   : > { %3378 = vmatpush1.bf16.msra.mxu1 %v10434_v52  ;;  %v11569_v52 = vld [vmem:[%s11320_s8 + $0x28c] ss:$12 sps:$4 sm:$0xff]  }
  0xf4   : > { %3379 = vmatprep.subr.bf16.mxu1 %v10451_v53 }
  0xf5   : > { %2425 = vmatmul.mubr.bf16.gmra.mrb[32].mxu0 %v10397_v54 }
  0xf6   : > { %3071 = vmatmul.mubr.bf16.gmra.mrb[48].mxu1 %v11417_v6  ;;  %2434 = vmatprep.mubr.bf16.mxu0 %v10398_v55  ;;  %v10496_v6 = vld [vmem:[#allocation5 + $0x684] ss:$36 sps:$4 sm:$0xff]  }
  0xf7   : > { %3080 = vmatprep.mubr.bf16.mxu1 %v11423_v35  ;;  %3380 = vmatpush1.bf16.msra.mxu1 %v10449_v56  ;;  %v10443_v35 = vld [vmem:[%s11320_s8 + $0x1fc] ss:$12 sps:$4 sm:$0xff]  }
  0xf8   : > { %3381 = vmatprep.subr.bf16.mxu1 %v10466_v62  ;;  %v11580_v56 = vld [vmem:[%s11320_s8 + $0x288] ss:$12 sps:$4 sm:$0xff]   ;;  %v11596_v62 = vld [vmem:[%s11320_s8 + $0x2a0] ss:$12 sps:$4 sm:$0xff]  }
  0xfb   : > { %3382 = vmatpush1.bf16.msra.mxu1 %v10464_v61 }
  0xfc   : > { %3383 = vmatprep.subr.bf16.mxu1 %v10481_v17 }
  0xfd   : > { %2435 = vmatmul.mubr.bf16.gmra.mrb[36].mxu0 %v10400_v57 }
  0xfe   : > { %3081 = vmatmul.mubr.bf16.gmra.mrb[52].mxu1 %v11431_v12  ;;  %2444 = vmatprep.mubr.bf16.mxu0 %v10401_v58  ;;  %v11504_v12 = vld [vmem:[%s11320_s8 + $0x210] ss:$12 sps:$4 sm:$0xff]  }
  0xff   : > { %3090 = vmatprep.mubr.bf16.mxu1 %v11437_v18  ;;  %3384 = vmatpush1.bf16.msra.mxu1 %v10479_v15 }
 0x100   : > { %3385 = vmatprep.subr.bf16.mxu1 %v10496_v6 }
 0x103   : > { %3386 = vmatpush1.bf16.msra.mxu1 %v10494_v33 }
 0x104   : > { %4430 = vmatprep.subr.bf16.mxu1 %v10512_v16  ;;  %v11676_v16 = vld [vmem:[%s11320_s8 + $0x20] ss:$12 sps:$4 sm:$0xff]  }
 0x105   : > { %2445 = vmatmul.mubr.bf16.gmra.mrb[40].mxu0 %v10403_v59 }
 0x106   : > { %3091 = vmatmul.mubr.bf16.gmra.mrb[56].mxu1 %v11445_v20  ;;  %2454 = vmatprep.mubr.bf16.mxu0 %v10407_v60  ;;  %v11521_v20 = vld [vmem:[%s11320_s8 + $0x244] ss:$12 sps:$4 sm:$0xff]  }
 0x107   : > { %3100 = vmatprep.mubr.bf16.mxu1 %v11451_v41  ;;  %v11532_v41 = vld [vmem:[%s11320_s8 + $0x240] ss:$12 sps:$4 sm:$0xff]  }
 0x10d   : > { %2455 = vmatmul.mubr.bf16.gmra.mrb[44].mxu0 %v10409_v63 }
 0x10e   : > { %3101 = vmatmul.mubr.bf16.gmra.mrb[60].mxu1 %v10381_v28  ;;  %2464 = vmatprep.mubr.bf16.mxu0 %v10410_v1 }
 0x10f   : > { %3110 = vmatprep.mubr.bf16.mxu1 %v10386_v43 }
 0x115   : > { %2465 = vmatmul.mubr.bf16.gmra.mrb[48].mxu0 %v10412_v3 }
 0x116   : > { %3111 = vmatmul.mubr.bf16.gmra.mrb[64].mxu1 %v10388_v30  ;;  %2474 = vmatprep.mubr.bf16.mxu0 %v10413_v5 }
 0x117   : > { %3120 = vmatprep.mubr.bf16.mxu1 %v10392_v44  ;;  %v11548_v44 = vld [vmem:[%s11320_s8 + $0x258] ss:$12 sps:$4 sm:$0xff]  }
 0x11d   : > { %2475 = vmatmul.mubr.bf16.gmra.mrb[52].mxu0 %v10415_v7 }
 0x11e   : > { %3121 = vmatmul.mubr.bf16.gmra.mrb[68].mxu1 %v10394_v48  ;;  %2484 = vmatprep.mubr.bf16.mxu0 %v10416_v9 }
 0x11f   : > { %3130 = vmatprep.mubr.bf16.mxu1 %v10395_v49 }
 0x125   : > { %2485 = vmatmul.mubr.bf16.gmra.mrb[56].mxu0 %v10418_v11 }
 0x126   : > { %3131 = vmatmul.mubr.bf16.gmra.mrb[72].mxu1 %v10397_v54  ;;  %2494 = vmatprep.mubr.bf16.mxu0 %v10422_v13 }
 0x127   : > { %3140 = vmatprep.mubr.bf16.mxu1 %v10398_v55 }
 0x12d   : > { %2495 = vmatmul.mubr.bf16.gmra.mrb[60].mxu0 %v10424_v19 }
 0x12e   : > { %3141 = vmatmul.mubr.bf16.gmra.mrb[76].mxu1 %v10400_v57  ;;  %2504 = vmatprep.mubr.bf16.mxu0 %v10425_v21 }
 0x12f   : > { %3150 = vmatprep.mubr.bf16.mxu1 %v10401_v58  ;;  %v11585_v58 = vld [vmem:[%s11320_s8 + $0x2a4] ss:$12 sps:$4 sm:$0xff]  }
 0x135   : > { %2505 = vmatmul.mubr.bf16.gmra.mrb[64].mxu0 %v10427_v23 }
 0x136   : > { %3151 = vmatmul.mubr.bf16.gmra.mrb[80].mxu1 %v10403_v59  ;;  %2514 = vmatprep.mubr.bf16.mxu0 %v10428_v25 }
 0x137   : > { %3160 = vmatprep.mubr.bf16.mxu1 %v10407_v60 }
 0x13d   : > { %2515 = vmatmul.mubr.bf16.gmra.mrb[68].mxu0 %v10430_v2 }
 0x13e   : > { %3161 = vmatmul.mubr.bf16.gmra.mrb[84].mxu1 %v10409_v63  ;;  %2524 = vmatprep.mubr.bf16.mxu0 %v10431_v29 }
 0x13f   : > { %3170 = vmatprep.mubr.bf16.mxu1 %v10410_v1  ;;  %v11601_v1 = vld [vmem:[%s11320_s8 + $0x2bc] ss:$12 sps:$4 sm:$0xff]  }
 0x145   : > { %2525 = vmatmul.mubr.bf16.gmra.mrb[72].mxu0 %v10433_v31 }
 0x146   : > { %3171 = vmatmul.mubr.bf16.gmra.mrb[88].mxu1 %v10412_v3  ;;  %2534 = vmatprep.mubr.bf16.mxu0 %v10437_v4 }
 0x147   : > { %3180 = vmatprep.mubr.bf16.mxu1 %v10413_v5 }
 0x14d   : > { %2535 = vmatmul.mubr.bf16.gmra.mrb[76].mxu0 %v10439_v34 }
 0x14e   : > { %3181 = vmatmul.mubr.bf16.gmra.mrb[92].mxu1 %v10415_v7  ;;  %2544 = vmatprep.mubr.bf16.mxu0 %v10440_v8 }
 0x14f   : > { %3190 = vmatprep.mubr.bf16.mxu1 %v10416_v9  ;;  %v11614_v9 = vld [vmem:[%s11320_s8 + $0x2b8] ss:$12 sps:$4 sm:$0xff]  }
 0x155   : > { %2545 = vmatmul.mubr.bf16.gmra.mrb[80].mxu0 %v10442_v10 }
 0x156   : > { %3191 = vmatmul.mubr.bf16.gmra.mrb[96].mxu1 %v10418_v11  ;;  %2554 = vmatprep.mubr.bf16.mxu0 %v10443_v35 }
 0x157   : > { %3200 = vmatprep.mubr.bf16.mxu1 %v10422_v13  ;;  %v11619_v13 = vld [vmem:[%s11320_s8 + $0x2d4] ss:$12 sps:$4 sm:$0xff]  }
 0x15d   : > { %2555 = vmatmul.mubr.bf16.gmra.mrb[84].mxu0 %v10445_v36 }
 0x15e   : > { %3201 = vmatmul.mubr.bf16.gmra.mrb[100].mxu1 %v10424_v19  ;;  %2564 = vmatprep.mubr.bf16.mxu0 %v10446_v37 }
 0x15f   : > { %3210 = vmatprep.mubr.bf16.mxu1 %v10425_v21  ;;  %v11632_v21 = vld [vmem:[%s11320_s8 + $0x2d0] ss:$12 sps:$4 sm:$0xff]  }
 0x165   : > { %2565 = vmatmul.mubr.bf16.gmra.mrb[88].mxu0 %v11504_v12 }
 0x166   : > { %3211 = vmatmul.mubr.bf16.gmra.mrb[104].mxu1 %v10427_v23  ;;  %2574 = vmatprep.mubr.bf16.mxu0 %v11507_v14 }
 0x167   : > { %3220 = vmatprep.mubr.bf16.mxu1 %v10428_v25  ;;  %v11637_v25 = vld [vmem:[%s11320_s8 + $0x2ec] ss:$12 sps:$4 sm:$0xff]  }
 0x169   : > { %v11511_v38 = vpop.f32.mrb[0].mxu1 }
 0x16a   : > { %v11513_v18 = vpop.f32.mrb[1].mxu1 }
 0x16b   : > { %v11518_v40 = vpop.f32.mrb[2].mxu1 }
 0x16c   : > { %v11523_v22 = vpop.f32.mrb[3].mxu1 }
 0x16d   : > { %2575 = vmatmul.mubr.bf16.gmra.mrb[92].mxu0 %v11516_v39 }
 0x16e   : > { %3221 = vmatmul.mubr.bf16.gmra.mrb[108].mxu1 %v10430_v2  ;;  %2584 = vmatprep.mubr.bf16.mxu0 %v11521_v20 }
 0x16f   : > { %3230 = vmatprep.mubr.bf16.mxu1 %v10431_v29 }
 0x171   : > { %v11527_v24 = vpop.f32.mrb[4].mxu1 }
 0x172   : > { %v11529_v26 = vpop.f32.mrb[5].mxu1 }
 0x173   : > { %v11534_v28 = vpop.f32.mrb[6].mxu1 }
 0x174   : > { %v11539_v43 = vpop.f32.mrb[7].mxu1 }
 0x175   : > { %2585 = vmatmul.mubr.bf16.gmra.mrb[96].mxu0 %v11532_v41 }
 0x176   : > { %3231 = vmatmul.mubr.bf16.gmra.mrb[112].mxu1 %v10433_v31  ;;  %2594 = vmatprep.mubr.bf16.mxu0 %v11537_v42  ;;  %v11650_v31 = vld [vmem:[%s11320_s8 + $0x2e8] ss:$12 sps:$4 sm:$0xff]  }
 0x177   : > { %3240 = vmatprep.mubr.bf16.mxu1 %v10437_v4 }
 0x179   : > { %v11543_v30 = vpop.f32.mrb[8].mxu1 }
 0x17a   : > { %v11545_v32 = vpop.f32.mrb[9].mxu1 }
 0x17b   : > { %v11550_v45 = vpop.f32.mrb[10].mxu1 }
 0x17c   : > { %v11555_v47 = vpop.f32.mrb[11].mxu1 }
 0x17d   : > { %2595 = vmatmul.mubr.bf16.gmra.mrb[100].mxu0 %v11548_v44 }
 0x17e   : > { %3241 = vmatmul.mubr.bf16.gmra.mrb[116].mxu1 %v10439_v34  ;;  %2604 = vmatprep.mubr.bf16.mxu0 %v11553_v46 }
 0x17f   : > { %3250 = vmatprep.mubr.bf16.mxu1 %v10440_v8  ;;  %v11665_v8 = vld [vmem:[%s11320_s8 + $0x8] ss:$12 sps:$4 sm:$0xff]  }
 0x181   : > { %v11559_v48 = vpop.f32.mrb[12].mxu1 }
 0x182   : > { %v11561_v49 = vpop.f32.mrb[13].mxu1 }
 0x183   : > { %v11566_v51 = vpop.f32.mrb[14].mxu1 }
 0x184   : > { %v11571_v53 = vpop.f32.mrb[15].mxu1 }
 0x185   : > { %2605 = vmatmul.mubr.bf16.gmra.mrb[104].mxu0 %v11564_v50 }
 0x186   : > { %3251 = vmatmul.mubr.bf16.gmra.mrb[120].mxu1 %v10442_v10  ;;  %2614 = vmatprep.mubr.bf16.mxu0 %v11569_v52 }
 0x187   : > { %3260 = vmatprep.mubr.bf16.mxu1 %v10443_v35  ;;  %v10486_v35 = vld [vmem:[#allocation5 + $0x10] ss:$36 sps:$4 sm:$0xff]  }
 0x189   : > { %v11575_v54 = vpop.f32.mrb[16].mxu1 }
 0x18a   : > { %v11577_v55 = vpop.f32.mrb[17].mxu1 }
 0x18b   : > { %v11582_v57 = vpop.f32.mrb[18].mxu1 }
 0x18c   : > { %v11587_v59 = vpop.f32.mrb[19].mxu1 }
 0x18d   : > { %2615 = vmatmul.mubr.bf16.gmra.mrb[108].mxu0 %v11580_v56 }
 0x18e   : > { %3261 = vmatmul.mubr.bf16.gmra.mrb[124].mxu1 %v10445_v36  ;;  %2624 = vmatprep.mubr.bf16.mxu0 %v11585_v58 }
 0x18f   : > { %3270 = vmatprep.mubr.bf16.mxu1 %v10446_v37  ;;  %v10492_v37 = vld [vmem:[#allocation5 + $0x5c] ss:$36 sps:$4 sm:$0xff]  }
 0x191   : > { %v11591_v60 = vpop.f32.mrb[20].mxu1 }
 0x192   : > { %v11593_v61 = vpop.f32.mrb[21].mxu1 }
 0x193   : > { %v11598_v63 = vpop.f32.mrb[22].mxu1 }
 0x194   : > { %v11603_v3 = vpop.f32.mrb[23].mxu1 }
 0x195   : > { %2625 = vmatmul.mubr.bf16.gmra.mrb[112].mxu0 %v11596_v62 }
 0x196   : > { %3271 = vmatmul.mubr.bf16.gmra.mrb[128].mxu1 %v11504_v12  ;;  %2634 = vmatprep.mubr.bf16.mxu0 %v11601_v1  ;;  %v10490_v12 = vld [vmem:[#allocation5 + $0x58] ss:$36 sps:$4 sm:$0xff]  }
 0x197   : > { %3280 = vmatprep.mubr.bf16.mxu1 %v11507_v14  ;;  %v10499_v14 = vld [vmem:[#allocation5 + $0xa4] ss:$36 sps:$4 sm:$0xff]  }
 0x199   : > { %v11609_v5 = vpop.f32.mrb[24].mxu1 }
 0x19a   : > { %v11611_v7 = vpop.f32.mrb[25].mxu1 }
 0x19b   : > { %v11616_v11 = vpop.f32.mrb[26].mxu1 }
 0x19c   : > { %v11621_v15 = vpop.f32.mrb[27].mxu1 }
 0x19d   : > { %2635 = vmatmul.mubr.bf16.gmra.mrb[116].mxu0 %v11614_v9 }
 0x19e   : > { %3281 = vmatmul.mubr.bf16.gmra.mrb[132].mxu1 %v11516_v39  ;;  %2644 = vmatprep.mubr.bf16.mxu0 %v11619_v13  ;;  %v10497_v39 = vld [vmem:[#allocation5 + $0xa0] ss:$36 sps:$4 sm:$0xff]  }
 0x19f   : > { %3290 = vmatprep.mubr.bf16.mxu1 %v11521_v20  ;;  %v10504_v20 = vld [vmem:[#allocation5 + $0xec] ss:$36 sps:$4 sm:$0xff]  }
 0x1a1   : > { %v11627_v17 = vpop.f32.mrb[28].mxu1 }
 0x1a2   : > { %v11629_v19 = vpop.f32.mrb[29].mxu1 }
 0x1a3   : > { %v11634_v23 = vpop.f32.mrb[30].mxu1 }
 0x1a4   : > { %v11639_v27 = vpop.f32.mrb[31].mxu1 }
 0x1a5   : > { %2645 = vmatmul.mubr.bf16.gmra.mrb[120].mxu0 %v11632_v21 }
 0x1a6   : > { %3291 = vmatmul.mubr.bf16.gmra.mrb[136].mxu1 %v11532_v41  ;;  %2654 = vmatprep.mubr.bf16.mxu0 %v11637_v25  ;;  %v10502_v41 = vld [vmem:[#allocation5 + $0xe8] ss:$36 sps:$4 sm:$0xff]  }
 0x1a7   : > { %3300 = vmatprep.mubr.bf16.mxu1 %v11537_v42  ;;  %v10508_v42 = vld [vmem:[#allocation5 + $0x134] ss:$36 sps:$4 sm:$0xff]  }
 0x1a9   : > { %v11645_v2 = vpop.f32.mrb[32].mxu1 }
 0x1aa   : > { %v11647_v29 = vpop.f32.mrb[33].mxu1 }
 0x1ab   : > { %v11652_v4 = vpop.f32.mrb[34].mxu1 }
 0x1ac   : > { %v11654_v33 = vpop.f32.mrb[35].mxu1 }
 0x1ad   : > { %2655 = vmatmul.mubr.bf16.gmra.mrb[124].mxu0 %v11650_v31 }
 0x1ae   : > { %3301 = vmatmul.mubr.bf16.gmra.mrb[140].mxu1 %v11548_v44  ;;  %2697 = vmatprep.mubr.bf16.mxu0 %v14322_v0  ;;  %v11683_v44 = vld [vmem:[%s11320_s8 + $0x38] ss:$12 sps:$4 sm:$0xff]  }
 0x1af   : > { %3310 = vmatprep.mubr.bf16.mxu1 %v11553_v46  ;;  %v10506_v46 = vld [vmem:[#allocation5 + $0x130] ss:$36 sps:$4 sm:$0xff]  }
 0x1b1   : > { %v11660_v6 = vpop.f32.mrb[36].mxu1 }
 0x1b2   : > { %v11662_v34 = vpop.f32.mrb[37].mxu1 }
 0x1b3   : > { %v11667_v10 = vpop.f32.mrb[38].mxu1 }
 0x1b4   : > { %v11669_v36 = vpop.f32.mrb[39].mxu1 }
 0x1b5   : > { %2698 = vmatmul.mubr.bf16.vlgmr.msra.gmra.mrb[0].mxu0 %v11665_v8 }
 0x1b6   : > { %3311 = vmatmul.mubr.bf16.gmra.mrb[144].mxu1 %v11564_v50  ;;  %3725 = vmatpush1.bf16.msra.mxu0 %v10486_v35  ;;  %v10515_v50 = vld [vmem:[#allocation5 + $0x17c] ss:$36 sps:$4 sm:$0xff]  }
 0x1b7   : > { %2707 = vmatprep.mubr.bf16.mxu0 %v14322_v0  ;;  %3320 = vmatprep.mubr.bf16.mxu1 %v11569_v52  ;;  %v10513_v52 = vld [vmem:[#allocation5 + $0x178] ss:$36 sps:$4 sm:$0xff]   ;;  %v10521_v35 = vld [vmem:[#allocation5 + $0x1c0] ss:$36 sps:$4 sm:$0xff]  }
 0x1b8   : > { %3726 = vmatprep.subr.bf16.mxu0 %v10492_v37  ;;  %v10527_v37 = vld [vmem:[#allocation5 + $0x20c] ss:$36 sps:$4 sm:$0xff]  }
 0x1ba   : > { %3727 = vmatpush1.bf16.msra.mxu0 %v10490_v12  ;;  %v11697_v12 = vld [vmem:[%s11320_s8 + $0x68] ss:$12 sps:$4 sm:$0xff]  }
 0x1bb   : > { %3728 = vmatprep.subr.bf16.mxu0 %v10499_v14  ;;  %v10533_v14 = vld [vmem:[#allocation5 + $0x250] ss:$36 sps:$4 sm:$0xff]  }
 0x1bd   : > { %2708 = vmatmul.mubr.bf16.gmra.mrb[4].mxu0 %v11676_v16 }
 0x1be   : > { %3321 = vmatmul.mubr.bf16.gmra.mrb[148].mxu1 %v11580_v56  ;;  %2717 = vmatprep.mubr.bf16.mxu0 %v14322_v0  ;;  %v10523_v56 = vld [vmem:[#allocation5 + $0x1c4] ss:$36 sps:$4 sm:$0xff]  }
 0x1bf   : > { %3330 = vmatprep.mubr.bf16.mxu1 %v11585_v58  ;;  %3729 = vmatpush1.bf16.msra.mxu0 %v10497_v39  ;;  %v11690_v58 = vld [vmem:[%s11320_s8 + $0x50] ss:$12 sps:$4 sm:$0xff]  }
 0x1c0   : > { %3730 = vmatprep.subr.bf16.mxu0 %v10504_v20  ;;  %v10542_v39 = vld [vmem:[#allocation5 + $0x29c] ss:$36 sps:$4 sm:$0xff]  }
 0x1c1   : > { %v11704_v20 = vld [vmem:[%s11320_s8 + $0x80] ss:$12 sps:$4 sm:$0xff]  }
 0x1c3   : > { %3731 = vmatpush1.bf16.msra.mxu0 %v10502_v41  ;;  %v10544_v41 = vld [vmem:[#allocation5 + $0x2e0] ss:$36 sps:$4 sm:$0xff]  }
 0x1c4   : > { %3732 = vmatprep.subr.bf16.mxu0 %v10508_v42  ;;  %v10554_v42 = vld [vmem:[#allocation5 + $0x32c] ss:$36 sps:$4 sm:$0xff]  }
 0x1c5   : > { %2718 = vmatmul.mubr.bf16.gmra.mrb[8].mxu0 %v11683_v44 }
 0x1c6   : > { %3331 = vmatmul.mubr.bf16.gmra.mrb[152].mxu1 %v11596_v62  ;;  %2727 = vmatprep.mubr.bf16.mxu0 %v14322_v0  ;;  %v10525_v62 = vld [vmem:[#allocation5 + $0x208] ss:$36 sps:$4 sm:$0xff]  }
 0x1c7   : > { %3340 = vmatprep.mubr.bf16.mxu1 %v11601_v1  ;;  %3733 = vmatpush1.bf16.msra.mxu0 %v10506_v46  ;;  %v10535_v1 = vld [vmem:[#allocation5 + $0x254] ss:$36 sps:$4 sm:$0xff]  }
 0x1c8   : > { %3734 = vmatprep.subr.bf16.mxu0 %v10515_v50  ;;  %v11711_v46 = vld [vmem:[%s11320_s8 + $0x98] ss:$12 sps:$4 sm:$0xff]  }
 0x1c9   : > { %v10510_v50 = vld [vmem:[#allocation5 + $0x18] ss:$36 sps:$4 sm:$0xff]  }
 0x1cb   : > { %3735 = vmatpush1.bf16.msra.mxu0 %v10513_v52  ;;  %v10520_v52 = vld [vmem:[#allocation5 + $0x64] ss:$36 sps:$4 sm:$0xff]  }
 0x1cc   : > { %3736 = vmatprep.subr.bf16.mxu0 %v10523_v56  ;;  %v10559_v56 = vld [vmem:[#allocation5 + $0x370] ss:$36 sps:$4 sm:$0xff]  }
 0x1cd   : > { %2728 = vmatmul.mubr.bf16.gmra.mrb[12].mxu0 %v11690_v58 }
 0x1ce   : > { %3341 = vmatmul.mubr.bf16.gmra.mrb[156].mxu1 %v11614_v9  ;;  %2737 = vmatprep.mubr.bf16.mxu0 %v14322_v0  ;;  %v10540_v9 = vld [vmem:[#allocation5 + $0x298] ss:$36 sps:$4 sm:$0xff]  }
 0x1cf   : > { %3350 = vmatprep.mubr.bf16.mxu1 %v11619_v13  ;;  %3737 = vmatpush1.bf16.msra.mxu0 %v10521_v35  ;;  %v10546_v13 = vld [vmem:[#allocation5 + $0x2e4] ss:$36 sps:$4 sm:$0xff]  }
 0x1d0   : > { %3738 = vmatprep.subr.bf16.mxu0 %v10527_v37  ;;  %v10518_v35 = vld [vmem:[#allocation5 + $0x60] ss:$36 sps:$4 sm:$0xff]   ;;  %v10531_v37 = vld [vmem:[#allocation5 + $0xac] ss:$36 sps:$4 sm:$0xff]  }
 0x1d3   : > { %3739 = vmatpush1.bf16.msra.mxu0 %v10525_v62  ;;  %v10563_v62 = vld [vmem:[#allocation5 + $0x3b8] ss:$36 sps:$4 sm:$0xff]  }
 0x1d4   : > { %3740 = vmatprep.subr.bf16.mxu0 %v10535_v1  ;;  %v11718_v1 = vld [vmem:[%s11320_s8 + $0xb0] ss:$12 sps:$4 sm:$0xff]  }
 0x1d5   : > { %2738 = vmatmul.mubr.bf16.gmra.mrb[16].mxu0 %v11697_v12 }
 0x1d6   : > { %3351 = vmatmul.mubr.bf16.gmra.mrb[160].mxu1 %v11632_v21  ;;  %2747 = vmatprep.mubr.bf16.mxu0 %v14322_v0  ;;  %v10552_v21 = vld [vmem:[#allocation5 + $0x328] ss:$36 sps:$4 sm:$0xff]  }
 0x1d7   : > { %3360 = vmatprep.mubr.bf16.mxu1 %v11637_v25  ;;  %3741 = vmatpush1.bf16.msra.mxu0 %v10533_v14  ;;  %v10561_v25 = vld [vmem:[#allocation5 + $0x374] ss:$36 sps:$4 sm:$0xff]   ;;  %v10529_v14 = vld [vmem:[#allocation5 + $0xa8] ss:$36 sps:$4 sm:$0xff]  }
 0x1d8   : > { %3742 = vmatprep.subr.bf16.mxu0 %v10542_v39  ;;  %v10573_v39 = vld [vmem:[#allocation5 + $0x404] ss:$36 sps:$4 sm:$0xff]  }
 0x1db   : > { %3743 = vmatpush1.bf16.msra.mxu0 %v10540_v9  ;;  %v10571_v9 = vld [vmem:[#allocation5 + $0x400] ss:$36 sps:$4 sm:$0xff]  }
 0x1dc   : > { %3744 = vmatprep.subr.bf16.mxu0 %v10546_v13  ;;  %v10580_v13 = vld [vmem:[#allocation5 + $0x44c] ss:$36 sps:$4 sm:$0xff]  }
 0x1dd   : > { %2748 = vmatmul.mubr.bf16.gmra.mrb[20].mxu0 %v11704_v20 }
 0x1de   : > { %3361 = vmatmul.mubr.bf16.gmra.mrb[164].mxu1 %v11650_v31  ;;  %2757 = vmatprep.mubr.bf16.mxu0 %v14322_v0  ;;  %v10565_v31 = vld [vmem:[#allocation5 + $0x3bc] ss:$36 sps:$4 sm:$0xff]  }
 0x1df   : > { %3403 = vmatprep.mubr.bf16.mxu1 %v14322_v0  ;;  %3745 = vmatpush1.bf16.msra.mxu0 %v10544_v41  ;;  %v10537_v41 = vld [vmem:[#allocation5 + $0xf0] ss:$36 sps:$4 sm:$0xff]  }
 0x1e0   : > { %3746 = vmatprep.subr.bf16.mxu0 %v10554_v42  ;;  %v10550_v42 = vld [vmem:[#allocation5 + $0x13c] ss:$36 sps:$4 sm:$0xff]  }
 0x1e3   : > { %3747 = vmatpush1.bf16.msra.mxu0 %v10552_v21  ;;  %v10578_v21 = vld [vmem:[#allocation5 + $0x448] ss:$36 sps:$4 sm:$0xff]  }
 0x1e4   : > { %3748 = vmatprep.subr.bf16.mxu0 %v10561_v25  ;;  %v11725_v25 = vld [vmem:[%s11320_s8 + $0xc8] ss:$12 sps:$4 sm:$0xff]  }
 0x1e5   : > { %2758 = vmatmul.mubr.bf16.gmra.mrb[24].mxu0 %v11711_v46 }
 0x1e6   : > { %3404 = vmatmul.mubr.bf16.vlgmr.msra.gmra.mrb[40].mxu1 %v11665_v8  ;;  %2767 = vmatprep.mubr.bf16.mxu0 %v14322_v0  ;;  %v10539_v8 = vld [vmem:[#allocation5 + $0xf4] ss:$36 sps:$4 sm:$0xff]  }
 0x1e7   : > { %4431 = vmatpush1.bf16.msra.mxu1 %v10510_v50  ;;  %3413 = vmatprep.mubr.bf16.mxu1 %v14322_v0  ;;  %v10548_v50 = vld [vmem:[#allocation5 + $0x138] ss:$36 sps:$4 sm:$0xff]  }
 0x1e8   : > { %4432 = vmatprep.subr.bf16.mxu1 %v10520_v52  ;;  %3749 = vmatpush1.bf16.msra.mxu0 %v10559_v56  ;;  %v10584_v52 = vld [vmem:[#allocation5 + $0x494] ss:$36 sps:$4 sm:$0xff]   ;;  %v10556_v56 = vld [vmem:[#allocation5 + $0x180] ss:$36 sps:$4 sm:$0xff]  }
 0x1e9   : > { %3750 = vmatprep.subr.bf16.mxu0 %v10565_v31  ;;  %v10569_v31 = vld [vmem:[#allocation5 + $0x1cc] ss:$36 sps:$4 sm:$0xff]  }
 0x1eb   : > { %4433 = vmatpush1.bf16.msra.mxu1 %v10518_v35  ;;  %v10524_v35 = vld [vmem:[%s11320_s8 + $0xe0] ss:$12 sps:$4 sm:$0xff]  }
 0x1ec   : > { %4434 = vmatprep.subr.bf16.mxu1 %v10531_v37  ;;  %3751 = vmatpush1.bf16.msra.mxu0 %v10563_v62  ;;  %v10567_v37 = vld [vmem:[#allocation5 + $0x1c8] ss:$36 sps:$4 sm:$0xff]   ;;  %v10577_v62 = vld [vmem:[#allocation5 + $0x214] ss:$36 sps:$4 sm:$0xff]  }
 0x1ed   : > { %2768 = vmatmul.mubr.bf16.gmra.mrb[28].mxu0 %v11718_v1  ;;  %3752 = vmatprep.subr.bf16.mxu0 %v10573_v39  ;;  %v10528_v39 = vld [vmem:[%s11320_s8 + $0xf8] ss:$12 sps:$4 sm:$0xff]  }
 0x1ee   : > { %3414 = vmatmul.mubr.bf16.gmra.mrb[44].mxu1 %v11676_v16  ;;  %2777 = vmatprep.mubr.bf16.mxu0 %v14322_v0  ;;  %v10558_v16 = vld [vmem:[#allocation5 + $0x184] ss:$36 sps:$4 sm:$0xff]  }
 0x1ef   : > { %3423 = vmatprep.mubr.bf16.mxu1 %v14322_v0  ;;  %4435 = vmatpush1.bf16.msra.mxu1 %v10529_v14  ;;  %v10587_v14 = vld [vmem:[#allocation5 + $0x25c] ss:$36 sps:$4 sm:$0xff]  }
 0x1f0   : > { %4436 = vmatprep.subr.bf16.mxu1 %v10539_v8  ;;  %3753 = vmatpush1.bf16.msra.mxu0 %v10571_v9  ;;  %v10585_v8 = vld [vmem:[#allocation5 + $0x258] ss:$36 sps:$4 sm:$0xff]   ;;  %v10590_v9 = vld [vmem:[#allocation5 + $0x2a4] ss:$36 sps:$4 sm:$0xff]  }
 0x1f1   : > { %3754 = vmatprep.subr.bf16.mxu0 %v10580_v13  ;;  %v11740_v13 = vld [vmem:[%s11320_s8 + $0x110] ss:$12 sps:$4 sm:$0xff]  }
 0x1f3   : > { %4437 = vmatpush1.bf16.msra.mxu1 %v10537_v41  ;;  %v10596_v41 = vld [vmem:[#allocation5 + $0x2ec] ss:$36 sps:$4 sm:$0xff]  }
 0x1f4   : > { %4438 = vmatprep.subr.bf16.mxu1 %v10550_v42  ;;  %3755 = vmatpush1.bf16.msra.mxu0 %v10578_v21  ;;  %v10594_v42 = vld [vmem:[#allocation5 + $0x2e8] ss:$36 sps:$4 sm:$0xff]   ;;  %v10597_v21 = vld [vmem:[#allocation5 + $0x330] ss:$36 sps:$4 sm:$0xff]  }
 0x1f5   : > { %2778 = vmatmul.mubr.bf16.gmra.mrb[32].mxu0 %v11725_v25  ;;  %4077 = vmatprep.subr.bf16.mxu0 %v10584_v52  ;;  %v10603_v52 = vld [vmem:[#allocation5 + $0x378] ss:$36 sps:$4 sm:$0xff]  }
 0x1f6   : > { %3424 = vmatmul.mubr.bf16.gmra.mrb[48].mxu1 %v11683_v44  ;;  %2787 = vmatprep.mubr.bf16.mxu0 %v14322_v0  ;;  %v10575_v44 = vld [vmem:[#allocation5 + $0x210] ss:$36 sps:$4 sm:$0xff]  }
 0x1f7   : > { %3433 = vmatprep.mubr.bf16.mxu1 %v14322_v0  ;;  %4439 = vmatpush1.bf16.msra.mxu1 %v10548_v50  ;;  %v11754_v50 = vld [vmem:[%s11320_s8 + $0x140] ss:$12 sps:$4 sm:$0xff]  }
 0x1f8   : > { %4440 = vmatprep.subr.bf16.mxu1 %v10558_v16  ;;  %v11768_v16 = vld [vmem:[%s11320_s8 + $0x170] ss:$12 sps:$4 sm:$0xff]  }
 0x1fb   : > { %4441 = vmatpush1.bf16.msra.mxu1 %v10556_v56  ;;  %v651_v56 = vlaneseq }
 0x1fc   : > { %4442 = vmatprep.subr.bf16.mxu1 %v10569_v31 }
 0x1fd   : > { %2788 = vmatmul.mubr.bf16.gmra.mrb[36].mxu0 %v10524_v35  ;;  %v11771_v31 = vshrl.u32 %v651_v56, 7 }
 0x1fe   : > { %3434 = vmatmul.mubr.bf16.gmra.mrb[52].mxu1 %v11690_v58  ;;  %2797 = vmatprep.mubr.bf16.mxu0 %v14322_v0  ;;  %v10588_v58 = vld [vmem:[#allocation5 + $0x2a0] ss:$36 sps:$4 sm:$0xff]  }
 0x1ff   : > { %3443 = vmatprep.mubr.bf16.mxu1 %v14322_v0  ;;  %4443 = vmatpush1.bf16.msra.mxu1 %v10567_v37  ;;  %14335 = vst [vmem:[#allocation15_spill] sm:$0xff] %v11771_v31  ;;  %v653_v37 = vsub.s32 0, %v11771_v31 }
 0x200   : > { %4444 = vmatprep.subr.bf16.mxu1 %v10577_v62  ;;  %v11779_v62 = vld [vmem:[#allocation7] sm:$0xff] }
 0x203   : > { %4445 = vmatpush1.bf16.msra.mxu1 %v10575_v44  ;;  %v657_v44 = vsub.s32 1, %v11771_v31 }
 0x204   : > { %4446 = vmatprep.subr.bf16.mxu1 %v10587_v14 }
 0x205   : > { %2798 = vmatmul.mubr.bf16.gmra.mrb[40].mxu0 %v10528_v39  ;;  %v11787_v14 = vrot.slane %v11779_v62, %v657_v44 }
 0x206   : > { %3444 = vmatmul.mubr.bf16.gmra.mrb[56].mxu1 %v11697_v12  ;;  %2807 = vmatprep.mubr.bf16.mxu0 %v14322_v0  ;;  %v11747_v12 = vld [vmem:[%s11320_s8 + $0x128] ss:$12 sps:$4 sm:$0xff]  }
 0x207   : > { %3453 = vmatprep.mubr.bf16.mxu1 %v14322_v0  ;;  %4447 = vmatpush1.bf16.msra.mxu1 %v10585_v8 }
 0x208   : > { %4448 = vmatprep.subr.bf16.mxu1 %v10590_v9  ;;  %v10606_v9 = vld [vmem:[#allocation5 + $0x3c0] ss:$36 sps:$4 sm:$0xff]  }
 0x20b   : > { %4449 = vmatpush1.bf16.msra.mxu1 %v10588_v58  ;;  %v10608_v58 = vld [vmem:[#allocation5 + $0x3c4] ss:$36 sps:$4 sm:$0xff]  }
 0x20c   : > { %4450 = vmatprep.subr.bf16.mxu1 %v10596_v41 }
 0x20d   : > { %2808 = vmatmul.mubr.bf16.gmra.mrb[44].mxu0 %v11740_v13 }
 0x20e   : > { %3454 = vmatmul.mubr.bf16.gmra.mrb[60].mxu1 %v11704_v20  ;;  %2817 = vmatprep.mubr.bf16.mxu0 %v14322_v0  ;;  %v10599_v20 = vld [vmem:[#allocation5 + $0x334] ss:$36 sps:$4 sm:$0xff]  }
 0x20f   : > { %3463 = vmatprep.mubr.bf16.mxu1 %v14322_v0  ;;  %4451 = vmatpush1.bf16.msra.mxu1 %v10594_v42 }
 0x210   : > { %4452 = vmatprep.subr.bf16.mxu1 %v10599_v20 }
 0x213   : > { %4453 = vmatpush1.bf16.msra.mxu1 %v10597_v21  ;;  %v11793_v21 = vld [vmem:[%s11320_s8 + $0x1a0] ss:$12 sps:$4 sm:$0xff]  }
 0x215   : > { %2818 = vmatmul.mubr.bf16.gmra.mrb[48].mxu0 %v11747_v12 }
 0x216   : > { %3464 = vmatmul.mubr.bf16.gmra.mrb[64].mxu1 %v11711_v46  ;;  %2827 = vmatprep.mubr.bf16.mxu0 %v14322_v0  ;;  %v11761_v46 = vld [vmem:[%s11320_s8 + $0x158] ss:$12 sps:$4 sm:$0xff]  }
 0x217   : > { %3473 = vmatprep.mubr.bf16.mxu1 %v14322_v0 }
 0x21d   : > { %2828 = vmatmul.mubr.bf16.gmra.mrb[52].mxu0 %v11754_v50 }
 0x21e   : > { %3474 = vmatmul.mubr.bf16.gmra.mrb[68].mxu1 %v11718_v1  ;;  %2837 = vmatprep.mubr.bf16.mxu0 %v14322_v0  ;;  %v10605_v1 = vld [vmem:[#allocation5 + $0x37c] ss:$36 sps:$4 sm:$0xff]  }
 0x21f   : > { %3483 = vmatprep.mubr.bf16.mxu1 %v14322_v0  ;;  %4454 = vmatprep.subr.bf16.mxu1 %v10605_v1 }
 0x220   : > { %4455 = vmatpush1.bf16.msra.mxu1 %v10603_v52 }
 0x221   : > { %4456 = vmatprep.subr.bf16.mxu1 %v10608_v58 }
 0x224   : > { %4457 = vmatpush1.bf16.msra.mxu1 %v10606_v9 }
 0x225   : > { %2838 = vmatmul.mubr.bf16.gmra.mrb[56].mxu0 %v11761_v46 }
 0x226   : > { %3484 = vmatmul.mubr.bf16.gmra.mrb[72].mxu1 %v11725_v25  ;;  %2847 = vmatprep.mubr.bf16.mxu0 %v14322_v0  ;;  %v11776_v25 = vld [vmem:[%s11320_s8 + $0x188] ss:$12 sps:$4 sm:$0xff]  }
 0x227   : > { %3493 = vmatprep.mubr.bf16.mxu1 %v14322_v0 }
 0x22d   : > { %2848 = vmatmul.mubr.bf16.gmra.mrb[60].mxu0 %v11768_v16 }
 0x22e   : > { %3494 = vmatmul.mubr.bf16.gmra.mrb[76].mxu1 %v10524_v35  ;;  %2857 = vmatprep.mubr.bf16.mxu0 %v14322_v0  ;;  %v11784_v35 = vrot.slane %v11779_v62, %v653_v37 }
 0x22f   : > { %3503 = vmatprep.mubr.bf16.mxu1 %v14322_v0 }
 0x235   : > { %2858 = vmatmul.mubr.bf16.gmra.mrb[64].mxu0 %v11776_v25 }
 0x236   : > { %3504 = vmatmul.mubr.bf16.gmra.mrb[80].mxu1 %v10528_v39  ;;  %2867 = vmatprep.mubr.bf16.mxu0 %v14322_v0 }
 0x237   : > { %3513 = vmatprep.mubr.bf16.mxu1 %v14322_v0 }
 0x238   : > { %v2566_v8 = vpop.f32.mrb[88].mxu0 }
 0x239   : > { %v2567_v41 = vadd.f32 %v2566_v8, %v11784_v35  ;;  %v2568_v42 = vpop.f32.mrb[89].mxu0 }
 0x23a   : > { %v2569_v39 = vadd.f32 %v2568_v42, %v11787_v14  ;;  %v2570_v20 = vpop.f32.mrb[90].mxu0 }
 0x23b   : > { %v2920_v52 = vadd.f32 %v11511_v38, %v2567_v41  ;;  %v2571_v56 = vadd.f32 %v2570_v20, %v11784_v35  ;;  %v2572_v1 = vpop.f32.mrb[91].mxu0  ;;  %v11813_v41 = vld [vmem:[%s11320_s8 + $0x1b8] ss:$12 sps:$4 sm:$0xff]  }
 0x23c   : > { %v2922_v37 = vadd.f32 %v11513_v18, %v2569_v39  ;;  %v2573_v44 = vadd.f32 %v2572_v1, %v11787_v14 }
 0x23d   : > { %v2924_v8 = vadd.f32 %v11518_v40, %v2571_v56  ;;  %2868 = vmatmul.mubr.bf16.gmra.mrb[68].mxu0 %v11793_v21 }
 0x23e   : > { %3514 = vmatmul.mubr.bf16.gmra.mrb[84].mxu1 %v11740_v13  ;;  %v8743_v42 = vpack.c.bf16 %v2922_v37, %v2920_v52  ;;  %v2926_v58 = vadd.f32 %v11523_v22, %v2573_v44  ;;  %2877 = vmatprep.mubr.bf16.mxu0 %v14322_v0 }
 0x23f   : > { %3523 = vmatprep.mubr.bf16.mxu1 %v14322_v0 }
 0x240   : > { %6442 = vst [vmem:[%s11808_s23 + $0x210] sm:$0xff] %v8743_v42  ;;  %v8745_v38 = vpack.c.bf16 %v2926_v58, %v2924_v8  ;;  %v2576_v18 = vpop.f32.mrb[92].mxu0 }
 0x241   : > { %v2577_v40 = vadd.f32 %v2576_v18, %v11784_v35  ;;  %v2578_v9 = vpop.f32.mrb[93].mxu0  ;;  %v10614_v18 = vld [vmem:[#allocation5 + $0x40c] ss:$36 sps:$4 sm:$0xff]  }
 0x242   : > { %6444 = vst [vmem:[%s11808_s23 + $0x21c] sm:$0xff] %v8745_v38  ;;  %v2579_v22 = vadd.f32 %v2578_v9, %v11787_v14  ;;  %v2580_v13 = vpop.f32.mrb[94].mxu0  ;;  %4458 = vmatprep.subr.bf16.mxu1 %v10614_v18 }
 0x243   : > { %v2930_v39 = vadd.f32 %v11527_v24, %v2577_v40  ;;  %v2581_v20 = vadd.f32 %v2580_v13, %v11784_v35  ;;  %v2582_v52 = vpop.f32.mrb[95].mxu0 }
 0x244   : > { %v2932_v56 = vadd.f32 %v11529_v26, %v2579_v22  ;;  %v2583_v1 = vadd.f32 %v2582_v52, %v11787_v14  ;;  %v11829_v26 = vld [vmem:[%s11320_s8 + $0x1d0] ss:$12 sps:$4 sm:$0xff]  }
 0x245   : > { %v2934_v37 = vadd.f32 %v11534_v28, %v2581_v20  ;;  %2878 = vmatmul.mubr.bf16.gmra.mrb[72].mxu0 %v11813_v41  ;;  %v10612_v28 = vld [vmem:[#allocation5 + $0x408] ss:$36 sps:$4 sm:$0xff]  }
 0x246   : > { %3524 = vmatmul.mubr.bf16.gmra.mrb[88].mxu1 %v11747_v12  ;;  %v8747_v44 = vpack.c.bf16 %v2932_v56, %v2930_v39  ;;  %v2936_v8 = vadd.f32 %v11539_v43, %v2583_v1  ;;  %2887 = vmatprep.mubr.bf16.mxu0 %v14322_v0 }
 0x247   : > { %3533 = vmatprep.mubr.bf16.mxu1 %v14322_v0  ;;  %4459 = vmatpush1.bf16.msra.mxu1 %v10612_v28 }
 0x248   : > { %6446 = vst [vmem:[%s11808_s23 + $0x228] sm:$0xff] %v8747_v44  ;;  %v8749_v24 = vpack.c.bf16 %v2936_v8, %v2934_v37  ;;  %v2586_v42 = vpop.f32.mrb[96].mxu0  ;;  %v11847_v44 = vld [vmem:[%s11320_s8 + $0x1e8] ss:$12 sps:$4 sm:$0xff]  }
 0x249   : > { %v2587_v58 = vadd.f32 %v2586_v42, %v11784_v35  ;;  %v2588_v38 = vpop.f32.mrb[97].mxu0 }
 0x24a   : > { %6448 = vst [vmem:[%s11808_s23 + $0x234] sm:$0xff] %v8749_v24  ;;  %v2589_v12 = vadd.f32 %v2588_v38, %v11787_v14  ;;  %v2590_v40 = vpop.f32.mrb[98].mxu0 }
 0x24b   : > { %v2940_v43 = vadd.f32 %v11543_v30, %v2587_v58  ;;  %v2591_v9 = vadd.f32 %v2590_v40, %v11784_v35  ;;  %v2592_v22 = vpop.f32.mrb[99].mxu0  ;;  %v10617_v40 = vld [vmem:[#allocation5 + $0x454] ss:$36 sps:$4 sm:$0xff]  }
 0x24c   : > { %v2942_v13 = vadd.f32 %v11545_v32, %v2589_v12  ;;  %v2593_v39 = vadd.f32 %v2592_v22, %v11787_v14  ;;  %v10615_v12 = vld [vmem:[#allocation5 + $0x450] ss:$36 sps:$4 sm:$0xff]   ;;  %4460 = vmatprep.subr.bf16.mxu1 %v10617_v40 }
 0x24d   : > { %v2944_v20 = vadd.f32 %v11550_v45, %v2591_v9  ;;  %2888 = vmatmul.mubr.bf16.gmra.mrb[76].mxu0 %v11829_v26  ;;  %4461 = vmatpush1.bf16.msra.mxu1 %v10615_v12 }
 0x24e   : > { %3534 = vmatmul.mubr.bf16.gmra.mrb[92].mxu1 %v11754_v50  ;;  %v8751_v52 = vpack.c.bf16 %v2942_v13, %v2940_v43  ;;  %v2946_v30 = vadd.f32 %v11555_v47, %v2593_v39  ;;  %2897 = vmatprep.mubr.bf16.mxu0 %v14322_v0 }
 0x24f   : > { %3543 = vmatprep.mubr.bf16.mxu1 %v14322_v0 }
 0x250   : > { %6450 = vst [vmem:[%s11808_s23 + $0x240] sm:$0xff] %v8751_v52  ;;  %v8753_v56 = vpack.c.bf16 %v2946_v30, %v2944_v20  ;;  %v2596_v32 = vpop.f32.mrb[100].mxu0 }
 0x251   : > { %v2597_v1 = vadd.f32 %v2596_v32, %v11784_v35  ;;  %v2598_v37 = vpop.f32.mrb[101].mxu0 }
 0x252   : > { %6452 = vst [vmem:[%s11808_s23 + $0x24c] sm:$0xff] %v8753_v56  ;;  %v2599_v45 = vadd.f32 %v2598_v37, %v11787_v14  ;;  %v2600_v50 = vpop.f32.mrb[102].mxu0 }
 0x253   : > { %v2950_v8 = vadd.f32 %v11559_v48, %v2597_v1  ;;  %v2601_v47 = vadd.f32 %v2600_v50, %v11784_v35  ;;  %v2602_v24 = vpop.f32.mrb[103].mxu0  ;;  %v10582_v50 = vld [vmem:[#allocation5 + $0x490] ss:$36 sps:$4 sm:$0xff]  }
 0x254   : > { %v2952_v42 = vadd.f32 %v11561_v49, %v2599_v45  ;;  %v2603_v58 = vadd.f32 %v2602_v24, %v11787_v14  ;;  %v10593_v24 = vld [vmem:[#allocation5 + $0x4dc] ss:$36 sps:$4 sm:$0xff]  }
 0x255   : > { %v2954_v38 = vadd.f32 %v11566_v51, %v2601_v47  ;;  %2898 = vmatmul.mubr.bf16.gmra.mrb[80].mxu0 %v11847_v44  ;;  %v11864_v51 = vld [vmem:[%s11320_s8 + $0x200] ss:$12 sps:$4 sm:$0xff]  }
 0x256   : > { %3544 = vmatmul.mubr.bf16.gmra.mrb[96].mxu1 %v11761_v46  ;;  %v8755_v28 = vpack.c.bf16 %v2952_v42, %v2950_v8  ;;  %v2956_v18 = vadd.f32 %v11571_v53, %v2603_v58  ;;  %2907 = vmatprep.mubr.bf16.mxu0 %v14322_v0 }
 0x257   : > { %3553 = vmatprep.mubr.bf16.mxu1 %v14322_v0 }
 0x258   : > { %6454 = vst [vmem:[%s11808_s23 + $0x258] sm:$0xff] %v8755_v28  ;;  %v8757_v48 = vpack.c.bf16 %v2956_v18, %v2954_v38  ;;  %v2606_v49 = vpop.f32.mrb[104].mxu0  ;;  %v11892_v28 = vld [vmem:[%s11320_s8] ss:$12 sps:$4 sm:$0xff]  }
 0x259   : > { %v2607_v43 = vadd.f32 %v2606_v49, %v11784_v35  ;;  %v2608_v9 = vpop.f32.mrb[105].mxu0  ;;  %v11898_v49 = vld [vmem:[%s11320_s8 + $0x1c] ss:$12 sps:$4 sm:$0xff]  }
 0x25a   : > { %6456 = vst [vmem:[%s11808_s23 + $0x264] sm:$0xff] %v8757_v48  ;;  %v2609_v46 = vadd.f32 %v2608_v9, %v11787_v14  ;;  %v2610_v22 = vpop.f32.mrb[106].mxu0  ;;  %v10591_v48 = vld [vmem:[#allocation5 + $0x4d8] ss:$36 sps:$4 sm:$0xff]  }
 0x25b   : > { %v2960_v53 = vadd.f32 %v11575_v54, %v2607_v43  ;;  %v2611_v13 = vadd.f32 %v2610_v22, %v11784_v35  ;;  %v2612_v39 = vpop.f32.mrb[107].mxu0  ;;  %v11878_v54 = vld [vmem:[%s11320_s8 + $0x4] ss:$12 sps:$4 sm:$0xff]   ;;  %v10623_v43 = vld [vmem:[#allocation5 + $0x49c] ss:$36 sps:$4 sm:$0xff]  }
 0x25c   : > { %v2962_v20 = vadd.f32 %v11577_v55, %v2609_v46  ;;  %v2613_v52 = vadd.f32 %v2612_v39, %v11787_v14  ;;  %4783 = vmatprep.subr.bf16.mxu1 %v10623_v43 }
 0x25d   : > { %v2964_v30 = vadd.f32 %v11582_v57, %v2611_v13  ;;  %2908 = vmatmul.mubr.bf16.gmra.mrb[84].mxu0 %v11864_v51  ;;  %v10600_v13 = vld [vmem:[#allocation5 + $0x520] ss:$36 sps:$4 sm:$0xff]  }
 0x25e   : > { %3554 = vmatmul.mubr.bf16.gmra.mrb[100].mxu1 %v11768_v16  ;;  %v8759_v56 = vpack.c.bf16 %v2962_v20, %v2960_v53  ;;  %v2966_v32 = vadd.f32 %v11587_v59, %v2613_v52  ;;  %3756 = vmatprep.mubr.bf16.mxu0 %v11878_v54  ;;  %v10611_v52 = vld [vmem:[#allocation5 + $0x56c] ss:$36 sps:$4 sm:$0xff]  }
 0x25f   : > { %3563 = vmatprep.mubr.bf16.mxu1 %v14322_v0 }
 0x260   : > { %6458 = vst [vmem:[%s11808_s23 + $0x270] sm:$0xff] %v8759_v56  ;;  %v8761_v1 = vpack.c.bf16 %v2966_v32, %v2964_v30  ;;  %v2616_v55 = vpop.f32.mrb[108].mxu0  ;;  %v11912_v56 = vld [vmem:[%s11320_s8 + $0x18] ss:$12 sps:$4 sm:$0xff]  }
 0x261   : > { %v2617_v37 = vadd.f32 %v2616_v55, %v11784_v35  ;;  %v2618_v57 = vpop.f32.mrb[109].mxu0 }
 0x262   : > { %6460 = vst [vmem:[%s11808_s23 + $0x27c] sm:$0xff] %v8761_v1  ;;  %v2619_v45 = vadd.f32 %v2618_v57, %v11787_v14  ;;  %v2620_v16 = vpop.f32.mrb[110].mxu0  ;;  %v11918_v1 = vld [vmem:[%s11320_s8 + $0x34] ss:$12 sps:$4 sm:$0xff]  }
 0x263   : > { %v2970_v59 = vadd.f32 %v11591_v60, %v2617_v37  ;;  %v2621_v8 = vadd.f32 %v2620_v16, %v11784_v35  ;;  %v2622_v47 = vpop.f32.mrb[111].mxu0 }
 0x264   : > { %v2972_v42 = vadd.f32 %v11593_v61, %v2619_v45  ;;  %v2623_v58 = vadd.f32 %v2622_v47, %v11787_v14  ;;  %v10602_v61 = vld [vmem:[#allocation5 + $0x524] ss:$36 sps:$4 sm:$0xff]  }
 0x265   : > { %v2974_v38 = vadd.f32 %v11598_v63, %v2621_v8  ;;  %3757 = vmatmul.mubr.bf16.vlgmr.msra.gmra.mrb[128].mxu0 %v11892_v28  ;;  %v10618_v8 = vld [vmem:[#allocation5 + $0x5b0] ss:$36 sps:$4 sm:$0xff]  }
 0x266   : > { %3564 = vmatmul.mubr.bf16.gmra.mrb[104].mxu1 %v11776_v25  ;;  %v8763_v18 = vpack.c.bf16 %v2972_v42, %v2970_v59  ;;  %v2976_v60 = vadd.f32 %v11603_v3, %v2623_v58  ;;  %4078 = vmatpush1.bf16.msra.mxu0 %v10582_v50  ;;  %v11932_v58 = vld [vmem:[%s11320_s8 + $0x30] ss:$12 sps:$4 sm:$0xff]  }
 0x267   : > { %3573 = vmatprep.mubr.bf16.mxu1 %v14322_v0  ;;  %3766 = vmatprep.mubr.bf16.mxu0 %v11898_v49 }
 0x268   : > { %4079 = vmatprep.subr.bf16.mxu0 %v10593_v24  ;;  %6462 = vst [vmem:[%s11808_s23 + $0x288] sm:$0xff] %v8763_v18  ;;  %v8765_v63 = vpack.c.bf16 %v2976_v60, %v2974_v38  ;;  %v2626_v25 = vpop.f32.mrb[112].mxu0  ;;  %v11938_v18 = vld [vmem:[%s11320_s8 + $0x4c] ss:$12 sps:$4 sm:$0xff]  }
 0x269   : > { %v2627_v12 = vadd.f32 %v2626_v25, %v11784_v35  ;;  %v2628_v40 = vpop.f32.mrb[113].mxu0 }
 0x26a   : > { %6464 = vst [vmem:[%s11808_s23 + $0x294] sm:$0xff] %v8765_v63  ;;  %v2629_v3 = vadd.f32 %v2628_v40, %v11787_v14  ;;  %v2630_v9 = vpop.f32.mrb[114].mxu0  ;;  %4080 = vmatpush1.bf16.msra.mxu0 %v10591_v48 }
 0x26b   : > { %v2980_v46 = vadd.f32 %v11609_v5, %v2627_v12  ;;  %v2631_v22 = vadd.f32 %v2630_v9, %v11784_v35  ;;  %v2632_v53 = vpop.f32.mrb[115].mxu0  ;;  %4081 = vmatprep.subr.bf16.mxu0 %v10602_v61 }
 0x26c   : > { %v2982_v39 = vadd.f32 %v11611_v7, %v2629_v3  ;;  %v2633_v20 = vadd.f32 %v2632_v53, %v11787_v14  ;;  %v10609_v7 = vld [vmem:[#allocation5 + $0x568] ss:$36 sps:$4 sm:$0xff]  }
 0x26d   : > { %v2984_v30 = vadd.f32 %v11616_v11, %v2631_v22  ;;  %3767 = vmatmul.mubr.bf16.gmra.mrb[132].mxu0 %v11912_v56  ;;  %v11952_v3 = vld [vmem:[%s11320_s8 + $0x48] ss:$12 sps:$4 sm:$0xff]  }
 0x26e   : > { %3574 = vmatmul.mubr.bf16.gmra.mrb[108].mxu1 %v11793_v21  ;;  %v8767_v5 = vpack.c.bf16 %v2982_v39, %v2980_v46  ;;  %v2986_v32 = vadd.f32 %v11621_v15, %v2633_v20  ;;  %3776 = vmatprep.mubr.bf16.mxu0 %v11918_v1  ;;  %v10620_v21 = vld [vmem:[#allocation5 + $0x5b4] ss:$36 sps:$4 sm:$0xff]  }
 0x26f   : > { %3583 = vmatprep.mubr.bf16.mxu1 %v14322_v0  ;;  %4082 = vmatpush1.bf16.msra.mxu0 %v10600_v13 }
 0x270   : > { %6466 = vst [vmem:[%s11808_s23 + $0x2a0] sm:$0xff] %v8767_v5  ;;  %v8769_v11 = vpack.c.bf16 %v2986_v32, %v2984_v30  ;;  %v2636_v55 = vpop.f32.mrb[116].mxu0  ;;  %4083 = vmatprep.subr.bf16.mxu0 %v10611_v52  ;;  %v11972_v32 = vld [vmem:[%s11320_s8 + $0x60] ss:$12 sps:$4 sm:$0xff]  }
 0x271   : > { %v2637_v37 = vadd.f32 %v2636_v55, %v11784_v35  ;;  %v2638_v57 = vpop.f32.mrb[117].mxu0  ;;  %v10624_v55 = vld [vmem:[#allocation5 + $0x5f8] ss:$36 sps:$4 sm:$0xff]  }
 0x272   : > { %6468 = vst [vmem:[%s11808_s23 + $0x2ac] sm:$0xff] %v8769_v11  ;;  %v2639_v15 = vadd.f32 %v2638_v57, %v11787_v14  ;;  %v2640_v45 = vpop.f32.mrb[118].mxu0 }
 0x273   : > { %v2990_v16 = vadd.f32 %v11627_v17, %v2637_v37  ;;  %v2641_v50 = vadd.f32 %v2640_v45, %v11784_v35  ;;  %v2642_v59 = vpop.f32.mrb[119].mxu0  ;;  %4084 = vmatpush1.bf16.msra.mxu0 %v10609_v7 }
 0x274   : > { %v2992_v47 = vadd.f32 %v11629_v19, %v2639_v15  ;;  %v2643_v24 = vadd.f32 %v2642_v59, %v11787_v14  ;;  %4085 = vmatprep.subr.bf16.mxu0 %v10620_v21  ;;  %v11989_v59 = vld [vmem:[%s11320_s8 + $0x78] ss:$12 sps:$4 sm:$0xff]  }
 0x275   : > { %v2994_v42 = vadd.f32 %v11634_v23, %v2641_v50  ;;  %3777 = vmatmul.mubr.bf16.gmra.mrb[136].mxu0 %v11932_v58 }
 0x276   : > { %3584 = vmatmul.mubr.bf16.gmra.mrb[112].mxu1 %v11813_v41  ;;  %v8771_v17 = vpack.c.bf16 %v2992_v47, %v2990_v16  ;;  %v2996_v38 = vadd.f32 %v11639_v27, %v2643_v24  ;;  %3786 = vmatprep.mubr.bf16.mxu0 %v11938_v18  ;;  %v11995_v47 = vld [vmem:[%s11320_s8 + $0x94] ss:$12 sps:$4 sm:$0xff]  }
 0x277   : > { %3593 = vmatprep.mubr.bf16.mxu1 %v14322_v0  ;;  %4086 = vmatpush1.bf16.msra.mxu0 %v10618_v8 }
 0x278   : > { %6470 = vst [vmem:[%s11808_s23 + $0x2b8] sm:$0xff] %v8771_v17  ;;  %v8773_v19 = vpack.c.bf16 %v2996_v38, %v2994_v42  ;;  %v2646_v23 = vpop.f32.mrb[120].mxu0 }
 0x279   : > { %v2647_v41 = vadd.f32 %v2646_v23, %v11784_v35  ;;  %v2648_v60 = vpop.f32.mrb[121].mxu0 }
 0x27a   : > { %6472 = vst [vmem:[%s11808_s23 + $0x2c4] sm:$0xff] %v8773_v19  ;;  %v2649_v48 = vadd.f32 %v2648_v60, %v11787_v14  ;;  %v2650_v27 = vpop.f32.mrb[122].mxu0 }
 0x27b   : > { %v3000_v61 = vadd.f32 %v11645_v2, %v2647_v41  ;;  %v2651_v63 = vadd.f32 %v2650_v27, %v11784_v35  ;;  %v2652_v25 = vpop.f32.mrb[123].mxu0  ;;  %v11958_v2 = vld [vmem:[%s11320_s8 + $0x64] ss:$12 sps:$4 sm:$0xff]  }
 0x27c   : > { %v3002_v12 = vadd.f32 %v11647_v29, %v2649_v48  ;;  %v2653_v40 = vadd.f32 %v2652_v25, %v11787_v14  ;;  %v10691_v48 = vld [vmem:[%s11320_s8 + $0x218] ss:$12 sps:$4 sm:$0xff]   ;;  %v12005_v27 = vld [vmem:[%s11320_s8 + $0x90] ss:$12 sps:$4 sm:$0xff]  }
 0x27d   : > { %v3004_v43 = vadd.f32 %v11652_v4, %v2651_v63  ;;  %3787 = vmatmul.mubr.bf16.gmra.mrb[140].mxu0 %v11952_v3  ;;  %v12011_v63 = vld [vmem:[%s11320_s8 + $0xac] ss:$12 sps:$4 sm:$0xff]  }
 0x27e   : > { %3594 = vmatmul.mubr.bf16.gmra.mrb[116].mxu1 %v11829_v26  ;;  %v8775_v9 = vpack.c.bf16 %v3002_v12, %v3000_v61  ;;  %v3006_v46 = vadd.f32 %v11654_v33, %v2653_v40  ;;  %3796 = vmatprep.mubr.bf16.mxu0 %v11958_v2 }
 0x27f   : > { %3603 = vmatprep.mubr.bf16.mxu1 %v14322_v0 }
 0x280   : > { %6474 = vst [vmem:[%s11808_s23 + $0x2d0] sm:$0xff] %v8775_v9  ;;  %v8777_v29 = vpack.c.bf16 %v3006_v46, %v3004_v43  ;;  %v2656_v22 = vpop.f32.mrb[124].mxu0 }
 0x281   : > { %v2657_v4 = vadd.f32 %v2656_v22, %v11784_v35  ;;  %v2658_v26 = vpop.f32.mrb[125].mxu0 }
 0x282   : > { %6476 = vst [vmem:[%s11808_s23 + $0x2dc] sm:$0xff] %v8777_v29  ;;  %v2659_v53 = vadd.f32 %v2658_v26, %v11787_v14  ;;  %v2660_v13 = vpop.f32.mrb[126].mxu0  ;;  %v10694_v26 = vld [vmem:[%s11320_s8 + $0x230] ss:$12 sps:$4 sm:$0xff]  }
 0x283   : > { %v3010_v33 = vadd.f32 %v11660_v6, %v2657_v4  ;;  %v2661_v39 = vadd.f32 %v2660_v13, %v11784_v35  ;;  %v2662_v20 = vpop.f32.mrb[127].mxu0  ;;  %v11978_v6 = vld [vmem:[%s11320_s8 + $0x7c] ss:$12 sps:$4 sm:$0xff]  }
 0x284   : > { %v3012_v52 = vadd.f32 %v11662_v34, %v2659_v53  ;;  %v2663_v30 = vadd.f32 %v2662_v20, %v11787_v14  ;;  %v12021_v53 = vld [vmem:[%s11320_s8 + $0xa8] ss:$12 sps:$4 sm:$0xff]  }
 0x285   : > { %v3014_v5 = vadd.f32 %v11667_v10, %v2661_v39  ;;  %3797 = vmatmul.mubr.bf16.gmra.mrb[144].mxu0 %v11972_v32 }
 0x286   : > { %3604 = vmatmul.mubr.bf16.gmra.mrb[120].mxu1 %v11847_v44  ;;  %v8779_v7 = vpack.c.bf16 %v3012_v52, %v3010_v33  ;;  %v3016_v11 = vadd.f32 %v11669_v36, %v2663_v30  ;;  %3806 = vmatprep.mubr.bf16.mxu0 %v11978_v6  ;;  %v10626_v44 = vld [vmem:[#allocation5 + $0x5fc] ss:$36 sps:$4 sm:$0xff]   ;;  %v12027_v33 = vld [vmem:[%s11320_s8 + $0xc4] ss:$12 sps:$4 sm:$0xff]  }
 0x287   : > { %3613 = vmatprep.mubr.bf16.mxu1 %v14322_v0  ;;  %4087 = vmatprep.subr.bf16.mxu0 %v10626_v44  ;;  %v12037_v44 = vld [vmem:[%s11320_s8 + $0xc0] ss:$12 sps:$4 sm:$0xff]  }
 0x288   : > { %6478 = vst [vmem:[%s11808_s23 + $0x2e8] sm:$0xff] %v8779_v7  ;;  %v8781_v34 = vpack.c.bf16 %v3016_v11, %v3014_v5  ;;  %v2699_v10 = vpop.f32.mrb[0].mxu0  ;;  %4088 = vmatpush1.bf16.msra.mxu0 %v10624_v55  ;;  %v10697_v55 = vld [vmem:[%s11320_s8 + $0x248] ss:$12 sps:$4 sm:$0xff]  }
 0x289   : > { %v9111_v21 = vadd.f32 %v2699_v10, %v11784_v35  ;;  %v2701_v37 = vpop.f32.mrb[1].mxu0 }
 0x28a   : > { %6480 = vst [vmem:[%s11808_s23 + $0x2f4] sm:$0xff] %v8781_v34  ;;  %v9112_v36 = vadd.f32 %v2701_v37, %v11787_v14  ;;  %v2703_v57 = vpop.f32.mrb[2].mxu0  ;;  %v12043_v37 = vld [vmem:[%s11320_s8 + $0xdc] ss:$12 sps:$4 sm:$0xff]  }
 0x28b   : > { %v9113_v15 = vadd.f32 %v2703_v57, %v11784_v35  ;;  %v2705_v45 = vpop.f32.mrb[3].mxu0  ;;  %v10630_v57 = vld [vmem:[#allocation5 + $0x640] ss:$36 sps:$4 sm:$0xff]  }
 0x28c   : > { %v8655_v16 = vpack.c.bf16 %v9112_v36, %v9111_v21  ;;  %v9114_v50 = vadd.f32 %v2705_v45, %v11787_v14 }
 0x28d   : > { %3807 = vmatmul.mubr.bf16.gmra.mrb[148].mxu0 %v11989_v59 }
 0x28e   : > { %3614 = vmatmul.mubr.bf16.gmra.mrb[124].mxu1 %v11864_v51  ;;  %6354 = vst [vmem:[%s11808_s23] sm:$0xff] %v8655_v16  ;;  %v8657_v8 = vpack.c.bf16 %v9114_v50, %v9113_v15  ;;  %3816 = vmatprep.mubr.bf16.mxu0 %v11995_v47  ;;  %v10632_v15 = vld [vmem:[#allocation5 + $0x644] ss:$36 sps:$4 sm:$0xff]  }
 0x28f   : > { %3623 = vmatprep.mubr.bf16.mxu1 %v14322_v0  ;;  %4089 = vmatprep.subr.bf16.mxu0 %v10632_v15 }
 0x290   : > { %6356 = vst [vmem:[%s11808_s23 + $0xc] sm:$0xff] %v8657_v8  ;;  %v2709_v24 = vpop.f32.mrb[4].mxu0  ;;  %4090 = vmatpush1.bf16.msra.mxu0 %v10630_v57 }
 0x291   : > { %v9115_v51 = vadd.f32 %v2709_v24, %v11784_v35  ;;  %v2711_v42 = vpop.f32.mrb[5].mxu0 }
 0x292   : > { %v9116_v17 = vadd.f32 %v2711_v42, %v11787_v14  ;;  %v2713_v38 = vpop.f32.mrb[6].mxu0 }
 0x293   : > { %v9117_v19 = vadd.f32 %v2713_v38, %v11784_v35  ;;  %v2715_v23 = vpop.f32.mrb[7].mxu0  ;;  %v10700_v38 = vld [vmem:[%s11320_s8 + $0x260] ss:$12 sps:$4 sm:$0xff]  }
 0x294   : > { %v8659_v41 = vpack.c.bf16 %v9116_v17, %v9115_v51  ;;  %v9118_v60 = vadd.f32 %v2715_v23, %v11787_v14 }
 0x295   : > { %3817 = vmatmul.mubr.bf16.gmra.mrb[152].mxu0 %v12005_v27 }
 0x296   : > { %3624 = vmatmul.mubr.bf16.gmra.mrb[128].mxu1 %v10691_v48  ;;  %6358 = vst [vmem:[%s11808_s23 + $0x18] sm:$0xff] %v8659_v41  ;;  %v8661_v61 = vpack.c.bf16 %v9118_v60, %v9117_v19  ;;  %3826 = vmatprep.mubr.bf16.mxu0 %v12011_v63  ;;  %v12053_v19 = vld [vmem:[%s11320_s8 + $0xd8] ss:$12 sps:$4 sm:$0xff]   ;;  %v12059_v41 = vld [vmem:[%s11320_s8 + $0xf4] ss:$12 sps:$4 sm:$0xff]  }
 0x297   : > { %3633 = vmatprep.mubr.bf16.mxu1 %v14322_v0 }
 0x298   : > { %6360 = vst [vmem:[%s11808_s23 + $0x24] sm:$0xff] %v8661_v61  ;;  %v2719_v25 = vpop.f32.mrb[8].mxu0 }
 0x299   : > { %v9119_v12 = vadd.f32 %v2719_v25, %v11784_v35  ;;  %v2721_v40 = vpop.f32.mrb[9].mxu0  ;;  %v661_v25 = vsub.s32 2, %v11771_v31 }
 0x29a   : > { %v9120_v43 = vadd.f32 %v2721_v40, %v11787_v14  ;;  %v2723_v9 = vpop.f32.mrb[10].mxu0 }
 0x29b   : > { %v9121_v46 = vadd.f32 %v2723_v9, %v11784_v35  ;;  %v2725_v29 = vpop.f32.mrb[11].mxu0 }
 0x29c   : > { %v8663_v22 = vpack.c.bf16 %v9120_v43, %v9119_v12  ;;  %v9122_v4 = vadd.f32 %v2725_v29, %v11787_v14 }
 0x29d   : > { %3827 = vmatmul.mubr.bf16.gmra.mrb[156].mxu0 %v12021_v53 }
 0x29e   : > { %3634 = vmatmul.mubr.bf16.gmra.mrb[132].mxu1 %v10694_v26  ;;  %6362 = vst [vmem:[%s11808_s23 + $0x30] sm:$0xff] %v8663_v22  ;;  %v8665_v13 = vpack.c.bf16 %v9122_v4, %v9121_v46  ;;  %3836 = vmatprep.mubr.bf16.mxu0 %v12027_v33  ;;  %v10703_v22 = vld [vmem:[%s11320_s8 + $0x278] ss:$12 sps:$4 sm:$0xff]   ;;  %v12070_v4 = vld [vmem:[%s11320_s8 + $0xf0] ss:$12 sps:$4 sm:$0xff]   ;;  %v12074_v26 = vrot.slane %v11779_v62, %v661_v25 }
 0x29f   : > { %3643 = vmatprep.mubr.bf16.mxu1 %v14322_v0 }
 0x2a0   : > { %6364 = vst [vmem:[%s11808_s23 + $0x3c] sm:$0xff] %v8665_v13  ;;  %v2729_v39 = vpop.f32.mrb[12].mxu0 }
 0x2a1   : > { %v9123_v20 = vadd.f32 %v2729_v39, %v11784_v35  ;;  %v2731_v52 = vpop.f32.mrb[13].mxu0  ;;  %v12079_v39 = vld [vmem:[%s11320_s8 + $0x10c] ss:$12 sps:$4 sm:$0xff]  }
 0x2a2   : > { %v9124_v30 = vadd.f32 %v2731_v52, %v11787_v14  ;;  %v2733_v5 = vpop.f32.mrb[14].mxu0 }
 0x2a3   : > { %v9125_v7 = vadd.f32 %v2733_v5, %v11784_v35  ;;  %v2735_v11 = vpop.f32.mrb[15].mxu0 }
 0x2a4   : > { %v8667_v34 = vpack.c.bf16 %v9124_v30, %v9123_v20  ;;  %v9126_v10 = vadd.f32 %v2735_v11, %v11787_v14 }
 0x2a5   : > { %3837 = vmatmul.mubr.bf16.gmra.mrb[160].mxu0 %v12037_v44 }
 0x2a6   : > { %3644 = vmatmul.mubr.bf16.gmra.mrb[136].mxu1 %v10697_v55  ;;  %6366 = vst [vmem:[%s11808_s23 + $0x48] sm:$0xff] %v8667_v34  ;;  %v8669_v21 = vpack.c.bf16 %v9126_v10, %v9125_v7  ;;  %3846 = vmatprep.mubr.bf16.mxu0 %v12043_v37 }
 0x2a7   : > { %3653 = vmatprep.mubr.bf16.mxu1 %v14322_v0 }
 0x2a8   : > { %6368 = vst [vmem:[%s11808_s23 + $0x54] sm:$0xff] %v8669_v21  ;;  %v2739_v36 = vpop.f32.mrb[16].mxu0 }
 0x2a9   : > { %v9127_v45 = vadd.f32 %v2739_v36, %v11784_v35  ;;  %v2741_v16 = vpop.f32.mrb[17].mxu0 }
 0x2aa   : > { %v9128_v50 = vadd.f32 %v2741_v16, %v11787_v14  ;;  %v2743_v8 = vpop.f32.mrb[18].mxu0 }
 0x2ab   : > { %v9129_v24 = vadd.f32 %v2743_v8, %v11784_v35  ;;  %v2745_v51 = vpop.f32.mrb[19].mxu0  ;;  %v10706_v8 = vld [vmem:[%s11320_s8 + $0x290] ss:$12 sps:$4 sm:$0xff]  }
 0x2ac   : > { %v8671_v42 = vpack.c.bf16 %v9128_v50, %v9127_v45  ;;  %v9130_v17 = vadd.f32 %v2745_v51, %v11787_v14 }
 0x2ad   : > { %3847 = vmatmul.mubr.bf16.gmra.mrb[164].mxu0 %v12053_v19 }
 0x2ae   : > { %3654 = vmatmul.mubr.bf16.gmra.mrb[140].mxu1 %v10700_v38  ;;  %6370 = vst [vmem:[%s11808_s23 + $0x60] sm:$0xff] %v8671_v42  ;;  %v8673_v23 = vpack.c.bf16 %v9130_v17, %v9129_v24  ;;  %3856 = vmatprep.mubr.bf16.mxu0 %v12059_v41  ;;  %v12096_v24 = vld [vmem:[%s11320_s8 + $0x108] ss:$12 sps:$4 sm:$0xff]   ;;  %v12102_v42 = vld [vmem:[%s11320_s8 + $0x124] ss:$12 sps:$4 sm:$0xff]  }
 0x2af   : > { %3663 = vmatprep.mubr.bf16.mxu1 %v14322_v0 }
 0x2b0   : > { %6372 = vst [vmem:[%s11808_s23 + $0x6c] sm:$0xff] %v8673_v23  ;;  %v2749_v60 = vpop.f32.mrb[20].mxu0 }
 0x2b1   : > { %v9131_v48 = vadd.f32 %v2749_v60, %v11784_v35  ;;  %v2751_v61 = vpop.f32.mrb[21].mxu0 }
 0x2b2   : > { %v9132_v12 = vadd.f32 %v2751_v61, %v11787_v14  ;;  %v2753_v40 = vpop.f32.mrb[22].mxu0 }
 0x2b3   : > { %v9133_v43 = vadd.f32 %v2753_v40, %v11784_v35  ;;  %v2755_v9 = vpop.f32.mrb[23].mxu0 }
 0x2b4   : > { %v8675_v46 = vpack.c.bf16 %v9132_v12, %v9131_v48  ;;  %v9134_v29 = vadd.f32 %v2755_v9, %v11787_v14 }
 0x2b5   : > { %3857 = vmatmul.mubr.bf16.gmra.mrb[168].mxu0 %v12070_v4 }
 0x2b6   : > { %3664 = vmatmul.mubr.bf16.gmra.mrb[144].mxu1 %v10703_v22  ;;  %6374 = vst [vmem:[%s11808_s23 + $0x78] sm:$0xff] %v8675_v46  ;;  %v8677_v13 = vpack.c.bf16 %v9134_v29, %v9133_v43  ;;  %3866 = vmatprep.mubr.bf16.mxu0 %v12079_v39 }
 0x2b7   : > { %3673 = vmatprep.mubr.bf16.mxu1 %v14322_v0 }
 0x2b8   : > { %6376 = vst [vmem:[%s11808_s23 + $0x84] sm:$0xff] %v8677_v13  ;;  %v2759_v20 = vpop.f32.mrb[24].mxu0 }
 0x2b9   : > { %v3405_v52 = vpop.f32.mrb[40].mxu1  ;;  %v9135_v30 = vadd.f32 %v2759_v20, %v11784_v35  ;;  %v2761_v7 = vpop.f32.mrb[25].mxu0 }
 0x2ba   : > { %v9279_v5 = vadd.f32 %v3405_v52, %v12074_v26  ;;  %v12085_v62 = vpop.f32.mrb[41].mxu1  ;;  %v9136_v11 = vadd.f32 %v2761_v7, %v11787_v14  ;;  %v2763_v34 = vpop.f32.mrb[26].mxu0 }
 0x2bb   : > { %v3409_v10 = vpop.f32.mrb[42].mxu1  ;;  %v9137_v21 = vadd.f32 %v2763_v34, %v11784_v35  ;;  %v2765_v57 = vpop.f32.mrb[27].mxu0  ;;  %v10636_v34 = vld [vmem:[#allocation5 + $0x688] ss:$36 sps:$4 sm:$0xff]  }
 0x2bc   : > { %v8656_v55 = vpack.c.bf16 %v9279_v5, %v9279_v5  ;;  %v9281_v36 = vadd.f32 %v3409_v10, %v12074_v26  ;;  %v12090_v15 = vpop.f32.mrb[43].mxu1  ;;  %v8679_v45 = vpack.c.bf16 %v9136_v11, %v9135_v30  ;;  %v9138_v16 = vadd.f32 %v2765_v57, %v11787_v14  ;;  %v10709_v30 = vld [vmem:[%s11320_s8 + $0x2a8] ss:$12 sps:$4 sm:$0xff]   ;;  %v12120_v5 = vld [vmem:[%s11320_s8 + $0x120] ss:$12 sps:$4 sm:$0xff]  }
 0x2bd   : > { %3867 = vmatmul.mubr.bf16.gmra.mrb[172].mxu0 %v12096_v24  ;;  %v12126_v11 = vld [vmem:[%s11320_s8 + $0x13c] ss:$12 sps:$4 sm:$0xff]   ;;  %v10638_v10 = vld [vmem:[#allocation5 + $0x68c] ss:$36 sps:$4 sm:$0xff]  }
 0x2be   : > { %6355 = vst [vmem:[%s11808_s23 + $0x8] sm:$0xf] %v8656_v55  ;;  %v8658_v50 = vpack.c.bf16 %v9281_v36, %v9281_v36  ;;  %3674 = vmatmul.mubr.bf16.gmra.mrb[148].mxu1 %v10706_v8  ;;  %6378 = vst [vmem:[%s11808_s23 + $0x90] sm:$0xff] %v8679_v45  ;;  %v8681_v51 = vpack.c.bf16 %v9138_v16, %v9137_v21  ;;  %3876 = vmatprep.mubr.bf16.mxu0 %v12102_v42 }
 0x2bf   : > { %3683 = vmatprep.mubr.bf16.mxu1 %v14322_v0  ;;  %4091 = vmatprep.subr.bf16.mxu0 %v10638_v10 }
 0x2c0   : > { %6357 = vst [vmem:[%s11808_s23 + $0x14] sm:$0xf] %v8658_v50  ;;  %6380 = vst [vmem:[%s11808_s23 + $0x9c] sm:$0xff] %v8681_v51  ;;  %v2769_v17 = vpop.f32.mrb[28].mxu0  ;;  %4092 = vmatpush1.bf16.msra.mxu0 %v10636_v34 }
 0x2c1   : > { %v3415_v38 = vpop.f32.mrb[44].mxu1  ;;  %v9139_v23 = vadd.f32 %v2769_v17, %v11784_v35  ;;  %v2771_v48 = vpop.f32.mrb[29].mxu0  ;;  %5136 = vmatprep.subr.bf16.mxu0 %v14322_v0 }
 0x2c2   : > { %v9283_v60 = vadd.f32 %v3415_v38, %v12074_v26  ;;  %v12109_v61 = vpop.f32.mrb[45].mxu1  ;;  %v9140_v25 = vadd.f32 %v2771_v48, %v11787_v14  ;;  %v2773_v12 = vpop.f32.mrb[30].mxu0 }
 0x2c3   : > { %v3419_v40 = vpop.f32.mrb[46].mxu1  ;;  %v9141_v9 = vadd.f32 %v2773_v12, %v11784_v35  ;;  %v2775_v29 = vpop.f32.mrb[31].mxu0 }
 0x2c4   : > { %v8660_v43 = vpack.c.bf16 %v9283_v60, %v9283_v60  ;;  %v9285_v46 = vadd.f32 %v3419_v40, %v12074_v26  ;;  %v12114_v22 = vpop.f32.mrb[47].mxu1  ;;  %v8683_v13 = vpack.c.bf16 %v9140_v25, %v9139_v23  ;;  %v9142_v20 = vadd.f32 %v2775_v29, %v11787_v14  ;;  %v12151_v29 = vld [vmem:[%s11320_s8 + $0x154] ss:$12 sps:$4 sm:$0xff]  }
 0x2c5   : > { %3877 = vmatmul.mubr.bf16.gmra.mrb[176].mxu0 %v12120_v5 }
 0x2c6   : > { %6359 = vst [vmem:[%s11808_s23 + $0x20] sm:$0xf] %v8660_v43  ;;  %v8662_v52 = vpack.c.bf16 %v9285_v46, %v9285_v46  ;;  %3684 = vmatmul.mubr.bf16.gmra.mrb[152].mxu1 %v10709_v30  ;;  %6382 = vst [vmem:[%s11808_s23 + $0xa8] sm:$0xff] %v8683_v13  ;;  %v8685_v7 = vpack.c.bf16 %v9142_v20, %v9141_v9  ;;  %3886 = vmatprep.mubr.bf16.mxu0 %v12126_v11  ;;  %v10712_v43 = vld [vmem:[%s11320_s8 + $0x2c0] ss:$12 sps:$4 sm:$0xff]  }
 0x2c7   : > { %3693 = vmatprep.mubr.bf16.mxu1 %v14322_v0  ;;  %v12145_v9 = vld [vmem:[%s11320_s8 + $0x138] ss:$12 sps:$4 sm:$0xff]  }
 0x2c8   : > { %6361 = vst [vmem:[%s11808_s23 + $0x2c] sm:$0xf] %v8662_v52  ;;  %6384 = vst [vmem:[%s11808_s23 + $0xb4] sm:$0xff] %v8685_v7  ;;  %v2779_v55 = vpop.f32.mrb[32].mxu0 }
 0x2c9   : > { %v3425_v21 = vpop.f32.mrb[48].mxu1  ;;  %v9143_v36 = vadd.f32 %v2779_v55, %v11784_v35  ;;  %v2781_v45 = vpop.f32.mrb[33].mxu0 }
 0x2ca   : > { %v9287_v57 = vadd.f32 %v3425_v21, %v12074_v26  ;;  %v12133_v16 = vpop.f32.mrb[49].mxu1  ;;  %v9144_v50 = vadd.f32 %v2781_v45, %v11787_v14  ;;  %v2783_v8 = vpop.f32.mrb[34].mxu0 }
 0x2cb   : > { %v3429_v51 = vpop.f32.mrb[50].mxu1  ;;  %v9145_v38 = vadd.f32 %v2783_v8, %v11784_v35  ;;  %v2785_v60 = vpop.f32.mrb[35].mxu0 }
 0x2cc   : > { %v8664_v17 = vpack.c.bf16 %v9287_v57, %v9287_v57  ;;  %v9289_v23 = vadd.f32 %v3429_v51, %v12074_v26  ;;  %v12138_v48 = vpop.f32.mrb[51].mxu1  ;;  %v8687_v25 = vpack.c.bf16 %v9144_v50, %v9143_v36  ;;  %v9146_v12 = vadd.f32 %v2785_v60, %v11787_v14  ;;  %v12169_v60 = vld [vmem:[%s11320_s8 + $0x150] ss:$12 sps:$4 sm:$0xff]  }
 0x2cd   : > { %3887 = vmatmul.mubr.bf16.gmra.mrb[180].mxu0 %v12145_v9 }
 0x2ce   : > { %6363 = vst [vmem:[%s11808_s23 + $0x38] sm:$0xf] %v8664_v17  ;;  %v8666_v40 = vpack.c.bf16 %v9289_v23, %v9289_v23  ;;  %3694 = vmatmul.mubr.bf16.gmra.mrb[156].mxu1 %v10712_v43  ;;  %6386 = vst [vmem:[%s11808_s23 + $0xc0] sm:$0xff] %v8687_v25  ;;  %v8689_v46 = vpack.c.bf16 %v9146_v12, %v9145_v38  ;;  %3896 = vmatprep.mubr.bf16.mxu0 %v12151_v29  ;;  %v10715_v23 = vld [vmem:[%s11320_s8 + $0x2d8] ss:$12 sps:$4 sm:$0xff]  }
 0x2cf   : > { %3703 = vmatprep.mubr.bf16.mxu1 %v14322_v0  ;;  %v12175_v12 = vld [vmem:[%s11320_s8 + $0x16c] ss:$12 sps:$4 sm:$0xff]  }
 0x2d0   : > { %6365 = vst [vmem:[%s11808_s23 + $0x44] sm:$0xf] %v8666_v40  ;;  %6388 = vst [vmem:[%s11808_s23 + $0xcc] sm:$0xff] %v8689_v46  ;;  %v2789_v13 = vpop.f32.mrb[36].mxu0 }
 0x2d1   : > { %v3435_v20 = vpop.f32.mrb[52].mxu1  ;;  %v9147_v52 = vadd.f32 %v2789_v13, %v11784_v35  ;;  %v2791_v7 = vpop.f32.mrb[37].mxu0 }
 0x2d2   : > { %v9291_v30 = vadd.f32 %v3435_v20, %v12074_v26  ;;  %v12158_v34 = vpop.f32.mrb[53].mxu1  ;;  %v9148_v10 = vadd.f32 %v2791_v7, %v11787_v14  ;;  %v2793_v55 = vpop.f32.mrb[38].mxu0 }
 0x2d3   : > { %v3439_v21 = vpop.f32.mrb[54].mxu1  ;;  %v9149_v57 = vadd.f32 %v2793_v55, %v11784_v35  ;;  %v2795_v50 = vpop.f32.mrb[39].mxu0 }
 0x2d4   : > { %v8668_v36 = vpack.c.bf16 %v9291_v30, %v9291_v30  ;;  %v9293_v45 = vadd.f32 %v3439_v21, %v12074_v26  ;;  %v12163_v8 = vpop.f32.mrb[55].mxu1  ;;  %v8691_v51 = vpack.c.bf16 %v9148_v10, %v9147_v52  ;;  %v9150_v17 = vadd.f32 %v2795_v50, %v11787_v14 }
 0x2d5   : > { %3897 = vmatmul.mubr.bf16.gmra.mrb[184].mxu0 %v12169_v60 }
 0x2d6   : > { %6367 = vst [vmem:[%s11808_s23 + $0x50] sm:$0xf] %v8668_v36  ;;  %v8670_v38 = vpack.c.bf16 %v9293_v45, %v9293_v45  ;;  %3704 = vmatmul.mubr.bf16.gmra.mrb[160].mxu1 %v10715_v23  ;;  %6390 = vst [vmem:[%s11808_s23 + $0xd8] sm:$0xff] %v8691_v51  ;;  %v8693_v25 = vpack.c.bf16 %v9150_v17, %v9149_v57  ;;  %3906 = vmatprep.mubr.bf16.mxu0 %v12175_v12  ;;  %v12193_v23 = vld [vmem:[%s11320_s8 + $0x168] ss:$12 sps:$4 sm:$0xff]  }
 0x2d7   : > { %3713 = vmatprep.mubr.bf16.mxu1 %v14322_v0 }
 0x2d8   : > { %6369 = vst [vmem:[%s11808_s23 + $0x5c] sm:$0xf] %v8670_v38  ;;  %6392 = vst [vmem:[%s11808_s23 + $0xe4] sm:$0xff] %v8693_v25  ;;  %v2799_v40 = vpop.f32.mrb[40].mxu0  ;;  %v10718_v38 = vld [vmem:[%s11320_s8 + $0x2f0] ss:$12 sps:$4 sm:$0xff]  }
 0x2d9   : > { %v3445_v43 = vpop.f32.mrb[56].mxu1  ;;  %v9151_v46 = vadd.f32 %v2799_v40, %v11784_v35  ;;  %v2801_v20 = vpop.f32.mrb[41].mxu0  ;;  %v12198_v40 = vld [vmem:[%s11320_s8 + $0x184] ss:$12 sps:$4 sm:$0xff]  }
 0x2da   : > { %v9295_v13 = vadd.f32 %v3445_v43, %v12074_v26  ;;  %v12182_v52 = vpop.f32.mrb[57].mxu1  ;;  %v9152_v30 = vadd.f32 %v2801_v20, %v11787_v14  ;;  %v2803_v7 = vpop.f32.mrb[42].mxu0 }
 0x2db   : > { %v3449_v10 = vpop.f32.mrb[58].mxu1  ;;  %v9153_v21 = vadd.f32 %v2803_v7, %v11784_v35  ;;  %v2805_v57 = vpop.f32.mrb[43].mxu0 }
 0x2dc   : > { %v8672_v55 = vpack.c.bf16 %v9295_v13, %v9295_v13  ;;  %v9297_v36 = vadd.f32 %v3449_v10, %v12074_v26  ;;  %v12187_v45 = vpop.f32.mrb[59].mxu1  ;;  %v8695_v50 = vpack.c.bf16 %v9152_v30, %v9151_v46  ;;  %v9154_v51 = vadd.f32 %v2805_v57, %v11787_v14 }
 0x2dd   : > { %3907 = vmatmul.mubr.bf16.gmra.mrb[188].mxu0 %v12193_v23 }
 0x2de   : > { %6371 = vst [vmem:[%s11808_s23 + $0x68] sm:$0xf] %v8672_v55  ;;  %v8674_v17 = vpack.c.bf16 %v9297_v36, %v9297_v36  ;;  %3714 = vmatmul.mubr.bf16.gmra.mrb[164].mxu1 %v10718_v38  ;;  %6394 = vst [vmem:[%s11808_s23 + $0xf0] sm:$0xff] %v8695_v50  ;;  %v8697_v25 = vpack.c.bf16 %v9154_v51, %v9153_v21  ;;  %3916 = vmatprep.mubr.bf16.mxu0 %v12198_v40  ;;  %v10621_v36 = vld [vmem:[#allocation5 + $0x498] ss:$36 sps:$4 sm:$0xff]  }
 0x2df   : > { %4462 = vmatprep.mubr.bf16.mxu1 %v11878_v54  ;;  %v10629_v38 = vld [vmem:[#allocation5 + $0x4e4] ss:$36 sps:$4 sm:$0xff]  }
 0x2e0   : > { %6373 = vst [vmem:[%s11808_s23 + $0x74] sm:$0xf] %v8674_v17  ;;  %6396 = vst [vmem:[%s11808_s23 + $0xfc] sm:$0xff] %v8697_v25  ;;  %v2809_v43 = vpop.f32.mrb[44].mxu0 }
 0x2e1   : > { %v3455_v46 = vpop.f32.mrb[60].mxu1  ;;  %v9155_v13 = vadd.f32 %v2809_v43, %v11784_v35  ;;  %v2811_v30 = vpop.f32.mrb[45].mxu0 }
 0x2e2   : > { %v9299_v20 = vadd.f32 %v3455_v46, %v12074_v26  ;;  %v12206_v7 = vpop.f32.mrb[61].mxu1  ;;  %v9156_v10 = vadd.f32 %v2811_v30, %v11787_v14  ;;  %v2813_v55 = vpop.f32.mrb[46].mxu0  ;;  %v12216_v30 = vld [vmem:[%s11320_s8 + $0x180] ss:$12 sps:$4 sm:$0xff]  }
 0x2e3   : > { %v3459_v21 = vpop.f32.mrb[62].mxu1  ;;  %v9157_v57 = vadd.f32 %v2813_v55, %v11784_v35  ;;  %v2815_v51 = vpop.f32.mrb[47].mxu0  ;;  %v12222_v55 = vld [vmem:[%s11320_s8 + $0x19c] ss:$12 sps:$4 sm:$0xff]  }
 0x2e4   : > { %v8676_v54 = vpack.c.bf16 %v9299_v20, %v9299_v20  ;;  %v9301_v50 = vadd.f32 %v3459_v21, %v12074_v26  ;;  %v12211_v17 = vpop.f32.mrb[63].mxu1  ;;  %v8699_v25 = vpack.c.bf16 %v9156_v10, %v9155_v13  ;;  %v9158_v43 = vadd.f32 %v2815_v51, %v11787_v14  ;;  %v10627_v21 = vld [vmem:[#allocation5 + $0x4e0] ss:$36 sps:$4 sm:$0xff]   ;;  %v10635_v13 = vld [vmem:[#allocation5 + $0x52c] ss:$36 sps:$4 sm:$0xff]  }
 0x2e5   : > { %14336 = vst [vmem:[#allocation16_spill] sm:$0xff] %v12211_v17  ;;  %3917 = vmatmul.mubr.bf16.gmra.mrb[192].mxu0 %v12216_v30  ;;  %v12240_v17 = vld [vmem:[%s11320_s8 + $0x198] ss:$12 sps:$4 sm:$0xff]  }
 0x2e6   : > { %6375 = vst [vmem:[%s11808_s23 + $0x80] sm:$0xf] %v8676_v54  ;;  %v8678_v46 = vpack.c.bf16 %v9301_v50, %v9301_v50  ;;  %4463 = vmatmul.mubr.bf16.vlgmr.msra.gmra.mrb[168].mxu1 %v11892_v28  ;;  %6398 = vst [vmem:[%s11808_s23 + $0x108] sm:$0xff] %v8699_v25  ;;  %v8701_v20 = vpack.c.bf16 %v9158_v43, %v9157_v57  ;;  %3926 = vmatprep.mubr.bf16.mxu0 %v12222_v55 }
 0x2e7   : > { %4784 = vmatpush1.bf16.msra.mxu1 %v10621_v36  ;;  %4472 = vmatprep.mubr.bf16.mxu1 %v11898_v49 }
 0x2e8   : > { %6377 = vst [vmem:[%s11808_s23 + $0x8c] sm:$0xf] %v8678_v46  ;;  %4785 = vmatprep.subr.bf16.mxu1 %v10629_v38  ;;  %6400 = vst [vmem:[%s11808_s23 + $0x114] sm:$0xff] %v8701_v20  ;;  %v2819_v10 = vpop.f32.mrb[48].mxu0 }
 0x2e9   : > { %v3465_v54 = vpop.f32.mrb[64].mxu1  ;;  %v9159_v50 = vadd.f32 %v2819_v10, %v11784_v35  ;;  %v2821_v51 = vpop.f32.mrb[49].mxu0 }
 0x2ea   : > { %v9303_v28 = vadd.f32 %v3465_v54, %v12074_v26  ;;  %v12230_v36 = vpop.f32.mrb[65].mxu1  ;;  %v9160_v57 = vadd.f32 %v2821_v51, %v11787_v14  ;;  %v2823_v25 = vpop.f32.mrb[50].mxu0  ;;  %v10633_v54 = vld [vmem:[#allocation5 + $0x528] ss:$36 sps:$4 sm:$0xff]  }
 0x2eb   : > { %14337 = vst [vmem:[#allocation17_spill] sm:$0xff] %v12230_v36  ;;  %v3469_v43 = vpop.f32.mrb[66].mxu1  ;;  %4786 = vmatpush1.bf16.msra.mxu1 %v10627_v21  ;;  %v9161_v38 = vadd.f32 %v2823_v25, %v11784_v35  ;;  %v2825_v20 = vpop.f32.mrb[51].mxu0  ;;  %v10641_v36 = vld [vmem:[#allocation5 + $0x574] ss:$36 sps:$4 sm:$0xff]  }
 0x2ec   : > { %v8680_v49 = vpack.c.bf16 %v9303_v28, %v9303_v28  ;;  %v9305_v46 = vadd.f32 %v3469_v43, %v12074_v26  ;;  %v12235_v10 = vpop.f32.mrb[67].mxu1  ;;  %4787 = vmatprep.subr.bf16.mxu1 %v10635_v13  ;;  %v8703_v0 = vpack.c.bf16 %v9160_v57, %v9159_v50  ;;  %v9162_v51 = vadd.f32 %v2825_v20, %v11787_v14  ;;  %v12246_v25 = vld [vmem:[%s11320_s8 + $0x1b4] ss:$12 sps:$4 sm:$0xff]  }
 0x2ed   : > { %14338 = vst [vmem:[#allocation18_spill] sm:$0xff] %v12235_v10  ;;  %3927 = vmatmul.mubr.bf16.gmra.mrb[196].mxu0 %v12240_v17  ;;  %v10639_v13 = vld [vmem:[#allocation5 + $0x570] ss:$36 sps:$4 sm:$0xff]   ;;  %v10644_v43 = vld [vmem:[#allocation5 + $0x5bc] ss:$36 sps:$4 sm:$0xff]  }
 0x2ee   : > { %6379 = vst [vmem:[%s11808_s23 + $0x98] sm:$0xf] %v8680_v49  ;;  %v8682_v21 = vpack.c.bf16 %v9305_v46, %v9305_v46  ;;  %4473 = vmatmul.mubr.bf16.gmra.mrb[172].mxu1 %v11912_v56  ;;  %6402 = vst [vmem:[%s11808_s23 + $0x120] sm:$0xff] %v8703_v0  ;;  %v8705_v28 = vpack.c.bf16 %v9162_v51, %v9161_v38  ;;  %3936 = vmatprep.mubr.bf16.mxu0 %v12246_v25  ;;  %v12264_v10 = vld [vmem:[%s11320_s8 + $0x1b0] ss:$12 sps:$4 sm:$0xff]  }
 0x2ef   : > { %4482 = vmatprep.mubr.bf16.mxu1 %v11918_v1  ;;  %4788 = vmatpush1.bf16.msra.mxu1 %v10633_v54 }
 0x2f0   : > { %6381 = vst [vmem:[%s11808_s23 + $0xa4] sm:$0xf] %v8682_v21  ;;  %6404 = vst [vmem:[%s11808_s23 + $0x12c] sm:$0xff] %v8705_v28  ;;  %v2829_v50 = vpop.f32.mrb[52].mxu0  ;;  %4789 = vmatprep.subr.bf16.mxu1 %v10641_v36 }
 0x2f1   : > { %v3475_v57 = vpop.f32.mrb[68].mxu1  ;;  %v9163_v49 = vadd.f32 %v2829_v50, %v11784_v35  ;;  %v2831_v0 = vpop.f32.mrb[53].mxu0  ;;  %v10642_v50 = vld [vmem:[#allocation5 + $0x5b8] ss:$36 sps:$4 sm:$0xff]  }
 0x2f2   : > { %v9307_v56 = vadd.f32 %v3475_v57, %v12074_v26  ;;  %v12254_v38 = vpop.f32.mrb[69].mxu1  ;;  %v9164_v46 = vadd.f32 %v2831_v0, %v11787_v14  ;;  %v2833_v1 = vpop.f32.mrb[54].mxu0 }
 0x2f3   : > { %14339 = vst [vmem:[#allocation19_spill] sm:$0xff] %v12254_v38  ;;  %v3479_v20 = vpop.f32.mrb[70].mxu1  ;;  %v9165_v51 = vadd.f32 %v2833_v1, %v11784_v35  ;;  %v2835_v21 = vpop.f32.mrb[55].mxu0  ;;  %4790 = vmatpush1.bf16.msra.mxu1 %v10639_v13  ;;  %v12270_v1 = vld [vmem:[%s11320_s8 + $0x1cc] ss:$12 sps:$4 sm:$0xff]  }
 0x2f4   : > { %v8684_v54 = vpack.c.bf16 %v9307_v56, %v9307_v56  ;;  %v9309_v36 = vadd.f32 %v3479_v20, %v12074_v26  ;;  %v12259_v28 = vpop.f32.mrb[71].mxu1  ;;  %v8707_v57 = vpack.c.bf16 %v9164_v46, %v9163_v49  ;;  %v9166_v38 = vadd.f32 %v2835_v21, %v11787_v14  ;;  %4791 = vmatprep.subr.bf16.mxu1 %v10644_v43 }
 0x2f5   : > { %3937 = vmatmul.mubr.bf16.gmra.mrb[200].mxu0 %v12264_v10 }
 0x2f6   : > { %6383 = vst [vmem:[%s11808_s23 + $0xb0] sm:$0xf] %v8684_v54  ;;  %v8686_v0 = vpack.c.bf16 %v9309_v36, %v9309_v36  ;;  %4483 = vmatmul.mubr.bf16.gmra.mrb[176].mxu1 %v11932_v58  ;;  %6406 = vst [vmem:[%s11808_s23 + $0x138] sm:$0xff] %v8707_v57  ;;  %v8709_v56 = vpack.c.bf16 %v9166_v38, %v9165_v51  ;;  %3946 = vmatprep.mubr.bf16.mxu0 %v12270_v1 }
 0x2f7   : > { %4492 = vmatprep.mubr.bf16.mxu1 %v11938_v18  ;;  %4792 = vmatpush1.bf16.msra.mxu1 %v10642_v50 }
 0x2f8   : > { %6385 = vst [vmem:[%s11808_s23 + $0xbc] sm:$0xf] %v8686_v0  ;;  %6408 = vst [vmem:[%s11808_s23 + $0x144] sm:$0xff] %v8709_v56  ;;  %v2839_v13 = vpop.f32.mrb[56].mxu0 }
 0x2f9   : > { %v3485_v43 = vpop.f32.mrb[72].mxu1  ;;  %v9167_v49 = vadd.f32 %v2839_v13, %v11784_v35  ;;  %v2841_v58 = vpop.f32.mrb[57].mxu0 }
 0x2fa   : > { %v9311_v46 = vadd.f32 %v3485_v43, %v12074_v26  ;;  %v12278_v20 = vpop.f32.mrb[73].mxu1  ;;  %v9168_v38 = vadd.f32 %v2841_v58, %v11787_v14  ;;  %v2843_v54 = vpop.f32.mrb[58].mxu0  ;;  %v12288_v43 = vld [vmem:[%s11320_s8 + $0x1c8] ss:$12 sps:$4 sm:$0xff]   ;;  %v12294_v58 = vld [vmem:[%s11320_s8 + $0x1e4] ss:$12 sps:$4 sm:$0xff]  }
 0x2fb   : > { %v3489_v18 = vpop.f32.mrb[74].mxu1  ;;  %v9169_v36 = vadd.f32 %v2843_v54, %v11784_v35  ;;  %v2845_v50 = vpop.f32.mrb[59].mxu0 }
 0x2fc   : > { %v8688_v51 = vpack.c.bf16 %v9311_v46, %v9311_v46  ;;  %v9313_v21 = vadd.f32 %v3489_v18, %v12074_v26  ;;  %v12283_v57 = vpop.f32.mrb[75].mxu1  ;;  %v8711_v0 = vpack.c.bf16 %v9168_v38, %v9167_v49  ;;  %v9170_v56 = vadd.f32 %v2845_v50, %v11787_v14 }
 0x2fd   : > { %14340 = vst [vmem:[#allocation20_spill] sm:$0xff] %v12283_v57  ;;  %3947 = vmatmul.mubr.bf16.gmra.mrb[204].mxu0 %v12288_v43  ;;  %v12312_v57 = vld [vmem:[%s11320_s8 + $0x1e0] ss:$12 sps:$4 sm:$0xff]  }
 0x2fe   : > { %6387 = vst [vmem:[%s11808_s23 + $0xc8] sm:$0xf] %v8688_v51  ;;  %v8690_v13 = vpack.c.bf16 %v9313_v21, %v9313_v21  ;;  %4493 = vmatmul.mubr.bf16.gmra.mrb[180].mxu1 %v11952_v3  ;;  %6410 = vst [vmem:[%s11808_s23 + $0x150] sm:$0xff] %v8711_v0  ;;  %v8713_v46 = vpack.c.bf16 %v9170_v56, %v9169_v36  ;;  %3956 = vmatprep.mubr.bf16.mxu0 %v12294_v58 }
 0x2ff   : > { %4502 = vmatprep.mubr.bf16.mxu1 %v11958_v2 }
 0x300   : > { %6389 = vst [vmem:[%s11808_s23 + $0xd4] sm:$0xf] %v8690_v13  ;;  %6412 = vst [vmem:[%s11808_s23 + $0x15c] sm:$0xff] %v8713_v46  ;;  %v2849_v49 = vpop.f32.mrb[60].mxu0 }
 0x301   : > { %v3495_v38 = vpop.f32.mrb[76].mxu1  ;;  %v9171_v54 = vadd.f32 %v2849_v49, %v11784_v35  ;;  %v2851_v51 = vpop.f32.mrb[61].mxu0 }
 0x302   : > { %v9315_v18 = vadd.f32 %v3495_v38, %v12074_v26  ;;  %v12302_v3 = vpop.f32.mrb[77].mxu1  ;;  %v9172_v36 = vadd.f32 %v2851_v51, %v11787_v14  ;;  %v2853_v21 = vpop.f32.mrb[62].mxu0  ;;  %v12318_v51 = vld [vmem:[%s11320_s8 + $0x1fc] ss:$12 sps:$4 sm:$0xff]  }
 0x303   : > { %14341 = vst [vmem:[#allocation21_spill] sm:$0xff] %v12302_v3  ;;  %v3499_v50 = vpop.f32.mrb[78].mxu1  ;;  %v9173_v0 = vadd.f32 %v2853_v21, %v11784_v35  ;;  %v2855_v13 = vpop.f32.mrb[63].mxu0 }
 0x304   : > { %v8692_v2 = vpack.c.bf16 %v9315_v18, %v9315_v18  ;;  %v9317_v56 = vadd.f32 %v3499_v50, %v12074_v26  ;;  %v12307_v46 = vpop.f32.mrb[79].mxu1  ;;  %v8715_v49 = vpack.c.bf16 %v9172_v36, %v9171_v54  ;;  %v9174_v38 = vadd.f32 %v2855_v13, %v11787_v14  ;;  %v10647_v54 = vld [vmem:[#allocation5 + $0x600] ss:$36 sps:$4 sm:$0xff]  }
 0x305   : > { %14342 = vst [vmem:[#allocation22_spill] sm:$0xff] %v12307_v46  ;;  %3957 = vmatmul.mubr.bf16.gmra.mrb[208].mxu0 %v12312_v57  ;;  %v10649_v36 = vld [vmem:[#allocation5 + $0x604] ss:$36 sps:$4 sm:$0xff]  }
 0x306   : > { %6391 = vst [vmem:[%s11808_s23 + $0xe0] sm:$0xf] %v8692_v2  ;;  %v8694_v3 = vpack.c.bf16 %v9317_v56, %v9317_v56  ;;  %4503 = vmatmul.mubr.bf16.gmra.mrb[184].mxu1 %v11972_v32  ;;  %6414 = vst [vmem:[%s11808_s23 + $0x168] sm:$0xff] %v8715_v49  ;;  %v8717_v18 = vpack.c.bf16 %v9174_v38, %v9173_v0  ;;  %3966 = vmatprep.mubr.bf16.mxu0 %v12318_v51 }
 0x307   : > { %4512 = vmatprep.mubr.bf16.mxu1 %v11978_v6  ;;  %4793 = vmatprep.subr.bf16.mxu1 %v10649_v36 }
 0x308   : > { %6393 = vst [vmem:[%s11808_s23 + $0xec] sm:$0xf] %v8694_v3  ;;  %6416 = vst [vmem:[%s11808_s23 + $0x174] sm:$0xff] %v8717_v18  ;;  %v2859_v21 = vpop.f32.mrb[64].mxu0  ;;  %4794 = vmatpush1.bf16.msra.mxu1 %v10647_v54 }
 0x309   : > { %v3505_v50 = vpop.f32.mrb[80].mxu1  ;;  %v9175_v2 = vadd.f32 %v2859_v21, %v11784_v35  ;;  %v2861_v32 = vpop.f32.mrb[65].mxu0 }
 0x30a   : > { %v9319_v56 = vadd.f32 %v3505_v50, %v12074_v26  ;;  %v12326_v0 = vpop.f32.mrb[81].mxu1  ;;  %v9176_v13 = vadd.f32 %v2861_v32, %v11787_v14  ;;  %v2863_v6 = vpop.f32.mrb[66].mxu0 }
 0x30b   : > { %14343 = vst [vmem:[#allocation23_spill] sm:$0xff] %v12326_v0  ;;  %v3509_v3 = vpop.f32.mrb[82].mxu1  ;;  %v9177_v38 = vadd.f32 %v2863_v6, %v11784_v35  ;;  %v2865_v21 = vpop.f32.mrb[67].mxu0  ;;  %v12336_v0 = vld [vmem:[%s11320_s8 + $0x1f8] ss:$12 sps:$4 sm:$0xff]  }
 0x30c   : > { %v8696_v49 = vpack.c.bf16 %v9319_v56, %v9319_v56  ;;  %v9321_v18 = vadd.f32 %v3509_v3, %v12074_v26  ;;  %v12331_v50 = vpop.f32.mrb[83].mxu1  ;;  %v8719_v46 = vpack.c.bf16 %v9176_v13, %v9175_v2  ;;  %v9178_v36 = vadd.f32 %v2865_v21, %v11787_v14  ;;  %v12342_v56 = vld [vmem:[%s11320_s8 + $0x214] ss:$12 sps:$4 sm:$0xff]  }
 0x30d   : > { %14344 = vst [vmem:[#allocation24_spill] sm:$0xff] %v12331_v50  ;;  %3967 = vmatmul.mubr.bf16.gmra.mrb[212].mxu0 %v12336_v0  ;;  %v12360_v50 = vld [vmem:[%s11320_s8 + $0x210] ss:$12 sps:$4 sm:$0xff]  }
 0x30e   : > { %6395 = vst [vmem:[%s11808_s23 + $0xf8] sm:$0xf] %v8696_v49  ;;  %v8698_v32 = vpack.c.bf16 %v9321_v18, %v9321_v18  ;;  %4513 = vmatmul.mubr.bf16.gmra.mrb[188].mxu1 %v11989_v59  ;;  %6418 = vst [vmem:[%s11808_s23 + $0x180] sm:$0xff] %v8719_v46  ;;  %v8721_v54 = vpack.c.bf16 %v9178_v36, %v9177_v38  ;;  %3976 = vmatprep.mubr.bf16.mxu0 %v12342_v56 }
 0x30f   : > { %4522 = vmatprep.mubr.bf16.mxu1 %v11995_v47 }
 0x310   : > { %6397 = vst [vmem:[%s11808_s23 + $0x104] sm:$0xf] %v8698_v32  ;;  %6420 = vst [vmem:[%s11808_s23 + $0x18c] sm:$0xff] %v8721_v54  ;;  %v2869_v2 = vpop.f32.mrb[68].mxu0 }
 0x311   : > { %v3515_v13 = vpop.f32.mrb[84].mxu1  ;;  %v9179_v6 = vadd.f32 %v2869_v2, %v11784_v35  ;;  %v2871_v49 = vpop.f32.mrb[69].mxu0 }
 0x312   : > { %v9323_v3 = vadd.f32 %v3515_v13, %v12074_v26  ;;  %v12350_v59 = vpop.f32.mrb[85].mxu1  ;;  %v9180_v46 = vadd.f32 %v2871_v49, %v11787_v14  ;;  %v2873_v38 = vpop.f32.mrb[70].mxu0  ;;  %v12366_v49 = vld [vmem:[%s11320_s8 + $0x22c] ss:$12 sps:$4 sm:$0xff]  }
 0x313   : > { %14345 = vst [vmem:[#allocation25_spill] sm:$0xff] %v12350_v59  ;;  %v3519_v18 = vpop.f32.mrb[86].mxu1  ;;  %v9181_v21 = vadd.f32 %v2873_v38, %v11784_v35  ;;  %v2875_v32 = vpop.f32.mrb[71].mxu0 }
 0x314   : > { %v8700_v47 = vpack.c.bf16 %v9323_v3, %v9323_v3  ;;  %v9325_v36 = vadd.f32 %v3519_v18, %v12074_v26  ;;  %v12355_v54 = vpop.f32.mrb[87].mxu1  ;;  %v8723_v2 = vpack.c.bf16 %v9180_v46, %v9179_v6  ;;  %v9182_v13 = vadd.f32 %v2875_v32, %v11787_v14 }
 0x315   : > { %14346 = vst [vmem:[#allocation26_spill] sm:$0xff] %v12355_v54  ;;  %3977 = vmatmul.mubr.bf16.gmra.mrb[216].mxu0 %v12360_v50  ;;  %v12384_v54 = vld [vmem:[%s11320_s8 + $0x228] ss:$12 sps:$4 sm:$0xff]  }
 0x316   : > { %6399 = vst [vmem:[%s11808_s23 + $0x110] sm:$0xf] %v8700_v47  ;;  %v8702_v59 = vpack.c.bf16 %v9325_v36, %v9325_v36  ;;  %4523 = vmatmul.mubr.bf16.gmra.mrb[192].mxu1 %v12005_v27  ;;  %6422 = vst [vmem:[%s11808_s23 + $0x198] sm:$0xff] %v8723_v2  ;;  %v8725_v3 = vpack.c.bf16 %v9182_v13, %v9181_v21  ;;  %3986 = vmatprep.mubr.bf16.mxu0 %v12366_v49 }
 0x317   : > { %4532 = vmatprep.mubr.bf16.mxu1 %v12011_v63 }
 0x318   : > { %6401 = vst [vmem:[%s11808_s23 + $0x11c] sm:$0xf] %v8702_v59  ;;  %6424 = vst [vmem:[%s11808_s23 + $0x1a4] sm:$0xff] %v8725_v3  ;;  %v2879_v6 = vpop.f32.mrb[72].mxu0 }
 0x319   : > { %v3525_v46 = vpop.f32.mrb[88].mxu1  ;;  %v9183_v38 = vadd.f32 %v2879_v6, %v11784_v35  ;;  %v2881_v47 = vpop.f32.mrb[73].mxu0 }
 0x31a   : > { %v9327_v18 = vadd.f32 %v3525_v46, %v12074_v26  ;;  %v12374_v27 = vpop.f32.mrb[89].mxu1  ;;  %v9184_v21 = vadd.f32 %v2881_v47, %v11787_v14  ;;  %v2883_v36 = vpop.f32.mrb[74].mxu0  ;;  %v12390_v47 = vld [vmem:[%s11320_s8 + $0x244] ss:$12 sps:$4 sm:$0xff]  }
 0x31b   : > { %14347 = vst [vmem:[#allocation27_spill] sm:$0xff] %v12374_v27  ;;  %v3529_v32 = vpop.f32.mrb[90].mxu1  ;;  %v9185_v59 = vadd.f32 %v2883_v36, %v11784_v35  ;;  %v2885_v13 = vpop.f32.mrb[75].mxu0 }
 0x31c   : > { %v8704_v63 = vpack.c.bf16 %v9327_v18, %v9327_v18  ;;  %v9329_v2 = vadd.f32 %v3529_v32, %v12074_v26  ;;  %v12379_v3 = vpop.f32.mrb[91].mxu1  ;;  %v8727_v6 = vpack.c.bf16 %v9184_v21, %v9183_v38  ;;  %v9186_v46 = vadd.f32 %v2885_v13, %v11787_v14 }
 0x31d   : > { %14348 = vst [vmem:[#allocation28_spill] sm:$0xff] %v12379_v3  ;;  %3987 = vmatmul.mubr.bf16.gmra.mrb[220].mxu0 %v12384_v54  ;;  %v12408_v3 = vld [vmem:[%s11320_s8 + $0x240] ss:$12 sps:$4 sm:$0xff]  }
 0x31e   : > { %6403 = vst [vmem:[%s11808_s23 + $0x128] sm:$0xf] %v8704_v63  ;;  %v8706_v27 = vpack.c.bf16 %v9329_v2, %v9329_v2  ;;  %4533 = vmatmul.mubr.bf16.gmra.mrb[196].mxu1 %v12021_v53  ;;  %6426 = vst [vmem:[%s11808_s23 + $0x1b0] sm:$0xff] %v8727_v6  ;;  %v8729_v18 = vpack.c.bf16 %v9186_v46, %v9185_v59  ;;  %3996 = vmatprep.mubr.bf16.mxu0 %v12390_v47 }
 0x31f   : > { %4542 = vmatprep.mubr.bf16.mxu1 %v12027_v33 }
 0x320   : > { %6405 = vst [vmem:[%s11808_s23 + $0x134] sm:$0xf] %v8706_v27  ;;  %6428 = vst [vmem:[%s11808_s23 + $0x1bc] sm:$0xff] %v8729_v18  ;;  %v2889_v38 = vpop.f32.mrb[76].mxu0 }
 0x321   : > { %v3535_v21 = vpop.f32.mrb[92].mxu1  ;;  %v9187_v36 = vadd.f32 %v2889_v38, %v11784_v35  ;;  %v2891_v63 = vpop.f32.mrb[77].mxu0 }
 0x322   : > { %v9331_v32 = vadd.f32 %v3535_v21, %v12074_v26  ;;  %v12398_v53 = vpop.f32.mrb[93].mxu1  ;;  %v9188_v59 = vadd.f32 %v2891_v63, %v11787_v14  ;;  %v2893_v2 = vpop.f32.mrb[78].mxu0  ;;  %v12414_v63 = vld [vmem:[%s11320_s8 + $0x25c] ss:$12 sps:$4 sm:$0xff]  }
 0x323   : > { %14349 = vst [vmem:[#allocation29_spill] sm:$0xff] %v12398_v53  ;;  %v3539_v13 = vpop.f32.mrb[94].mxu1  ;;  %v9189_v27 = vadd.f32 %v2893_v2, %v11784_v35  ;;  %v2895_v46 = vpop.f32.mrb[79].mxu0 }
 0x324   : > { %v8708_v33 = vpack.c.bf16 %v9331_v32, %v9331_v32  ;;  %v9333_v6 = vadd.f32 %v3539_v13, %v12074_v26  ;;  %v12403_v18 = vpop.f32.mrb[95].mxu1  ;;  %v8731_v38 = vpack.c.bf16 %v9188_v59, %v9187_v36  ;;  %v9190_v21 = vadd.f32 %v2895_v46, %v11787_v14  ;;  %v10652_v36 = vld [vmem:[#allocation5 + $0x648] ss:$36 sps:$4 sm:$0xff]  }
 0x325   : > { %14350 = vst [vmem:[#allocation30_spill] sm:$0xff] %v12403_v18  ;;  %3997 = vmatmul.mubr.bf16.gmra.mrb[224].mxu0 %v12408_v3  ;;  %v10654_v59 = vld [vmem:[#allocation5 + $0x64c] ss:$36 sps:$4 sm:$0xff]  }
 0x326   : > { %6407 = vst [vmem:[%s11808_s23 + $0x140] sm:$0xf] %v8708_v33  ;;  %v8710_v53 = vpack.c.bf16 %v9333_v6, %v9333_v6  ;;  %4543 = vmatmul.mubr.bf16.gmra.mrb[200].mxu1 %v12037_v44  ;;  %6430 = vst [vmem:[%s11808_s23 + $0x1c8] sm:$0xff] %v8731_v38  ;;  %v8733_v32 = vpack.c.bf16 %v9190_v21, %v9189_v27  ;;  %4006 = vmatprep.mubr.bf16.mxu0 %v12414_v63 }
 0x327   : > { %4552 = vmatprep.mubr.bf16.mxu1 %v12043_v37  ;;  %4795 = vmatprep.subr.bf16.mxu1 %v10654_v59 }
 0x328   : > { %6409 = vst [vmem:[%s11808_s23 + $0x14c] sm:$0xf] %v8710_v53  ;;  %6432 = vst [vmem:[%s11808_s23 + $0x1d4] sm:$0xff] %v8733_v32  ;;  %v2899_v2 = vpop.f32.mrb[80].mxu0  ;;  %4796 = vmatpush1.bf16.msra.mxu1 %v10652_v36 }
 0x329   : > { %v3545_v13 = vpop.f32.mrb[96].mxu1  ;;  %v9191_v33 = vadd.f32 %v2899_v2, %v11784_v35  ;;  %v2901_v44 = vpop.f32.mrb[81].mxu0 }
 0x32a   : > { %v9335_v6 = vadd.f32 %v3545_v13, %v12074_v26  ;;  %v12422_v27 = vpop.f32.mrb[97].mxu1  ;;  %v9192_v46 = vadd.f32 %v2901_v44, %v11787_v14  ;;  %v2903_v37 = vpop.f32.mrb[82].mxu0 }
 0x32b   : > { %14351 = vst [vmem:[#allocation31_spill] sm:$0xff] %v12422_v27  ;;  %v3549_v53 = vpop.f32.mrb[98].mxu1  ;;  %v9193_v21 = vadd.f32 %v2903_v37, %v11784_v35  ;;  %v2905_v2 = vpop.f32.mrb[83].mxu0  ;;  %v12432_v27 = vld [vmem:[%s11320_s8 + $0x258] ss:$12 sps:$4 sm:$0xff]  }
 0x32c   : > { %v8712_v38 = vpack.c.bf16 %v9335_v6, %v9335_v6  ;;  %v9337_v32 = vadd.f32 %v3549_v53, %v12074_v26  ;;  %v12427_v13 = vpop.f32.mrb[99].mxu1  ;;  %v8735_v18 = vpack.c.bf16 %v9192_v46, %v9191_v33  ;;  %v9194_v59 = vadd.f32 %v2905_v2, %v11787_v14  ;;  %v12438_v6 = vld [vmem:[%s11320_s8 + $0x274] ss:$12 sps:$4 sm:$0xff]  }
 0x32d   : > { %14352 = vst [vmem:[#allocation32_spill] sm:$0xff] %v12427_v13  ;;  %4007 = vmatmul.mubr.bf16.gmra.mrb[228].mxu0 %v12432_v27  ;;  %v12456_v13 = vld [vmem:[%s11320_s8 + $0x270] ss:$12 sps:$4 sm:$0xff]  }
 0x32e   : > { %6411 = vst [vmem:[%s11808_s23 + $0x158] sm:$0xf] %v8712_v38  ;;  %v8714_v44 = vpack.c.bf16 %v9337_v32, %v9337_v32  ;;  %4553 = vmatmul.mubr.bf16.gmra.mrb[204].mxu1 %v12053_v19  ;;  %6434 = vst [vmem:[%s11808_s23 + $0x1e0] sm:$0xff] %v8735_v18  ;;  %v8737_v36 = vpack.c.bf16 %v9194_v59, %v9193_v21  ;;  %4016 = vmatprep.mubr.bf16.mxu0 %v12438_v6 }
 0x32f   : > { %4562 = vmatprep.mubr.bf16.mxu1 %v12059_v41 }
 0x330   : > { %6413 = vst [vmem:[%s11808_s23 + $0x164] sm:$0xf] %v8714_v44  ;;  %6436 = vst [vmem:[%s11808_s23 + $0x1ec] sm:$0xff] %v8737_v36  ;;  %v2909_v33 = vpop.f32.mrb[84].mxu0 }
 0x331   : > { %v3555_v46 = vpop.f32.mrb[100].mxu1  ;;  %v9195_v37 = vadd.f32 %v2909_v33, %v11784_v35  ;;  %v2911_v38 = vpop.f32.mrb[85].mxu0 }
 0x332   : > { %v9339_v53 = vadd.f32 %v3555_v46, %v12074_v26  ;;  %v12446_v19 = vpop.f32.mrb[101].mxu1  ;;  %v9196_v18 = vadd.f32 %v2911_v38, %v11787_v14  ;;  %v2913_v21 = vpop.f32.mrb[86].mxu0 }
 0x333   : > { %14353 = vst [vmem:[#allocation33_spill] sm:$0xff] %v12446_v19  ;;  %v3559_v32 = vpop.f32.mrb[102].mxu1  ;;  %v9197_v2 = vadd.f32 %v2913_v21, %v11784_v35  ;;  %v2915_v44 = vpop.f32.mrb[87].mxu0 }
 0x334   : > { %v8716_v41 = vpack.c.bf16 %v9339_v53, %v9339_v53  ;;  %v9341_v59 = vadd.f32 %v3559_v32, %v12074_v26  ;;  %v12451_v36 = vpop.f32.mrb[103].mxu1  ;;  %v8739_v33 = vpack.c.bf16 %v9196_v18, %v9195_v37  ;;  %v9198_v46 = vadd.f32 %v2915_v44, %v11787_v14  ;;  %v12462_v53 = vld [vmem:[%s11320_s8 + $0x28c] ss:$12 sps:$4 sm:$0xff]  }
 0x335   : > { %4017 = vmatmul.mubr.bf16.gmra.mrb[232].mxu0 %v12456_v13 }
 0x336   : > { %6415 = vst [vmem:[%s11808_s23 + $0x170] sm:$0xf] %v8716_v41  ;;  %v8718_v19 = vpack.c.bf16 %v9341_v59, %v9341_v59  ;;  %4563 = vmatmul.mubr.bf16.gmra.mrb[208].mxu1 %v12070_v4  ;;  %6438 = vst [vmem:[%s11808_s23 + $0x1f8] sm:$0xff] %v8739_v33  ;;  %v8741_v35 = vpack.c.bf16 %v9198_v46, %v9197_v2  ;;  %4026 = vmatprep.mubr.bf16.mxu0 %v12462_v53  ;;  %v12476_v2 = vld [vmem:[%s11320_s8 + $0x288] ss:$12 sps:$4 sm:$0xff]  }
 0x337   : > { %4572 = vmatprep.mubr.bf16.mxu1 %v12079_v39  ;;  %v12481_v39 = vld [vmem:[%s11320_s8 + $0x2a4] ss:$12 sps:$4 sm:$0xff]  }
 0x338   : > { %6417 = vst [vmem:[%s11808_s23 + $0x17c] sm:$0xf] %v8718_v19  ;;  %6440 = vst [vmem:[%s11808_s23 + $0x204] sm:$0xff] %v8741_v35 }
 0x339   : > { %v3565_v14 = vpop.f32.mrb[104].mxu1 }
 0x33a   : > { %v9343_v37 = vadd.f32 %v3565_v14, %v12074_v26  ;;  %v12469_v38 = vpop.f32.mrb[105].mxu1 }
 0x33b   : > { %v3569_v18 = vpop.f32.mrb[106].mxu1 }
 0x33c   : > { %v8720_v4 = vpack.c.bf16 %v9343_v37, %v9343_v37  ;;  %v9345_v21 = vadd.f32 %v3569_v18, %v12074_v26  ;;  %v12472_v32 = vpop.f32.mrb[107].mxu1  ;;  %v12494_v37 = vld [vmem:[%s11320_s8 + $0x2a0] ss:$12 sps:$4 sm:$0xff]   ;;  %v10659_v18 = vld [vmem:[#allocation5 + $0x694] ss:$36 sps:$4 sm:$0xff]  }
 0x33d   : > { %4027 = vmatmul.mubr.bf16.gmra.mrb[236].mxu0 %v12476_v2  ;;  %4797 = vmatprep.subr.bf16.mxu1 %v10659_v18 }
 0x33e   : > { %6419 = vst [vmem:[%s11808_s23 + $0x188] sm:$0xf] %v8720_v4  ;;  %v8722_v41 = vpack.c.bf16 %v9345_v21, %v9345_v21  ;;  %4573 = vmatmul.mubr.bf16.gmra.mrb[212].mxu1 %v12096_v24  ;;  %4036 = vmatprep.mubr.bf16.mxu0 %v12481_v39  ;;  %v12499_v4 = vld [vmem:[%s11320_s8 + $0x2bc] ss:$12 sps:$4 sm:$0xff]  }
 0x33f   : > { %4582 = vmatprep.mubr.bf16.mxu1 %v12102_v42  ;;  %v10657_v42 = vld [vmem:[#allocation5 + $0x690] ss:$36 sps:$4 sm:$0xff]  }
 0x340   : > { %6421 = vst [vmem:[%s11808_s23 + $0x194] sm:$0xf] %v8722_v41  ;;  %4798 = vmatpush1.bf16.msra.mxu1 %v10657_v42 }
 0x341   : > { %v3575_v19 = vpop.f32.mrb[108].mxu1 }
 0x342   : > { %v9347_v59 = vadd.f32 %v3575_v19, %v12074_v26  ;;  %v12487_v44 = vpop.f32.mrb[109].mxu1 }
 0x343   : > { %v3579_v33 = vpop.f32.mrb[110].mxu1 }
 0x344   : > { %v8724_v46 = vpack.c.bf16 %v9347_v59, %v9347_v59  ;;  %v9349_v35 = vadd.f32 %v3579_v33, %v12074_v26  ;;  %v12490_v14 = vpop.f32.mrb[111].mxu1 }
 0x345   : > { %4037 = vmatmul.mubr.bf16.gmra.mrb[240].mxu0 %v12494_v37 }
 0x346   : > { %6423 = vst [vmem:[%s11808_s23 + $0x1a0] sm:$0xf] %v8724_v46  ;;  %v8726_v24 = vpack.c.bf16 %v9349_v35, %v9349_v35  ;;  %4583 = vmatmul.mubr.bf16.gmra.mrb[216].mxu1 %v12120_v5  ;;  %4046 = vmatprep.mubr.bf16.mxu0 %v12499_v4 }
 0x347   : > { %4592 = vmatprep.mubr.bf16.mxu1 %v12126_v11  ;;  %v12512_v11 = vld [vmem:[%s11320_s8 + $0x2b8] ss:$12 sps:$4 sm:$0xff]  }
 0x348   : > { %6425 = vst [vmem:[%s11808_s23 + $0x1ac] sm:$0xf] %v8726_v24  ;;  %v12517_v24 = vld [vmem:[%s11320_s8 + $0x2d4] ss:$12 sps:$4 sm:$0xff]  }
 0x349   : > { %v3585_v21 = vpop.f32.mrb[112].mxu1 }
 0x34a   : > { %v9351_v41 = vadd.f32 %v3585_v21, %v12074_v26  ;;  %v12505_v19 = vpop.f32.mrb[113].mxu1 }
 0x34b   : > { %14354 = vst [vmem:[#allocation34_spill] sm:$0xff] %v12505_v19  ;;  %v3589_v5 = vpop.f32.mrb[114].mxu1  ;;  %v12563_v19 = vld [vmem:[%s11320_s8 + $0x8] ss:$12 sps:$4 sm:$0xff]  }
 0x34c   : > { %v8728_v59 = vpack.c.bf16 %v9351_v41, %v9351_v41  ;;  %v9353_v33 = vadd.f32 %v3589_v5, %v12074_v26  ;;  %v12508_v46 = vpop.f32.mrb[115].mxu1 }
 0x34d   : > { %14355 = vst [vmem:[#allocation35_spill] sm:$0xff] %v12508_v46  ;;  %4047 = vmatmul.mubr.bf16.gmra.mrb[244].mxu0 %v12512_v11  ;;  %v12530_v46 = vld [vmem:[%s11320_s8 + $0x2d0] ss:$12 sps:$4 sm:$0xff]  }
 0x34e   : > { %6427 = vst [vmem:[%s11808_s23 + $0x1b8] sm:$0xf] %v8728_v59  ;;  %v8730_v35 = vpack.c.bf16 %v9353_v33, %v9353_v33  ;;  %4593 = vmatmul.mubr.bf16.gmra.mrb[220].mxu1 %v12145_v9  ;;  %4056 = vmatprep.mubr.bf16.mxu0 %v12517_v24 }
 0x34f   : > { %4602 = vmatprep.mubr.bf16.mxu1 %v12151_v29  ;;  %v12535_v29 = vld [vmem:[%s11320_s8 + $0x2ec] ss:$12 sps:$4 sm:$0xff]  }
 0x350   : > { %6429 = vst [vmem:[%s11808_s23 + $0x1c4] sm:$0xf] %v8730_v35 }
 0x351   : > { %v3595_v42 = vpop.f32.mrb[116].mxu1 }
 0x352   : > { %v9355_v18 = vadd.f32 %v3595_v42, %v12074_v26  ;;  %v12523_v21 = vpop.f32.mrb[117].mxu1 }
 0x353   : > { %14356 = vst [vmem:[#allocation36_spill] sm:$0xff] %v12523_v21  ;;  %v3599_v41 = vpop.f32.mrb[118].mxu1  ;;  %v12548_v21 = vld [vmem:[%s11320_s8 + $0x2e8] ss:$12 sps:$4 sm:$0xff]  }
 0x354   : > { %v8732_v5 = vpack.c.bf16 %v9355_v18, %v9355_v18  ;;  %v9357_v59 = vadd.f32 %v3599_v41, %v12074_v26  ;;  %v12526_v33 = vpop.f32.mrb[119].mxu1 }
 0x355   : > { %14357 = vst [vmem:[#allocation37_spill] sm:$0xff] %v12526_v33  ;;  %4057 = vmatmul.mubr.bf16.gmra.mrb[248].mxu0 %v12530_v46 }
 0x356   : > { %6431 = vst [vmem:[%s11808_s23 + $0x1d0] sm:$0xf] %v8732_v5  ;;  %v8734_v9 = vpack.c.bf16 %v9357_v59, %v9357_v59  ;;  %4603 = vmatmul.mubr.bf16.gmra.mrb[224].mxu1 %v12169_v60  ;;  %4066 = vmatprep.mubr.bf16.mxu0 %v12535_v29 }
 0x357   : > { %4612 = vmatprep.mubr.bf16.mxu1 %v12175_v12  ;;  %v14360_v12 = vmov 0  }
 0x358   : > { %6433 = vst [vmem:[%s11808_s23 + $0x1dc] sm:$0xf] %v8734_v9 }
 0x359   : > { %v3605_v35 = vpop.f32.mrb[120].mxu1 }
 0x35a   : > { %v9359_v42 = vadd.f32 %v3605_v35, %v12074_v26  ;;  %v12541_v18 = vpop.f32.mrb[121].mxu1 }
 0x35b   : > { %14358 = vst [vmem:[#allocation38_spill] sm:$0xff] %v12541_v18  ;;  %v3609_v41 = vpop.f32.mrb[122].mxu1 }
 0x35c   : > { %v8736_v5 = vpack.c.bf16 %v9359_v42, %v9359_v42  ;;  %v9361_v59 = vadd.f32 %v3609_v41, %v12074_v26  ;;  %v12544_v33 = vpop.f32.mrb[123].mxu1 }
 0x35d   : > { %14359 = vst [vmem:[#allocation39_spill] sm:$0xff] %v12544_v33  ;;  %4067 = vmatmul.mubr.bf16.gmra.mrb[252].mxu0 %v12548_v21 }
 0x35e   : > { %6435 = vst [vmem:[%s11808_s23 + $0x1e8] sm:$0xf] %v8736_v5  ;;  %v8738_v60 = vpack.c.bf16 %v9361_v59, %v9361_v59  ;;  %4613 = vmatmul.mubr.bf16.gmra.mrb[228].mxu1 %v12193_v23  ;;  %4109 = vmatprep.mubr.bf16.mxu0 %v14360_v12  ;;  %v10645_v5 = vld [vmem:[#allocation5 + $0x20] ss:$36 sps:$4 sm:$0xff]  }
 0x35f   : > { %4622 = vmatprep.mubr.bf16.mxu1 %v12198_v40  ;;  %v12567_v40 = vld [vmem:[#allocation5 + $0x4a0] ss:$36 sps:$4 sm:$0xff]  }
 0x360   : > { %6437 = vst [vmem:[%s11808_s23 + $0x1f4] sm:$0xf] %v8738_v60  ;;  %v10646_v60 = vld [vmem:[#allocation5 + $0x68] ss:$36 sps:$4 sm:$0xff]   ;;  %9015 = vmatprep.subr.bf16.mxu1 %v12567_v40 }
 0x361   : > { %v3615_v9 = vpop.f32.mrb[124].mxu1 }
 0x362   : > { %v9363_v35 = vadd.f32 %v3615_v9, %v12074_v26  ;;  %v12556_v42 = vpop.f32.mrb[125].mxu1 }
 0x363   : > { %v3619_v41 = vpop.f32.mrb[126].mxu1 }
 0x364   : > { %v8740_v59 = vpack.c.bf16 %v9363_v35, %v9363_v35  ;;  %v9365_v33 = vadd.f32 %v3619_v41, %v12074_v26  ;;  %v12559_v18 = vpop.f32.mrb[127].mxu1 }
 0x365   : > { %14361 = vst [vmem:[#allocation40_spill] sm:$0xff] %v12559_v18  ;;  %4110 = vmatmul.mubr.bf16.vlgmr.msra.gmra.mrb[128].mxu0 %v12563_v19  ;;  %v12583_v18 = vld [vmem:[%s11320_s8 + $0x20] ss:$12 sps:$4 sm:$0xff]  }
 0x366   : > { %6439 = vst [vmem:[%s11808_s23 + $0x200] sm:$0xf] %v8740_v59  ;;  %v8742_v23 = vpack.c.bf16 %v9365_v33, %v9365_v33  ;;  %4623 = vmatmul.mubr.bf16.gmra.mrb[232].mxu1 %v12216_v30  ;;  %5137 = vmatpush1.bf16.msra.mxu0 %v10645_v5 }
 0x367   : > { %4119 = vmatprep.mubr.bf16.mxu0 %v14360_v12  ;;  %4632 = vmatprep.mubr.bf16.mxu1 %v12222_v55  ;;  %v10650_v55 = vld [vmem:[#allocation5 + $0xb0] ss:$36 sps:$4 sm:$0xff]  }
 0x368   : > { %6441 = vst [vmem:[%s11808_s23 + $0x20c] sm:$0xf] %v8742_v23  ;;  %5138 = vmatprep.subr.bf16.mxu0 %v14360_v12 }
 0x369   : > { %v3625_v33 = vpop.f32.mrb[128].mxu1 }
 0x36a   : > { %v9367_v9 = vadd.f32 %v3625_v33, %v12074_v26  ;;  %v12575_v30 = vpop.f32.mrb[129].mxu1  ;;  %5139 = vmatpush1.bf16.msra.mxu0 %v10646_v60  ;;  %v10651_v60 = vld [vmem:[#allocation5 + $0xf8] ss:$36 sps:$4 sm:$0xff]  }
 0x36b   : > { %v3629_v35 = vpop.f32.mrb[130].mxu1  ;;  %5140 = vmatprep.subr.bf16.mxu0 %v14360_v12 }
 0x36c   : > { %v8744_v41 = vpack.c.bf16 %v9367_v9, %v9367_v9  ;;  %v9369_v5 = vadd.f32 %v3629_v35, %v12074_v26  ;;  %v12578_v59 = vpop.f32.mrb[131].mxu1 }
 0x36d   : > { %14362 = vst [vmem:[#allocation41_spill] sm:$0xff] %v12578_v59  ;;  %4120 = vmatmul.mubr.bf16.gmra.mrb[132].mxu0 %v12583_v18 }
 0x36e   : > { %6443 = vst [vmem:[%s11808_s23 + $0x218] sm:$0xf] %v8744_v41  ;;  %v8746_v23 = vpack.c.bf16 %v9369_v5, %v9369_v5  ;;  %4633 = vmatmul.mubr.bf16.gmra.mrb[236].mxu1 %v12240_v17  ;;  %4129 = vmatprep.mubr.bf16.mxu0 %v14360_v12 }
 0x36f   : > { %4642 = vmatprep.mubr.bf16.mxu1 %v12246_v25  ;;  %5141 = vmatpush1.bf16.msra.mxu0 %v10650_v55  ;;  %v10655_v25 = vld [vmem:[#allocation5 + $0x140] ss:$36 sps:$4 sm:$0xff]  }
 0x370   : > { %6445 = vst [vmem:[%s11808_s23 + $0x224] sm:$0xf] %v8746_v23  ;;  %5142 = vmatprep.subr.bf16.mxu0 %v14360_v12  ;;  %v12600_v23 = vld [vmem:[%s11320_s8 + $0x38] ss:$12 sps:$4 sm:$0xff]  }
 0x371   : > { %v3635_v33 = vpop.f32.mrb[132].mxu1 }
 0x372   : > { %v9371_v9 = vadd.f32 %v3635_v33, %v12074_v26  ;;  %v12592_v35 = vpop.f32.mrb[133].mxu1 }
 0x373   : > { %v3639_v41 = vpop.f32.mrb[134].mxu1  ;;  %5143 = vmatpush1.bf16.msra.mxu0 %v10651_v60  ;;  %v10656_v60 = vld [vmem:[#allocation5 + $0x188] ss:$36 sps:$4 sm:$0xff]  }
 0x374   : > { %v8748_v5 = vpack.c.bf16 %v9371_v9, %v9371_v9  ;;  %v9373_v17 = vadd.f32 %v3639_v41, %v12074_v26  ;;  %v12595_v59 = vpop.f32.mrb[135].mxu1  ;;  %5144 = vmatprep.subr.bf16.mxu0 %v14360_v12 }
 0x375   : > { %14363 = vst [vmem:[#allocation42_spill] sm:$0xff] %v12595_v59  ;;  %4130 = vmatmul.mubr.bf16.gmra.mrb[136].mxu0 %v12600_v23 }
 0x376   : > { %6447 = vst [vmem:[%s11808_s23 + $0x230] sm:$0xf] %v8748_v5  ;;  %v8750_v55 = vpack.c.bf16 %v9373_v17, %v9373_v17  ;;  %4643 = vmatmul.mubr.bf16.gmra.mrb[240].mxu1 %v12264_v10  ;;  %4139 = vmatprep.mubr.bf16.mxu0 %v14360_v12 }
 0x377   : > { %4652 = vmatprep.mubr.bf16.mxu1 %v12270_v1  ;;  %5145 = vmatpush1.bf16.msra.mxu0 %v10655_v25  ;;  %v10660_v1 = vld [vmem:[#allocation5 + $0x1d0] ss:$36 sps:$4 sm:$0xff]  }
 0x378   : > { %6449 = vst [vmem:[%s11808_s23 + $0x23c] sm:$0xf] %v8750_v55  ;;  %5146 = vmatprep.subr.bf16.mxu0 %v14360_v12  ;;  %v12617_v55 = vld [vmem:[%s11320_s8 + $0x50] ss:$12 sps:$4 sm:$0xff]  }
 0x379   : > { %v3645_v33 = vpop.f32.mrb[136].mxu1 }
 0x37a   : > { %v9375_v9 = vadd.f32 %v3645_v33, %v12074_v26  ;;  %v12609_v41 = vpop.f32.mrb[137].mxu1 }
 0x37b   : > { %v3649_v5 = vpop.f32.mrb[138].mxu1  ;;  %5147 = vmatpush1.bf16.msra.mxu0 %v10656_v60  ;;  %v10661_v60 = vld [vmem:[#allocation5 + $0x218] ss:$36 sps:$4 sm:$0xff]  }
 0x37c   : > { %v8752_v17 = vpack.c.bf16 %v9375_v9, %v9375_v9  ;;  %v9377_v10 = vadd.f32 %v3649_v5, %v12074_v26  ;;  %v12612_v59 = vpop.f32.mrb[139].mxu1  ;;  %5148 = vmatprep.subr.bf16.mxu0 %v14360_v12 }
 0x37d   : > { %14364 = vst [vmem:[#allocation43_spill] sm:$0xff] %v12612_v59  ;;  %4140 = vmatmul.mubr.bf16.gmra.mrb[140].mxu0 %v12617_v55 }
 0x37e   : > { %6451 = vst [vmem:[%s11808_s23 + $0x248] sm:$0xf] %v8752_v17  ;;  %v8754_v25 = vpack.c.bf16 %v9377_v10, %v9377_v10  ;;  %4653 = vmatmul.mubr.bf16.gmra.mrb[244].mxu1 %v12288_v43  ;;  %4149 = vmatprep.mubr.bf16.mxu0 %v14360_v12 }
 0x37f   : > { %4662 = vmatprep.mubr.bf16.mxu1 %v12294_v58  ;;  %5149 = vmatpush1.bf16.msra.mxu0 %v10660_v1  ;;  %v10662_v58 = vld [vmem:[#allocation5 + $0x260] ss:$36 sps:$4 sm:$0xff]  }
 0x380   : > { %6453 = vst [vmem:[%s11808_s23 + $0x254] sm:$0xf] %v8754_v25  ;;  %5150 = vmatprep.subr.bf16.mxu0 %v14360_v12  ;;  %v12634_v25 = vld [vmem:[%s11320_s8 + $0x68] ss:$12 sps:$4 sm:$0xff]  }
 0x381   : > { %v3655_v33 = vpop.f32.mrb[140].mxu1 }
 0x382   : > { %v9379_v9 = vadd.f32 %v3655_v33, %v12074_v26  ;;  %v12626_v5 = vpop.f32.mrb[141].mxu1 }
 0x383   : > { %v3659_v17 = vpop.f32.mrb[142].mxu1  ;;  %5151 = vmatpush1.bf16.msra.mxu0 %v10661_v60  ;;  %v10664_v60 = vld [vmem:[#allocation5 + $0x2a8] ss:$36 sps:$4 sm:$0xff]  }
 0x384   : > { %v8756_v10 = vpack.c.bf16 %v9379_v9, %v9379_v9  ;;  %v9381_v43 = vadd.f32 %v3659_v17, %v12074_v26  ;;  %v12629_v59 = vpop.f32.mrb[143].mxu1  ;;  %5152 = vmatprep.subr.bf16.mxu0 %v14360_v12 }
 0x385   : > { %14365 = vst [vmem:[#allocation44_spill] sm:$0xff] %v12629_v59  ;;  %4150 = vmatmul.mubr.bf16.gmra.mrb[144].mxu0 %v12634_v25 }
 0x386   : > { %6455 = vst [vmem:[%s11808_s23 + $0x260] sm:$0xf] %v8756_v10  ;;  %v8758_v1 = vpack.c.bf16 %v9381_v43, %v9381_v43  ;;  %4663 = vmatmul.mubr.bf16.gmra.mrb[248].mxu1 %v12312_v57  ;;  %4159 = vmatprep.mubr.bf16.mxu0 %v14360_v12 }
 0x387   : > { %4672 = vmatprep.mubr.bf16.mxu1 %v12318_v51  ;;  %5153 = vmatpush1.bf16.msra.mxu0 %v10662_v58  ;;  %v10665_v51 = vld [vmem:[#allocation5 + $0x2f0] ss:$36 sps:$4 sm:$0xff]  }
 0x388   : > { %6457 = vst [vmem:[%s11808_s23 + $0x26c] sm:$0xf] %v8758_v1  ;;  %5154 = vmatprep.subr.bf16.mxu0 %v14360_v12  ;;  %v12651_v1 = vld [vmem:[%s11320_s8 + $0x80] ss:$12 sps:$4 sm:$0xff]  }
 0x389   : > { %v3665_v33 = vpop.f32.mrb[144].mxu1 }
 0x38a   : > { %v9383_v9 = vadd.f32 %v3665_v33, %v12074_v26  ;;  %v12643_v17 = vpop.f32.mrb[145].mxu1 }
 0x38b   : > { %14366 = vst [vmem:[#allocation45_spill] sm:$0xff] %v12643_v17  ;;  %v3669_v10 = vpop.f32.mrb[146].mxu1  ;;  %5155 = vmatpush1.bf16.msra.mxu0 %v10664_v60  ;;  %v12667_v17 = vld [vmem:[%s11320_s8 + $0x98] ss:$12 sps:$4 sm:$0xff]  }
 0x38c   : > { %v8760_v43 = vpack.c.bf16 %v9383_v9, %v9383_v9  ;;  %v9385_v57 = vadd.f32 %v3669_v10, %v12074_v26  ;;  %v12646_v59 = vpop.f32.mrb[147].mxu1  ;;  %5156 = vmatprep.subr.bf16.mxu0 %v14360_v12 }
 0x38d   : > { %14367 = vst [vmem:[#allocation46_spill] sm:$0xff] %v12646_v59  ;;  %4160 = vmatmul.mubr.bf16.gmra.mrb[148].mxu0 %v12651_v1 }
 0x38e   : > { %6459 = vst [vmem:[%s11808_s23 + $0x278] sm:$0xf] %v8760_v43  ;;  %v8762_v58 = vpack.c.bf16 %v9385_v57, %v9385_v57  ;;  %4673 = vmatmul.mubr.bf16.gmra.mrb[252].mxu1 %v12336_v0  ;;  %4169 = vmatprep.mubr.bf16.mxu0 %v14360_v12 }
 0x38f   : > { %4682 = vmatprep.mubr.bf16.mxu1 %v12342_v56  ;;  %5157 = vmatpush1.bf16.msra.mxu0 %v10665_v51  ;;  %v10667_v56 = vld [vmem:[#allocation5 + $0x338] ss:$36 sps:$4 sm:$0xff]  }
 0x390   : > { %6461 = vst [vmem:[%s11808_s23 + $0x284] sm:$0xf] %v8762_v58  ;;  %5158 = vmatprep.subr.bf16.mxu0 %v14360_v12 }
 0x391   : > { %v3675_v60 = vpop.f32.mrb[148].mxu1 }
 0x392   : > { %v9387_v33 = vadd.f32 %v3675_v60, %v12074_v26  ;;  %v12660_v9 = vpop.f32.mrb[149].mxu1 }
 0x393   : > { %v3679_v10 = vpop.f32.mrb[150].mxu1  ;;  %5159 = vmatpush1.bf16.msra.mxu0 %v10667_v56 }
 0x394   : > { %v8764_v43 = vpack.c.bf16 %v9387_v33, %v9387_v33  ;;  %v9389_v57 = vadd.f32 %v3679_v10, %v12074_v26  ;;  %v12663_v59 = vpop.f32.mrb[151].mxu1  ;;  %5160 = vmatprep.subr.bf16.mxu0 %v14360_v12 }
 0x395   : > { %4170 = vmatmul.mubr.bf16.gmra.mrb[152].mxu0 %v12667_v17 }
 0x396   : > { %6463 = vst [vmem:[%s11808_s23 + $0x290] sm:$0xf] %v8764_v43  ;;  %v8766_v0 = vpack.c.bf16 %v9389_v57, %v9389_v57  ;;  %4683 = vmatmul.mubr.bf16.gmra.mrb[0].mxu1 %v12360_v50  ;;  %4179 = vmatprep.mubr.bf16.mxu0 %v14360_v12 }
 0x397   : > { %4692 = vmatprep.mubr.bf16.mxu1 %v12366_v49  ;;  %v12683_v49 = vld [vmem:[%s11320_s8 + $0xb0] ss:$12 sps:$4 sm:$0xff]  }
 0x398   : > { %6465 = vst [vmem:[%s11808_s23 + $0x29c] sm:$0xf] %v8766_v0 }
 0x399   : > { %v3685_v51 = vpop.f32.mrb[152].mxu1 }
 0x39a   : > { %v9391_v58 = vadd.f32 %v3685_v51, %v12074_v26  ;;  %v12676_v60 = vpop.f32.mrb[153].mxu1 }
 0x39b   : > { %v3689_v33 = vpop.f32.mrb[154].mxu1 }
 0x39c   : > { %v8768_v10 = vpack.c.bf16 %v9391_v58, %v9391_v58  ;;  %v9393_v50 = vadd.f32 %v3689_v33, %v12074_v26  ;;  %v12679_v43 = vpop.f32.mrb[155].mxu1 }
 0x39d   : > { %14368 = vst [vmem:[#allocation47_spill] sm:$0xff] %v12679_v43  ;;  %4180 = vmatmul.mubr.bf16.gmra.mrb[156].mxu0 %v12683_v49 }
 0x39e   : > { %6467 = vst [vmem:[%s11808_s23 + $0x2a8] sm:$0xf] %v8768_v10  ;;  %v8770_v57 = vpack.c.bf16 %v9393_v50, %v9393_v50  ;;  %4693 = vmatmul.mubr.bf16.gmra.mrb[4].mxu1 %v12384_v54  ;;  %4189 = vmatprep.mubr.bf16.mxu0 %v14360_v12  ;;  %v12698_v54 = vld [vmem:[%s11320_s8 + $0xc8] ss:$12 sps:$4 sm:$0xff]  }
 0x39f   : > { %4702 = vmatprep.mubr.bf16.mxu1 %v12390_v47  ;;  %v10668_v47 = vld [vmem:[#allocation5 + $0x380] ss:$36 sps:$4 sm:$0xff]  }
 0x3a0   : > { %6469 = vst [vmem:[%s11808_s23 + $0x2b4] sm:$0xf] %v8770_v57  ;;  %5161 = vmatpush1.bf16.msra.mxu0 %v10668_v47 }
 0x3a1   : > { %v3695_v0 = vpop.f32.mrb[156].mxu1  ;;  %5162 = vmatprep.subr.bf16.mxu0 %v14360_v12 }
 0x3a2   : > { %v9395_v56 = vadd.f32 %v3695_v0, %v12074_v26  ;;  %v12691_v51 = vpop.f32.mrb[157].mxu1 }
 0x3a3   : > { %14369 = vst [vmem:[#allocation48_spill] sm:$0xff] %v12691_v51  ;;  %v3699_v58 = vpop.f32.mrb[158].mxu1 }
 0x3a4   : > { %v8772_v33 = vpack.c.bf16 %v9395_v56, %v9395_v56  ;;  %v9397_v10 = vadd.f32 %v3699_v58, %v12074_v26  ;;  %v12694_v50 = vpop.f32.mrb[159].mxu1 }
 0x3a5   : > { %14370 = vst [vmem:[#allocation49_spill] sm:$0xff] %v12694_v50  ;;  %4190 = vmatmul.mubr.bf16.gmra.mrb[160].mxu0 %v12698_v54 }
 0x3a6   : > { %6471 = vst [vmem:[%s11808_s23 + $0x2c0] sm:$0xf] %v8772_v33  ;;  %v8774_v43 = vpack.c.bf16 %v9397_v10, %v9397_v10  ;;  %4703 = vmatmul.mubr.bf16.gmra.mrb[8].mxu1 %v12408_v3  ;;  %4199 = vmatprep.mubr.bf16.mxu0 %v14360_v12 }
 0x3a7   : > { %4712 = vmatprep.mubr.bf16.mxu1 %v12414_v63  ;;  %v12714_v63 = vld [vmem:[%s11320_s8 + $0xe0] ss:$12 sps:$4 sm:$0xff]  }
 0x3a8   : > { %6473 = vst [vmem:[%s11808_s23 + $0x2cc] sm:$0xf] %v8774_v43 }
 0x3a9   : > { %v3705_v57 = vpop.f32.mrb[160].mxu1 }
 0x3aa   : > { %v9399_v0 = vadd.f32 %v3705_v57, %v12074_v26  ;;  %v12707_v56 = vpop.f32.mrb[161].mxu1 }
 0x3ab   : > { %14371 = vst [vmem:[#allocation50_spill] sm:$0xff] %v12707_v56  ;;  %v3709_v58 = vpop.f32.mrb[162].mxu1 }
 0x3ac   : > { %v8776_v33 = vpack.c.bf16 %v9399_v0, %v9399_v0  ;;  %v9401_v3 = vadd.f32 %v3709_v58, %v12074_v26  ;;  %v12710_v10 = vpop.f32.mrb[163].mxu1 }
 0x3ad   : > { %14372 = vst [vmem:[#allocation51_spill] sm:$0xff] %v12710_v10  ;;  %4200 = vmatmul.mubr.bf16.gmra.mrb[164].mxu0 %v12714_v63  ;;  %v12729_v10 = vld [vmem:[%s11320_s8 + $0xf8] ss:$12 sps:$4 sm:$0xff]  }
 0x3ae   : > { %6475 = vst [vmem:[%s11808_s23 + $0x2d8] sm:$0xf] %v8776_v33  ;;  %v8778_v50 = vpack.c.bf16 %v9401_v3, %v9401_v3  ;;  %4713 = vmatmul.mubr.bf16.gmra.mrb[12].mxu1 %v12432_v27  ;;  %4209 = vmatprep.mubr.bf16.mxu0 %v14360_v12 }
 0x3af   : > { %4722 = vmatprep.mubr.bf16.mxu1 %v12438_v6  ;;  %v10670_v6 = vld [vmem:[#allocation5 + $0x3c8] ss:$36 sps:$4 sm:$0xff]  }
 0x3b0   : > { %6477 = vst [vmem:[%s11808_s23 + $0x2e4] sm:$0xf] %v8778_v50  ;;  %5163 = vmatpush1.bf16.msra.mxu0 %v10670_v6  ;;  %v12803_v50 = vld [vmem:[%s11320_s8 + $0x1e8] ss:$12 sps:$4 sm:$0xff]  }
 0x3b1   : > { %v3715_v43 = vpop.f32.mrb[164].mxu1  ;;  %5164 = vmatprep.subr.bf16.mxu0 %v14360_v12 }
 0x3b2   : > { %v9403_v47 = vadd.f32 %v3715_v43, %v12074_v26  ;;  %v12722_v57 = vpop.f32.mrb[165].mxu1  ;;  %v12824_v43 = vld [vmem:[%s11320_s8 + $0x230] ss:$12 sps:$4 sm:$0xff]  }
 0x3b3   : > { %14373 = vst [vmem:[#allocation52_spill] sm:$0xff] %v12722_v57  ;;  %v3719_v0 = vpop.f32.mrb[166].mxu1 }
 0x3b4   : > { %v8780_v58 = vpack.c.bf16 %v9403_v47, %v9403_v47  ;;  %v9405_v33 = vadd.f32 %v3719_v0, %v12074_v26  ;;  %v12725_v3 = vpop.f32.mrb[167].mxu1  ;;  %v12738_v26 = vld [vmem:[%s11320_s8 + $0x110] ss:$12 sps:$4 sm:$0xff]   ;;  %v669_v47 = vsub.s32 4, %v11771_v31  ;;  %v12846_v0 = vld [vmem:[#allocation7] sm:$0xff] }
 0x3b5   : > { %14374 = vst [vmem:[#allocation53_spill] sm:$0xff] %v12725_v3  ;;  %4210 = vmatmul.mubr.bf16.gmra.mrb[168].mxu0 %v12729_v10 }
 0x3b6   : > { %6479 = vst [vmem:[%s11808_s23 + $0x2f0] sm:$0xf] %v8780_v58  ;;  %v8782_v27 = vpack.c.bf16 %v9405_v33, %v9405_v33  ;;  %4723 = vmatmul.mubr.bf16.gmra.mrb[16].mxu1 %v12456_v13  ;;  %4219 = vmatprep.mubr.bf16.mxu0 %v14360_v12  ;;  %v12745_v13 = vld [vmem:[%s11320_s8 + $0x128] ss:$12 sps:$4 sm:$0xff]   ;;  %v12852_v33 = vld [vmem:[%s11320_s8 + $0x278] ss:$12 sps:$4 sm:$0xff]  }
 0x3b7   : > { %4732 = vmatprep.mubr.bf16.mxu1 %v12462_v53  ;;  %v10671_v53 = vld [vmem:[#allocation5 + $0x410] ss:$36 sps:$4 sm:$0xff]  }
 0x3b8   : > { %6481 = vst [vmem:[%s11808_s23 + $0x2fc] sm:$0xf] %v8782_v27  ;;  %5165 = vmatpush1.bf16.msra.mxu0 %v10671_v53 }
 0x3b9   : > { %5166 = vmatprep.subr.bf16.mxu0 %v14360_v12 }
 0x3bd   : > { %4220 = vmatmul.mubr.bf16.gmra.mrb[172].mxu0 %v12738_v26 }
 0x3be   : > { %4733 = vmatmul.mubr.bf16.gmra.mrb[20].mxu1 %v12476_v2  ;;  %4229 = vmatprep.mubr.bf16.mxu0 %v14360_v12  ;;  %v12753_v2 = vld [vmem:[%s11320_s8 + $0x140] ss:$12 sps:$4 sm:$0xff]  }
 0x3bf   : > { %4742 = vmatprep.mubr.bf16.mxu1 %v12481_v39  ;;  %v12760_v39 = vld [vmem:[%s11320_s8 + $0x158] ss:$12 sps:$4 sm:$0xff]  }
 0x3c5   : > { %4230 = vmatmul.mubr.bf16.gmra.mrb[176].mxu0 %v12745_v13 }
 0x3c6   : > { %4743 = vmatmul.mubr.bf16.gmra.mrb[24].mxu1 %v12494_v37  ;;  %4239 = vmatprep.mubr.bf16.mxu0 %v14360_v12  ;;  %v10673_v37 = vld [vmem:[#allocation5 + $0x458] ss:$36 sps:$4 sm:$0xff]  }
 0x3c7   : > { %4752 = vmatprep.mubr.bf16.mxu1 %v12499_v4  ;;  %5167 = vmatpush1.bf16.msra.mxu0 %v10673_v37  ;;  %v12767_v4 = vld [vmem:[%s11320_s8 + $0x170] ss:$12 sps:$4 sm:$0xff]  }
 0x3cd   : > { %4240 = vmatmul.mubr.bf16.gmra.mrb[180].mxu0 %v12753_v2 }
 0x3ce   : > { %4753 = vmatmul.mubr.bf16.gmra.mrb[28].mxu1 %v12512_v11  ;;  %4249 = vmatprep.mubr.bf16.mxu0 %v14360_v12  ;;  %v10666_v11 = vld [vmem:[#allocation5 + $0x4e8] ss:$36 sps:$4 sm:$0xff]  }
 0x3cf   : > { %4762 = vmatprep.mubr.bf16.mxu1 %v12517_v24  ;;  %v12774_v24 = vld [vmem:[%s11320_s8 + $0x188] ss:$12 sps:$4 sm:$0xff]  }
 0x3d5   : > { %4250 = vmatmul.mubr.bf16.gmra.mrb[184].mxu0 %v12760_v39 }
 0x3d6   : > { %4763 = vmatmul.mubr.bf16.gmra.mrb[32].mxu1 %v12530_v46  ;;  %4259 = vmatprep.mubr.bf16.mxu0 %v14360_v12  ;;  %v10669_v46 = vld [vmem:[#allocation5 + $0x530] ss:$36 sps:$4 sm:$0xff]  }
 0x3d7   : > { %4772 = vmatprep.mubr.bf16.mxu1 %v12535_v29  ;;  %v12782_v29 = vld [vmem:[%s11320_s8 + $0x1a0] ss:$12 sps:$4 sm:$0xff]  }
 0x3dd   : > { %4260 = vmatmul.mubr.bf16.gmra.mrb[188].mxu0 %v12767_v4 }
 0x3de   : > { %4773 = vmatmul.mubr.bf16.gmra.mrb[36].mxu1 %v12548_v21  ;;  %4269 = vmatprep.mubr.bf16.mxu0 %v14360_v12  ;;  %v10672_v21 = vld [vmem:[#allocation5 + $0x578] ss:$36 sps:$4 sm:$0xff]  }
 0x3df   : > { %4815 = vmatprep.mubr.bf16.mxu1 %v14360_v12 }
 0x3e5   : > { %4270 = vmatmul.mubr.bf16.gmra.mrb[192].mxu0 %v12774_v24 }
 0x3e6   : > { %4816 = vmatmul.mubr.bf16.vlgmr.msra.gmra.mrb[168].mxu1 %v12563_v19  ;;  %4279 = vmatprep.mubr.bf16.mxu0 %v14360_v12  ;;  %v10674_v19 = vld [vmem:[#allocation5 + $0x5c0] ss:$36 sps:$4 sm:$0xff]  }
 0x3e7   : > { %9016 = vmatpush3.bf16.msra.mxu1 %v12567_v40  ;;  %4825 = vmatprep.mubr.bf16.mxu1 %v14360_v12  ;;  %v12789_v40 = vld [vmem:[%s11320_s8 + $0x1b8] ss:$12 sps:$4 sm:$0xff]  }
 0x3e8   : > { %9017 = vmatprep.subr.bf16.mxu1 %v10666_v11 }
 0x3eb   : > { %9018 = vmatpush3.bf16.msra.mxu1 %v10666_v11 }
 0x3ec   : > { %9019 = vmatprep.subr.bf16.mxu1 %v10669_v46 }
 0x3ed   : > { %4280 = vmatmul.mubr.bf16.gmra.mrb[196].mxu0 %v12782_v29 }
 0x3ee   : > { %4826 = vmatmul.mubr.bf16.gmra.mrb[172].mxu1 %v12583_v18  ;;  %4289 = vmatprep.mubr.bf16.mxu0 %v14360_v12  ;;  %v12796_v18 = vld [vmem:[%s11320_s8 + $0x1d0] ss:$12 sps:$4 sm:$0xff]  }
 0x3ef   : > { %4835 = vmatprep.mubr.bf16.mxu1 %v14360_v12  ;;  %9020 = vmatpush3.bf16.msra.mxu1 %v10669_v46 }
 0x3f0   : > { %9021 = vmatprep.subr.bf16.mxu1 %v10672_v21 }
 0x3f3   : > { %9022 = vmatpush3.bf16.msra.mxu1 %v10672_v21 }
 0x3f4   : > { %9023 = vmatprep.subr.bf16.mxu1 %v10674_v19 }
 0x3f5   : > { %4290 = vmatmul.mubr.bf16.gmra.mrb[200].mxu0 %v12789_v40 }
 0x3f6   : > { %4836 = vmatmul.mubr.bf16.gmra.mrb[176].mxu1 %v12600_v23  ;;  %4299 = vmatprep.mubr.bf16.mxu0 %v14360_v12  ;;  %v10675_v23 = vld [vmem:[#allocation5 + $0x608] ss:$36 sps:$4 sm:$0xff]  }
 0x3f7   : > { %4845 = vmatprep.mubr.bf16.mxu1 %v14360_v12  ;;  %9024 = vmatpush3.bf16.msra.mxu1 %v10674_v19 }
 0x3f8   : > { %9025 = vmatprep.subr.bf16.mxu1 %v10675_v23 }
 0x3fb   : > { %9026 = vmatpush3.bf16.msra.mxu1 %v10675_v23 }
 0x3fd   : > { %4300 = vmatmul.mubr.bf16.gmra.mrb[204].mxu0 %v12796_v18 }
 0x3fe   : > { %4846 = vmatmul.mubr.bf16.gmra.mrb[180].mxu1 %v12617_v55  ;;  %4309 = vmatprep.mubr.bf16.mxu0 %v14360_v12  ;;  %v12810_v55 = vld [vmem:[%s11320_s8 + $0x200] ss:$12 sps:$4 sm:$0xff]  }
 0x3ff   : > { %4855 = vmatprep.mubr.bf16.mxu1 %v14360_v12 }
 0x405   : > { %4310 = vmatmul.mubr.bf16.gmra.mrb[208].mxu0 %v12803_v50 }
 0x406   : > { %4856 = vmatmul.mubr.bf16.gmra.mrb[184].mxu1 %v12634_v25  ;;  %4319 = vmatprep.mubr.bf16.mxu0 %v14360_v12  ;;  %v12817_v25 = vld [vmem:[%s11320_s8 + $0x218] ss:$12 sps:$4 sm:$0xff]  }
 0x407   : > { %4865 = vmatprep.mubr.bf16.mxu1 %v14360_v12 }
 0x40d   : > { %4320 = vmatmul.mubr.bf16.gmra.mrb[212].mxu0 %v12810_v55 }
 0x40e   : > { %4866 = vmatmul.mubr.bf16.gmra.mrb[188].mxu1 %v12651_v1  ;;  %4329 = vmatprep.mubr.bf16.mxu0 %v14360_v12  ;;  %v12831_v1 = vld [vmem:[%s11320_s8 + $0x248] ss:$12 sps:$4 sm:$0xff]  }
 0x40f   : > { %4875 = vmatprep.mubr.bf16.mxu1 %v14360_v12 }
 0x415   : > { %4330 = vmatmul.mubr.bf16.gmra.mrb[216].mxu0 %v12817_v25 }
 0x416   : > { %4876 = vmatmul.mubr.bf16.gmra.mrb[192].mxu1 %v12667_v17  ;;  %4339 = vmatprep.mubr.bf16.mxu0 %v14360_v12  ;;  %v10676_v17 = vld [vmem:[#allocation5 + $0x650] ss:$36 sps:$4 sm:$0xff]  }
 0x417   : > { %4885 = vmatprep.mubr.bf16.mxu1 %v14360_v12  ;;  %9027 = vmatprep.subr.bf16.mxu1 %v10676_v17 }
 0x418   : > { %9028 = vmatpush3.bf16.msra.mxu1 %v10676_v17 }
 0x41d   : > { %4340 = vmatmul.mubr.bf16.gmra.mrb[220].mxu0 %v12824_v43 }
 0x41e   : > { %4886 = vmatmul.mubr.bf16.gmra.mrb[196].mxu1 %v12683_v49  ;;  %4349 = vmatprep.mubr.bf16.mxu0 %v14360_v12  ;;  %v12838_v49 = vld [vmem:[%s11320_s8 + $0x260] ss:$12 sps:$4 sm:$0xff]  }
 0x41f   : > { %4895 = vmatprep.mubr.bf16.mxu1 %v14360_v12 }
 0x425   : > { %4350 = vmatmul.mubr.bf16.gmra.mrb[224].mxu0 %v12831_v1 }
 0x426   : > { %4896 = vmatmul.mubr.bf16.gmra.mrb[200].mxu1 %v12698_v54  ;;  %4359 = vmatprep.mubr.bf16.mxu0 %v14360_v12  ;;  %v665_v54 = vsub.s32 3, %v11771_v31 }
 0x427   : > { %4905 = vmatprep.mubr.bf16.mxu1 %v14360_v12 }
 0x428   : > { %v12849_v58 = vrot.slane %v12846_v0, %v665_v54 }
 0x42a   : > { %v9280_v6 = vadd.f32 %v12085_v62, %v12849_v58  ;;  %v12876_v62 = vld [vmem:[%s11320_s8 + $0x290] ss:$12 sps:$4 sm:$0xff]   ;;  %v9284_v17 = vadd.f32 %v12109_v61, %v12849_v58 }
 0x42b   : > { %v10677_v61 = vld [vmem:[#allocation5 + $0x698] ss:$36 sps:$4 sm:$0xff]  }
 0x42c   : > { %9029 = vmatprep.subr.bf16.mxu1 %v10677_v61 }
 0x42d   : > { %4360 = vmatmul.mubr.bf16.gmra.mrb[228].mxu0 %v12838_v49  ;;  %9030 = vmatpush3.bf16.msra.mxu1 %v10677_v61 }
 0x42e   : > { %4906 = vmatmul.mubr.bf16.gmra.mrb[204].mxu1 %v12714_v63  ;;  %4369 = vmatprep.mubr.bf16.mxu0 %v14360_v12  ;;  %v12857_v63 = vrot.slane %v12846_v0, %v669_v47 }
 0x42f   : > { %4915 = vmatprep.mubr.bf16.mxu1 %v14360_v12 }
 0x435   : > { %4370 = vmatmul.mubr.bf16.gmra.mrb[232].mxu0 %v12852_v33 }
 0x436   : > { %4916 = vmatmul.mubr.bf16.gmra.mrb[208].mxu1 %v12729_v10  ;;  %4379 = vmatprep.mubr.bf16.mxu0 %v14360_v12  ;;  %v9282_v10 = vadd.f32 %v12090_v15, %v12849_v58 }
 0x437   : > { %4925 = vmatprep.mubr.bf16.mxu1 %v14360_v12 }
 0x438   : > { %v4111_v27 = vpop.f32.mrb[128].mxu0 }
 0x439   : > { %v9407_v53 = vadd.f32 %v4111_v27, %v12857_v63  ;;  %v12865_v37 = vpop.f32.mrb[129].mxu0 }
 0x43a   : > { %v4115_v11 = vpop.f32.mrb[130].mxu0 }
 0x43b   : > { %v8783_v46 = vpack.c.bf16 %v9407_v53, %v9280_v6  ;;  %v9409_v21 = vadd.f32 %v4115_v11, %v12857_v63  ;;  %v12870_v19 = vpop.f32.mrb[131].mxu0  ;;  %v9286_v6 = vadd.f32 %v12114_v22, %v12849_v58 }
 0x43d   : > { %7634 = vst [vmem:[%s12872_s27] sm:$0xff] %v8783_v46  ;;  %v8786_v23 = vpack.c.bf16 %v9409_v21, %v9282_v10  ;;  %4380 = vmatmul.mubr.bf16.gmra.mrb[236].mxu0 %v12876_v62  ;;  %v12895_v46 = vld [vmem:[%s11320_s8 + $0x2a8] ss:$12 sps:$4 sm:$0xff]   ;;  %v9288_v21 = vadd.f32 %v12133_v16, %v12849_v58  ;;  %v12914_v16 = vld [vmem:[%s11320_s8 + $0x2c0] ss:$12 sps:$4 sm:$0xff]  }
 0x43e   : > { %4926 = vmatmul.mubr.bf16.gmra.mrb[212].mxu1 %v12738_v26  ;;  %4389 = vmatprep.mubr.bf16.mxu0 %v14360_v12 }
 0x43f   : > { %4935 = vmatprep.mubr.bf16.mxu1 %v14360_v12  ;;  %7637 = vst [vmem:[%s12872_s27 + $0x18] sm:$0xff] %v8786_v23 }
 0x440   : > { %v4121_v15 = vpop.f32.mrb[132].mxu0 }
 0x441   : > { %v9411_v54 = vadd.f32 %v4121_v15, %v12857_v63  ;;  %v12886_v47 = vpop.f32.mrb[133].mxu0 }
 0x442   : > { %v4125_v27 = vpop.f32.mrb[134].mxu0 }
 0x443   : > { %v8789_v53 = vpack.c.bf16 %v9411_v54, %v9284_v17  ;;  %v9413_v26 = vadd.f32 %v4125_v27, %v12857_v63  ;;  %v12891_v11 = vpop.f32.mrb[135].mxu0 }
 0x445   : > { %7640 = vst [vmem:[%s12872_s27 + $0x30] sm:$0xff] %v8789_v53  ;;  %v8792_v10 = vpack.c.bf16 %v9413_v26, %v9286_v6  ;;  %4390 = vmatmul.mubr.bf16.gmra.mrb[240].mxu0 %v12895_v46  ;;  %v9292_v26 = vadd.f32 %v12158_v34, %v12849_v58 }
 0x446   : > { %4936 = vmatmul.mubr.bf16.gmra.mrb[216].mxu1 %v12745_v13  ;;  %4399 = vmatprep.mubr.bf16.mxu0 %v14360_v12  ;;  %v9290_v13 = vadd.f32 %v12138_v48, %v12849_v58 }
 0x447   : > { %4945 = vmatprep.mubr.bf16.mxu1 %v14360_v12  ;;  %7643 = vst [vmem:[%s12872_s27 + $0x48] sm:$0xff] %v8792_v10 }
 0x448   : > { %v4131_v22 = vpop.f32.mrb[136].mxu0 }
 0x449   : > { %v9415_v23 = vadd.f32 %v4131_v22, %v12857_v63  ;;  %v12905_v15 = vpop.f32.mrb[137].mxu0 }
 0x44a   : > { %v4135_v17 = vpop.f32.mrb[138].mxu0 }
 0x44b   : > { %v8795_v54 = vpack.c.bf16 %v9415_v23, %v9288_v21  ;;  %v9417_v27 = vadd.f32 %v4135_v17, %v12857_v63  ;;  %v12910_v6 = vpop.f32.mrb[139].mxu0  ;;  %v9294_v21 = vadd.f32 %v12163_v8, %v12849_v58  ;;  %v9296_v8 = vadd.f32 %v12182_v52, %v12849_v58  ;;  %v10785_v52 = vld [vmem:[%s11320_s8 + $0x4] ss:$12 sps:$4 sm:$0xff]  }
 0x44d   : > { %7646 = vst [vmem:[%s12872_s27 + $0x60] sm:$0xff] %v8795_v54  ;;  %v8798_v53 = vpack.c.bf16 %v9417_v27, %v9290_v13  ;;  %4400 = vmatmul.mubr.bf16.gmra.mrb[244].mxu0 %v12914_v16  ;;  %v12933_v54 = vld [vmem:[%s11320_s8 + $0x2d8] ss:$12 sps:$4 sm:$0xff]  }
 0x44e   : > { %4946 = vmatmul.mubr.bf16.gmra.mrb[220].mxu1 %v12753_v2  ;;  %4409 = vmatprep.mubr.bf16.mxu0 %v14360_v12 }
 0x44f   : > { %4955 = vmatprep.mubr.bf16.mxu1 %v14360_v12  ;;  %7649 = vst [vmem:[%s12872_s27 + $0x78] sm:$0xff] %v8798_v53 }
 0x450   : > { %v4141_v48 = vpop.f32.mrb[140].mxu0 }
 0x451   : > { %v9419_v10 = vadd.f32 %v4141_v48, %v12857_v63  ;;  %v12924_v61 = vpop.f32.mrb[141].mxu0 }
 0x452   : > { %v4145_v22 = vpop.f32.mrb[142].mxu0 }
 0x453   : > { %v8801_v23 = vpack.c.bf16 %v9419_v10, %v9292_v26  ;;  %v9421_v2 = vadd.f32 %v4145_v22, %v12857_v63  ;;  %v12929_v17 = vpop.f32.mrb[143].mxu0  ;;  %v9298_v26 = vadd.f32 %v12187_v45, %v12849_v58 }
 0x455   : > { %7652 = vst [vmem:[%s12872_s27 + $0x90] sm:$0xff] %v8801_v23  ;;  %v8804_v13 = vpack.c.bf16 %v9421_v2, %v9294_v21  ;;  %4410 = vmatmul.mubr.bf16.gmra.mrb[248].mxu0 %v12933_v54  ;;  %v12952_v23 = vld [vmem:[%s11320_s8 + $0x2f0] ss:$12 sps:$4 sm:$0xff]   ;;  %v9300_v2 = vadd.f32 %v12206_v7, %v12849_v58  ;;  %v10786_v7 = vld [vmem:[%s11320_s8] ss:$12 sps:$4 sm:$0xff]  }
 0x456   : > { %4956 = vmatmul.mubr.bf16.gmra.mrb[224].mxu1 %v12760_v39  ;;  %4419 = vmatprep.mubr.bf16.mxu0 %v14360_v12 }
 0x457   : > { %4965 = vmatprep.mubr.bf16.mxu1 %v14360_v12  ;;  %7655 = vst [vmem:[%s12872_s27 + $0xa8] sm:$0xff] %v8804_v13 }
 0x458   : > { %v4151_v34 = vpop.f32.mrb[144].mxu0 }
 0x459   : > { %v9423_v27 = vadd.f32 %v4151_v34, %v12857_v63  ;;  %v12943_v53 = vpop.f32.mrb[145].mxu0 }
 0x45a   : > { %v4155_v48 = vpop.f32.mrb[146].mxu0 }
 0x45b   : > { %v8807_v39 = vpack.c.bf16 %v9423_v27, %v9296_v8  ;;  %v9425_v10 = vadd.f32 %v4155_v48, %v12857_v63  ;;  %v12948_v22 = vpop.f32.mrb[147].mxu0  ;;  %v14375_v27 = vld [vmem:[#allocation16_spill] sm:$0xff] }
 0x45d   : > { %7658 = vst [vmem:[%s12872_s27 + $0xc0] sm:$0xff] %v8807_v39  ;;  %v8810_v21 = vpack.c.bf16 %v9425_v10, %v9298_v26  ;;  %4420 = vmatmul.mubr.bf16.gmra.mrb[252].mxu0 %v12952_v23 }
 0x45e   : > { %4966 = vmatmul.mubr.bf16.gmra.mrb[228].mxu1 %v12767_v4  ;;  %5168 = vmatprep.mubr.bf16.mxu0 %v10785_v52  ;;  %v9302_v4 = vadd.f32 %v14375_v27, %v12849_v58  ;;  %v14377_v27 = vld [vmem:[#allocation18_spill] sm:$0xff] }
 0x45f   : > { %4975 = vmatprep.mubr.bf16.mxu1 %v14360_v12  ;;  %7661 = vst [vmem:[%s12872_s27 + $0xd8] sm:$0xff] %v8810_v21  ;;  %v10787_v21 = vld [vmem:[%s11320_s8 + $0x1c] ss:$12 sps:$4 sm:$0xff]  }
 0x460   : > { %v4161_v45 = vpop.f32.mrb[148].mxu0 }
 0x461   : > { %v9427_v13 = vadd.f32 %v4161_v45, %v12857_v63  ;;  %v12962_v34 = vpop.f32.mrb[149].mxu0  ;;  %v14376_v45 = vld [vmem:[#allocation17_spill] sm:$0xff] }
 0x462   : > { %v4165_v8 = vpop.f32.mrb[150].mxu0 }
 0x463   : > { %v8813_v48 = vpack.c.bf16 %v9427_v13, %v9300_v2  ;;  %v9429_v26 = vadd.f32 %v4165_v8, %v12857_v63  ;;  %v12967_v39 = vpop.f32.mrb[151].mxu0  ;;  %v9304_v2 = vadd.f32 %v14376_v45, %v12849_v58 }
 0x465   : > { %7664 = vst [vmem:[%s12872_s27 + $0xf0] sm:$0xff] %v8813_v48  ;;  %v8816_v10 = vpack.c.bf16 %v9429_v26, %v9302_v4  ;;  %5169 = vmatmul.mubr.bf16.vlgmr.msra.gmra.mrb[0].mxu0 %v10786_v7  ;;  %v9306_v4 = vadd.f32 %v14377_v27, %v12849_v58 }
 0x466   : > { %4976 = vmatmul.mubr.bf16.gmra.mrb[232].mxu1 %v12774_v24  ;;  %5176 = vmatprep.mubr.bf16.mxu0 %v10787_v21  ;;  %v10788_v21 = vld [vmem:[%s11320_s8 + $0x18] ss:$12 sps:$4 sm:$0xff]  }
 0x467   : > { %4985 = vmatprep.mubr.bf16.mxu1 %v14360_v12  ;;  %7667 = vst [vmem:[%s12872_s27 + $0x108] sm:$0xff] %v8816_v10 }
 0x468   : > { %v4171_v52 = vpop.f32.mrb[152].mxu0 }
 0x469   : > { %v9431_v13 = vadd.f32 %v4171_v52, %v12857_v63  ;;  %v12978_v8 = vpop.f32.mrb[153].mxu0  ;;  %v10789_v52 = vld [vmem:[%s11320_s8 + $0x34] ss:$12 sps:$4 sm:$0xff]  }
 0x46a   : > { %v4175_v24 = vpop.f32.mrb[154].mxu0 }
 0x46b   : > { %v8819_v48 = vpack.c.bf16 %v9431_v13, %v9304_v2  ;;  %v9433_v26 = vadd.f32 %v4175_v24, %v12857_v63  ;;  %v12983_v7 = vpop.f32.mrb[155].mxu0  ;;  %v14378_v2 = vld [vmem:[#allocation19_spill] sm:$0xff] }
 0x46c   : > { %v9308_v13 = vadd.f32 %v14378_v2, %v12849_v58  ;;  %v9312_v2 = vadd.f32 %v12278_v20, %v12849_v58  ;;  %v10792_v20 = vld [vmem:[%s11320_s8 + $0x48] ss:$12 sps:$4 sm:$0xff]  }
 0x46d   : > { %7670 = vst [vmem:[%s12872_s27 + $0x120] sm:$0xff] %v8819_v48  ;;  %v8822_v10 = vpack.c.bf16 %v9433_v26, %v9306_v4  ;;  %5177 = vmatmul.mubr.bf16.gmra.mrb[4].mxu0 %v10788_v21  ;;  %v9310_v4 = vadd.f32 %v12259_v28, %v12849_v58 }
 0x46e   : > { %4986 = vmatmul.mubr.bf16.gmra.mrb[236].mxu1 %v12782_v29  ;;  %5184 = vmatprep.mubr.bf16.mxu0 %v10789_v52  ;;  %v10790_v52 = vld [vmem:[%s11320_s8 + $0x30] ss:$12 sps:$4 sm:$0xff]  }
 0x46f   : > { %4995 = vmatprep.mubr.bf16.mxu1 %v14360_v12  ;;  %7673 = vst [vmem:[%s12872_s27 + $0x138] sm:$0xff] %v8822_v10 }
 0x470   : > { %v4181_v45 = vpop.f32.mrb[156].mxu0 }
 0x471   : > { %v9435_v24 = vadd.f32 %v4181_v45, %v12857_v63  ;;  %v12994_v27 = vpop.f32.mrb[157].mxu0  ;;  %v10791_v45 = vld [vmem:[%s11320_s8 + $0x4c] ss:$12 sps:$4 sm:$0xff]  }
 0x472   : > { %v4185_v29 = vpop.f32.mrb[158].mxu0 }
 0x473   : > { %v8825_v48 = vpack.c.bf16 %v9435_v24, %v9308_v13  ;;  %v9437_v26 = vadd.f32 %v4185_v29, %v12857_v63  ;;  %v12999_v21 = vpop.f32.mrb[159].mxu0  ;;  %v14379_v29 = vld [vmem:[#allocation20_spill] sm:$0xff] }
 0x475   : > { %7676 = vst [vmem:[%s12872_s27 + $0x150] sm:$0xff] %v8825_v48  ;;  %v8828_v10 = vpack.c.bf16 %v9437_v26, %v9310_v4  ;;  %5185 = vmatmul.mubr.bf16.gmra.mrb[8].mxu0 %v10790_v52  ;;  %v9314_v4 = vadd.f32 %v14379_v29, %v12849_v58 }
 0x476   : > { %4996 = vmatmul.mubr.bf16.gmra.mrb[240].mxu1 %v12789_v40  ;;  %5192 = vmatprep.mubr.bf16.mxu0 %v10791_v45  ;;  %v10793_v45 = vld [vmem:[%s11320_s8 + $0x64] ss:$12 sps:$4 sm:$0xff]  }
 0x477   : > { %5005 = vmatprep.mubr.bf16.mxu1 %v14360_v12  ;;  %7679 = vst [vmem:[%s12872_s27 + $0x168] sm:$0xff] %v8828_v10 }
 0x478   : > { %v4191_v28 = vpop.f32.mrb[160].mxu0 }
 0x479   : > { %v9439_v13 = vadd.f32 %v4191_v28, %v12857_v63  ;;  %v13010_v24 = vpop.f32.mrb[161].mxu0 }
 0x47a   : > { %v4195_v40 = vpop.f32.mrb[162].mxu0 }
 0x47b   : > { %v8831_v48 = vpack.c.bf16 %v9439_v13, %v9312_v2  ;;  %v9441_v26 = vadd.f32 %v4195_v40, %v12857_v63  ;;  %v13015_v52 = vpop.f32.mrb[163].mxu0  ;;  %v14380_v2 = vld [vmem:[#allocation21_spill] sm:$0xff] }
 0x47c   : > { %v9316_v13 = vadd.f32 %v14380_v2, %v12849_v58 }
 0x47d   : > { %7682 = vst [vmem:[%s12872_s27 + $0x180] sm:$0xff] %v8831_v48  ;;  %v8834_v10 = vpack.c.bf16 %v9441_v26, %v9314_v4  ;;  %5193 = vmatmul.mubr.bf16.gmra.mrb[12].mxu0 %v10792_v20  ;;  %v14381_v4 = vld [vmem:[#allocation22_spill] sm:$0xff] }
 0x47e   : > { %5006 = vmatmul.mubr.bf16.gmra.mrb[244].mxu1 %v12796_v18  ;;  %5200 = vmatprep.mubr.bf16.mxu0 %v10793_v45  ;;  %v9318_v48 = vadd.f32 %v14381_v4, %v12849_v58  ;;  %v10794_v45 = vld [vmem:[%s11320_s8 + $0x60] ss:$12 sps:$4 sm:$0xff]  }
 0x47f   : > { %5015 = vmatprep.mubr.bf16.mxu1 %v14360_v12  ;;  %7685 = vst [vmem:[%s12872_s27 + $0x198] sm:$0xff] %v8834_v10 }
 0x480   : > { %v4201_v28 = vpop.f32.mrb[164].mxu0 }
 0x481   : > { %v9443_v40 = vadd.f32 %v4201_v28, %v12857_v63  ;;  %v13026_v29 = vpop.f32.mrb[165].mxu0  ;;  %v10795_v28 = vld [vmem:[%s11320_s8 + $0x7c] ss:$12 sps:$4 sm:$0xff]  }
 0x482   : > { %v4205_v18 = vpop.f32.mrb[166].mxu0 }
 0x483   : > { %v8837_v26 = vpack.c.bf16 %v9443_v40, %v9316_v13  ;;  %v9445_v20 = vadd.f32 %v4205_v18, %v12857_v63  ;;  %v13031_v3 = vpop.f32.mrb[167].mxu0  ;;  %v14382_v13 = vld [vmem:[#allocation23_spill] sm:$0xff] }
 0x484   : > { %v9320_v40 = vadd.f32 %v14382_v13, %v12849_v58 }
 0x485   : > { %7688 = vst [vmem:[%s12872_s27 + $0x1b0] sm:$0xff] %v8837_v26  ;;  %v8840_v10 = vpack.c.bf16 %v9445_v20, %v9318_v48  ;;  %5201 = vmatmul.mubr.bf16.gmra.mrb[16].mxu0 %v10794_v45  ;;  %v14383_v48 = vld [vmem:[#allocation24_spill] sm:$0xff] }
 0x486   : > { %5016 = vmatmul.mubr.bf16.gmra.mrb[248].mxu1 %v12803_v50  ;;  %5208 = vmatprep.mubr.bf16.mxu0 %v10795_v28  ;;  %v9322_v26 = vadd.f32 %v14383_v48, %v12849_v58  ;;  %v10796_v28 = vld [vmem:[%s11320_s8 + $0x78] ss:$12 sps:$4 sm:$0xff]  }
 0x487   : > { %5025 = vmatprep.mubr.bf16.mxu1 %v14360_v12  ;;  %7691 = vst [vmem:[%s12872_s27 + $0x1c8] sm:$0xff] %v8840_v10 }
 0x488   : > { %v4211_v2 = vpop.f32.mrb[168].mxu0 }
 0x489   : > { %v9447_v18 = vadd.f32 %v4211_v2, %v12857_v63  ;;  %v13042_v4 = vpop.f32.mrb[169].mxu0  ;;  %v10797_v2 = vld [vmem:[%s11320_s8 + $0x94] ss:$12 sps:$4 sm:$0xff]  }
 0x48a   : > { %v4215_v50 = vpop.f32.mrb[170].mxu0 }
 0x48b   : > { %v8843_v20 = vpack.c.bf16 %v9447_v18, %v9320_v40  ;;  %v9449_v45 = vadd.f32 %v4215_v50, %v12857_v63  ;;  %v13047_v57 = vpop.f32.mrb[171].mxu0  ;;  %v14384_v40 = vld [vmem:[#allocation25_spill] sm:$0xff] }
 0x48c   : > { %v9324_v18 = vadd.f32 %v14384_v40, %v12849_v58 }
 0x48d   : > { %7694 = vst [vmem:[%s12872_s27 + $0x1e0] sm:$0xff] %v8843_v20  ;;  %v8846_v10 = vpack.c.bf16 %v9449_v45, %v9322_v26  ;;  %5209 = vmatmul.mubr.bf16.gmra.mrb[20].mxu0 %v10796_v28  ;;  %v14385_v26 = vld [vmem:[#allocation26_spill] sm:$0xff] }
 0x48e   : > { %5026 = vmatmul.mubr.bf16.gmra.mrb[252].mxu1 %v12810_v55  ;;  %5216 = vmatprep.mubr.bf16.mxu0 %v10797_v2  ;;  %v9326_v20 = vadd.f32 %v14385_v26, %v12849_v58  ;;  %v10798_v2 = vld [vmem:[%s11320_s8 + $0x90] ss:$12 sps:$4 sm:$0xff]  }
 0x48f   : > { %5035 = vmatprep.mubr.bf16.mxu1 %v14360_v12  ;;  %7697 = vst [vmem:[%s12872_s27 + $0x1f8] sm:$0xff] %v8846_v10 }
 0x490   : > { %v4221_v13 = vpop.f32.mrb[172].mxu0 }
 0x491   : > { %v9451_v50 = vadd.f32 %v4221_v13, %v12857_v63  ;;  %v13058_v48 = vpop.f32.mrb[173].mxu0  ;;  %v10799_v13 = vld [vmem:[%s11320_s8 + $0xac] ss:$12 sps:$4 sm:$0xff]  }
 0x492   : > { %v4225_v55 = vpop.f32.mrb[174].mxu0 }
 0x493   : > { %v8849_v45 = vpack.c.bf16 %v9451_v50, %v9324_v18  ;;  %v9453_v28 = vadd.f32 %v4225_v55, %v12857_v63  ;;  %v13063_v56 = vpop.f32.mrb[175].mxu0  ;;  %v14386_v18 = vld [vmem:[#allocation27_spill] sm:$0xff] }
 0x494   : > { %v9328_v50 = vadd.f32 %v14386_v18, %v12849_v58 }
 0x495   : > { %7700 = vst [vmem:[%s12872_s27 + $0x210] sm:$0xff] %v8849_v45  ;;  %v8852_v10 = vpack.c.bf16 %v9453_v28, %v9326_v20  ;;  %5217 = vmatmul.mubr.bf16.gmra.mrb[24].mxu0 %v10798_v2  ;;  %v14387_v20 = vld [vmem:[#allocation28_spill] sm:$0xff] }
 0x496   : > { %5036 = vmatmul.mubr.bf16.gmra.mrb[0].mxu1 %v12817_v25  ;;  %5224 = vmatprep.mubr.bf16.mxu0 %v10799_v13  ;;  %v9330_v45 = vadd.f32 %v14387_v20, %v12849_v58  ;;  %v10800_v13 = vld [vmem:[%s11320_s8 + $0xa8] ss:$12 sps:$4 sm:$0xff]  }
 0x497   : > { %5045 = vmatprep.mubr.bf16.mxu1 %v14360_v12  ;;  %7703 = vst [vmem:[%s12872_s27 + $0x228] sm:$0xff] %v8852_v10 }
 0x498   : > { %v4231_v40 = vpop.f32.mrb[176].mxu0 }
 0x499   : > { %v9455_v55 = vadd.f32 %v4231_v40, %v12857_v63  ;;  %v13074_v26 = vpop.f32.mrb[177].mxu0  ;;  %v10801_v40 = vld [vmem:[%s11320_s8 + $0xc4] ss:$12 sps:$4 sm:$0xff]  }
 0x49a   : > { %v4235_v25 = vpop.f32.mrb[178].mxu0 }
 0x49b   : > { %v8855_v28 = vpack.c.bf16 %v9455_v55, %v9328_v50  ;;  %v9457_v2 = vadd.f32 %v4235_v25, %v12857_v63  ;;  %v13079_v51 = vpop.f32.mrb[179].mxu0  ;;  %v14389_v50 = vld [vmem:[#allocation29_spill] sm:$0xff] }
 0x49c   : > { %14388 = vst [vmem:[#allocation16_spill] sm:$0xff] %v13079_v51  ;;  %v9332_v55 = vadd.f32 %v14389_v50, %v12849_v58 }
 0x49d   : > { %7706 = vst [vmem:[%s12872_s27 + $0x240] sm:$0xff] %v8855_v28  ;;  %v8858_v10 = vpack.c.bf16 %v9457_v2, %v9330_v45  ;;  %5225 = vmatmul.mubr.bf16.gmra.mrb[28].mxu0 %v10800_v13  ;;  %v14390_v45 = vld [vmem:[#allocation30_spill] sm:$0xff] }
 0x49e   : > { %5046 = vmatmul.mubr.bf16.gmra.mrb[4].mxu1 %v12824_v43  ;;  %5232 = vmatprep.mubr.bf16.mxu0 %v10801_v40  ;;  %v9334_v28 = vadd.f32 %v14390_v45, %v12849_v58  ;;  %v10802_v40 = vld [vmem:[%s11320_s8 + $0xc0] ss:$12 sps:$4 sm:$0xff]  }
 0x49f   : > { %5055 = vmatprep.mubr.bf16.mxu1 %v14360_v12  ;;  %7709 = vst [vmem:[%s12872_s27 + $0x258] sm:$0xff] %v8858_v10 }
 0x4a0   : > { %v4241_v18 = vpop.f32.mrb[180].mxu0 }
 0x4a1   : > { %v9459_v25 = vadd.f32 %v4241_v18, %v12857_v63  ;;  %v13090_v20 = vpop.f32.mrb[181].mxu0  ;;  %v10803_v18 = vld [vmem:[%s11320_s8 + $0xdc] ss:$12 sps:$4 sm:$0xff]  }
 0x4a2   : > { %v4245_v43 = vpop.f32.mrb[182].mxu0 }
 0x4a3   : > { %v8861_v2 = vpack.c.bf16 %v9459_v25, %v9332_v55  ;;  %v9461_v13 = vadd.f32 %v4245_v43, %v12857_v63  ;;  %v13095_v51 = vpop.f32.mrb[183].mxu0  ;;  %v14392_v55 = vld [vmem:[#allocation31_spill] sm:$0xff] }
 0x4a4   : > { %14391 = vst [vmem:[#allocation17_spill] sm:$0xff] %v13095_v51  ;;  %v9336_v25 = vadd.f32 %v14392_v55, %v12849_v58 }
 0x4a5   : > { %7712 = vst [vmem:[%s12872_s27 + $0x270] sm:$0xff] %v8861_v2  ;;  %v8864_v10 = vpack.c.bf16 %v9461_v13, %v9334_v28  ;;  %5233 = vmatmul.mubr.bf16.gmra.mrb[32].mxu0 %v10802_v40  ;;  %v14393_v28 = vld [vmem:[#allocation32_spill] sm:$0xff] }
 0x4a6   : > { %5056 = vmatmul.mubr.bf16.gmra.mrb[8].mxu1 %v12831_v1  ;;  %5240 = vmatprep.mubr.bf16.mxu0 %v10803_v18  ;;  %v9338_v2 = vadd.f32 %v14393_v28, %v12849_v58  ;;  %v10804_v18 = vld [vmem:[%s11320_s8 + $0xd8] ss:$12 sps:$4 sm:$0xff]  }
 0x4a7   : > { %5065 = vmatprep.mubr.bf16.mxu1 %v14360_v12  ;;  %7715 = vst [vmem:[%s12872_s27 + $0x288] sm:$0xff] %v8864_v10 }
 0x4a8   : > { %v4251_v50 = vpop.f32.mrb[184].mxu0 }
 0x4a9   : > { %v9463_v43 = vadd.f32 %v4251_v50, %v12857_v63  ;;  %v13106_v45 = vpop.f32.mrb[185].mxu0  ;;  %v10805_v50 = vld [vmem:[%s11320_s8 + $0xf4] ss:$12 sps:$4 sm:$0xff]  }
 0x4aa   : > { %v4255_v1 = vpop.f32.mrb[186].mxu0 }
 0x4ab   : > { %v8867_v13 = vpack.c.bf16 %v9463_v43, %v9336_v25  ;;  %v9465_v40 = vadd.f32 %v4255_v1, %v12857_v63  ;;  %v13111_v51 = vpop.f32.mrb[187].mxu0  ;;  %v14394_v25 = vld [vmem:[#allocation33_spill] sm:$0xff]  ;;  %v673_v1 = vsub.s32 5, %v11771_v31 }
 0x4ac   : > { %v9340_v43 = vadd.f32 %v14394_v25, %v12849_v58 }
 0x4ad   : > { %7718 = vst [vmem:[%s12872_s27 + $0x2a0] sm:$0xff] %v8867_v13  ;;  %v8870_v10 = vpack.c.bf16 %v9465_v40, %v9338_v2  ;;  %5241 = vmatmul.mubr.bf16.gmra.mrb[36].mxu0 %v10804_v18  ;;  %v9342_v40 = vadd.f32 %v12451_v36, %v12849_v58  ;;  %v13132_v25 = vrot.slane %v12846_v0, %v673_v1  ;;  %v10807_v36 = vld [vmem:[%s11320_s8 + $0x10c] ss:$12 sps:$4 sm:$0xff]  }
 0x4ae   : > { %5066 = vmatmul.mubr.bf16.gmra.mrb[12].mxu1 %v12838_v49  ;;  %5248 = vmatprep.mubr.bf16.mxu0 %v10805_v50  ;;  %v677_v49 = vsub.s32 6, %v11771_v31  ;;  %v9344_v1 = vadd.f32 %v12469_v38, %v12849_v58 }
 0x4af   : > { %5075 = vmatprep.mubr.bf16.mxu1 %v14360_v12  ;;  %7721 = vst [vmem:[%s12872_s27 + $0x2b8] sm:$0xff] %v8870_v10  ;;  %v9410_v38 = vadd.f32 %v12870_v19, %v13132_v25  ;;  %v10808_v19 = vld [vmem:[%s11320_s8 + $0x108] ss:$12 sps:$4 sm:$0xff]  }
 0x4b0   : > { %v4261_v55 = vpop.f32.mrb[188].mxu0  ;;  %v13138_v31 = vrot.slane %v12846_v0, %v677_v49 }
 0x4b1   : > { %v9467_v28 = vadd.f32 %v4261_v55, %v12857_v63  ;;  %v13123_v2 = vpop.f32.mrb[189].mxu0 }
 0x4b2   : > { %14395 = vst [vmem:[#allocation18_spill] sm:$0xff] %v13123_v2  ;;  %v4265_v13 = vpop.f32.mrb[190].mxu0  ;;  %v10806_v2 = vld [vmem:[%s11320_s8 + $0xf0] ss:$12 sps:$4 sm:$0xff]  }
 0x4b3   : > { %v8873_v10 = vpack.c.bf16 %v9467_v28, %v9340_v43  ;;  %v9469_v18 = vadd.f32 %v4265_v13, %v12857_v63  ;;  %v13129_v50 = vpop.f32.mrb[191].mxu0  ;;  %v9408_v13 = vadd.f32 %v12865_v37, %v13132_v25 }
 0x4b5   : > { %7724 = vst [vmem:[%s12872_s27 + $0x2d0] sm:$0xff] %v8873_v10  ;;  %v8876_v55 = vpack.c.bf16 %v9469_v18, %v9342_v40  ;;  %5249 = vmatmul.mubr.bf16.gmra.mrb[40].mxu0 %v10806_v2  ;;  %v9346_v40 = vadd.f32 %v12472_v32, %v12849_v58 }
 0x4b6   : > { %5076 = vmatmul.mubr.bf16.gmra.mrb[16].mxu1 %v12852_v33  ;;  %5256 = vmatprep.mubr.bf16.mxu0 %v10807_v36 }
 0x4b7   : > { %5085 = vmatprep.mubr.bf16.mxu1 %v14360_v12  ;;  %7727 = vst [vmem:[%s12872_s27 + $0x2e8] sm:$0xff] %v8876_v55 }
 0x4b8   : > { %v4271_v43 = vpop.f32.mrb[192].mxu0 }
 0x4b9   : > { %v4817_v28 = vpop.f32.mrb[168].mxu1  ;;  %v9471_v33 = vadd.f32 %v4271_v43, %v12857_v63  ;;  %v13149_v2 = vpop.f32.mrb[193].mxu0 }
 0x4ba   : > { %v9535_v0 = vadd.f32 %v4817_v28, %v13138_v31  ;;  %14396 = vst [vmem:[#allocation19_spill] sm:$0xff] %v13149_v2  ;;  %v13151_v49 = vpop.f32.mrb[169].mxu1  ;;  %v4275_v10 = vpop.f32.mrb[194].mxu0 }
 0x4bb   : > { %14397 = vst [vmem:[#allocation20_spill] sm:$0xff] %v13151_v49  ;;  %v4821_v18 = vpop.f32.mrb[170].mxu1  ;;  %v8879_v37 = vpack.c.bf16 %v9471_v33, %v9344_v1  ;;  %v9473_v36 = vadd.f32 %v4275_v10, %v12857_v63  ;;  %v13159_v28 = vpop.f32.mrb[195].mxu0  ;;  %v10809_v1 = vld [vmem:[%s11320_s8 + $0x124] ss:$12 sps:$4 sm:$0xff]  }
 0x4bc   : > { %v8784_v55 = vpack.c.bf16 %v9535_v0, %v9408_v13  ;;  %v9537_v43 = vadd.f32 %v4821_v18, %v13138_v31  ;;  %v13161_v49 = vpop.f32.mrb[171].mxu1  ;;  %v9348_v0 = vadd.f32 %v12487_v44, %v12849_v58  ;;  %v9414_v44 = vadd.f32 %v12891_v11, %v13132_v25  ;;  %v10810_v11 = vld [vmem:[%s11320_s8 + $0x120] ss:$12 sps:$4 sm:$0xff]  }
 0x4bd   : > { %7730 = vst [vmem:[%s12872_s27 + $0x300] sm:$0xff] %v8879_v37  ;;  %v8882_v32 = vpack.c.bf16 %v9473_v36, %v9346_v40  ;;  %5257 = vmatmul.mubr.bf16.gmra.mrb[44].mxu0 %v10808_v19  ;;  %v9412_v40 = vadd.f32 %v12886_v47, %v13132_v25 }
 0x4be   : > { %7635 = vst [vmem:[%s12872_s27 + $0x8] sm:$0xff] %v8784_v55  ;;  %v8787_v2 = vpack.c.bf16 %v9537_v43, %v9410_v38  ;;  %5086 = vmatmul.mubr.bf16.gmra.mrb[20].mxu1 %v12876_v62  ;;  %5264 = vmatprep.mubr.bf16.mxu0 %v10809_v1 }
 0x4bf   : > { %5095 = vmatprep.mubr.bf16.mxu1 %v14360_v12  ;;  %7733 = vst [vmem:[%s12872_s27 + $0x318] sm:$0xff] %v8882_v32 }
 0x4c0   : > { %7638 = vst [vmem:[%s12872_s27 + $0x20] sm:$0xff] %v8787_v2  ;;  %v4281_v13 = vpop.f32.mrb[196].mxu0  ;;  %v9350_v2 = vadd.f32 %v12490_v14, %v12849_v58 }
 0x4c1   : > { %v4827_v33 = vpop.f32.mrb[172].mxu1  ;;  %v9475_v62 = vadd.f32 %v4281_v13, %v12857_v63  ;;  %v13177_v10 = vpop.f32.mrb[197].mxu0 }
 0x4c2   : > { %v9539_v38 = vadd.f32 %v4827_v33, %v13138_v31  ;;  %v13179_v18 = vpop.f32.mrb[173].mxu1  ;;  %v4285_v37 = vpop.f32.mrb[198].mxu0  ;;  %v10811_v33 = vld [vmem:[%s11320_s8 + $0x13c] ss:$12 sps:$4 sm:$0xff]  }
 0x4c3   : > { %v4831_v55 = vpop.f32.mrb[174].mxu1  ;;  %v8885_v47 = vpack.c.bf16 %v9475_v62, %v9348_v0  ;;  %v9477_v43 = vadd.f32 %v4285_v37, %v12857_v63  ;;  %v13187_v19 = vpop.f32.mrb[199].mxu0  ;;  %v14398_v62 = vld [vmem:[#allocation34_spill] sm:$0xff] }
 0x4c4   : > { %v8790_v36 = vpack.c.bf16 %v9539_v38, %v9412_v40  ;;  %v9541_v32 = vadd.f32 %v4831_v55, %v13138_v31  ;;  %v13189_v1 = vpop.f32.mrb[175].mxu1  ;;  %v9352_v38 = vadd.f32 %v14398_v62, %v12849_v58 }
 0x4c5   : > { %7736 = vst [vmem:[%s12872_s27 + $0x330] sm:$0xff] %v8885_v47  ;;  %v8888_v14 = vpack.c.bf16 %v9477_v43, %v9350_v2  ;;  %5265 = vmatmul.mubr.bf16.gmra.mrb[48].mxu0 %v10810_v11  ;;  %v9416_v2 = vadd.f32 %v12905_v15, %v13132_v25  ;;  %v14399_v47 = vld [vmem:[#allocation35_spill] sm:$0xff]  ;;  %v9418_v43 = vadd.f32 %v12910_v6, %v13132_v25  ;;  %v10812_v6 = vld [vmem:[%s11320_s8 + $0x138] ss:$12 sps:$4 sm:$0xff]  }
 0x4c6   : > { %7641 = vst [vmem:[%s12872_s27 + $0x38] sm:$0xff] %v8790_v36  ;;  %v8793_v13 = vpack.c.bf16 %v9541_v32, %v9414_v44  ;;  %5096 = vmatmul.mubr.bf16.gmra.mrb[24].mxu1 %v12895_v46  ;;  %5272 = vmatprep.mubr.bf16.mxu0 %v10811_v33  ;;  %v9354_v36 = vadd.f32 %v14399_v47, %v12849_v58 }
 0x4c7   : > { %5105 = vmatprep.mubr.bf16.mxu1 %v14360_v12  ;;  %7739 = vst [vmem:[%s12872_s27 + $0x348] sm:$0xff] %v8888_v14 }
 0x4c8   : > { %7644 = vst [vmem:[%s12872_s27 + $0x50] sm:$0xff] %v8793_v13  ;;  %v4291_v0 = vpop.f32.mrb[200].mxu0 }
 0x4c9   : > { %v4837_v40 = vpop.f32.mrb[176].mxu1  ;;  %v9479_v46 = vadd.f32 %v4291_v0, %v12857_v63  ;;  %v13205_v37 = vpop.f32.mrb[201].mxu0 }
 0x4ca   : > { %v9543_v44 = vadd.f32 %v4837_v40, %v13138_v31  ;;  %v13207_v55 = vpop.f32.mrb[177].mxu1  ;;  %v4295_v32 = vpop.f32.mrb[202].mxu0 }
 0x4cb   : > { %v4841_v14 = vpop.f32.mrb[178].mxu1  ;;  %v8891_v15 = vpack.c.bf16 %v9479_v46, %v9352_v38  ;;  %v9481_v11 = vadd.f32 %v4295_v32, %v12857_v63  ;;  %v13215_v0 = vpop.f32.mrb[203].mxu0  ;;  %v10813_v38 = vld [vmem:[%s11320_s8 + $0x154] ss:$12 sps:$4 sm:$0xff]  }
 0x4cc   : > { %v8796_v13 = vpack.c.bf16 %v9543_v44, %v9416_v2  ;;  %v9545_v33 = vadd.f32 %v4841_v14, %v13138_v31  ;;  %v13217_v40 = vpop.f32.mrb[179].mxu1  ;;  %v14401_v44 = vld [vmem:[#allocation36_spill] sm:$0xff] }
 0x4cd   : > { %14400 = vst [vmem:[#allocation21_spill] sm:$0xff] %v13217_v40  ;;  %7742 = vst [vmem:[%s12872_s27 + $0x360] sm:$0xff] %v8891_v15  ;;  %v8894_v62 = vpack.c.bf16 %v9481_v11, %v9354_v36  ;;  %5273 = vmatmul.mubr.bf16.gmra.mrb[52].mxu0 %v10812_v6  ;;  %v9356_v32 = vadd.f32 %v14401_v44, %v12849_v58  ;;  %v9420_v36 = vadd.f32 %v12924_v61, %v13132_v25 }
 0x4ce   : > { %7647 = vst [vmem:[%s12872_s27 + $0x68] sm:$0xff] %v8796_v13  ;;  %v8799_v47 = vpack.c.bf16 %v9545_v33, %v9418_v43  ;;  %5106 = vmatmul.mubr.bf16.gmra.mrb[28].mxu1 %v12914_v16  ;;  %5280 = vmatprep.mubr.bf16.mxu0 %v10813_v38  ;;  %v14402_v13 = vld [vmem:[#allocation37_spill] sm:$0xff]  ;;  %v9422_v33 = vadd.f32 %v12929_v17, %v13132_v25 }
 0x4cf   : > { %5115 = vmatprep.mubr.bf16.mxu1 %v14360_v12  ;;  %7745 = vst [vmem:[%s12872_s27 + $0x378] sm:$0xff] %v8894_v62  ;;  %v9358_v11 = vadd.f32 %v14402_v13, %v12849_v58  ;;  %v10814_v17 = vld [vmem:[%s11320_s8 + $0x150] ss:$12 sps:$4 sm:$0xff]  }
 0x4d0   : > { %7650 = vst [vmem:[%s12872_s27 + $0x80] sm:$0xff] %v8799_v47  ;;  %v4301_v2 = vpop.f32.mrb[204].mxu0 }
 0x4d1   : > { %v4847_v46 = vpop.f32.mrb[180].mxu1  ;;  %v9483_v16 = vadd.f32 %v4301_v2, %v12857_v63  ;;  %v13233_v14 = vpop.f32.mrb[205].mxu0 }
 0x4d2   : > { %v9547_v43 = vadd.f32 %v4847_v46, %v13138_v31  ;;  %v13235_v15 = vpop.f32.mrb[181].mxu1  ;;  %v4305_v62 = vpop.f32.mrb[206].mxu0 }
 0x4d3   : > { %v4851_v47 = vpop.f32.mrb[182].mxu1  ;;  %v8897_v61 = vpack.c.bf16 %v9483_v16, %v9356_v32  ;;  %v9485_v38 = vadd.f32 %v4305_v62, %v12857_v63  ;;  %v13243_v46 = vpop.f32.mrb[207].mxu0  ;;  %v10815_v32 = vld [vmem:[%s11320_s8 + $0x16c] ss:$12 sps:$4 sm:$0xff]  }
 0x4d4   : > { %v8802_v6 = vpack.c.bf16 %v9547_v43, %v9420_v36  ;;  %v9549_v2 = vadd.f32 %v4851_v47, %v13138_v31  ;;  %v13245_v44 = vpop.f32.mrb[183].mxu1  ;;  %v14403_v43 = vld [vmem:[#allocation38_spill] sm:$0xff] }
 0x4d5   : > { %7748 = vst [vmem:[%s12872_s27 + $0x390] sm:$0xff] %v8897_v61  ;;  %v8900_v13 = vpack.c.bf16 %v9485_v38, %v9358_v11  ;;  %5281 = vmatmul.mubr.bf16.gmra.mrb[56].mxu0 %v10814_v17  ;;  %v9360_v62 = vadd.f32 %v14403_v43, %v12849_v58  ;;  %v9424_v11 = vadd.f32 %v12943_v53, %v13132_v25 }
 0x4d6   : > { %7653 = vst [vmem:[%s12872_s27 + $0x98] sm:$0xff] %v8802_v6  ;;  %v8805_v40 = vpack.c.bf16 %v9549_v2, %v9422_v33  ;;  %5116 = vmatmul.mubr.bf16.gmra.mrb[32].mxu1 %v12933_v54  ;;  %5288 = vmatprep.mubr.bf16.mxu0 %v10815_v32  ;;  %v9426_v6 = vadd.f32 %v12948_v22, %v13132_v25 }
 0x4d7   : > { %5125 = vmatprep.mubr.bf16.mxu1 %v14360_v12  ;;  %7751 = vst [vmem:[%s12872_s27 + $0x3a8] sm:$0xff] %v8900_v13 }
 0x4d8   : > { %7656 = vst [vmem:[%s12872_s27 + $0xb0] sm:$0xff] %v8805_v40  ;;  %v4311_v36 = vpop.f32.mrb[208].mxu0  ;;  %v14404_v40 = vld [vmem:[#allocation39_spill] sm:$0xff] }
 0x4d9   : > { %v4857_v16 = vpop.f32.mrb[184].mxu1  ;;  %v9487_v54 = vadd.f32 %v4311_v36, %v12857_v63  ;;  %v13261_v47 = vpop.f32.mrb[209].mxu0  ;;  %v9362_v61 = vadd.f32 %v14404_v40, %v12849_v58  ;;  %v10816_v40 = vld [vmem:[%s11320_s8 + $0x168] ss:$12 sps:$4 sm:$0xff]  }
 0x4da   : > { %v9551_v33 = vadd.f32 %v4857_v16, %v13138_v31  ;;  %v13263_v12 = vpop.f32.mrb[185].mxu1  ;;  %v4315_v38 = vpop.f32.mrb[210].mxu0 }
 0x4db   : > { %v4861_v2 = vpop.f32.mrb[186].mxu1  ;;  %v8903_v53 = vpack.c.bf16 %v9487_v54, %v9360_v62  ;;  %v9489_v17 = vadd.f32 %v4315_v38, %v12857_v63  ;;  %v13271_v36 = vpop.f32.mrb[211].mxu0  ;;  %v10817_v62 = vld [vmem:[%s11320_s8 + $0x184] ss:$12 sps:$4 sm:$0xff]   ;;  %v9364_v38 = vadd.f32 %v12556_v42, %v12849_v58  ;;  %v9430_v42 = vadd.f32 %v12967_v39, %v13132_v25 }
 0x4dc   : > { %v8808_v13 = vpack.c.bf16 %v9551_v33, %v9424_v11  ;;  %v9553_v32 = vadd.f32 %v4861_v2, %v13138_v31  ;;  %v13273_v16 = vpop.f32.mrb[187].mxu1  ;;  %v10818_v11 = vld [vmem:[%s11320_s8 + $0x8] ss:$12 sps:$4 sm:$0xff]  }
 0x4dd   : > { %14405 = vst [vmem:[#allocation22_spill] sm:$0xff] %v13273_v16  ;;  %7754 = vst [vmem:[%s12872_s27 + $0x3c0] sm:$0xff] %v8903_v53  ;;  %v8906_v43 = vpack.c.bf16 %v9489_v17, %v9362_v61  ;;  %5289 = vmatmul.mubr.bf16.gmra.mrb[60].mxu0 %v10816_v40  ;;  %v9428_v61 = vadd.f32 %v12962_v34, %v13132_v25  ;;  %v10820_v16 = vld [vmem:[%s11320_s8 + $0x20] ss:$12 sps:$4 sm:$0xff]  }
 0x4de   : > { %7659 = vst [vmem:[%s12872_s27 + $0xc8] sm:$0xff] %v8808_v13  ;;  %v8811_v22 = vpack.c.bf16 %v9553_v32, %v9426_v6  ;;  %5126 = vmatmul.mubr.bf16.gmra.mrb[36].mxu1 %v12952_v23  ;;  %5296 = vmatprep.mubr.bf16.mxu0 %v10817_v62  ;;  %v14406_v13 = vld [vmem:[#allocation40_spill] sm:$0xff] }
 0x4df   : > { %9031 = vmatprep.mubr.bf16.mxu1 %v10818_v11  ;;  %7757 = vst [vmem:[%s12872_s27 + $0x3d8] sm:$0xff] %v8906_v43  ;;  %v9366_v17 = vadd.f32 %v14406_v13, %v12849_v58  ;;  %v10819_v13 = vld [vmem:[%s11320_s8 + $0x180] ss:$12 sps:$4 sm:$0xff]  }
 0x4e0   : > { %7662 = vst [vmem:[%s12872_s27 + $0xe0] sm:$0xff] %v8811_v22  ;;  %v4321_v54 = vpop.f32.mrb[212].mxu0 }
 0x4e1   : > { %v4867_v33 = vpop.f32.mrb[188].mxu1  ;;  %v9491_v23 = vadd.f32 %v4321_v54, %v12857_v63  ;;  %v13289_v2 = vpop.f32.mrb[213].mxu0 }
 0x4e2   : > { %v9555_v6 = vadd.f32 %v4867_v33, %v13138_v31  ;;  %v13291_v53 = vpop.f32.mrb[189].mxu1  ;;  %v4325_v32 = vpop.f32.mrb[214].mxu0 }
 0x4e3   : > { %v4871_v34 = vpop.f32.mrb[190].mxu1  ;;  %v8909_v43 = vpack.c.bf16 %v9491_v23, %v9364_v38  ;;  %v9493_v40 = vadd.f32 %v4325_v32, %v12857_v63  ;;  %v13299_v11 = vpop.f32.mrb[215].mxu0  ;;  %v10821_v38 = vld [vmem:[%s11320_s8 + $0x19c] ss:$12 sps:$4 sm:$0xff]   ;;  %v9368_v32 = vadd.f32 %v12575_v30, %v12849_v58  ;;  %v9434_v30 = vadd.f32 %v12983_v7, %v13132_v25 }
 0x4e4   : > { %v8814_v22 = vpack.c.bf16 %v9555_v6, %v9428_v61  ;;  %v9557_v62 = vadd.f32 %v4871_v34, %v13138_v31  ;;  %v13301_v54 = vpop.f32.mrb[191].mxu1  ;;  %v10822_v61 = vld [vmem:[%s11320_s8 + $0x38] ss:$12 sps:$4 sm:$0xff]  }
 0x4e5   : > { %7760 = vst [vmem:[%s12872_s27 + $0x3f0] sm:$0xff] %v8909_v43  ;;  %v8912_v33 = vpack.c.bf16 %v9493_v40, %v9366_v17  ;;  %5297 = vmatmul.mubr.bf16.gmra.mrb[64].mxu0 %v10819_v13  ;;  %v9432_v17 = vadd.f32 %v12978_v8, %v13132_v25 }
 0x4e6   : > { %7665 = vst [vmem:[%s12872_s27 + $0xf8] sm:$0xff] %v8814_v22  ;;  %v8817_v39 = vpack.c.bf16 %v9557_v62, %v9430_v42  ;;  %9032 = vmatmul.mubr.bf16.vlgmr.msra.gmra.mrb[40].mxu1 %v10820_v16  ;;  %5304 = vmatprep.mubr.bf16.mxu0 %v10821_v38  ;;  %v14408_v22 = vld [vmem:[#allocation41_spill] sm:$0xff] }
 0x4e7   : > { %9035 = vmatprep.mubr.bf16.mxu1 %v10822_v61  ;;  %7763 = vst [vmem:[%s12872_s27 + $0x408] sm:$0xff] %v8912_v33  ;;  %v9370_v40 = vadd.f32 %v14408_v22, %v12849_v58  ;;  %v10823_v22 = vld [vmem:[%s11320_s8 + $0x198] ss:$12 sps:$4 sm:$0xff]  }
 0x4e8   : > { %7668 = vst [vmem:[%s12872_s27 + $0x110] sm:$0xff] %v8817_v39  ;;  %v4331_v23 = vpop.f32.mrb[216].mxu0 }
 0x4e9   : > { %v4877_v6 = vpop.f32.mrb[192].mxu1  ;;  %v9495_v42 = vadd.f32 %v4331_v23, %v12857_v63  ;;  %v13317_v34 = vpop.f32.mrb[217].mxu0 }
 0x4ea   : > { %v9559_v16 = vadd.f32 %v4877_v6, %v13138_v31  ;;  %v13319_v43 = vpop.f32.mrb[193].mxu1  ;;  %v4335_v62 = vpop.f32.mrb[218].mxu0 }
 0x4eb   : > { %14407 = vst [vmem:[#allocation23_spill] sm:$0xff] %v13319_v43  ;;  %v4881_v8 = vpop.f32.mrb[194].mxu1  ;;  %v8915_v33 = vpack.c.bf16 %v9495_v42, %v9368_v32  ;;  %v9497_v13 = vadd.f32 %v4335_v62, %v12857_v63  ;;  %v13327_v61 = vpop.f32.mrb[219].mxu0  ;;  %v10824_v43 = vld [vmem:[%s11320_s8 + $0x50] ss:$12 sps:$4 sm:$0xff]   ;;  %v9372_v62 = vadd.f32 %v12592_v35, %v12849_v58  ;;  %v9438_v35 = vadd.f32 %v12999_v21, %v13132_v25 }
 0x4ec   : > { %v8820_v39 = vpack.c.bf16 %v9559_v16, %v9432_v17  ;;  %v9561_v38 = vadd.f32 %v4881_v8, %v13138_v31  ;;  %v13329_v23 = vpop.f32.mrb[195].mxu1  ;;  %v10825_v32 = vld [vmem:[%s11320_s8 + $0x1b4] ss:$12 sps:$4 sm:$0xff]  }
 0x4ed   : > { %14409 = vst [vmem:[#allocation24_spill] sm:$0xff] %v13329_v23  ;;  %7766 = vst [vmem:[%s12872_s27 + $0x420] sm:$0xff] %v8915_v33  ;;  %v8918_v6 = vpack.c.bf16 %v9497_v13, %v9370_v40  ;;  %5305 = vmatmul.mubr.bf16.gmra.mrb[68].mxu0 %v10823_v22  ;;  %v10826_v17 = vld [vmem:[%s11320_s8 + $0x68] ss:$12 sps:$4 sm:$0xff]   ;;  %v9436_v40 = vadd.f32 %v12994_v27, %v13132_v25  ;;  %v10828_v23 = vld [vmem:[%s11320_s8 + $0x80] ss:$12 sps:$4 sm:$0xff]  }
 0x4ee   : > { %7671 = vst [vmem:[%s12872_s27 + $0x128] sm:$0xff] %v8820_v39  ;;  %v8823_v7 = vpack.c.bf16 %v9561_v38, %v9434_v30  ;;  %9036 = vmatmul.mubr.bf16.gmra.mrb[44].mxu1 %v10824_v43  ;;  %5312 = vmatprep.mubr.bf16.mxu0 %v10825_v32  ;;  %v14410_v39 = vld [vmem:[#allocation42_spill] sm:$0xff] }
 0x4ef   : > { %9039 = vmatprep.mubr.bf16.mxu1 %v10826_v17  ;;  %7769 = vst [vmem:[%s12872_s27 + $0x438] sm:$0xff] %v8918_v6  ;;  %v9374_v13 = vadd.f32 %v14410_v39, %v12849_v58  ;;  %v10827_v39 = vld [vmem:[%s11320_s8 + $0x1b0] ss:$12 sps:$4 sm:$0xff]  }
 0x4f0   : > { %7674 = vst [vmem:[%s12872_s27 + $0x140] sm:$0xff] %v8823_v7  ;;  %v4341_v42 = vpop.f32.mrb[220].mxu0 }
 0x4f1   : > { %v4887_v16 = vpop.f32.mrb[196].mxu1  ;;  %v9499_v30 = vadd.f32 %v4341_v42, %v12857_v63  ;;  %v13345_v8 = vpop.f32.mrb[221].mxu0 }
 0x4f2   : > { %v9563_v43 = vadd.f32 %v4887_v16, %v13138_v31  ;;  %v13347_v33 = vpop.f32.mrb[197].mxu1  ;;  %v4345_v38 = vpop.f32.mrb[222].mxu0 }
 0x4f3   : > { %v4891_v27 = vpop.f32.mrb[198].mxu1  ;;  %v8921_v6 = vpack.c.bf16 %v9499_v30, %v9372_v62  ;;  %v9501_v22 = vadd.f32 %v4345_v38, %v12857_v63  ;;  %v13355_v17 = vpop.f32.mrb[223].mxu0  ;;  %v10829_v62 = vld [vmem:[%s11320_s8 + $0x1cc] ss:$12 sps:$4 sm:$0xff]   ;;  %v9376_v38 = vadd.f32 %v12609_v41, %v12849_v58  ;;  %v9442_v41 = vadd.f32 %v13015_v52, %v13132_v25 }
 0x4f4   : > { %v8826_v7 = vpack.c.bf16 %v9563_v43, %v9436_v40  ;;  %v9565_v32 = vadd.f32 %v4891_v27, %v13138_v31  ;;  %v13357_v42 = vpop.f32.mrb[199].mxu1  ;;  %v10830_v40 = vld [vmem:[%s11320_s8 + $0x98] ss:$12 sps:$4 sm:$0xff]  }
 0x4f5   : > { %7772 = vst [vmem:[%s12872_s27 + $0x450] sm:$0xff] %v8921_v6  ;;  %v8924_v16 = vpack.c.bf16 %v9501_v22, %v9374_v13  ;;  %5313 = vmatmul.mubr.bf16.gmra.mrb[72].mxu0 %v10827_v39  ;;  %v9440_v13 = vadd.f32 %v13010_v24, %v13132_v25 }
 0x4f6   : > { %7677 = vst [vmem:[%s12872_s27 + $0x158] sm:$0xff] %v8826_v7  ;;  %v8829_v21 = vpack.c.bf16 %v9565_v32, %v9438_v35  ;;  %9040 = vmatmul.mubr.bf16.gmra.mrb[48].mxu1 %v10828_v23  ;;  %5320 = vmatprep.mubr.bf16.mxu0 %v10829_v62  ;;  %v14412_v7 = vld [vmem:[#allocation43_spill] sm:$0xff] }
 0x4f7   : > { %9043 = vmatprep.mubr.bf16.mxu1 %v10830_v40  ;;  %7775 = vst [vmem:[%s12872_s27 + $0x468] sm:$0xff] %v8924_v16  ;;  %v9378_v22 = vadd.f32 %v14412_v7, %v12849_v58  ;;  %v10831_v7 = vld [vmem:[%s11320_s8 + $0x1c8] ss:$12 sps:$4 sm:$0xff]  }
 0x4f8   : > { %7680 = vst [vmem:[%s12872_s27 + $0x170] sm:$0xff] %v8829_v21  ;;  %v4351_v30 = vpop.f32.mrb[224].mxu0 }
 0x4f9   : > { %v4897_v43 = vpop.f32.mrb[200].mxu1  ;;  %v9503_v35 = vadd.f32 %v4351_v30, %v12857_v63  ;;  %v13373_v27 = vpop.f32.mrb[225].mxu0 }
 0x4fa   : > { %v9567_v23 = vadd.f32 %v4897_v43, %v13138_v31  ;;  %v13375_v6 = vpop.f32.mrb[201].mxu1  ;;  %v4355_v32 = vpop.f32.mrb[226].mxu0 }
 0x4fb   : > { %14411 = vst [vmem:[#allocation25_spill] sm:$0xff] %v13375_v6  ;;  %v4901_v24 = vpop.f32.mrb[202].mxu1  ;;  %v8927_v16 = vpack.c.bf16 %v9503_v35, %v9376_v38  ;;  %v9505_v39 = vadd.f32 %v4355_v32, %v12857_v63  ;;  %v13383_v40 = vpop.f32.mrb[227].mxu0  ;;  %v10832_v6 = vld [vmem:[%s11320_s8 + $0xb0] ss:$12 sps:$4 sm:$0xff]   ;;  %v9380_v32 = vadd.f32 %v12626_v5, %v12849_v58  ;;  %v9446_v5 = vadd.f32 %v13031_v3, %v13132_v25 }
 0x4fc   : > { %v8832_v21 = vpack.c.bf16 %v9567_v23, %v9440_v13  ;;  %v9569_v62 = vadd.f32 %v4901_v24, %v13138_v31  ;;  %v13385_v30 = vpop.f32.mrb[203].mxu1  ;;  %v10833_v38 = vld [vmem:[%s11320_s8 + $0x1e4] ss:$12 sps:$4 sm:$0xff]   ;;  %v10834_v13 = vld [vmem:[%s11320_s8 + $0xc8] ss:$12 sps:$4 sm:$0xff]  }
 0x4fd   : > { %14413 = vst [vmem:[#allocation26_spill] sm:$0xff] %v13385_v30  ;;  %7778 = vst [vmem:[%s12872_s27 + $0x480] sm:$0xff] %v8927_v16  ;;  %v8930_v43 = vpack.c.bf16 %v9505_v39, %v9378_v22  ;;  %5321 = vmatmul.mubr.bf16.gmra.mrb[76].mxu0 %v10831_v7  ;;  %v9444_v22 = vadd.f32 %v13026_v29, %v13132_v25  ;;  %v10836_v30 = vld [vmem:[%s11320_s8 + $0xe0] ss:$12 sps:$4 sm:$0xff]  }
 0x4fe   : > { %7683 = vst [vmem:[%s12872_s27 + $0x188] sm:$0xff] %v8832_v21  ;;  %v8835_v52 = vpack.c.bf16 %v9569_v62, %v9442_v41  ;;  %9044 = vmatmul.mubr.bf16.gmra.mrb[52].mxu1 %v10832_v6  ;;  %5328 = vmatprep.mubr.bf16.mxu0 %v10833_v38  ;;  %v14414_v21 = vld [vmem:[#allocation44_spill] sm:$0xff] }
 0x4ff   : > { %9047 = vmatprep.mubr.bf16.mxu1 %v10834_v13  ;;  %7781 = vst [vmem:[%s12872_s27 + $0x498] sm:$0xff] %v8930_v43  ;;  %v9382_v39 = vadd.f32 %v14414_v21, %v12849_v58  ;;  %v10835_v21 = vld [vmem:[%s11320_s8 + $0x1e0] ss:$12 sps:$4 sm:$0xff]  }
 0x500   : > { %7686 = vst [vmem:[%s12872_s27 + $0x1a0] sm:$0xff] %v8835_v52  ;;  %v4361_v35 = vpop.f32.mrb[228].mxu0 }
 0x501   : > { %v4907_v23 = vpop.f32.mrb[204].mxu1  ;;  %v9507_v41 = vadd.f32 %v4361_v35, %v12857_v63  ;;  %v13401_v24 = vpop.f32.mrb[229].mxu0 }
 0x502   : > { %v9571_v6 = vadd.f32 %v4907_v23, %v13138_v31  ;;  %v13403_v16 = vpop.f32.mrb[205].mxu1  ;;  %v4365_v62 = vpop.f32.mrb[230].mxu0 }
 0x503   : > { %v4911_v29 = vpop.f32.mrb[206].mxu1  ;;  %v8933_v43 = vpack.c.bf16 %v9507_v41, %v9380_v32  ;;  %v9509_v7 = vadd.f32 %v4365_v62, %v12857_v63  ;;  %v13411_v13 = vpop.f32.mrb[231].mxu0  ;;  %v10837_v32 = vld [vmem:[%s11320_s8 + $0x1fc] ss:$12 sps:$4 sm:$0xff]  }
 0x504   : > { %v8838_v52 = vpack.c.bf16 %v9571_v6, %v9444_v22  ;;  %v9573_v38 = vadd.f32 %v4911_v29, %v13138_v31  ;;  %v13413_v35 = vpop.f32.mrb[207].mxu1  ;;  %v10838_v22 = vld [vmem:[%s11320_s8 + $0xf8] ss:$12 sps:$4 sm:$0xff]  }
 0x505   : > { %14415 = vst [vmem:[#allocation27_spill] sm:$0xff] %v13413_v35  ;;  %7784 = vst [vmem:[%s12872_s27 + $0x4b0] sm:$0xff] %v8933_v43  ;;  %v8936_v23 = vpack.c.bf16 %v9509_v7, %v9382_v39  ;;  %5329 = vmatmul.mubr.bf16.gmra.mrb[80].mxu0 %v10835_v21  ;;  %v14416_v62 = vld [vmem:[#allocation45_spill] sm:$0xff]  ;;  %v9448_v39 = vadd.f32 %v13042_v4, %v13132_v25  ;;  %v14418_v7 = vld [vmem:[#allocation46_spill] sm:$0xff] }
 0x506   : > { %7689 = vst [vmem:[%s12872_s27 + $0x1b8] sm:$0xff] %v8838_v52  ;;  %v8841_v3 = vpack.c.bf16 %v9573_v38, %v9446_v5  ;;  %9048 = vmatmul.mubr.bf16.gmra.mrb[56].mxu1 %v10836_v30  ;;  %5336 = vmatprep.mubr.bf16.mxu0 %v10837_v32  ;;  %v9384_v29 = vadd.f32 %v14416_v62, %v12849_v58  ;;  %v10840_v35 = vld [vmem:[%s11320_s8 + $0x110] ss:$12 sps:$4 sm:$0xff]  }
 0x507   : > { %9051 = vmatprep.mubr.bf16.mxu1 %v10838_v22  ;;  %7787 = vst [vmem:[%s12872_s27 + $0x4c8] sm:$0xff] %v8936_v23  ;;  %v9386_v38 = vadd.f32 %v14418_v7, %v12849_v58  ;;  %v9450_v23 = vadd.f32 %v13047_v57, %v13132_v25 }
 0x508   : > { %7692 = vst [vmem:[%s12872_s27 + $0x1d0] sm:$0xff] %v8841_v3  ;;  %v4371_v41 = vpop.f32.mrb[232].mxu0 }
 0x509   : > { %v4917_v6 = vpop.f32.mrb[208].mxu1  ;;  %v9511_v5 = vadd.f32 %v4371_v41, %v12857_v63  ;;  %v13429_v43 = vpop.f32.mrb[233].mxu0 }
 0x50a   : > { %v9575_v30 = vadd.f32 %v4917_v6, %v13138_v31  ;;  %v13431_v52 = vpop.f32.mrb[209].mxu1  ;;  %v4375_v3 = vpop.f32.mrb[234].mxu0 }
 0x50b   : > { %14417 = vst [vmem:[#allocation28_spill] sm:$0xff] %v13431_v52  ;;  %v4921_v4 = vpop.f32.mrb[210].mxu1  ;;  %v8939_v21 = vpack.c.bf16 %v9511_v5, %v9384_v29  ;;  %v9513_v22 = vadd.f32 %v4375_v3, %v12857_v63  ;;  %v13439_v6 = vpop.f32.mrb[235].mxu0  ;;  %v10839_v52 = vld [vmem:[%s11320_s8 + $0x1f8] ss:$12 sps:$4 sm:$0xff]   ;;  %v9388_v3 = vadd.f32 %v12660_v9, %v12849_v58  ;;  %v9454_v9 = vadd.f32 %v13063_v56, %v13132_v25 }
 0x50c   : > { %v8844_v32 = vpack.c.bf16 %v9575_v30, %v9448_v39  ;;  %v9577_v41 = vadd.f32 %v4921_v4, %v13138_v31  ;;  %v13441_v62 = vpop.f32.mrb[211].mxu1  ;;  %v10841_v29 = vld [vmem:[%s11320_s8 + $0x214] ss:$12 sps:$4 sm:$0xff]  }
 0x50d   : > { %14419 = vst [vmem:[#allocation29_spill] sm:$0xff] %v13441_v62  ;;  %7790 = vst [vmem:[%s12872_s27 + $0x4e0] sm:$0xff] %v8939_v21  ;;  %v8942_v7 = vpack.c.bf16 %v9513_v22, %v9386_v38  ;;  %5337 = vmatmul.mubr.bf16.gmra.mrb[88].mxu0 %v10839_v52  ;;  %v10842_v39 = vld [vmem:[%s11320_s8 + $0x128] ss:$12 sps:$4 sm:$0xff]   ;;  %v9452_v38 = vadd.f32 %v13058_v48, %v13132_v25  ;;  %v9390_v21 = vadd.f32 %v12663_v59, %v12849_v58  ;;  %v10848_v62 = vld [vmem:[%s11320_s8 + $0x170] ss:$12 sps:$4 sm:$0xff]  }
 0x50e   : > { %7695 = vst [vmem:[%s12872_s27 + $0x1e8] sm:$0xff] %v8844_v32  ;;  %v8847_v57 = vpack.c.bf16 %v9577_v41, %v9450_v23  ;;  %9052 = vmatmul.mubr.bf16.gmra.mrb[60].mxu1 %v10840_v35  ;;  %5344 = vmatprep.mubr.bf16.mxu0 %v10841_v29 }
 0x50f   : > { %9055 = vmatprep.mubr.bf16.mxu1 %v10842_v39  ;;  %7793 = vst [vmem:[%s12872_s27 + $0x4f8] sm:$0xff] %v8942_v7 }
 0x510   : > { %7698 = vst [vmem:[%s12872_s27 + $0x200] sm:$0xff] %v8847_v57  ;;  %v4381_v5 = vpop.f32.mrb[236].mxu0 }
 0x511   : > { %v4927_v30 = vpop.f32.mrb[212].mxu1  ;;  %v9515_v52 = vadd.f32 %v4381_v5, %v12857_v63  ;;  %v13457_v23 = vpop.f32.mrb[237].mxu0  ;;  %v10843_v5 = vld [vmem:[%s11320_s8 + $0x210] ss:$12 sps:$4 sm:$0xff]  }
 0x512   : > { %v9579_v35 = vadd.f32 %v4927_v30, %v13138_v31  ;;  %v13459_v4 = vpop.f32.mrb[213].mxu1  ;;  %v4385_v32 = vpop.f32.mrb[238].mxu0  ;;  %v10844_v30 = vld [vmem:[%s11320_s8 + $0x140] ss:$12 sps:$4 sm:$0xff]  }
 0x513   : > { %v4931_v48 = vpop.f32.mrb[214].mxu1  ;;  %v8945_v22 = vpack.c.bf16 %v9515_v52, %v9388_v3  ;;  %v9517_v7 = vadd.f32 %v4385_v32, %v12857_v63  ;;  %v13467_v29 = vpop.f32.mrb[239].mxu0  ;;  %v10845_v3 = vld [vmem:[%s11320_s8 + $0x22c] ss:$12 sps:$4 sm:$0xff]   ;;  %v9392_v32 = vadd.f32 %v12676_v60, %v12849_v58 }
 0x514   : > { %v8850_v41 = vpack.c.bf16 %v9579_v35, %v9452_v38  ;;  %v9581_v57 = vadd.f32 %v4931_v48, %v13138_v31  ;;  %v13469_v39 = vpop.f32.mrb[215].mxu1  ;;  %v10846_v38 = vld [vmem:[%s11320_s8 + $0x158] ss:$12 sps:$4 sm:$0xff]  }
 0x515   : > { %14420 = vst [vmem:[#allocation30_spill] sm:$0xff] %v13469_v39  ;;  %7796 = vst [vmem:[%s12872_s27 + $0x510] sm:$0xff] %v8945_v22  ;;  %v8948_v59 = vpack.c.bf16 %v9517_v7, %v9390_v21  ;;  %5345 = vmatmul.mubr.bf16.gmra.mrb[84].mxu0 %v10843_v5  ;;  %v9456_v21 = vadd.f32 %v13074_v26, %v13132_v25  ;;  %v14422_v7 = vld [vmem:[#allocation47_spill] sm:$0xff] }
 0x516   : > { %7701 = vst [vmem:[%s12872_s27 + $0x218] sm:$0xff] %v8850_v41  ;;  %v8853_v56 = vpack.c.bf16 %v9581_v57, %v9454_v9  ;;  %9056 = vmatmul.mubr.bf16.gmra.mrb[64].mxu1 %v10844_v30  ;;  %5352 = vmatprep.mubr.bf16.mxu0 %v10845_v3  ;;  %v9394_v57 = vadd.f32 %v14422_v7, %v12849_v58  ;;  %v10852_v39 = vld [vmem:[%s11320_s8 + $0x1a0] ss:$12 sps:$4 sm:$0xff]  }
 0x517   : > { %9059 = vmatprep.mubr.bf16.mxu1 %v10846_v38  ;;  %7799 = vst [vmem:[%s12872_s27 + $0x528] sm:$0xff] %v8948_v59  ;;  %v14423_v59 = vld [vmem:[#allocation16_spill] sm:$0xff] }
 0x518   : > { %7704 = vst [vmem:[%s12872_s27 + $0x230] sm:$0xff] %v8853_v56  ;;  %v4391_v52 = vpop.f32.mrb[240].mxu0  ;;  %v9458_v60 = vadd.f32 %v14423_v59, %v13132_v25 }
 0x519   : > { %v4937_v35 = vpop.f32.mrb[216].mxu1  ;;  %v9519_v9 = vadd.f32 %v4391_v52, %v12857_v63  ;;  %v13485_v22 = vpop.f32.mrb[241].mxu0 }
 0x51a   : > { %v9583_v48 = vadd.f32 %v4937_v35, %v13138_v31  ;;  %v13487_v41 = vpop.f32.mrb[217].mxu1  ;;  %v4395_v56 = vpop.f32.mrb[242].mxu0 }
 0x51b   : > { %14421 = vst [vmem:[#allocation31_spill] sm:$0xff] %v13487_v41  ;;  %v4941_v26 = vpop.f32.mrb[218].mxu1  ;;  %v8951_v5 = vpack.c.bf16 %v9519_v9, %v9392_v32  ;;  %v9521_v3 = vadd.f32 %v4395_v56, %v12857_v63  ;;  %v13495_v52 = vpop.f32.mrb[243].mxu0  ;;  %v10847_v41 = vld [vmem:[%s11320_s8 + $0x228] ss:$12 sps:$4 sm:$0xff]  }
 0x51c   : > { %v8856_v30 = vpack.c.bf16 %v9583_v48, %v9456_v21  ;;  %v9585_v38 = vadd.f32 %v4941_v26, %v13138_v31  ;;  %v13497_v35 = vpop.f32.mrb[219].mxu1  ;;  %v10849_v32 = vld [vmem:[%s11320_s8 + $0x244] ss:$12 sps:$4 sm:$0xff]   ;;  %v10850_v21 = vld [vmem:[%s11320_s8 + $0x188] ss:$12 sps:$4 sm:$0xff]  }
 0x51d   : > { %14424 = vst [vmem:[#allocation32_spill] sm:$0xff] %v13497_v35  ;;  %7802 = vst [vmem:[%s12872_s27 + $0x540] sm:$0xff] %v8951_v5  ;;  %v8954_v7 = vpack.c.bf16 %v9521_v3, %v9394_v57  ;;  %5353 = vmatmul.mubr.bf16.gmra.mrb[92].mxu0 %v10847_v41  ;;  %v14425_v56 = vld [vmem:[#allocation48_spill] sm:$0xff]  ;;  %v9460_v57 = vadd.f32 %v13090_v20, %v13132_v25 }
 0x51e   : > { %7707 = vst [vmem:[%s12872_s27 + $0x248] sm:$0xff] %v8856_v30  ;;  %v8859_v59 = vpack.c.bf16 %v9585_v38, %v9458_v60  ;;  %9060 = vmatmul.mubr.bf16.gmra.mrb[68].mxu1 %v10848_v62  ;;  %5360 = vmatprep.mubr.bf16.mxu0 %v10849_v32  ;;  %v9396_v26 = vadd.f32 %v14425_v56, %v12849_v58  ;;  %v14427_v30 = vld [vmem:[#allocation49_spill] sm:$0xff] }
 0x51f   : > { %9063 = vmatprep.mubr.bf16.mxu1 %v10850_v21  ;;  %7805 = vst [vmem:[%s12872_s27 + $0x558] sm:$0xff] %v8954_v7  ;;  %v9398_v3 = vadd.f32 %v14427_v30, %v12849_v58  ;;  %v14428_v38 = vld [vmem:[#allocation17_spill] sm:$0xff] }
 0x520   : > { %7710 = vst [vmem:[%s12872_s27 + $0x260] sm:$0xff] %v8859_v59  ;;  %v4401_v9 = vpop.f32.mrb[244].mxu0  ;;  %v9462_v7 = vadd.f32 %v14428_v38, %v13132_v25 }
 0x521   : > { %v4947_v48 = vpop.f32.mrb[220].mxu1  ;;  %v9523_v41 = vadd.f32 %v4401_v9, %v12857_v63  ;;  %v13513_v60 = vpop.f32.mrb[245].mxu0 }
 0x522   : > { %v9587_v62 = vadd.f32 %v4947_v48, %v13138_v31  ;;  %v13515_v5 = vpop.f32.mrb[221].mxu1  ;;  %v4405_v59 = vpop.f32.mrb[246].mxu0 }
 0x523   : > { %14426 = vst [vmem:[#allocation33_spill] sm:$0xff] %v13515_v5  ;;  %v4951_v20 = vpop.f32.mrb[222].mxu1  ;;  %v8957_v32 = vpack.c.bf16 %v9523_v41, %v9396_v26  ;;  %v9525_v9 = vadd.f32 %v4405_v59, %v12857_v63  ;;  %v13523_v56 = vpop.f32.mrb[247].mxu0  ;;  %v10851_v5 = vld [vmem:[%s11320_s8 + $0x240] ss:$12 sps:$4 sm:$0xff]  }
 0x524   : > { %v8862_v21 = vpack.c.bf16 %v9587_v62, %v9460_v57  ;;  %v9589_v48 = vadd.f32 %v4951_v20, %v13138_v31  ;;  %v13525_v35 = vpop.f32.mrb[223].mxu1  ;;  %v10853_v26 = vld [vmem:[%s11320_s8 + $0x25c] ss:$12 sps:$4 sm:$0xff]   ;;  %v10854_v57 = vld [vmem:[%s11320_s8 + $0x1b8] ss:$12 sps:$4 sm:$0xff]  }
 0x525   : > { %14429 = vst [vmem:[#allocation34_spill] sm:$0xff] %v13525_v35  ;;  %7808 = vst [vmem:[%s12872_s27 + $0x570] sm:$0xff] %v8957_v32  ;;  %v8960_v30 = vpack.c.bf16 %v9525_v9, %v9398_v3  ;;  %5361 = vmatmul.mubr.bf16.gmra.mrb[96].mxu0 %v10851_v5  ;;  %v14430_v59 = vld [vmem:[#allocation50_spill] sm:$0xff]  ;;  %v9464_v3 = vadd.f32 %v13106_v45, %v13132_v25  ;;  %v10856_v35 = vld [vmem:[%s11320_s8 + $0x1d0] ss:$12 sps:$4 sm:$0xff]  }
 0x526   : > { %7713 = vst [vmem:[%s12872_s27 + $0x278] sm:$0xff] %v8862_v21  ;;  %v8865_v38 = vpack.c.bf16 %v9589_v48, %v9462_v7  ;;  %9064 = vmatmul.mubr.bf16.gmra.mrb[72].mxu1 %v10852_v39  ;;  %5368 = vmatprep.mubr.bf16.mxu0 %v10853_v26  ;;  %v9400_v20 = vadd.f32 %v14430_v59, %v12849_v58  ;;  %v14432_v21 = vld [vmem:[#allocation51_spill] sm:$0xff] }
 0x527   : > { %9067 = vmatprep.mubr.bf16.mxu1 %v10854_v57  ;;  %7811 = vst [vmem:[%s12872_s27 + $0x588] sm:$0xff] %v8960_v30  ;;  %v9402_v9 = vadd.f32 %v14432_v21, %v12849_v58  ;;  %v9466_v48 = vadd.f32 %v13111_v51, %v13132_v25 }
 0x528   : > { %7716 = vst [vmem:[%s12872_s27 + $0x290] sm:$0xff] %v8865_v38  ;;  %v4411_v41 = vpop.f32.mrb[248].mxu0 }
 0x529   : > { %v4957_v62 = vpop.f32.mrb[224].mxu1  ;;  %v9527_v5 = vadd.f32 %v4411_v41, %v12857_v63  ;;  %v13541_v7 = vpop.f32.mrb[249].mxu0 }
 0x52a   : > { %v9591_v39 = vadd.f32 %v4957_v62, %v13138_v31  ;;  %v13543_v32 = vpop.f32.mrb[225].mxu1  ;;  %v4415_v30 = vpop.f32.mrb[250].mxu0 }
 0x52b   : > { %14431 = vst [vmem:[#allocation35_spill] sm:$0xff] %v13543_v32  ;;  %v4961_v45 = vpop.f32.mrb[226].mxu1  ;;  %v8963_v38 = vpack.c.bf16 %v9527_v5, %v9400_v20  ;;  %v9529_v57 = vadd.f32 %v4415_v30, %v12857_v63  ;;  %v13551_v62 = vpop.f32.mrb[251].mxu0  ;;  %v10855_v32 = vld [vmem:[%s11320_s8 + $0x258] ss:$12 sps:$4 sm:$0xff]  }
 0x52c   : > { %v8868_v26 = vpack.c.bf16 %v9591_v39, %v9464_v3  ;;  %v9593_v41 = vadd.f32 %v4961_v45, %v13138_v31  ;;  %v13553_v59 = vpop.f32.mrb[227].mxu1  ;;  %v10857_v20 = vld [vmem:[%s11320_s8 + $0x274] ss:$12 sps:$4 sm:$0xff]  }
 0x52d   : > { %14433 = vst [vmem:[#allocation36_spill] sm:$0xff] %v13553_v59  ;;  %7814 = vst [vmem:[%s12872_s27 + $0x5a0] sm:$0xff] %v8963_v38  ;;  %v8966_v21 = vpack.c.bf16 %v9529_v57, %v9402_v9  ;;  %5369 = vmatmul.mubr.bf16.gmra.mrb[100].mxu0 %v10855_v32  ;;  %v10858_v3 = vld [vmem:[%s11320_s8 + $0x1e8] ss:$12 sps:$4 sm:$0xff]   ;;  %v14437_v57 = vld [vmem:[#allocation53_spill] sm:$0xff] }
 0x52e   : > { %7719 = vst [vmem:[%s12872_s27 + $0x2a8] sm:$0xff] %v8868_v26  ;;  %v8871_v51 = vpack.c.bf16 %v9593_v41, %v9466_v48  ;;  %9068 = vmatmul.mubr.bf16.gmra.mrb[76].mxu1 %v10856_v35  ;;  %5376 = vmatprep.mubr.bf16.mxu0 %v10857_v20  ;;  %v14434_v30 = vld [vmem:[#allocation52_spill] sm:$0xff]  ;;  %v14435_v38 = vld [vmem:[#allocation18_spill] sm:$0xff]  ;;  %v9406_v41 = vadd.f32 %v14437_v57, %v12849_v58 }
 0x52f   : > { %9071 = vmatprep.mubr.bf16.mxu1 %v10858_v3  ;;  %7817 = vst [vmem:[%s12872_s27 + $0x5b8] sm:$0xff] %v8966_v21  ;;  %v9404_v45 = vadd.f32 %v14434_v30, %v12849_v58  ;;  %v9468_v9 = vadd.f32 %v14435_v38, %v13132_v25  ;;  %v9470_v21 = vadd.f32 %v13129_v50, %v13132_v25  ;;  %v10859_v57 = vld [vmem:[%s11320_s8 + $0x270] ss:$12 sps:$4 sm:$0xff]  }
 0x530   : > { %7722 = vst [vmem:[%s12872_s27 + $0x2c0] sm:$0xff] %v8871_v51  ;;  %v4421_v5 = vpop.f32.mrb[252].mxu0 }
 0x531   : > { %v4967_v39 = vpop.f32.mrb[228].mxu1  ;;  %v9531_v32 = vadd.f32 %v4421_v5, %v12857_v63  ;;  %v13569_v48 = vpop.f32.mrb[253].mxu0 }
 0x532   : > { %v9595_v35 = vadd.f32 %v4967_v39, %v13138_v31  ;;  %v13571_v26 = vpop.f32.mrb[229].mxu1  ;;  %v4425_v51 = vpop.f32.mrb[254].mxu0 }
 0x533   : > { %14436 = vst [vmem:[#allocation37_spill] sm:$0xff] %v13571_v26  ;;  %v4971_v20 = vpop.f32.mrb[230].mxu1  ;;  %v8969_v3 = vpack.c.bf16 %v9531_v32, %v9404_v45  ;;  %v9533_v39 = vadd.f32 %v4425_v51, %v12857_v63  ;;  %v13579_v38 = vpop.f32.mrb[255].mxu0  ;;  %v10860_v26 = vld [vmem:[%s11320_s8 + $0x200] ss:$12 sps:$4 sm:$0xff]  }
 0x534   : > { %v8874_v5 = vpack.c.bf16 %v9595_v35, %v9468_v9  ;;  %v9597_v30 = vadd.f32 %v4971_v20, %v13138_v31  ;;  %v13581_v59 = vpop.f32.mrb[231].mxu1  ;;  %v10861_v45 = vld [vmem:[%s11320_s8 + $0x28c] ss:$12 sps:$4 sm:$0xff]  }
 0x535   : > { %7820 = vst [vmem:[%s12872_s27 + $0x5d0] sm:$0xff] %v8969_v3  ;;  %v8972_v58 = vpack.c.bf16 %v9533_v39, %v9406_v41  ;;  %5377 = vmatmul.mubr.bf16.gmra.mrb[104].mxu0 %v10859_v57  ;;  %v10862_v9 = vld [vmem:[%s11320_s8 + $0x218] ss:$12 sps:$4 sm:$0xff]   ;;  %v14438_v35 = vld [vmem:[#allocation19_spill] sm:$0xff] }
 0x536   : > { %7725 = vst [vmem:[%s12872_s27 + $0x2d8] sm:$0xff] %v8874_v5  ;;  %v8877_v50 = vpack.c.bf16 %v9597_v30, %v9470_v21  ;;  %9072 = vmatmul.mubr.bf16.gmra.mrb[80].mxu1 %v10860_v26  ;;  %5384 = vmatprep.mubr.bf16.mxu0 %v10861_v45  ;;  %v9472_v41 = vadd.f32 %v14438_v35, %v13132_v25  ;;  %v10863_v45 = vld [vmem:[%s11320_s8 + $0x288] ss:$12 sps:$4 sm:$0xff]  }
 0x537   : > { %9075 = vmatprep.mubr.bf16.mxu1 %v10862_v9  ;;  %7823 = vst [vmem:[%s12872_s27 + $0x5e8] sm:$0xff] %v8972_v58  ;;  %v9474_v5 = vadd.f32 %v13159_v28, %v13132_v25  ;;  %v10864_v9 = vld [vmem:[%s11320_s8 + $0x230] ss:$12 sps:$4 sm:$0xff]   ;;  %v10866_v35 = vld [vmem:[%s11320_s8 + $0x248] ss:$12 sps:$4 sm:$0xff]  }
 0x538   : > { %7728 = vst [vmem:[%s12872_s27 + $0x2f0] sm:$0xff] %v8877_v50  ;;  %v13591_v32 = vpop.f32.mrb[0].mxu0 }
 0x539   : > { %v4977_v63 = vpop.f32.mrb[232].mxu1  ;;  %v5172_v26 = vpop.f32.mrb[1].mxu0 }
 0x53a   : > { %v9599_v21 = vadd.f32 %v4977_v63, %v13138_v31  ;;  %v13596_v51 = vpop.f32.mrb[233].mxu1  ;;  %v13598_v3 = vpop.f32.mrb[2].mxu0  ;;  %v10865_v63 = vld [vmem:[%s11320_s8 + $0x2a4] ss:$12 sps:$4 sm:$0xff]  }
 0x53b   : > { %14439 = vst [vmem:[#allocation38_spill] sm:$0xff] %v13596_v51  ;;  %v4981_v20 = vpop.f32.mrb[234].mxu1  ;;  %v5175_v50 = vpop.f32.mrb[3].mxu0 }
 0x53c   : > { %v8880_v39 = vpack.c.bf16 %v9599_v21, %v9472_v41  ;;  %v9601_v30 = vadd.f32 %v4981_v20, %v13138_v31  ;;  %v13603_v58 = vpop.f32.mrb[235].mxu1  ;;  %v9476_v21 = vadd.f32 %v13177_v10, %v13132_v25  ;;  %v9478_v50 = vadd.f32 %v13187_v19, %v13132_v25 }
 0x53d   : > { %14440 = vst [vmem:[#allocation39_spill] sm:$0xff] %v13603_v58  ;;  %5385 = vmatmul.mubr.bf16.gmra.mrb[108].mxu0 %v10863_v45  ;;  %v10870_v58 = vld [vmem:[%s11320_s8 + $0x278] ss:$12 sps:$4 sm:$0xff]  }
 0x53e   : > { %7731 = vst [vmem:[%s12872_s27 + $0x308] sm:$0xff] %v8880_v39  ;;  %v8883_v57 = vpack.c.bf16 %v9601_v30, %v9474_v5  ;;  %9076 = vmatmul.mubr.bf16.gmra.mrb[84].mxu1 %v10864_v9  ;;  %5392 = vmatprep.mubr.bf16.mxu0 %v10865_v63 }
 0x53f   : > { %9079 = vmatprep.mubr.bf16.mxu1 %v10866_v35  ;;  %v10867_v35 = vld [vmem:[%s11320_s8 + $0x2a0] ss:$12 sps:$4 sm:$0xff]  }
 0x540   : > { %7734 = vst [vmem:[%s12872_s27 + $0x320] sm:$0xff] %v8883_v57  ;;  %v13611_v41 = vpop.f32.mrb[4].mxu0 }
 0x541   : > { %v4987_v28 = vpop.f32.mrb[236].mxu1  ;;  %v5180_v5 = vpop.f32.mrb[5].mxu0 }
 0x542   : > { %v9603_v26 = vadd.f32 %v4987_v28, %v13138_v31  ;;  %v13616_v20 = vpop.f32.mrb[237].mxu1  ;;  %v13618_v30 = vpop.f32.mrb[6].mxu0  ;;  %v10868_v28 = vld [vmem:[%s11320_s8 + $0x260] ss:$12 sps:$4 sm:$0xff]   ;;  %v10869_v5 = vld [vmem:[%s11320_s8 + $0x2bc] ss:$12 sps:$4 sm:$0xff]  }
 0x543   : > { %v4991_v39 = vpop.f32.mrb[238].mxu1  ;;  %v5183_v10 = vpop.f32.mrb[7].mxu0 }
 0x544   : > { %v8886_v57 = vpack.c.bf16 %v9603_v26, %v9476_v21  ;;  %v9605_v45 = vadd.f32 %v4991_v39, %v13138_v31  ;;  %v13623_v9 = vpop.f32.mrb[239].mxu1  ;;  %v9480_v26 = vadd.f32 %v13205_v37, %v13132_v25 }
 0x545   : > { %14441 = vst [vmem:[#allocation40_spill] sm:$0xff] %v13623_v9  ;;  %5393 = vmatmul.mubr.bf16.gmra.mrb[112].mxu0 %v10867_v35  ;;  %v10874_v9 = vld [vmem:[%s11320_s8 + $0x2a8] ss:$12 sps:$4 sm:$0xff]  }
 0x546   : > { %7737 = vst [vmem:[%s12872_s27 + $0x338] sm:$0xff] %v8886_v57  ;;  %v8889_v63 = vpack.c.bf16 %v9605_v45, %v9478_v50  ;;  %9080 = vmatmul.mubr.bf16.gmra.mrb[88].mxu1 %v10868_v28  ;;  %5400 = vmatprep.mubr.bf16.mxu0 %v10869_v5 }
 0x547   : > { %9083 = vmatprep.mubr.bf16.mxu1 %v10870_v58  ;;  %v9482_v58 = vadd.f32 %v13215_v0, %v13132_v25 }
 0x548   : > { %7740 = vst [vmem:[%s12872_s27 + $0x350] sm:$0xff] %v8889_v63  ;;  %v13631_v21 = vpop.f32.mrb[8].mxu0 }
 0x549   : > { %v4997_v19 = vpop.f32.mrb[240].mxu1  ;;  %v5188_v57 = vpop.f32.mrb[9].mxu0 }
 0x54a   : > { %v9607_v39 = vadd.f32 %v4997_v19, %v13138_v31  ;;  %v13636_v50 = vpop.f32.mrb[241].mxu1  ;;  %v13638_v10 = vpop.f32.mrb[10].mxu0  ;;  %v10871_v19 = vld [vmem:[%s11320_s8 + $0x2b8] ss:$12 sps:$4 sm:$0xff]   ;;  %v10873_v57 = vld [vmem:[%s11320_s8 + $0x2d4] ss:$12 sps:$4 sm:$0xff]  }
 0x54b   : > { %14442 = vst [vmem:[#allocation41_spill] sm:$0xff] %v13636_v50  ;;  %v5001_v45 = vpop.f32.mrb[242].mxu1  ;;  %v5191_v37 = vpop.f32.mrb[11].mxu0  ;;  %v10872_v50 = vld [vmem:[%s11320_s8 + $0x290] ss:$12 sps:$4 sm:$0xff]  }
 0x54c   : > { %v8892_v63 = vpack.c.bf16 %v9607_v39, %v9480_v26  ;;  %v9609_v35 = vadd.f32 %v5001_v45, %v13138_v31  ;;  %v13643_v28 = vpop.f32.mrb[243].mxu1  ;;  %v9484_v39 = vadd.f32 %v13233_v14, %v13132_v25 }
 0x54d   : > { %14443 = vst [vmem:[#allocation42_spill] sm:$0xff] %v13643_v28  ;;  %5401 = vmatmul.mubr.bf16.gmra.mrb[116].mxu0 %v10871_v19  ;;  %v10876_v28 = vld [vmem:[%s11320_s8 + $0x2c0] ss:$12 sps:$4 sm:$0xff]  }
 0x54e   : > { %7743 = vst [vmem:[%s12872_s27 + $0x368] sm:$0xff] %v8892_v63  ;;  %v8895_v5 = vpack.c.bf16 %v9609_v35, %v9482_v58  ;;  %9084 = vmatmul.mubr.bf16.gmra.mrb[92].mxu1 %v10872_v50  ;;  %5408 = vmatprep.mubr.bf16.mxu0 %v10873_v57 }
 0x54f   : > { %9087 = vmatprep.mubr.bf16.mxu1 %v10874_v9  ;;  %v9486_v9 = vadd.f32 %v13243_v46, %v13132_v25 }
 0x550   : > { %7746 = vst [vmem:[%s12872_s27 + $0x380] sm:$0xff] %v8895_v5  ;;  %v13651_v26 = vpop.f32.mrb[12].mxu0 }
 0x551   : > { %v5007_v0 = vpop.f32.mrb[244].mxu1  ;;  %v5196_v50 = vpop.f32.mrb[13].mxu0 }
 0x552   : > { %v9611_v45 = vadd.f32 %v5007_v0, %v13138_v31  ;;  %v13656_v58 = vpop.f32.mrb[245].mxu1  ;;  %v13658_v35 = vpop.f32.mrb[14].mxu0  ;;  %v10875_v0 = vld [vmem:[%s11320_s8 + $0x2d0] ss:$12 sps:$4 sm:$0xff]   ;;  %v10877_v50 = vld [vmem:[%s11320_s8 + $0x2ec] ss:$12 sps:$4 sm:$0xff]  }
 0x553   : > { %14444 = vst [vmem:[#allocation43_spill] sm:$0xff] %v13656_v58  ;;  %v5011_v63 = vpop.f32.mrb[246].mxu1  ;;  %v5199_v14 = vpop.f32.mrb[15].mxu0  ;;  %v10878_v58 = vld [vmem:[%s11320_s8 + $0x2d8] ss:$12 sps:$4 sm:$0xff]  }
 0x554   : > { %v8898_v37 = vpack.c.bf16 %v9611_v45, %v9484_v39  ;;  %v9613_v5 = vadd.f32 %v5011_v63, %v13138_v31  ;;  %v13663_v19 = vpop.f32.mrb[247].mxu1  ;;  %v9488_v45 = vadd.f32 %v13261_v47, %v13132_v25 }
 0x555   : > { %14445 = vst [vmem:[#allocation44_spill] sm:$0xff] %v13663_v19  ;;  %5409 = vmatmul.mubr.bf16.gmra.mrb[120].mxu0 %v10875_v0  ;;  %v10879_v19 = vld [vmem:[%s11320_s8 + $0x2e8] ss:$12 sps:$4 sm:$0xff]  }
 0x556   : > { %7749 = vst [vmem:[%s12872_s27 + $0x398] sm:$0xff] %v8898_v37  ;;  %v8901_v57 = vpack.c.bf16 %v9613_v5, %v9486_v9  ;;  %9088 = vmatmul.mubr.bf16.gmra.mrb[96].mxu1 %v10876_v28  ;;  %5416 = vmatprep.mubr.bf16.mxu0 %v10877_v50 }
 0x557   : > { %9091 = vmatprep.mubr.bf16.mxu1 %v10878_v58  ;;  %v9490_v58 = vadd.f32 %v13271_v36, %v13132_v25  ;;  %v9492_v36 = vadd.f32 %v13289_v2, %v13132_v25 }
 0x558   : > { %7752 = vst [vmem:[%s12872_s27 + $0x3b0] sm:$0xff] %v8901_v57  ;;  %v13671_v39 = vpop.f32.mrb[16].mxu0 }
 0x559   : > { %v5017_v46 = vpop.f32.mrb[248].mxu1  ;;  %v5204_v28 = vpop.f32.mrb[17].mxu0 }
 0x55a   : > { %v9615_v63 = vadd.f32 %v5017_v46, %v13138_v31  ;;  %v13676_v9 = vpop.f32.mrb[249].mxu1  ;;  %v13678_v5 = vpop.f32.mrb[18].mxu0  ;;  %v10880_v46 = vld [vmem:[%s11320_s8 + $0x2f0] ss:$12 sps:$4 sm:$0xff]  }
 0x55b   : > { %14446 = vst [vmem:[#allocation45_spill] sm:$0xff] %v13676_v9  ;;  %v5021_v37 = vpop.f32.mrb[250].mxu1  ;;  %v5207_v50 = vpop.f32.mrb[19].mxu0 }
 0x55c   : > { %v8904_v14 = vpack.c.bf16 %v9615_v63, %v9488_v45  ;;  %v9617_v57 = vadd.f32 %v5021_v37, %v13138_v31  ;;  %v13683_v0 = vpop.f32.mrb[251].mxu1 }
 0x55d   : > { %14447 = vst [vmem:[#allocation46_spill] sm:$0xff] %v13683_v0  ;;  %5417 = vmatmul.mubr.bf16.gmra.mrb[124].mxu0 %v10879_v19  ;;  %v9494_v19 = vadd.f32 %v13299_v11, %v13132_v25 }
 0x55e   : > { %7755 = vst [vmem:[%s12872_s27 + $0x3c8] sm:$0xff] %v8904_v14  ;;  %v8907_v47 = vpack.c.bf16 %v9617_v57, %v9490_v58  ;;  %9092 = vmatmul.mubr.bf16.gmra.mrb[100].mxu1 %v10880_v46 }
 0x560   : > { %7758 = vst [vmem:[%s12872_s27 + $0x3e0] sm:$0xff] %v8907_v47  ;;  %v13689_v9 = vpop.f32.mrb[20].mxu0 }
 0x561   : > { %v5027_v28 = vpop.f32.mrb[252].mxu1  ;;  %v5212_v37 = vpop.f32.mrb[21].mxu0 }
 0x562   : > { %v9619_v45 = vadd.f32 %v5027_v28, %v13138_v31  ;;  %v13694_v63 = vpop.f32.mrb[253].mxu1  ;;  %v13696_v58 = vpop.f32.mrb[22].mxu0  ;;  %v9496_v37 = vadd.f32 %v13317_v34, %v13132_v25 }
 0x563   : > { %14448 = vst [vmem:[#allocation47_spill] sm:$0xff] %v13694_v63  ;;  %v5031_v14 = vpop.f32.mrb[254].mxu1  ;;  %v5215_v46 = vpop.f32.mrb[23].mxu0 }
 0x564   : > { %v8910_v57 = vpack.c.bf16 %v9619_v45, %v9492_v36  ;;  %v9621_v50 = vadd.f32 %v5031_v14, %v13138_v31  ;;  %v13701_v47 = vpop.f32.mrb[255].mxu1 }
 0x565   : > { %14449 = vst [vmem:[#allocation16_spill] sm:$0xff] %v13701_v47 }
 0x566   : > { %7761 = vst [vmem:[%s12872_s27 + $0x3f8] sm:$0xff] %v8910_v57  ;;  %v8913_v2 = vpack.c.bf16 %v9621_v50, %v9494_v19  ;;  %v9498_v57 = vadd.f32 %v13327_v61, %v13132_v25 }
 0x568   : > { %7764 = vst [vmem:[%s12872_s27 + $0x410] sm:$0xff] %v8913_v2  ;;  %v13705_v0 = vpop.f32.mrb[24].mxu0 }
 0x569   : > { %v5037_v28 = vpop.f32.mrb[0].mxu1  ;;  %v5220_v36 = vpop.f32.mrb[25].mxu0 }
 0x56a   : > { %v9623_v63 = vadd.f32 %v5037_v28, %v13138_v31  ;;  %v13710_v11 = vpop.f32.mrb[1].mxu1  ;;  %v13712_v14 = vpop.f32.mrb[26].mxu0  ;;  %v9500_v36 = vadd.f32 %v13345_v8, %v13132_v25 }
 0x56b   : > { %14450 = vst [vmem:[#allocation48_spill] sm:$0xff] %v13710_v11  ;;  %v5041_v45 = vpop.f32.mrb[2].mxu1  ;;  %v5223_v2 = vpop.f32.mrb[27].mxu0 }
 0x56c   : > { %v8916_v19 = vpack.c.bf16 %v9623_v63, %v9496_v37  ;;  %v9625_v50 = vadd.f32 %v5041_v45, %v13138_v31  ;;  %v13717_v46 = vpop.f32.mrb[3].mxu1 }
 0x56d   : > { %14451 = vst [vmem:[#allocation49_spill] sm:$0xff] %v13717_v46 }
 0x56e   : > { %7767 = vst [vmem:[%s12872_s27 + $0x428] sm:$0xff] %v8916_v19  ;;  %v8919_v34 = vpack.c.bf16 %v9625_v50, %v9498_v57  ;;  %v9502_v19 = vadd.f32 %v13355_v17, %v13132_v25 }
 0x570   : > { %7770 = vst [vmem:[%s12872_s27 + $0x440] sm:$0xff] %v8919_v34  ;;  %v13721_v11 = vpop.f32.mrb[28].mxu0 }
 0x571   : > { %v5047_v28 = vpop.f32.mrb[4].mxu1  ;;  %v5228_v63 = vpop.f32.mrb[29].mxu0 }
 0x572   : > { %v9627_v47 = vadd.f32 %v5047_v28, %v13138_v31  ;;  %v13726_v61 = vpop.f32.mrb[5].mxu1  ;;  %v13728_v45 = vpop.f32.mrb[30].mxu0  ;;  %v9504_v63 = vadd.f32 %v13373_v27, %v13132_v25 }
 0x573   : > { %14452 = vst [vmem:[#allocation17_spill] sm:$0xff] %v13726_v61  ;;  %v5051_v37 = vpop.f32.mrb[6].mxu1  ;;  %v5231_v34 = vpop.f32.mrb[31].mxu0 }
 0x574   : > { %v8922_v57 = vpack.c.bf16 %v9627_v47, %v9500_v36  ;;  %v9629_v50 = vadd.f32 %v5051_v37, %v13138_v31  ;;  %v13733_v2 = vpop.f32.mrb[7].mxu1 }
 0x575   : > { %14453 = vst [vmem:[#allocation50_spill] sm:$0xff] %v13733_v2 }
 0x576   : > { %7773 = vst [vmem:[%s12872_s27 + $0x458] sm:$0xff] %v8922_v57  ;;  %v8925_v8 = vpack.c.bf16 %v9629_v50, %v9502_v19  ;;  %v9506_v57 = vadd.f32 %v13383_v40, %v13132_v25 }
 0x578   : > { %7776 = vst [vmem:[%s12872_s27 + $0x470] sm:$0xff] %v8925_v8  ;;  %v13737_v46 = vpop.f32.mrb[32].mxu0 }
 0x579   : > { %v5057_v28 = vpop.f32.mrb[8].mxu1  ;;  %v5236_v47 = vpop.f32.mrb[33].mxu0 }
 0x57a   : > { %v9631_v61 = vadd.f32 %v5057_v28, %v13138_v31  ;;  %v13742_v17 = vpop.f32.mrb[9].mxu1  ;;  %v13744_v37 = vpop.f32.mrb[34].mxu0  ;;  %v9508_v47 = vadd.f32 %v13401_v24, %v13132_v25 }
 0x57b   : > { %14454 = vst [vmem:[#allocation51_spill] sm:$0xff] %v13742_v17  ;;  %v5061_v36 = vpop.f32.mrb[10].mxu1  ;;  %v5239_v8 = vpop.f32.mrb[35].mxu0 }
 0x57c   : > { %v8928_v19 = vpack.c.bf16 %v9631_v61, %v9504_v63  ;;  %v9633_v50 = vadd.f32 %v5061_v36, %v13138_v31  ;;  %v13749_v34 = vpop.f32.mrb[11].mxu1 }
 0x57d   : > { %14455 = vst [vmem:[#allocation52_spill] sm:$0xff] %v13749_v34 }
 0x57e   : > { %7779 = vst [vmem:[%s12872_s27 + $0x488] sm:$0xff] %v8928_v19  ;;  %v8931_v27 = vpack.c.bf16 %v9633_v50, %v9506_v57  ;;  %v9510_v19 = vadd.f32 %v13411_v13, %v13132_v25 }
 0x580   : > { %7782 = vst [vmem:[%s12872_s27 + $0x4a0] sm:$0xff] %v8931_v27  ;;  %v13753_v17 = vpop.f32.mrb[36].mxu0 }
 0x581   : > { %v5067_v28 = vpop.f32.mrb[12].mxu1  ;;  %v5244_v61 = vpop.f32.mrb[37].mxu0 }
 0x582   : > { %v9635_v2 = vadd.f32 %v5067_v28, %v13138_v31  ;;  %v13758_v40 = vpop.f32.mrb[13].mxu1  ;;  %v13760_v36 = vpop.f32.mrb[38].mxu0  ;;  %v9512_v61 = vadd.f32 %v13429_v43, %v13132_v25 }
 0x583   : > { %14456 = vst [vmem:[#allocation18_spill] sm:$0xff] %v13758_v40  ;;  %v5071_v63 = vpop.f32.mrb[14].mxu1  ;;  %v5247_v27 = vpop.f32.mrb[39].mxu0 }
 0x584   : > { %v8934_v57 = vpack.c.bf16 %v9635_v2, %v9508_v47  ;;  %v9637_v50 = vadd.f32 %v5071_v63, %v13138_v31  ;;  %v13765_v8 = vpop.f32.mrb[15].mxu1 }
 0x585   : > { %14457 = vst [vmem:[#allocation53_spill] sm:$0xff] %v13765_v8 }
 0x586   : > { %7785 = vst [vmem:[%s12872_s27 + $0x4b8] sm:$0xff] %v8934_v57  ;;  %v8937_v24 = vpack.c.bf16 %v9637_v50, %v9510_v19  ;;  %v9514_v57 = vadd.f32 %v13439_v6, %v13132_v25 }
 0x588   : > { %7788 = vst [vmem:[%s12872_s27 + $0x4d0] sm:$0xff] %v8937_v24  ;;  %v13769_v34 = vpop.f32.mrb[40].mxu0 }
 0x589   : > { %v5077_v28 = vpop.f32.mrb[16].mxu1  ;;  %v5252_v2 = vpop.f32.mrb[41].mxu0 }
 0x58a   : > { %v9639_v40 = vadd.f32 %v5077_v28, %v13138_v31  ;;  %v13774_v13 = vpop.f32.mrb[17].mxu1  ;;  %v13776_v63 = vpop.f32.mrb[42].mxu0  ;;  %v9516_v2 = vadd.f32 %v13457_v23, %v13132_v25 }
 0x58b   : > { %14458 = vst [vmem:[#allocation19_spill] sm:$0xff] %v13774_v13  ;;  %v5081_v47 = vpop.f32.mrb[18].mxu1  ;;  %v5255_v24 = vpop.f32.mrb[43].mxu0 }
 0x58c   : > { %v8940_v19 = vpack.c.bf16 %v9639_v40, %v9512_v61  ;;  %v9641_v50 = vadd.f32 %v5081_v47, %v13138_v31  ;;  %v13781_v27 = vpop.f32.mrb[19].mxu1 }
 0x58d   : > { %14459 = vst [vmem:[#allocation54_spill] sm:$0xff] %v13781_v27 }
 0x58e   : > { %7791 = vst [vmem:[%s12872_s27 + $0x4e8] sm:$0xff] %v8940_v19  ;;  %v8943_v43 = vpack.c.bf16 %v9641_v50, %v9514_v57  ;;  %v9518_v19 = vadd.f32 %v13467_v29, %v13132_v25 }
 0x590   : > { %7794 = vst [vmem:[%s12872_s27 + $0x500] sm:$0xff] %v8943_v43  ;;  %v13785_v13 = vpop.f32.mrb[44].mxu0 }
 0x591   : > { %v5087_v28 = vpop.f32.mrb[20].mxu1  ;;  %v5260_v40 = vpop.f32.mrb[45].mxu0 }
 0x592   : > { %v9643_v8 = vadd.f32 %v5087_v28, %v13138_v31  ;;  %v13790_v6 = vpop.f32.mrb[21].mxu1  ;;  %v13792_v47 = vpop.f32.mrb[46].mxu0  ;;  %v9520_v40 = vadd.f32 %v13485_v22, %v13132_v25 }
 0x593   : > { %14460 = vst [vmem:[#allocation55_spill] sm:$0xff] %v13790_v6  ;;  %v5091_v61 = vpop.f32.mrb[22].mxu1  ;;  %v5263_v43 = vpop.f32.mrb[47].mxu0 }
 0x594   : > { %v8946_v57 = vpack.c.bf16 %v9643_v8, %v9516_v2  ;;  %v9645_v50 = vadd.f32 %v5091_v61, %v13138_v31  ;;  %v13797_v24 = vpop.f32.mrb[23].mxu1 }
 0x595   : > { %14461 = vst [vmem:[#allocation56_spill] sm:$0xff] %v13797_v24 }
 0x596   : > { %7797 = vst [vmem:[%s12872_s27 + $0x518] sm:$0xff] %v8946_v57  ;;  %v8949_v23 = vpack.c.bf16 %v9645_v50, %v9518_v19  ;;  %v9522_v57 = vadd.f32 %v13495_v52, %v13132_v25 }
 0x598   : > { %7800 = vst [vmem:[%s12872_s27 + $0x530] sm:$0xff] %v8949_v23  ;;  %v13801_v27 = vpop.f32.mrb[48].mxu0 }
 0x599   : > { %v5097_v28 = vpop.f32.mrb[24].mxu1  ;;  %v5268_v8 = vpop.f32.mrb[49].mxu0 }
 0x59a   : > { %v9647_v6 = vadd.f32 %v5097_v28, %v13138_v31  ;;  %v13806_v29 = vpop.f32.mrb[25].mxu1  ;;  %v13808_v61 = vpop.f32.mrb[50].mxu0  ;;  %v9524_v8 = vadd.f32 %v13513_v60, %v13132_v25 }
 0x59b   : > { %14462 = vst [vmem:[#allocation57_spill] sm:$0xff] %v13806_v29  ;;  %v5101_v2 = vpop.f32.mrb[26].mxu1  ;;  %v5271_v23 = vpop.f32.mrb[51].mxu0 }
 0x59c   : > { %v8952_v19 = vpack.c.bf16 %v9647_v6, %v9520_v40  ;;  %v9649_v50 = vadd.f32 %v5101_v2, %v13138_v31  ;;  %v13813_v43 = vpop.f32.mrb[27].mxu1 }
 0x59d   : > { %14463 = vst [vmem:[#allocation58_spill] sm:$0xff] %v13813_v43 }
 0x59e   : > { %7803 = vst [vmem:[%s12872_s27 + $0x548] sm:$0xff] %v8952_v19  ;;  %v8955_v22 = vpack.c.bf16 %v9649_v50, %v9522_v57  ;;  %v9526_v19 = vadd.f32 %v13523_v56, %v13132_v25 }
 0x5a0   : > { %7806 = vst [vmem:[%s12872_s27 + $0x560] sm:$0xff] %v8955_v22  ;;  %v13817_v29 = vpop.f32.mrb[52].mxu0 }
 0x5a1   : > { %v5107_v28 = vpop.f32.mrb[28].mxu1  ;;  %v5276_v6 = vpop.f32.mrb[53].mxu0 }
 0x5a2   : > { %v9651_v24 = vadd.f32 %v5107_v28, %v13138_v31  ;;  %v13822_v52 = vpop.f32.mrb[29].mxu1  ;;  %v13824_v2 = vpop.f32.mrb[54].mxu0  ;;  %v9528_v6 = vadd.f32 %v13541_v7, %v13132_v25 }
 0x5a3   : > { %14464 = vst [vmem:[#allocation59_spill] sm:$0xff] %v13822_v52  ;;  %v5111_v40 = vpop.f32.mrb[30].mxu1  ;;  %v5279_v22 = vpop.f32.mrb[55].mxu0 }
 0x5a4   : > { %v8958_v57 = vpack.c.bf16 %v9651_v24, %v9524_v8  ;;  %v9653_v50 = vadd.f32 %v5111_v40, %v13138_v31  ;;  %v13829_v23 = vpop.f32.mrb[31].mxu1 }
 0x5a5   : > { %14465 = vst [vmem:[#allocation60_spill] sm:$0xff] %v13829_v23 }
 0x5a6   : > { %7809 = vst [vmem:[%s12872_s27 + $0x578] sm:$0xff] %v8958_v57  ;;  %v8961_v60 = vpack.c.bf16 %v9653_v50, %v9526_v19  ;;  %v9530_v57 = vadd.f32 %v13551_v62, %v13132_v25 }
 0x5a8   : > { %7812 = vst [vmem:[%s12872_s27 + $0x590] sm:$0xff] %v8961_v60  ;;  %v13833_v43 = vpop.f32.mrb[56].mxu0 }
 0x5a9   : > { %v5117_v28 = vpop.f32.mrb[32].mxu1  ;;  %v5284_v24 = vpop.f32.mrb[57].mxu0 }
 0x5aa   : > { %v9655_v52 = vadd.f32 %v5117_v28, %v13138_v31  ;;  %v13838_v56 = vpop.f32.mrb[33].mxu1  ;;  %v13840_v40 = vpop.f32.mrb[58].mxu0  ;;  %v9532_v24 = vadd.f32 %v13569_v48, %v13132_v25 }
 0x5ab   : > { %14466 = vst [vmem:[#allocation61_spill] sm:$0xff] %v13838_v56  ;;  %v5121_v8 = vpop.f32.mrb[34].mxu1  ;;  %v5287_v60 = vpop.f32.mrb[59].mxu0 }
 0x5ac   : > { %v8964_v19 = vpack.c.bf16 %v9655_v52, %v9528_v6  ;;  %v9657_v50 = vadd.f32 %v5121_v8, %v13138_v31  ;;  %v13845_v22 = vpop.f32.mrb[35].mxu1  ;;  %v14469_v52 = vld [vmem:[#allocation15_spill] sm:$0xff] }
 0x5ad   : > { %14467 = vst [vmem:[#allocation62_spill] sm:$0xff] %v13845_v22  ;;  %v681_v6 = vsub.s32 7, %v14469_v52  ;;  %v10881_v22 = vld [vmem:[#allocation7] sm:$0xff] }
 0x5ae   : > { %7815 = vst [vmem:[%s12872_s27 + $0x5a8] sm:$0xff] %v8964_v19  ;;  %v8967_v23 = vpack.c.bf16 %v9657_v50, %v9530_v57 }
 0x5b0   : > { %7818 = vst [vmem:[%s12872_s27 + $0x5c0] sm:$0xff] %v8967_v23  ;;  %v13849_v28 = vpop.f32.mrb[60].mxu0  ;;  %v9534_v23 = vadd.f32 %v13579_v38, %v13132_v25 }
 0x5b1   : > { %v5127_v7 = vpop.f32.mrb[36].mxu1  ;;  %v5292_v62 = vpop.f32.mrb[61].mxu0 }
 0x5b2   : > { %v9659_v56 = vadd.f32 %v5127_v7, %v13138_v31  ;;  %v13854_v51 = vpop.f32.mrb[37].mxu1  ;;  %v13857_v19 = vpop.f32.mrb[62].mxu0  ;;  %v13864_v7 = vld [vmem:[#allocation7 + $0x8] ss:$0 sm:$0xff] }
 0x5b3   : > { %14468 = vst [vmem:[#allocation63_spill] sm:$0xff] %v13854_v51  ;;  %v5131_v8 = vpop.f32.mrb[38].mxu1  ;;  %v5295_v60 = vpop.f32.mrb[63].mxu0  ;;  %v13867_v51 = vrot.slane %v10881_v22, %v681_v6  ;;  %v5179_v52 = vadd.f32 %v13864_v7, %v13611_v41  ;;  %v5171_v25 = vadd.f32 %v13864_v7, %v13591_v32  ;;  %v14470_v32 = vld [vmem:[#allocation20_spill] sm:$0xff] }
 0x5b4   : > { %v8970_v57 = vpack.c.bf16 %v9659_v56, %v9532_v24  ;;  %v9661_v50 = vadd.f32 %v5131_v8, %v13138_v31  ;;  %v13862_v48 = vpop.f32.mrb[39].mxu1  ;;  %v5182_v24 = vadd.f32 %v13864_v7, %v13618_v30 }
 0x5b5   : > { %v9540_v56 = vadd.f32 %v13179_v18, %v13867_v51  ;;  %v9536_v41 = vadd.f32 %v14470_v32, %v13867_v51 }
 0x5b6   : > { %7821 = vst [vmem:[%s12872_s27 + $0x5d8] sm:$0xff] %v8970_v57  ;;  %v8973_v62 = vpack.c.bf16 %v9661_v50, %v9534_v23  ;;  %v5174_v23 = vadd.f32 %v13864_v7, %v13598_v3  ;;  %v9542_v50 = vadd.f32 %v13189_v1, %v13867_v51  ;;  %v9538_v3 = vadd.f32 %v13161_v49, %v13867_v51 }
 0x5b8   : > { %7824 = vst [vmem:[%s12872_s27 + $0x5f0] sm:$0xff] %v8973_v62  ;;  %v13875_v38 = vpop.f32.mrb[64].mxu0 }
 0x5b9   : > { %v9033_v31 = vpop.f32.mrb[40].mxu1  ;;  %v5300_v6 = vpop.f32.mrb[65].mxu0 }
 0x5ba   : > { %v5468_v22 = vadd.f32 %v9033_v31, %v5179_v52  ;;  %v5459_v8 = vpop.f32.mrb[41].mxu1  ;;  %v13891_v57 = vpop.f32.mrb[66].mxu0 }
 0x5bb   : > { %v5460_v18 = vadd.f32 %v5459_v8, %v5171_v25  ;;  %v9034_v30 = vpop.f32.mrb[42].mxu1  ;;  %v5303_v52 = vpop.f32.mrb[67].mxu0 }
 0x5bc   : > { %v8791_v60 = vpack.c.bf16 %v5468_v22, %v9540_v56  ;;  %v5471_v62 = vadd.f32 %v9034_v30, %v5182_v24  ;;  %v5462_v31 = vpop.f32.mrb[43].mxu1 }
 0x5bd   : > { %v8785_v6 = vpack.c.bf16 %v5460_v18, %v9536_v41  ;;  %v5463_v25 = vadd.f32 %v5462_v31, %v5174_v23 }
 0x5be   : > { %10981 = shalt.err (!%p10978_p2)
}
 0x5bf   : > { %s10982_s12 = scalar_lea.hbm %s13885_s24, 12288  ;;  %s10986_s25 = scalar_lea.hbm %s14316_s3, 24576 }
 0x5c0   : > { %p10983_p0 = scmp.ne.s32.totalorder %s13885_s24, %s10982_s12  ;;  %p10987_p6 = scmp.lt.u32.totalorder %s13885_s24, %s14316_s3 }
 0x5c1   : > { %p10988_p7 = scmp.lt.u32.totalorder %s10986_s25, %s10982_s12  ;;  %p10990_p8 = scmp.lt.u32.totalorder %s10982_s12, %s13885_s24 }
 0x5c2   : > { %p10984_p4 = pnand %p10983_p0, %p14471_p12 }
 0x5c3   : > { %p10989_p11 = por %p10988_p7, %p10987_p6 }
 0x5c4   : > { %p10985_p13 = pneg %p10984_p4 }
 0x5c5   : > { %p10991_p1 = por %p10990_p8, %p10989_p11 }
 0x5c7   : > { %p10992_p10 = pnand %p10991_p1, %p10985_p13 }
 0x5c9   : > { %10995 = shalt.err (!%p10992_p10)
}
 0x5ca   : > { %s11097_s21 = smov 192   ;;  %s11098_s5 = smov 12   ;;  %7642 = vst [vmem:[%s12872_s27 + $0x40] sm:$0xff] %v8791_v60  ;;  %v8794_v49 = vpack.c.bf16 %v5471_v62, %v9542_v50  ;;  %7636 = vst [vmem:[%s12872_s27 + $0x10] sm:$0xff] %v8785_v6  ;;  %v8788_v1 = vpack.c.bf16 %v5463_v25, %v9538_v3  ;;  %v5195_v56 = vadd.f32 %v13864_v7, %v13651_v26  ;;  %v13931_v22 = vpop.f32.mrb[68].mxu0  ;;  %v9037_v8 = vpop.f32.mrb[44].mxu1 }
 0x5cb   : > { %10151 = dma.vmem_to_hbm [thread:$0]  (%p14471_p12), %s13893_s13, 12288, %s13885_s24, %s7827_s29, %s11097_s21, %s11097_s21, %s11098_s5   ;;  %v5187_v24 = vadd.f32 %v13864_v7, %v13631_v21  ;;  %v9548_v32 = vadd.f32 %v13235_v15, %v13867_v51  ;;  %v5198_v41 = vadd.f32 %v13864_v7, %v13658_v35  ;;  %v5308_v18 = vpop.f32.mrb[69].mxu0  ;;  %v5475_v30 = vpop.f32.mrb[45].mxu1  ;;  %v9544_v26 = vadd.f32 %v13207_v55, %v13867_v51  ;;  %v14472_v6 = vld [vmem:[#allocation21_spill] sm:$0xff] }
 0x5cc   : > { %7645 = vst [vmem:[%s12872_s27 + $0x58] sm:$0xff] %v8794_v49  ;;  %7639 = vst [vmem:[%s12872_s27 + $0x28] sm:$0xff] %v8788_v1  ;;  %v5484_v23 = vadd.f32 %v9037_v8, %v5195_v56  ;;  %v5190_v21 = vadd.f32 %v13864_v7, %v13638_v10  ;;  %v13941_v60 = vpop.f32.mrb[70].mxu0  ;;  %v9038_v62 = vpop.f32.mrb[46].mxu1  ;;  %v9550_v15 = vadd.f32 %v13245_v44, %v13867_v51  ;;  %s10140_s13 = smul.u32 24576, %s11078_s18  ;;  %s7867_s24 = sshll.u32 %s12872_s27, 4  ;;  %s14261_s24 = int_to_ptr.vmem [resolvable:$true] %s7867_s24 }
 0x5cd   : > { %v5476_v50 = vadd.f32 %v5475_v30, %v5187_v24  ;;  %v5487_v52 = vadd.f32 %v9038_v62, %v5198_v41  ;;  %v5311_v31 = vpop.f32.mrb[71].mxu0  ;;  %v5478_v3 = vpop.f32.mrb[47].mxu1  ;;  %v9546_v25 = vadd.f32 %v14472_v6, %v13867_v51  ;;  %v5211_v56 = vadd.f32 %v13864_v7, %v13689_v9  ;;  %s7832_s7 = scalar_lea.sflag [#allocation10], %s11314_s6  ;;  %s10996_s11 = scalar_lea.vmem %s14261_s24, 24576 }
 0x5ce   : > { %v8803_v35 = vpack.c.bf16 %v5484_v23, %v9548_v32  ;;  %v5479_v49 = vadd.f32 %v5478_v3, %v5190_v21  ;;  %v5203_v44 = vadd.f32 %v13864_v7, %v13671_v39  ;;  %v13955_v24 = vpop.f32.mrb[72].mxu0  ;;  %v9041_v8 = vpop.f32.mrb[48].mxu1  ;;  %v9556_v32 = vadd.f32 %v13291_v53, %v13867_v51  ;;  %s14259_s22 = scalar_lea.hbm %s14317_s4, %s10140_s13  ;;  %p10997_p3 = scmp.ne.s32.totalorder %s14261_s24, %s10996_s11 }
 0x5cf   : > { %v8797_v55 = vpack.c.bf16 %v5476_v50, %v9544_v26  ;;  %v8806_v10 = vpack.c.bf16 %v5487_v52, %v9550_v15  ;;  %v5214_v41 = vadd.f32 %v13864_v7, %v13696_v58  ;;  %v5500_v23 = vadd.f32 %v9041_v8, %v5211_v56  ;;  %v5316_v18 = vpop.f32.mrb[73].mxu0  ;;  %v5491_v30 = vpop.f32.mrb[49].mxu1  ;;  %v14473_v52 = vld [vmem:[#allocation22_spill] sm:$0xff]  ;;  %s11099_s12 = smov [#allocation9]  }
 0x5d0   : > { %7654 = vst [vmem:[%s12872_s27 + $0xa0] sm:$0xff] %v8803_v35  ;;  %v8800_v1 = vpack.c.bf16 %v5479_v49, %v9546_v25  ;;  %v9552_v9 = vadd.f32 %v13263_v12, %v13867_v51  ;;  %v5206_v39 = vadd.f32 %v13864_v7, %v13678_v5  ;;  %v5492_v26 = vadd.f32 %v5491_v30, %v5203_v44  ;;  %v13965_v21 = vpop.f32.mrb[74].mxu0  ;;  %v9042_v50 = vpop.f32.mrb[50].mxu1  ;;  %p10998_p5 = pnand %p10997_p3, %p14471_p12  ;;  %s11000_s8 = sshll.u32 %s11099_s12, 4  ;;  %s11001_s8 = int_to_ptr.vmem [resolvable:$false] %s11000_s8 }
 0x5d1   : > { %7648 = vst [vmem:[%s12872_s27 + $0x70] sm:$0xff] %v8797_v55  ;;  %7657 = vst [vmem:[%s12872_s27 + $0xb8] sm:$0xff] %v8806_v10  ;;  %v9558_v53 = vadd.f32 %v13301_v54, %v13867_v51  ;;  %v8815_v58 = vpack.c.bf16 %v5500_v23, %v9556_v32  ;;  %v5503_v62 = vadd.f32 %v9042_v50, %v5214_v41  ;;  %v5319_v15 = vpop.f32.mrb[75].mxu0  ;;  %v5494_v35 = vpop.f32.mrb[51].mxu1  ;;  %s11002_s23 = scalar_lea.vmem %s11001_s8, 49152  ;;  %p11003_p2 = scmp.lt.s32.totalorder %s14261_s24, %s11001_s8 }
 0x5d2   : > { %7651 = vst [vmem:[%s12872_s27 + $0x88] sm:$0xff] %v8800_v1  ;;  %v9554_v31 = vadd.f32 %v14473_v52, %v13867_v51  ;;  %v8809_v12 = vpack.c.bf16 %v5492_v26, %v9552_v9  ;;  %v5495_v3 = vadd.f32 %v5494_v35, %v5206_v39  ;;  %v5227_v25 = vadd.f32 %v13864_v7, %v13721_v11  ;;  %v13979_v55 = vpop.f32.mrb[76].mxu0  ;;  %v9045_v49 = vpop.f32.mrb[52].mxu1  ;;  %v14474_v11 = vld [vmem:[#allocation23_spill] sm:$0xff]  ;;  %v14475_v26 = vld [vmem:[#allocation24_spill] sm:$0xff]  ;;  %p10999_p9 = pneg %p10998_p5  ;;  %p11004_p0 = scmp.lt.s32.totalorder %s11002_s23, %s10996_s11 }
 0x5d3   : > { %7666 = vst [vmem:[%s12872_s27 + $0x100] sm:$0xff] %v8815_v58  ;;  %v8818_v5 = vpack.c.bf16 %v5503_v62, %v9558_v53  ;;  %v5219_v54 = vadd.f32 %v13864_v7, %v13705_v0  ;;  %v9564_v10 = vadd.f32 %v13347_v33, %v13867_v51  ;;  %v5230_v1 = vadd.f32 %v13864_v7, %v13728_v45  ;;  %v5324_v44 = vpop.f32.mrb[77].mxu0  ;;  %v5507_v8 = vpop.f32.mrb[53].mxu1 }
 0x5d4   : > { %7660 = vst [vmem:[%s12872_s27 + $0xd0] sm:$0xff] %v8809_v12  ;;  %v8812_v6 = vpack.c.bf16 %v5495_v3, %v9554_v31  ;;  %v5516_v56 = vadd.f32 %v9045_v49, %v5227_v25  ;;  %v9560_v32 = vadd.f32 %v14474_v11, %v13867_v51  ;;  %v5222_v0 = vadd.f32 %v13864_v7, %v13712_v14  ;;  %v13989_v23 = vpop.f32.mrb[78].mxu0  ;;  %v9046_v18 = vpop.f32.mrb[54].mxu1  ;;  %v14478_v11 = vld [vmem:[#allocation26_spill] sm:$0xff]  ;;  %p11005_p4 = por %p11004_p0, %p11003_p2 }
 0x5d5   : > { %7669 = vst [vmem:[%s12872_s27 + $0x118] sm:$0xff] %v8818_v5  ;;  %v5508_v41 = vadd.f32 %v5507_v8, %v5219_v54  ;;  %v9566_v33 = vadd.f32 %v13357_v42, %v13867_v51  ;;  %v5519_v30 = vadd.f32 %v9046_v18, %v5230_v1  ;;  %v5327_v9 = vpop.f32.mrb[79].mxu0  ;;  %v5510_v39 = vpop.f32.mrb[55].mxu1  ;;  %v9562_v50 = vadd.f32 %v14475_v26, %v13867_v51 }
 0x5d6   : > { %7663 = vst [vmem:[%s12872_s27 + $0xe8] sm:$0xff] %v8812_v6  ;;  %v8827_v45 = vpack.c.bf16 %v5516_v56, %v9564_v10  ;;  %v5511_v58 = vadd.f32 %v5510_v39, %v5222_v0  ;;  %v5243_v15 = vadd.f32 %v13864_v7, %v13753_v17  ;;  %v5235_v42 = vadd.f32 %v13864_v7, %v13737_v46  ;;  %v14476_v17 = vld [vmem:[#allocation25_spill] sm:$0xff]  ;;  %p11006_p13 = pnand %p11005_p4, %p10999_p9 }
 0x5d7   : > { %v8821_v53 = vpack.c.bf16 %v5508_v41, %v9560_v32  ;;  %v8830_v14 = vpack.c.bf16 %v5519_v30, %v9566_v33  ;;  %v9572_v31 = vadd.f32 %v13403_v16, %v13867_v51  ;;  %v5246_v12 = vadd.f32 %v13864_v7, %v13760_v36  ;;  %v14477_v16 = vld [vmem:[#allocation27_spill] sm:$0xff] }
 0x5d8   : > { %7678 = vst [vmem:[%s12872_s27 + $0x160] sm:$0xff] %v8827_v45  ;;  %v8824_v62 = vpack.c.bf16 %v5511_v58, %v9562_v50  ;;  %v14003_v35 = vpop.f32.mrb[80].mxu0  ;;  %v9568_v25 = vadd.f32 %v14476_v17, %v13867_v51  ;;  %v5238_v46 = vadd.f32 %v13864_v7, %v13744_v37  ;;  %v9574_v36 = vadd.f32 %v14477_v16, %v13867_v51 }
 0x5d9   : > { %7672 = vst [vmem:[%s12872_s27 + $0x130] sm:$0xff] %v8821_v53  ;;  %7681 = vst [vmem:[%s12872_s27 + $0x178] sm:$0xff] %v8830_v14  ;;  %v9049_v52 = vpop.f32.mrb[56].mxu1  ;;  %v5332_v5 = vpop.f32.mrb[81].mxu0  ;;  %v9570_v32 = vadd.f32 %v14478_v11, %v13867_v51  ;;  %v5259_v33 = vadd.f32 %v13864_v7, %v13785_v13  ;;  %v5251_v45 = vadd.f32 %v13864_v7, %v13769_v34  ;;  %v14479_v13 = vld [vmem:[#allocation28_spill] sm:$0xff] }
 0x5da   : > { %7675 = vst [vmem:[%s12872_s27 + $0x148] sm:$0xff] %v8824_v62  ;;  %v5532_v3 = vadd.f32 %v9049_v52, %v5243_v15  ;;  %v5523_v6 = vpop.f32.mrb[57].mxu1  ;;  %v14013_v49 = vpop.f32.mrb[82].mxu0  ;;  %v9580_v39 = vadd.f32 %v13459_v4, %v13867_v51  ;;  %v5262_v26 = vadd.f32 %v13864_v7, %v13792_v47  ;;  %v9576_v14 = vadd.f32 %v14479_v13, %v13867_v51  ;;  %v14480_v4 = vld [vmem:[#allocation30_spill] sm:$0xff]  ;;  %v14481_v5 = vld [vmem:[#allocation29_spill] sm:$0xff] }
 0x5db   : > { %v5524_v54 = vadd.f32 %v5523_v6, %v5235_v42  ;;  %v9050_v10 = vpop.f32.mrb[58].mxu1  ;;  %v5335_v44 = vpop.f32.mrb[83].mxu0  ;;  %v5254_v34 = vadd.f32 %v13864_v7, %v13776_v63  ;;  %v9582_v47 = vadd.f32 %v14480_v4, %v13867_v51  ;;  %v9578_v6 = vadd.f32 %v14481_v5, %v13867_v51 }
 0x5dc   : > { %v8839_v1 = vpack.c.bf16 %v5532_v3, %v9572_v31  ;;  %v5535_v56 = vadd.f32 %v9050_v10, %v5246_v12  ;;  %v5526_v8 = vpop.f32.mrb[59].mxu1  ;;  %v5267_v10 = vadd.f32 %v13864_v7, %v13801_v27  ;;  %v5278_v44 = vadd.f32 %v13864_v7, %v13824_v2 }
 0x5dd   : > { %v8833_v0 = vpack.c.bf16 %v5524_v54, %v9568_v25  ;;  %v5527_v41 = vadd.f32 %v5526_v8, %v5238_v46  ;;  %v5275_v54 = vadd.f32 %v13864_v7, %v13817_v29  ;;  %v14483_v29 = vld [vmem:[#allocation31_spill] sm:$0xff]  ;;  %v5270_v27 = vadd.f32 %v13864_v7, %v13808_v61 }
 0x5de   : > { %7690 = vst [vmem:[%s12872_s27 + $0x1c0] sm:$0xff] %v8839_v1  ;;  %v8842_v37 = vpack.c.bf16 %v5535_v56, %v9574_v36  ;;  %v14482_v1 = vld [vmem:[#allocation33_spill] sm:$0xff] }
 0x5df   : > { %7684 = vst [vmem:[%s12872_s27 + $0x190] sm:$0xff] %v8833_v0  ;;  %v8836_v18 = vpack.c.bf16 %v5527_v41, %v9570_v32  ;;  %v9588_v56 = vadd.f32 %v14482_v1, %v13867_v51  ;;  %v9584_v0 = vadd.f32 %v14483_v29, %v13867_v51  ;;  %v14488_v1 = vld [vmem:[#allocation36_spill] sm:$0xff] }
 0x5e0   : > { %7693 = vst [vmem:[%s12872_s27 + $0x1d8] sm:$0xff] %v8842_v37  ;;  %v14027_v30 = vpop.f32.mrb[88].mxu0 }
 0x5e1   : > { %7687 = vst [vmem:[%s12872_s27 + $0x1a8] sm:$0xff] %v8836_v18  ;;  %v9053_v9 = vpop.f32.mrb[60].mxu1  ;;  %v5340_v53 = vpop.f32.mrb[89].mxu0 }
 0x5e2   : > { %v5548_v50 = vadd.f32 %v9053_v9, %v5259_v33  ;;  %v5539_v58 = vpop.f32.mrb[61].mxu1  ;;  %v14037_v15 = vpop.f32.mrb[90].mxu0  ;;  %v14484_v33 = vld [vmem:[#allocation34_spill] sm:$0xff] }
 0x5e3   : > { %v5540_v62 = vadd.f32 %v5539_v58, %v5251_v45  ;;  %v9054_v42 = vpop.f32.mrb[62].mxu1  ;;  %v5343_v12 = vpop.f32.mrb[91].mxu0  ;;  %v9590_v2 = vadd.f32 %v14484_v33, %v13867_v51 }
 0x5e4   : > { %v8851_v52 = vpack.c.bf16 %v5548_v50, %v9580_v39  ;;  %v5551_v31 = vadd.f32 %v9054_v42, %v5262_v26  ;;  %v5542_v3 = vpop.f32.mrb[63].mxu1  ;;  %v14485_v50 = vld [vmem:[#allocation32_spill] sm:$0xff] }
 0x5e5   : > { %v8845_v17 = vpack.c.bf16 %v5540_v62, %v9576_v14  ;;  %v5543_v25 = vadd.f32 %v5542_v3, %v5254_v34  ;;  %v9586_v53 = vadd.f32 %v14485_v50, %v13867_v51  ;;  %v5291_v34 = vadd.f32 %v13864_v7, %v13849_v28  ;;  %v14487_v28 = vld [vmem:[#allocation35_spill] sm:$0xff] }
 0x5e6   : > { %7702 = vst [vmem:[%s12872_s27 + $0x220] sm:$0xff] %v8851_v52  ;;  %v8854_v63 = vpack.c.bf16 %v5551_v31, %v9582_v47  ;;  %v5283_v62 = vadd.f32 %v13864_v7, %v13833_v43  ;;  %v14486_v47 = vld [vmem:[#allocation37_spill] sm:$0xff]  ;;  %v5294_v31 = vadd.f32 %v13864_v7, %v13857_v19  ;;  %v5286_v43 = vadd.f32 %v13864_v7, %v13840_v40 }
 0x5e7   : > { %7696 = vst [vmem:[%s12872_s27 + $0x1f0] sm:$0xff] %v8845_v17  ;;  %v8848_v46 = vpack.c.bf16 %v5543_v25, %v9578_v6  ;;  %v9596_v52 = vadd.f32 %v14486_v47, %v13867_v51  ;;  %v9592_v6 = vadd.f32 %v14487_v28, %v13867_v51  ;;  %v9598_v19 = vadd.f32 %v13581_v59, %v13867_v51 }
 0x5e8   : > { %7705 = vst [vmem:[%s12872_s27 + $0x238] sm:$0xff] %v8854_v63  ;;  %v14051_v16 = vpop.f32.mrb[84].mxu0  ;;  %v5299_v59 = vadd.f32 %v13864_v7, %v13875_v38  ;;  %v5302_v38 = vadd.f32 %v13864_v7, %v13891_v57  ;;  %v5323_v47 = vadd.f32 %v13864_v7, %v13979_v55  ;;  %v5326_v28 = vadd.f32 %v13864_v7, %v13989_v23  ;;  %v14493_v55 = vld [vmem:[#allocation41_spill] sm:$0xff] }
 0x5e9   : > { %7699 = vst [vmem:[%s12872_s27 + $0x208] sm:$0xff] %v8848_v46  ;;  %v9057_v36 = vpop.f32.mrb[64].mxu1  ;;  %v5348_v11 = vpop.f32.mrb[85].mxu0 }
 0x5ea   : > { %v5564_v8 = vadd.f32 %v9057_v36, %v5275_v54  ;;  %v5555_v32 = vpop.f32.mrb[65].mxu1  ;;  %v14061_v37 = vpop.f32.mrb[86].mxu0 }
 0x5eb   : > { %v5556_v41 = vadd.f32 %v5555_v32, %v5267_v10  ;;  %v9058_v18 = vpop.f32.mrb[66].mxu1  ;;  %v5351_v39 = vpop.f32.mrb[87].mxu0  ;;  %v5307_v32 = vadd.f32 %v13864_v7, %v13931_v22  ;;  %v14489_v22 = vld [vmem:[#allocation38_spill] sm:$0xff] }
 0x5ec   : > { %v8863_v45 = vpack.c.bf16 %v5564_v8, %v9588_v56  ;;  %v5567_v9 = vadd.f32 %v9058_v18, %v5278_v44  ;;  %v5558_v26 = vpop.f32.mrb[67].mxu1  ;;  %v9594_v56 = vadd.f32 %v14488_v1, %v13867_v51 }
 0x5ed   : > { %v8857_v58 = vpack.c.bf16 %v5556_v41, %v9584_v0  ;;  %v5559_v13 = vadd.f32 %v5558_v26, %v5270_v27  ;;  %v9604_v27 = vadd.f32 %v13616_v20, %v13867_v51  ;;  %v5310_v41 = vadd.f32 %v13864_v7, %v13941_v60  ;;  %v14490_v20 = vld [vmem:[#allocation40_spill] sm:$0xff] }
 0x5ee   : > { %7714 = vst [vmem:[%s12872_s27 + $0x280] sm:$0xff] %v8863_v45  ;;  %v8866_v61 = vpack.c.bf16 %v5567_v9, %v9590_v2  ;;  %v9600_v45 = vadd.f32 %v14489_v22, %v13867_v51  ;;  %v9606_v60 = vadd.f32 %v14490_v20, %v13867_v51  ;;  %v5342_v22 = vadd.f32 %v13864_v7, %v14037_v15 }
 0x5ef   : > { %7708 = vst [vmem:[%s12872_s27 + $0x250] sm:$0xff] %v8857_v58  ;;  %v8860_v14 = vpack.c.bf16 %v5559_v13, %v9586_v53 }
 0x5f0   : > { %7717 = vst [vmem:[%s12872_s27 + $0x298] sm:$0xff] %v8866_v61  ;;  %v14075_v42 = vpop.f32.mrb[92].mxu0  ;;  %v14491_v61 = vld [vmem:[#allocation39_spill] sm:$0xff] }
 0x5f1   : > { %7711 = vst [vmem:[%s12872_s27 + $0x268] sm:$0xff] %v8860_v14  ;;  %v9061_v4 = vpop.f32.mrb[68].mxu1  ;;  %v5356_v3 = vpop.f32.mrb[93].mxu0  ;;  %v9602_v14 = vadd.f32 %v14491_v61, %v13867_v51 }
 0x5f2   : > { %v5580_v12 = vadd.f32 %v9061_v4, %v5291_v34  ;;  %v5571_v5 = vpop.f32.mrb[69].mxu1  ;;  %v14085_v25 = vpop.f32.mrb[94].mxu0  ;;  %v14492_v3 = vld [vmem:[#allocation43_spill] sm:$0xff] }
 0x5f3   : > { %v5572_v17 = vadd.f32 %v5571_v5, %v5283_v62  ;;  %v9062_v63 = vpop.f32.mrb[70].mxu1  ;;  %v5359_v10 = vpop.f32.mrb[95].mxu0  ;;  %v9612_v5 = vadd.f32 %v14492_v3, %v13867_v51 }
 0x5f4   : > { %v8875_v46 = vpack.c.bf16 %v5580_v12, %v9596_v52  ;;  %v5583_v54 = vadd.f32 %v9062_v63, %v5294_v31  ;;  %v5574_v36 = vpop.f32.mrb[71].mxu1  ;;  %v5315_v52 = vadd.f32 %v13864_v7, %v13955_v24  ;;  %v9608_v63 = vadd.f32 %v14493_v55, %v13867_v51  ;;  %v14494_v10 = vld [vmem:[#allocation44_spill] sm:$0xff] }
 0x5f5   : > { %v8869_v44 = vpack.c.bf16 %v5572_v17, %v9592_v6  ;;  %v5575_v8 = vadd.f32 %v5574_v36, %v5286_v43  ;;  %v5318_v24 = vadd.f32 %v13864_v7, %v13965_v21  ;;  %v9614_v23 = vadd.f32 %v14494_v10, %v13867_v51 }
 0x5f6   : > { %7726 = vst [vmem:[%s12872_s27 + $0x2e0] sm:$0xff] %v8875_v46  ;;  %v8878_v40 = vpack.c.bf16 %v5583_v54, %v9598_v19 }
 0x5f7   : > { %7720 = vst [vmem:[%s12872_s27 + $0x2b0] sm:$0xff] %v8869_v44  ;;  %v8872_v11 = vpack.c.bf16 %v5575_v8, %v9594_v56  ;;  %v14495_v8 = vld [vmem:[#allocation42_spill] sm:$0xff] }
 0x5f8   : > { %7729 = vst [vmem:[%s12872_s27 + $0x2f8] sm:$0xff] %v8878_v40  ;;  %v14099_v29 = vpop.f32.mrb[96].mxu0  ;;  %v9610_v40 = vadd.f32 %v14495_v8, %v13867_v51  ;;  %v14503_v8 = vld [vmem:[#allocation49_spill] sm:$0xff] }
 0x5f9   : > { %7723 = vst [vmem:[%s12872_s27 + $0x2c8] sm:$0xff] %v8872_v11  ;;  %v9065_v0 = vpop.f32.mrb[72].mxu1  ;;  %v5364_v33 = vpop.f32.mrb[97].mxu0 }
 0x5fa   : > { %v5596_v18 = vadd.f32 %v9065_v0, %v5307_v32  ;;  %v5587_v2 = vpop.f32.mrb[73].mxu1  ;;  %v14109_v39 = vpop.f32.mrb[98].mxu0  ;;  %v5339_v0 = vadd.f32 %v13864_v7, %v14027_v30  ;;  %v14496_v33 = vld [vmem:[#allocation47_spill] sm:$0xff]  ;;  %v14497_v30 = vld [vmem:[#allocation45_spill] sm:$0xff] }
 0x5fb   : > { %v5588_v9 = vadd.f32 %v5587_v2, %v5299_v59  ;;  %v9066_v26 = vpop.f32.mrb[74].mxu1  ;;  %v5367_v58 = vpop.f32.mrb[99].mxu0  ;;  %v9620_v2 = vadd.f32 %v14496_v33, %v13867_v51  ;;  %v14504_v33 = vld [vmem:[#allocation18_spill] sm:$0xff] }
 0x5fc   : > { %v8887_v50 = vpack.c.bf16 %v5596_v18, %v9604_v27  ;;  %v5599_v53 = vadd.f32 %v9066_v26, %v5310_v41  ;;  %v5590_v13 = vpop.f32.mrb[75].mxu1  ;;  %v5331_v27 = vadd.f32 %v13864_v7, %v14003_v35  ;;  %v9616_v26 = vadd.f32 %v14497_v30, %v13867_v51  ;;  %v14505_v30 = vld [vmem:[#allocation51_spill] sm:$0xff] }
 0x5fd   : > { %v8881_v34 = vpack.c.bf16 %v5588_v9, %v9600_v45  ;;  %v5591_v62 = vadd.f32 %v5590_v13, %v5302_v38  ;;  %v5334_v35 = vadd.f32 %v13864_v7, %v14013_v49 }
 0x5fe   : > { %7738 = vst [vmem:[%s12872_s27 + $0x340] sm:$0xff] %v8887_v50  ;;  %v8890_v57 = vpack.c.bf16 %v5599_v53, %v9606_v60  ;;  %v14498_v53 = vld [vmem:[#allocation16_spill] sm:$0xff] }
 0x5ff   : > { %7732 = vst [vmem:[%s12872_s27 + $0x310] sm:$0xff] %v8881_v34  ;;  %v8884_v4 = vpack.c.bf16 %v5591_v62, %v9602_v14  ;;  %v9622_v15 = vadd.f32 %v14498_v53, %v13867_v51  ;;  %v14499_v34 = vld [vmem:[#allocation46_spill] sm:$0xff] }
 0x600   : > { %7741 = vst [vmem:[%s12872_s27 + $0x358] sm:$0xff] %v8890_v57  ;;  %v14123_v31 = vpop.f32.mrb[100].mxu0  ;;  %v9618_v62 = vadd.f32 %v14499_v34, %v13867_v51 }
 0x601   : > { %7735 = vst [vmem:[%s12872_s27 + $0x328] sm:$0xff] %v8884_v4  ;;  %v9069_v12 = vpop.f32.mrb[76].mxu1  ;;  %v5372_v43 = vpop.f32.mrb[101].mxu0 }
 0x602   : > { %v5612_v6 = vadd.f32 %v9069_v12, %v5323_v47  ;;  %v5603_v17 = vpop.f32.mrb[77].mxu1  ;;  %v14133_v46 = vpop.f32.mrb[102].mxu0  ;;  %v5347_v12 = vadd.f32 %v13864_v7, %v14051_v16  ;;  %v5358_v43 = vadd.f32 %v13864_v7, %v14085_v25  ;;  %v5350_v16 = vadd.f32 %v13864_v7, %v14061_v37 }
 0x603   : > { %v5604_v19 = vadd.f32 %v5603_v17, %v5315_v52  ;;  %v9070_v54 = vpop.f32.mrb[78].mxu1  ;;  %v5375_v56 = vpop.f32.mrb[103].mxu0  ;;  %v5355_v52 = vadd.f32 %v13864_v7, %v14075_v42 }
 0x604   : > { %v8899_v36 = vpack.c.bf16 %v5612_v6, %v9612_v5  ;;  %v5615_v1 = vadd.f32 %v9070_v54, %v5326_v28  ;;  %v5606_v44 = vpop.f32.mrb[79].mxu1  ;;  %v14500_v28 = vld [vmem:[#allocation17_spill] sm:$0xff] }
 0x605   : > { %v8893_v11 = vpack.c.bf16 %v5604_v19, %v9608_v63  ;;  %v5607_v32 = vadd.f32 %v5606_v44, %v5318_v24  ;;  %v9628_v6 = vadd.f32 %v14500_v28, %v13867_v51  ;;  %v14501_v24 = vld [vmem:[#allocation48_spill] sm:$0xff] }
 0x606   : > { %7750 = vst [vmem:[%s12872_s27 + $0x3a0] sm:$0xff] %v8899_v36  ;;  %v8902_v21 = vpack.c.bf16 %v5615_v1, %v9614_v23  ;;  %v9624_v42 = vadd.f32 %v14501_v24, %v13867_v51  ;;  %v14502_v23 = vld [vmem:[#allocation50_spill] sm:$0xff] }
 0x607   : > { %7744 = vst [vmem:[%s12872_s27 + $0x370] sm:$0xff] %v8893_v11  ;;  %v8896_v59 = vpack.c.bf16 %v5607_v32, %v9610_v40  ;;  %v9630_v36 = vadd.f32 %v14502_v23, %v13867_v51  ;;  %v9626_v40 = vadd.f32 %v14503_v8, %v13867_v51 }
 0x608   : > { %7753 = vst [vmem:[%s12872_s27 + $0x3b8] sm:$0xff] %v8902_v21  ;;  %v14147_v41 = vpop.f32.mrb[104].mxu0 }
 0x609   : > { %7747 = vst [vmem:[%s12872_s27 + $0x388] sm:$0xff] %v8896_v59  ;;  %v9073_v18 = vpop.f32.mrb[80].mxu1  ;;  %v5380_v38 = vpop.f32.mrb[105].mxu0  ;;  %v5371_v59 = vadd.f32 %v13864_v7, %v14123_v31  ;;  %v9632_v31 = vadd.f32 %v14505_v30, %v13867_v51 }
 0x60a   : > { %v5628_v45 = vadd.f32 %v9073_v18, %v5339_v0  ;;  %v5619_v9 = vpop.f32.mrb[81].mxu1  ;;  %v14157_v60 = vpop.f32.mrb[106].mxu0  ;;  %v5363_v0 = vadd.f32 %v13864_v7, %v14099_v29  ;;  %v5366_v29 = vadd.f32 %v13864_v7, %v14109_v39 }
 0x60b   : > { %v5620_v20 = vadd.f32 %v5619_v9, %v5331_v27  ;;  %v9074_v50 = vpop.f32.mrb[82].mxu1  ;;  %v5383_v61 = vpop.f32.mrb[107].mxu0 }
 0x60c   : > { %v8911_v58 = vpack.c.bf16 %v5628_v45, %v9620_v2  ;;  %v5631_v13 = vadd.f32 %v9074_v50, %v5342_v22  ;;  %v5622_v14 = vpop.f32.mrb[83].mxu1  ;;  %v9636_v2 = vadd.f32 %v14504_v33, %v13867_v51  ;;  %v5374_v22 = vadd.f32 %v13864_v7, %v14133_v46  ;;  %v14506_v50 = vld [vmem:[#allocation53_spill] sm:$0xff]  ;;  %v14507_v61 = vld [vmem:[#allocation52_spill] sm:$0xff] }
 0x60d   : > { %v8905_v57 = vpack.c.bf16 %v5620_v20, %v9616_v26  ;;  %v5623_v4 = vadd.f32 %v5622_v14, %v5334_v35  ;;  %v9638_v53 = vadd.f32 %v14506_v50, %v13867_v51  ;;  %v9634_v14 = vadd.f32 %v14507_v61, %v13867_v51 }
 0x60e   : > { %7762 = vst [vmem:[%s12872_s27 + $0x400] sm:$0xff] %v8911_v58  ;;  %v8914_v49 = vpack.c.bf16 %v5631_v13, %v9622_v15 }
 0x60f   : > { %7756 = vst [vmem:[%s12872_s27 + $0x3d0] sm:$0xff] %v8905_v57  ;;  %v8908_v47 = vpack.c.bf16 %v5623_v4, %v9618_v62 }
 0x610   : > { %7765 = vst [vmem:[%s12872_s27 + $0x418] sm:$0xff] %v8914_v49  ;;  %v5386_v3 = vpop.f32.mrb[108].mxu0  ;;  %v5379_v49 = vadd.f32 %v13864_v7, %v14147_v41 }
 0x611   : > { %7759 = vst [vmem:[%s12872_s27 + $0x3e8] sm:$0xff] %v8908_v47  ;;  %v9077_v5 = vpop.f32.mrb[84].mxu1  ;;  %v5388_v55 = vpop.f32.mrb[109].mxu0  ;;  %v5387_v4 = vadd.f32 %v13864_v7, %v5386_v3 }
 0x612   : > { %v5644_v17 = vadd.f32 %v9077_v5, %v5355_v52  ;;  %v5635_v63 = vpop.f32.mrb[85].mxu1  ;;  %v5389_v54 = vpop.f32.mrb[110].mxu0  ;;  %v14509_v55 = vld [vmem:[#allocation19_spill] sm:$0xff] }
 0x613   : > { %v5636_v19 = vadd.f32 %v5635_v63, %v5347_v12  ;;  %v9078_v10 = vpop.f32.mrb[86].mxu1  ;;  %v5391_v56 = vpop.f32.mrb[111].mxu0  ;;  %v14508_v12 = vld [vmem:[#allocation55_spill] sm:$0xff]  ;;  %v5390_v28 = vadd.f32 %v13864_v7, %v5389_v54  ;;  %v9640_v3 = vadd.f32 %v14509_v55, %v13867_v51  ;;  %v5382_v63 = vadd.f32 %v13864_v7, %v14157_v60 }
 0x614   : > { %v8923_v25 = vpack.c.bf16 %v5644_v17, %v9628_v6  ;;  %v5647_v1 = vadd.f32 %v9078_v10, %v5358_v43  ;;  %v5638_v44 = vpop.f32.mrb[87].mxu1  ;;  %v9644_v5 = vadd.f32 %v14508_v12, %v13867_v51 }
 0x615   : > { %v8917_v11 = vpack.c.bf16 %v5636_v19, %v9624_v42  ;;  %v5639_v32 = vadd.f32 %v5638_v44, %v5350_v16  ;;  %v14510_v16 = vld [vmem:[#allocation56_spill] sm:$0xff] }
 0x616   : > { %7774 = vst [vmem:[%s12872_s27 + $0x460] sm:$0xff] %v8923_v25  ;;  %v8926_v21 = vpack.c.bf16 %v5647_v1, %v9630_v36  ;;  %v9646_v19 = vadd.f32 %v14510_v16, %v13867_v51  ;;  %v14511_v25 = vld [vmem:[#allocation54_spill] sm:$0xff] }
 0x617   : > { %7768 = vst [vmem:[%s12872_s27 + $0x430] sm:$0xff] %v8917_v11  ;;  %v8920_v37 = vpack.c.bf16 %v5639_v32, %v9626_v40  ;;  %v9642_v1 = vadd.f32 %v14511_v25, %v13867_v51 }
 0x618   : > { %7777 = vst [vmem:[%s12872_s27 + $0x478] sm:$0xff] %v8926_v21  ;;  %v5394_v27 = vpop.f32.mrb[112].mxu0 }
 0x619   : > { %7771 = vst [vmem:[%s12872_s27 + $0x448] sm:$0xff] %v8920_v37  ;;  %v9081_v18 = vpop.f32.mrb[88].mxu1  ;;  %v5396_v38 = vpop.f32.mrb[113].mxu0  ;;  %v5395_v11 = vadd.f32 %v13864_v7, %v5394_v27  ;;  %v14512_v37 = vld [vmem:[#allocation59_spill] sm:$0xff] }
 0x61a   : > { %v5660_v45 = vadd.f32 %v9081_v18, %v5371_v59  ;;  %v5651_v9 = vpop.f32.mrb[89].mxu1  ;;  %v5397_v35 = vpop.f32.mrb[114].mxu0  ;;  %v9652_v59 = vadd.f32 %v14512_v37, %v13867_v51 }
 0x61b   : > { %v5652_v26 = vadd.f32 %v5651_v9, %v5363_v0  ;;  %v9082_v20 = vpop.f32.mrb[90].mxu1  ;;  %v5399_v58 = vpop.f32.mrb[115].mxu0  ;;  %v5398_v38 = vadd.f32 %v13864_v7, %v5397_v35 }
 0x61c   : > { %v8935_v46 = vpack.c.bf16 %v5660_v45, %v9636_v2  ;;  %v5663_v15 = vadd.f32 %v9082_v20, %v5374_v22  ;;  %v5654_v13 = vpop.f32.mrb[91].mxu1  ;;  %v14513_v22 = vld [vmem:[#allocation57_spill] sm:$0xff] }
 0x61d   : > { %v8929_v34 = vpack.c.bf16 %v5652_v26, %v9632_v31  ;;  %v5655_v62 = vadd.f32 %v5654_v13, %v5366_v29  ;;  %v9648_v45 = vadd.f32 %v14513_v22, %v13867_v51  ;;  %v14514_v31 = vld [vmem:[#allocation60_spill] sm:$0xff] }
 0x61e   : > { %7786 = vst [vmem:[%s12872_s27 + $0x4c0] sm:$0xff] %v8935_v46  ;;  %v8938_v57 = vpack.c.bf16 %v5663_v15, %v9638_v53  ;;  %v9654_v29 = vadd.f32 %v14514_v31, %v13867_v51  ;;  %v14515_v46 = vld [vmem:[#allocation58_spill] sm:$0xff] }
 0x61f   : > { %7780 = vst [vmem:[%s12872_s27 + $0x490] sm:$0xff] %v8929_v34  ;;  %v8932_v39 = vpack.c.bf16 %v5655_v62, %v9634_v14  ;;  %v9650_v15 = vadd.f32 %v14515_v46, %v13867_v51 }
 0x620   : > { %7789 = vst [vmem:[%s12872_s27 + $0x4d8] sm:$0xff] %v8938_v57  ;;  %v5402_v47 = vpop.f32.mrb[116].mxu0 }
 0x621   : > { %7783 = vst [vmem:[%s12872_s27 + $0x4a8] sm:$0xff] %v8932_v39  ;;  %v9085_v52 = vpop.f32.mrb[92].mxu1  ;;  %v5404_v43 = vpop.f32.mrb[117].mxu0  ;;  %v5403_v40 = vadd.f32 %v13864_v7, %v5402_v47 }
 0x622   : > { %v5676_v6 = vadd.f32 %v9085_v52, %v5387_v4  ;;  %v5667_v17 = vpop.f32.mrb[93].mxu1  ;;  %v5405_v24 = vpop.f32.mrb[118].mxu0 }
 0x623   : > { %v5668_v41 = vadd.f32 %v5667_v17, %v5379_v49  ;;  %v9086_v42 = vpop.f32.mrb[94].mxu1  ;;  %v5407_v23 = vpop.f32.mrb[119].mxu0  ;;  %v5406_v0 = vadd.f32 %v13864_v7, %v5405_v24  ;;  %v14516_v49 = vld [vmem:[#allocation61_spill] sm:$0xff] }
 0x624   : > { %v8947_v54 = vpack.c.bf16 %v5676_v6, %v9644_v5  ;;  %v5679_v10 = vadd.f32 %v9086_v42, %v5390_v28  ;;  %v5670_v36 = vpop.f32.mrb[95].mxu1  ;;  %v9656_v47 = vadd.f32 %v14516_v49, %v13867_v51  ;;  %v14517_v6 = vld [vmem:[#allocation63_spill] sm:$0xff] }
 0x625   : > { %v8941_v56 = vpack.c.bf16 %v5668_v41, %v9640_v3  ;;  %v5671_v44 = vadd.f32 %v5670_v36, %v5382_v63  ;;  %v9660_v43 = vadd.f32 %v14517_v6, %v13867_v51  ;;  %v14518_v41 = vld [vmem:[#allocation62_spill] sm:$0xff] }
 0x626   : > { %7798 = vst [vmem:[%s12872_s27 + $0x520] sm:$0xff] %v8947_v54  ;;  %v8950_v8 = vpack.c.bf16 %v5679_v10, %v9646_v19  ;;  %v9658_v24 = vadd.f32 %v14518_v41, %v13867_v51  ;;  %v9662_v19 = vadd.f32 %v13862_v48, %v13867_v51 }
 0x627   : > { %7792 = vst [vmem:[%s12872_s27 + $0x4f0] sm:$0xff] %v8941_v56  ;;  %v8944_v60 = vpack.c.bf16 %v5671_v44, %v9642_v1 }
 0x628   : > { %7801 = vst [vmem:[%s12872_s27 + $0x538] sm:$0xff] %v8950_v8  ;;  %v5410_v32 = vpop.f32.mrb[120].mxu0 }
 0x629   : > { %7795 = vst [vmem:[%s12872_s27 + $0x508] sm:$0xff] %v8944_v60  ;;  %v9089_v21 = vpop.f32.mrb[96].mxu1  ;;  %v5412_v33 = vpop.f32.mrb[121].mxu0  ;;  %v5411_v14 = vadd.f32 %v13864_v7, %v5410_v32 }
 0x62a   : > { %v5692_v18 = vadd.f32 %v9089_v21, %v5403_v40  ;;  %v5683_v2 = vpop.f32.mrb[97].mxu1  ;;  %v5413_v9 = vpop.f32.mrb[122].mxu0 }
 0x62b   : > { %v5684_v27 = vadd.f32 %v5683_v2, %v5395_v11  ;;  %v9090_v30 = vpop.f32.mrb[98].mxu1  ;;  %v5415_v50 = vpop.f32.mrb[123].mxu0  ;;  %v5414_v52 = vadd.f32 %v13864_v7, %v5413_v9 }
 0x62c   : > { %v8959_v26 = vpack.c.bf16 %v5692_v18, %v9652_v59  ;;  %v5695_v20 = vadd.f32 %v9090_v30, %v5406_v0  ;;  %v5686_v53 = vpop.f32.mrb[99].mxu1 }
 0x62d   : > { %v8953_v58 = vpack.c.bf16 %v5684_v27, %v9648_v45  ;;  %v5687_v13 = vadd.f32 %v5686_v53, %v5398_v38 }
 0x62e   : > { %7810 = vst [vmem:[%s12872_s27 + $0x580] sm:$0xff] %v8959_v26  ;;  %v8962_v61 = vpack.c.bf16 %v5695_v20, %v9654_v29 }
 0x62f   : > { %7804 = vst [vmem:[%s12872_s27 + $0x550] sm:$0xff] %v8953_v58  ;;  %v8956_v35 = vpack.c.bf16 %v5687_v13, %v9650_v15 }
 0x630   : > { %7813 = vst [vmem:[%s12872_s27 + $0x598] sm:$0xff] %v8962_v61  ;;  %v5418_v34 = vpop.f32.mrb[124].mxu0 }
 0x631   : > { %7807 = vst [vmem:[%s12872_s27 + $0x568] sm:$0xff] %v8956_v35  ;;  %v9093_v62 = vpop.f32.mrb[100].mxu1  ;;  %v5419_v57 = vadd.f32 %v13864_v7, %v5418_v34  ;;  %v5420_v39 = vpop.f32.mrb[125].mxu0 }
 0x632   : > { %v5699_v4 = vpop.f32.mrb[101].mxu1  ;;  %v5421_v5 = vpop.f32.mrb[126].mxu0 }
 0x633   : > { %v5700_v12 = vadd.f32 %v5699_v4, %v5411_v14  ;;  %v9094_v28 = vpop.f32.mrb[102].mxu1  ;;  %v5708_v17 = vadd.f32 %v9093_v62, %v5419_v57  ;;  %v5422_v55 = vadd.f32 %v13864_v7, %v5421_v5  ;;  %v5423_v3 = vpop.f32.mrb[127].mxu0 }
 0x634   : > { %v5702_v63 = vpop.f32.mrb[103].mxu1 }
 0x635   : > { %v8965_v42 = vpack.c.bf16 %v5700_v12, %v9656_v47  ;;  %v5703_v16 = vadd.f32 %v5702_v63, %v5414_v52  ;;  %v8971_v54 = vpack.c.bf16 %v5708_v17, %v9660_v43  ;;  %v5711_v10 = vadd.f32 %v9094_v28, %v5422_v55 }
 0x637   : > { %7816 = vst [vmem:[%s12872_s27 + $0x5b0] sm:$0xff] %v8965_v42  ;;  %v8968_v23 = vpack.c.bf16 %v5703_v16, %v9658_v24  ;;  %7822 = vst [vmem:[%s12872_s27 + $0x5e0] sm:$0xff] %v8971_v54  ;;  %v8974_v7 = vpack.c.bf16 %v5711_v10, %v9662_v19 }
 0x639   : > { %7819 = vst [vmem:[%s12872_s27 + $0x5c8] sm:$0xff] %v8968_v23  ;;  %7825 = vst [vmem:[%s12872_s27 + $0x5f8] sm:$0xff] %v8974_v7 }
 0x63a   : > { %11009 = shalt.err (!%p11006_p13)
}
 0x63b   : > { %s11010_s27 = scalar_lea.hbm %s14259_s22, 24576  ;;  %s11014_s14 = scalar_lea.hbm %s14317_s4, 49152 }
 0x63c   : > { %p11011_p6 = scmp.ne.s32.totalorder %s14259_s22, %s11010_s27  ;;  %p11015_p8 = scmp.lt.u32.totalorder %s14259_s22, %s14317_s4 }
 0x63d   : > { %p11016_p1 = scmp.lt.u32.totalorder %s11014_s14, %s11010_s27  ;;  %p11018_p3 = scmp.lt.u32.totalorder %s11010_s27, %s14259_s22 }
 0x63e   : > { %p11012_p7 = pnand %p11011_p6, %p14471_p12 }
 0x63f   : > { %p11017_p10 = por %p11016_p1, %p11015_p8 }
 0x640   : > { %p11013_p11 = pneg %p11012_p7 }
 0x641   : > { %p11019_p5 = por %p11018_p3, %p11017_p10 }
 0x643   : > { %p11020_p9 = pnand %p11019_p5, %p11013_p11 }
 0x645   : > { %11023 = shalt.err (!%p11020_p9)
}
 0x646   : > { %s11100_s13 = smov 384   ;;  %s11101_s18 = smov 24  }
 0x647   : > { %10152 = dma.vmem_to_hbm [thread:$0]  (%p14471_p12), %s14261_s24, 24576, %s14259_s22, %s7832_s7, %s11100_s13, %s11100_s13, %s11101_s18  }
 0x648 PF: > { %s7882_s29 = sand.u32 1, %s11066_s15   ;;  %p14519_p2 = scmp.ne.s32.totalorder %s14328_s26, 0 }
 0x649   : > { %p14520_p0 = scmp.ge.s32.totalorder %s11086_s20, 2  ;;  %s7883_s11 = scalar_lea.sflag [#allocation4], %s7882_s29 }
 0x64b   : > { %p10167_p4 = pnand %p14520_p0, %p14519_p2 }
 0x64d   : > { %11057 = dma.done.wait (!%p10167_p4), %s7883_s11, 12288  }
 0x64e   : > { %11059 = vsyncadd (!%p10167_p4), %s7883_s11, 4294955008  ;;  %s7892_s12 = scalar_lea.sflag [#allocation10], %s7882_s29 }
 0x64f   : > { %11061 = dma.done.wait (!%p10167_p4), %s7892_s12, 24576  }
 0x650   : > { %11063 = vsyncadd (!%p10167_p4), %s7892_s12, 4294942720  ;;  %s25_s20 = sadd.s32 1, %s11086_s20   ;;  %s14521_s15 = smov %s11070_s16 }
 0x651   : > { %p22_p13 = scmp.ge.s32.totalorder %s25_s20, 4   ;;  %s14522_s16 = smov %s11074_s17 }
 0x652   : > { %s14523_s17 = smov %s11273_s10  ;;  %s14524_s18 = smov %s11082_s19 }
 0x653   : > { %s14525_s19 = smov %s14527_s28  ;;  %24 = sbr.rel (!%p22_p13) target bundleno = 9 (0x9), region = 102 }
 0x65a   :  { %7897 = vsyncpa [#allocation3], 1 }
 0x65b   :  { %7899 = vsyncpa [#allocation3 + $0x1], 1 }
 0x65c   :  { %7900 = vsyncpa [#allocation6], 1 }
 0x65d   :  { %7901 = vsyncpa [#allocation4], 1 }
 0x65e   :  { %7903 = vsyncpa [#allocation4 + $0x1], 1 }
 0x65f   :  { %7904 = vsyncpa [#allocation10], 1 }
 0x660   :  { %7906 = vsyncpa [#allocation10 + $0x1], 1 }

</bundles_post_ra>
